<compile_context>
chip_gen: v6e
topology: v6e:2x2x1
jax: 0.10.0
libtpu: 0.0.40
codegen_flags: <defaults>
</compile_context>

<pallas_src>
import jax
import jax.numpy as jnp
from jax.experimental import pallas as pl
from jax.experimental.pallas import tpu as pltpu

NEG_INF = -1.0e30  # same constant masked_softmax uses in the reference code


# ----------------------------------------------------------------------------
# Fused kernel: one batch tile per grid step
# ----------------------------------------------------------------------------
def _output_layer_kernel(att_ref, q_ref, qmask_ref, cmask_ref,
                         wqa_ref, bqa_ref, wa1_ref, wr1_ref, watt_ref,
                         wih_ref, whh_ref, brnn_ref,
                         logp1_ref, logp2_ref):
    att = att_ref[...].astype(jnp.float32)          # (Bt, Sc, 4H)
    q = q_ref[...].astype(jnp.float32)              # (Bt, Sq, 2H)
    qmask = qmask_ref[...]                          # (Bt, Sq) float, 1 = valid
    cmask = cmask_ref[...]                          # (Bt, Sc) float, 1 = valid

    Bt, Sc, E4 = att.shape
    Sq, E2 = q.shape[1], q.shape[2]
    A = wqa_ref.shape[1]

    w_att3 = watt_ref[...].reshape(1, 1, A)         # att_layer weight, (1,1,A)

    # ---- question-side attention pooling: init = softmax(att_layer(tanh(Wqa q))) @ q
    qa = jnp.tanh(
        jnp.dot(q.reshape(Bt * Sq, E2), wqa_ref[...],
                preferred_element_type=jnp.float32) + bqa_ref[...])
    qa3 = qa.reshape(Bt, Sq, A)
    q_logit = jnp.sum(qa3 * w_att3, axis=-1)                        # (Bt, Sq)
    q_logit = jnp.where(qmask > 0.5, q_logit, NEG_INF)
    q_logit = q_logit - jnp.max(q_logit, axis=-1, keepdims=True)
    q_exp = jnp.exp(q_logit)
    nu = q_exp * pl.reciprocal(jnp.sum(q_exp, axis=-1, keepdims=True), approx=True)
    init = jnp.einsum('bxq,bqe->bxe', nu[:, None, :], q,
                      preferred_element_type=jnp.float32)[:, 0, :]  # (Bt, 2H)

    # ---- att_linear_1(att): computed once, reused by both pointer heads
    att_lin = jnp.dot(att.reshape(Bt * Sc, E4), wa1_ref[...],
                      preferred_element_type=jnp.float32).reshape(Bt, Sc, A)

    def pointer_logits(hidden):                     # hidden: (Bt, 2H)
        r = jnp.dot(hidden, wr1_ref[...], preferred_element_type=jnp.float32)  # (Bt, A)
        feat = jnp.tanh(att_lin + r[:, None, :])                               # (Bt, Sc, A)
        s = jnp.sum(feat * w_att3, axis=-1)                                    # (Bt, Sc)
        s = jnp.where(cmask > 0.5, s, NEG_INF)
        return s - jnp.max(s, axis=-1, keepdims=True)

    # ---- start pointer
    s1 = pointer_logits(init)
    e1 = jnp.exp(s1)
    z1 = jnp.sum(e1, axis=-1, keepdims=True)
    logp1_ref[...] = (s1 - jnp.log(z1)).astype(logp1_ref.dtype)
    a1 = e1 * pl.reciprocal(z1, approx=True)                                   # (Bt, Sc)

    # ---- c1 = a1 @ att ; one-step tanh RNN (ansPoint) with h0 = init
    c1 = jnp.einsum('bxs,bsd->bxd', a1[:, None, :], att,
                    preferred_element_type=jnp.float32)[:, 0, :]               # (Bt, 4H)
    h1 = jnp.tanh(
        jnp.dot(c1, wih_ref[...], preferred_element_type=jnp.float32)
        + jnp.dot(init, whh_ref[...], preferred_element_type=jnp.float32)
        + brnn_ref[...])                                                       # (Bt, 2H)
    # F.dropout(h1, drop_prob) is the identity in eval / drop_prob == 0.

    # ---- end pointer
    s2 = pointer_logits(h1)
    z2 = jnp.sum(jnp.exp(s2), axis=-1, keepdims=True)
    logp2_ref[...] = (s2 - jnp.log(z2)).astype(logp2_ref.dtype)


# ----------------------------------------------------------------------------
# Wrapper: weight layout plumbing + pallas_call
# ----------------------------------------------------------------------------
def self_attention_rnn_output_forward(att, q, q_mask, mask, params, batch_tile=None):
    B, Sc, E4 = att.shape
    _, Sq, E2 = q.shape
    A = params["w_question_att"].shape[0]
    assert E4 == 2 * E2

    if batch_tile is None or batch_tile > B:
        batch_tile = B
    if batch_tile != B and (batch_tile % 8 != 0 or B % batch_tile != 0):
        batch_tile = B                      # keep (8,128) / full-dim block rules satisfied
    bt = batch_tile
    grid = (B // bt,)

    # Pre-transpose weights (x @ W form) and fold RNN biases — free wrapper-side plumbing.
    wqa_t = jnp.transpose(params["w_question_att"])          # (2H, A)
    bqa = params["b_question_att"].reshape(1, A)
    wa1_t = jnp.transpose(params["w_att_linear_1"])          # (4H, A)
    wr1_t = jnp.transpose(params["w_rnn_linear_1"])          # (2H, A)
    watt = params["w_att_layer"].reshape(1, A)               # (1, A)
    wih_t = jnp.transpose(params["w_ih"])                    # (4H, 2H)
    whh_t = jnp.transpose(params["w_hh"])                    # (2H, 2H)
    brnn = (params["b_ih"] + params["b_hh"]).reshape(1, E2)  # folded RNN bias

    qm = q_mask.astype(jnp.float32)                          # (B, Sq)
    cm = mask.astype(jnp.float32)                            # (B, Sc)

    full2 = lambda i: (0, 0)
    out_shape = (jax.ShapeDtypeStruct((B, Sc), jnp.float32),
                 jax.ShapeDtypeStruct((B, Sc), jnp.float32))
    return pl.pallas_call(
        _output_layer_kernel,
        out_shape=out_shape,
        grid=grid,
        in_specs=[
            pl.BlockSpec((bt, Sc, E4), lambda i: (i, 0, 0)),   # att
            pl.BlockSpec((bt, Sq, E2), lambda i: (i, 0, 0)),   # q
            pl.BlockSpec((bt, Sq), lambda i: (i, 0)),          # q_mask
            pl.BlockSpec((bt, Sc), lambda i: (i, 0)),          # mask
            pl.BlockSpec((E2, A), full2),                      # question_att.weight^T
            pl.BlockSpec((1, A), full2),                       # question_att.bias
            pl.BlockSpec((E4, A), full2),                      # att_linear_1.weight^T
            pl.BlockSpec((E2, A), full2),                      # rnn_linear_1.weight^T
            pl.BlockSpec((1, A), full2),                       # att_layer.weight
            pl.BlockSpec((E4, E2), full2),                     # RNN weight_ih^T
            pl.BlockSpec((E2, E2), full2),                     # RNN weight_hh^T
            pl.BlockSpec((1, E2), full2),                      # RNN bias (ih+hh)
        ],
        out_specs=(pl.BlockSpec((bt, Sc), lambda i: (i, 0)),
                   pl.BlockSpec((bt, Sc), lambda i: (i, 0))),
        compiler_params=pltpu.CompilerParams(dimension_semantics=("parallel",)),
    )(att, q, qm, cm, wqa_t, bqa, wa1_t, wr1_t, watt, wih_t, whh_t, brnn)


# ----------------------------------------------------------------------------
# Parameters (PyTorch nn.Linear / nn.RNN layouts, so real weights can be imported)
# ----------------------------------------------------------------------------
def init_params(key, hidden_size):
    A = hidden_size
    E2 = 2 * hidden_size
    E4 = 4 * hidden_size
    ks = jax.random.split(key, 9)
    n = lambda k, shape: jax.random.normal(k, shape, jnp.float32) * 0.1
    return {
        "w_att_linear_1": n(ks[0], (A, E4)),   # att_linear_1.weight (out,in), no bias
        "w_rnn_linear_1": n(ks[1], (A, E2)),   # rnn_linear_1.weight, no bias
        "w_question_att": n(ks[2], (A, E2)),   # question_att.weight
        "b_question_att": n(ks[3], (A,)),      # question_att.bias
        "w_att_layer":    n(ks[4], (1, A)),    # att_layer.weight, no bias
        "w_ih": n(ks[5], (E2, E4)),            # ansPoint.weight_ih_l0
        "w_hh": n(ks[6], (E2, E2)),            # ansPoint.weight_hh_l0
        "b_ih": n(ks[7], (E2,)),               # ansPoint.bias_ih_l0
        "b_hh": n(ks[8], (E2,)),               # ansPoint.bias_hh_l0
    }


# ----------------------------------------------------------------------------
# Pure-JAX reference (for a tolerance sanity check)
# ----------------------------------------------------------------------------
def reference_forward(att, q, q_mask, mask, params):
    hp = jax.lax.Precision.HIGHEST
    qm = q_mask.astype(jnp.float32)
    cm = mask.astype(jnp.float32)
    qa = jnp.tanh(jnp.einsum('bqe,ae->bqa', q, params["w_question_att"], precision=hp)
                  + params["b_question_att"])
    q_logit = jnp.einsum('bqa,a->bq', qa, params["w_att_layer"][0], precision=hp)
    q_logit = jnp.where(qm > 0.5, q_logit, NEG_INF)
    nu = jax.nn.softmax(q_logit, axis=-1)
    init = jnp.einsum('bq,bqe->be', nu, q, precision=hp)
    att_lin = jnp.einsum('bsd,ad->bsa', att, params["w_att_linear_1"], precision=hp)

    def logits(hidden):
        r = jnp.einsum('be,ae->ba', hidden, params["w_rnn_linear_1"], precision=hp)
        s = jnp.einsum('bsa,a->bs', jnp.tanh(att_lin + r[:, None, :]),
                       params["w_att_layer"][0], precision=hp)
        return jnp.where(cm > 0.5, s, NEG_INF)

    s1 = logits(init)
    log_p1 = jax.nn.log_softmax(s1, axis=-1)
    a1 = jax.nn.softmax(s1, axis=-1)
    c1 = jnp.einsum('bs,bsd->bd', a1, att, precision=hp)
    h1 = jnp.tanh(jnp.einsum('bd,hd->bh', c1, params["w_ih"], precision=hp)
                  + jnp.einsum('be,he->bh', init, params["w_hh"], precision=hp)
                  + params["b_ih"] + params["b_hh"])
    s2 = logits(h1)
    log_p2 = jax.nn.log_softmax(s2, axis=-1)
    return log_p1, log_p2


if __name__ == "__main__":
    hidden_size = 32          # A = 32, 2H = 64, 4H = 128
    B, Sc, Sq = 16, 128, 64   # context length = 128 keeps output lane-dense

    key = jax.random.PRNGKey(0)
    k_att, k_q, k_p, k_cl, k_ql = jax.random.split(key, 5)
    att = jax.random.normal(k_att, (B, Sc, 4 * hidden_size), jnp.float32)
    q = jax.random.normal(k_q, (B, Sq, 2 * hidden_size), jnp.float32)
    c_len = jax.random.randint(k_cl, (B,), 16, Sc + 1)
    q_len = jax.random.randint(k_ql, (B,), 8, Sq + 1)
    mask = jnp.arange(Sc)[None, :] < c_len[:, None]     # (B, Sc) bool, True = valid
    q_mask = jnp.arange(Sq)[None, :] < q_len[:, None]   # (B, Sq) bool

    params = init_params(k_p, hidden_size)

    log_p1, log_p2 = self_attention_rnn_output_forward(att, q, q_mask, mask, params,
                                                       batch_tile=8)
    log_p1, log_p2 = jax.block_until_ready((log_p1, log_p2))

    assert log_p1.shape == (B, Sc) and log_p2.shape == (B, Sc)
    assert bool(jnp.all(jnp.isfinite(log_p1))) and bool(jnp.all(jnp.isfinite(log_p2)))
    # log-softmax rows must sum (under exp) to ~1
    assert bool(jnp.allclose(jnp.sum(jnp.exp(log_p1), -1), 1.0, atol=1e-3))
    assert bool(jnp.allclose(jnp.sum(jnp.exp(log_p2), -1), 1.0, atol=1e-3))
    # compare against a pure-JAX reference (loose tol: approx reciprocal + MXU rounding)
    r1, r2 = reference_forward(att, q, q_mask, mask, params)
    assert bool(jnp.allclose(log_p1, r1, rtol=1e-1, atol=1e-1))
    assert bool(jnp.allclose(log_p2, r2, rtol=1e-1, atol=1e-1))

    print("KERNEL_OK")
</pallas_src>

<mosaic_0001>
module attributes {stable_mosaic.version = 11 : i64} {
  func.func @_output_layer_kernel(%arg0: i32, %arg1: memref<8x128x128xf32, #tpu.memory_space<vmem>>, %arg2: memref<8x64x64xf32, #tpu.memory_space<vmem>>, %arg3: memref<8x64xf32, #tpu.memory_space<vmem>>, %arg4: memref<8x128xf32, #tpu.memory_space<vmem>>, %arg5: memref<64x32xf32, #tpu.memory_space<vmem>>, %arg6: memref<1x32xf32, #tpu.memory_space<vmem>>, %arg7: memref<128x32xf32, #tpu.memory_space<vmem>>, %arg8: memref<64x32xf32, #tpu.memory_space<vmem>>, %arg9: memref<1x32xf32, #tpu.memory_space<vmem>>, %arg10: memref<128x64xf32, #tpu.memory_space<vmem>>, %arg11: memref<64x64xf32, #tpu.memory_space<vmem>>, %arg12: memref<1x64xf32, #tpu.memory_space<vmem>>, %arg13: memref<8x128xf32, #tpu.memory_space<vmem>>, %arg14: memref<8x128xf32, #tpu.memory_space<vmem>>) attributes {dimension_semantics = [#tpu.dimension_semantics<parallel>], iteration_bounds = array<i64: 2>, scalar_prefetch = 0 : i64, scratch_operands = 0 : i64, tpu.core_type = #tpu.core_type<tc>, window_params = [{transform_indices = @transform_0, window_bounds = array<i64: 8, 128, 128>}, {transform_indices = @transform_1, window_bounds = array<i64: 8, 64, 64>}, {transform_indices = @transform_2, window_bounds = array<i64: 8, 64>}, {transform_indices = @transform_3, window_bounds = array<i64: 8, 128>}, {pipeline_mode = #tpu.pipeline_mode<synchronous>, transform_indices = @transform_4, window_bounds = array<i64: 64, 32>}, {pipeline_mode = #tpu.pipeline_mode<synchronous>, transform_indices = @transform_5, window_bounds = array<i64: 1, 32>}, {pipeline_mode = #tpu.pipeline_mode<synchronous>, transform_indices = @transform_6, window_bounds = array<i64: 128, 32>}, {pipeline_mode = #tpu.pipeline_mode<synchronous>, transform_indices = @transform_7, window_bounds = array<i64: 64, 32>}, {pipeline_mode = #tpu.pipeline_mode<synchronous>, transform_indices = @transform_8, window_bounds = array<i64: 1, 32>}, {pipeline_mode = #tpu.pipeline_mode<synchronous>, transform_indices = @transform_9, window_bounds = array<i64: 128, 64>}, {pipeline_mode = #tpu.pipeline_mode<synchronous>, transform_indices = @transform_10, window_bounds = array<i64: 64, 64>}, {pipeline_mode = #tpu.pipeline_mode<synchronous>, transform_indices = @transform_11, window_bounds = array<i64: 1, 64>}, {transform_indices = @transform_12, window_bounds = array<i64: 8, 128>}, {transform_indices = @transform_13, window_bounds = array<i64: 8, 128>}]} {
    %c0 = arith.constant 0 : index
    %c0_0 = arith.constant 0 : index
    %c0_1 = arith.constant 0 : index
    %0 = vector.load %arg1[%c0, %c0_0, %c0_1] : memref<8x128x128xf32, #tpu.memory_space<vmem>>, vector<8x128x128xf32>
    %c0_2 = arith.constant 0 : index
    %c0_3 = arith.constant 0 : index
    %c0_4 = arith.constant 0 : index
    %1 = vector.load %arg2[%c0_2, %c0_3, %c0_4] : memref<8x64x64xf32, #tpu.memory_space<vmem>>, vector<8x64x64xf32>
    %c0_5 = arith.constant 0 : index
    %c0_6 = arith.constant 0 : index
    %2 = vector.load %arg3[%c0_5, %c0_6] : memref<8x64xf32, #tpu.memory_space<vmem>>, vector<8x64xf32>
    %c0_7 = arith.constant 0 : index
    %c0_8 = arith.constant 0 : index
    %3 = vector.load %arg4[%c0_7, %c0_8] : memref<8x128xf32, #tpu.memory_space<vmem>>, vector<8x128xf32>
    %c0_9 = arith.constant 0 : index
    %c0_10 = arith.constant 0 : index
    %4 = vector.load %arg9[%c0_9, %c0_10] : memref<1x32xf32, #tpu.memory_space<vmem>>, vector<1x32xf32>
    %5 = vector.shape_cast %4 : vector<1x32xf32> to vector<1x1x32xf32>
    %6 = vector.shape_cast %1 : vector<8x64x64xf32> to vector<512x64xf32>
    %c0_11 = arith.constant 0 : index
    %c0_12 = arith.constant 0 : index
    %7 = vector.load %arg5[%c0_11, %c0_12] : memref<64x32xf32, #tpu.memory_space<vmem>>, vector<64x32xf32>
    %cst = arith.constant dense<0.000000e+00> : vector<512x32xf32>
    %8 = tpu.matmul %6, %7, %cst {dimension_numbers = #tpu.dot_dimension_numbers<[1], [0], [0], [1], [0, 0, 1, 1], [], []>} : vector<512x64xf32>, vector<64x32xf32>, vector<512x32xf32> -> vector<512x32xf32>
    %c0_13 = arith.constant 0 : index
    %c0_14 = arith.constant 0 : index
    %9 = vector.load %arg6[%c0_13, %c0_14] : memref<1x32xf32, #tpu.memory_space<vmem>>, vector<1x32xf32>
    %10 = vector.broadcast %9 : vector<1x32xf32> to vector<512x32xf32>
    %11 = arith.addf %8, %10 : vector<512x32xf32>
    %12 = math.tanh %11 : vector<512x32xf32>
    %13 = vector.shape_cast %12 : vector<512x32xf32> to vector<8x64x32xf32>
    %14 = vector.broadcast %5 : vector<1x1x32xf32> to vector<8x64x32xf32>
    %15 = arith.mulf %13, %14 : vector<8x64x32xf32>
    %cst_15 = arith.constant dense<0.000000e+00> : vector<8x64xf32>
    %16 = vector.multi_reduction <add>, %15, %cst_15 [2] : vector<8x64x32xf32> to vector<8x64xf32>
    %cst_16 = arith.constant 5.000000e-01 : f32
    %17 = vector.broadcast %cst_16 : f32 to vector<8x64xf32>
    %18 = arith.cmpf ogt, %2, %17 : vector<8x64xf32>
    %cst_17 = arith.constant -1.000000e+30 : f32
    %19 = vector.broadcast %cst_17 : f32 to vector<8x64xf32>
    %20 = arith.select %18, %16, %19 : vector<8x64xi1>, vector<8x64xf32>
    %cst_18 = arith.constant dense<0xFF800000> : vector<8xf32>
    %21 = vector.multi_reduction <maximumf>, %20, %cst_18 [1] : vector<8x64xf32> to vector<8xf32>
    %22 = vector.shape_cast %21 : vector<8xf32> to vector<8x1xf32>
    %23 = vector.broadcast %22 : vector<8x1xf32> to vector<8x64xf32>
    %24 = arith.subf %20, %23 : vector<8x64xf32>
    %25 = math.exp %24 : vector<8x64xf32>
    %cst_19 = arith.constant dense<0.000000e+00> : vector<8xf32>
    %26 = vector.multi_reduction <add>, %25, %cst_19 [1] : vector<8x64xf32> to vector<8xf32>
    %27 = vector.shape_cast %26 : vector<8xf32> to vector<8x1xf32>
    %28 = tpu.reciprocal %27 {approx = true} : vector<8x1xf32> -> vector<8x1xf32>
    %29 = vector.broadcast %28 : vector<8x1xf32> to vector<8x64xf32>
    %30 = arith.mulf %25, %29 : vector<8x64xf32>
    %31 = vector.shape_cast %30 : vector<8x64xf32> to vector<8x1x64xf32>
    "tpu.trace_start"() <{level = 10 : i32, message = "bxq,bqe->bxe"}> : () -> ()
    %cst_20 = arith.constant dense<0.000000e+00> : vector<8x1x64xf32>
    %32 = tpu.matmul %31, %1, %cst_20 {dimension_numbers = #tpu.dot_dimension_numbers<[2], [1], [1], [2], [0, 0, 0, 1, 1, 2], [0], [0]>} : vector<8x1x64xf32>, vector<8x64x64xf32>, vector<8x1x64xf32> -> vector<8x1x64xf32>
    "tpu.trace_stop"() : () -> ()
    %33 = vector.shape_cast %32 : vector<8x1x64xf32> to vector<8x64xf32>
    %34 = vector.shape_cast %0 : vector<8x128x128xf32> to vector<1024x128xf32>
    %c0_21 = arith.constant 0 : index
    %c0_22 = arith.constant 0 : index
    %35 = vector.load %arg7[%c0_21, %c0_22] : memref<128x32xf32, #tpu.memory_space<vmem>>, vector<128x32xf32>
    %cst_23 = arith.constant dense<0.000000e+00> : vector<1024x32xf32>
    %36 = tpu.matmul %34, %35, %cst_23 {dimension_numbers = #tpu.dot_dimension_numbers<[1], [0], [0], [1], [0, 0, 1, 1], [], []>} : vector<1024x128xf32>, vector<128x32xf32>, vector<1024x32xf32> -> vector<1024x32xf32>
    %37 = vector.shape_cast %36 : vector<1024x32xf32> to vector<8x128x32xf32>
    %c0_24 = arith.constant 0 : index
    %c0_25 = arith.constant 0 : index
    %38 = vector.load %arg8[%c0_24, %c0_25] : memref<64x32xf32, #tpu.memory_space<vmem>>, vector<64x32xf32>
    %cst_26 = arith.constant dense<0.000000e+00> : vector<8x32xf32>
    %39 = tpu.matmul %33, %38, %cst_26 {dimension_numbers = #tpu.dot_dimension_numbers<[1], [0], [0], [1], [0, 0, 1, 1], [], []>} : vector<8x64xf32>, vector<64x32xf32>, vector<8x32xf32> -> vector<8x32xf32>
    %40 = vector.shape_cast %39 : vector<8x32xf32> to vector<8x1x32xf32>
    %41 = vector.broadcast %40 : vector<8x1x32xf32> to vector<8x128x32xf32>
    %42 = arith.addf %37, %41 : vector<8x128x32xf32>
    %43 = math.tanh %42 : vector<8x128x32xf32>
    %44 = vector.broadcast %5 : vector<1x1x32xf32> to vector<8x128x32xf32>
    %45 = arith.mulf %43, %44 : vector<8x128x32xf32>
    %cst_27 = arith.constant dense<0.000000e+00> : vector<8x128xf32>
    %46 = vector.multi_reduction <add>, %45, %cst_27 [2] : vector<8x128x32xf32> to vector<8x128xf32>
    %cst_28 = arith.constant 5.000000e-01 : f32
    %47 = vector.broadcast %cst_28 : f32 to vector<8x128xf32>
    %48 = arith.cmpf ogt, %3, %47 : vector<8x128xf32>
    %cst_29 = arith.constant -1.000000e+30 : f32
    %49 = vector.broadcast %cst_29 : f32 to vector<8x128xf32>
    %50 = arith.select %48, %46, %49 : vector<8x128xi1>, vector<8x128xf32>
    %cst_30 = arith.constant dense<0xFF800000> : vector<8xf32>
    %51 = vector.multi_reduction <maximumf>, %50, %cst_30 [1] : vector<8x128xf32> to vector<8xf32>
    %52 = vector.shape_cast %51 : vector<8xf32> to vector<8x1xf32>
    %53 = vector.broadcast %52 : vector<8x1xf32> to vector<8x128xf32>
    %54 = arith.subf %50, %53 : vector<8x128xf32>
    %55 = math.exp %54 : vector<8x128xf32>
    %cst_31 = arith.constant dense<0.000000e+00> : vector<8xf32>
    %56 = vector.multi_reduction <add>, %55, %cst_31 [1] : vector<8x128xf32> to vector<8xf32>
    %57 = vector.shape_cast %56 : vector<8xf32> to vector<8x1xf32>
    %58 = math.log %57 : vector<8x1xf32>
    %59 = vector.broadcast %58 : vector<8x1xf32> to vector<8x128xf32>
    %60 = arith.subf %54, %59 : vector<8x128xf32>
    %c0_32 = arith.constant 0 : index
    %c0_33 = arith.constant 0 : index
    %61 = vector.load %arg13[%c0_32, %c0_33] : memref<8x128xf32, #tpu.memory_space<vmem>>, vector<8x128xf32>
    tpu.vector_store %arg13[%c0_32, %c0_33], %60 {strides = array<i32>} : memref<8x128xf32, #tpu.memory_space<vmem>>, vector<8x128xf32>,
    %62 = tpu.reciprocal %57 {approx = true} : vector<8x1xf32> -> vector<8x1xf32>
    %63 = vector.broadcast %62 : vector<8x1xf32> to vector<8x128xf32>
    %64 = arith.mulf %55, %63 : vector<8x128xf32>
    %65 = vector.shape_cast %64 : vector<8x128xf32> to vector<8x1x128xf32>
    "tpu.trace_start"() <{level = 10 : i32, message = "bxs,bsd->bxd"}> : () -> ()
    %cst_34 = arith.constant dense<0.000000e+00> : vector<8x1x128xf32>
    %66 = tpu.matmul %65, %0, %cst_34 {dimension_numbers = #tpu.dot_dimension_numbers<[2], [1], [1], [2], [0, 0, 0, 1, 1, 2], [0], [0]>} : vector<8x1x128xf32>, vector<8x128x128xf32>, vector<8x1x128xf32> -> vector<8x1x128xf32>
    "tpu.trace_stop"() : () -> ()
    %67 = vector.shape_cast %66 : vector<8x1x128xf32> to vector<8x128xf32>
    %c0_35 = arith.constant 0 : index
    %c0_36 = arith.constant 0 : index
    %68 = vector.load %arg10[%c0_35, %c0_36] : memref<128x64xf32, #tpu.memory_space<vmem>>, vector<128x64xf32>
    %cst_37 = arith.constant dense<0.000000e+00> : vector<8x64xf32>
    %69 = tpu.matmul %67, %68, %cst_37 {dimension_numbers = #tpu.dot_dimension_numbers<[1], [0], [0], [1], [0, 0, 1, 1], [], []>} : vector<8x128xf32>, vector<128x64xf32>, vector<8x64xf32> -> vector<8x64xf32>
    %c0_38 = arith.constant 0 : index
    %c0_39 = arith.constant 0 : index
    %70 = vector.load %arg11[%c0_38, %c0_39] : memref<64x64xf32, #tpu.memory_space<vmem>>, vector<64x64xf32>
    %cst_40 = arith.constant dense<0.000000e+00> : vector<8x64xf32>
    %71 = tpu.matmul %33, %70, %cst_40 {dimension_numbers = #tpu.dot_dimension_numbers<[1], [0], [0], [1], [0, 0, 1, 1], [], []>} : vector<8x64xf32>, vector<64x64xf32>, vector<8x64xf32> -> vector<8x64xf32>
    %72 = arith.addf %69, %71 : vector<8x64xf32>
    %c0_41 = arith.constant 0 : index
    %c0_42 = arith.constant 0 : index
    %73 = vector.load %arg12[%c0_41, %c0_42] : memref<1x64xf32, #tpu.memory_space<vmem>>, vector<1x64xf32>
    %74 = vector.broadcast %73 : vector<1x64xf32> to vector<8x64xf32>
    %75 = arith.addf %72, %74 : vector<8x64xf32>
    %76 = math.tanh %75 : vector<8x64xf32>
    %c0_43 = arith.constant 0 : index
    %c0_44 = arith.constant 0 : index
    %77 = vector.load %arg8[%c0_43, %c0_44] : memref<64x32xf32, #tpu.memory_space<vmem>>, vector<64x32xf32>
    %cst_45 = arith.constant dense<0.000000e+00> : vector<8x32xf32>
    %78 = tpu.matmul %76, %77, %cst_45 {dimension_numbers = #tpu.dot_dimension_numbers<[1], [0], [0], [1], [0, 0, 1, 1], [], []>} : vector<8x64xf32>, vector<64x32xf32>, vector<8x32xf32> -> vector<8x32xf32>
    %79 = vector.shape_cast %78 : vector<8x32xf32> to vector<8x1x32xf32>
    %80 = vector.broadcast %79 : vector<8x1x32xf32> to vector<8x128x32xf32>
    %81 = arith.addf %37, %80 : vector<8x128x32xf32>
    %82 = math.tanh %81 : vector<8x128x32xf32>
    %83 = vector.broadcast %5 : vector<1x1x32xf32> to vector<8x128x32xf32>
    %84 = arith.mulf %82, %83 : vector<8x128x32xf32>
    %cst_46 = arith.constant dense<0.000000e+00> : vector<8x128xf32>
    %85 = vector.multi_reduction <add>, %84, %cst_46 [2] : vector<8x128x32xf32> to vector<8x128xf32>
    %cst_47 = arith.constant 5.000000e-01 : f32
    %86 = vector.broadcast %cst_47 : f32 to vector<8x128xf32>
    %87 = arith.cmpf ogt, %3, %86 : vector<8x128xf32>
    %cst_48 = arith.constant -1.000000e+30 : f32
    %88 = vector.broadcast %cst_48 : f32 to vector<8x128xf32>
    %89 = arith.select %87, %85, %88 : vector<8x128xi1>, vector<8x128xf32>
    %cst_49 = arith.constant dense<0xFF800000> : vector<8xf32>
    %90 = vector.multi_reduction <maximumf>, %89, %cst_49 [1] : vector<8x128xf32> to vector<8xf32>
    %91 = vector.shape_cast %90 : vector<8xf32> to vector<8x1xf32>
    %92 = vector.broadcast %91 : vector<8x1xf32> to vector<8x128xf32>
    %93 = arith.subf %89, %92 : vector<8x128xf32>
    %94 = math.exp %93 : vector<8x128xf32>
    %cst_50 = arith.constant dense<0.000000e+00> : vector<8xf32>
    %95 = vector.multi_reduction <add>, %94, %cst_50 [1] : vector<8x128xf32> to vector<8xf32>
    %96 = vector.shape_cast %95 : vector<8xf32> to vector<8x1xf32>
    %97 = math.log %96 : vector<8x1xf32>
    %98 = vector.broadcast %97 : vector<8x1xf32> to vector<8x128xf32>
    %99 = arith.subf %93, %98 : vector<8x128xf32>
    %c0_51 = arith.constant 0 : index
    %c0_52 = arith.constant 0 : index
    %100 = vector.load %arg14[%c0_51, %c0_52] : memref<8x128xf32, #tpu.memory_space<vmem>>, vector<8x128xf32>
    tpu.vector_store %arg14[%c0_51, %c0_52], %99 {strides = array<i32>} : memref<8x128xf32, #tpu.memory_space<vmem>>, vector<8x128xf32>,
    return
  }
  func.func @transform_0(%arg0: i32) -> (i32, i32, i32) {
    %c0_i32 = arith.constant 0 : i32
    %c0_i32_0 = arith.constant 0 : i32
    %c0_i32_1 = arith.constant 0 : i32
    return %arg0, %c0_i32, %c0_i32_0 : i32, i32, i32
  }
  func.func @transform_1(%arg0: i32) -> (i32, i32, i32) {
    %c0_i32 = arith.constant 0 : i32
    %c0_i32_0 = arith.constant 0 : i32
    %c0_i32_1 = arith.constant 0 : i32
    return %arg0, %c0_i32, %c0_i32_0 : i32, i32, i32
  }
  func.func @transform_2(%arg0: i32) -> (i32, i32) {
    %c0_i32 = arith.constant 0 : i32
    %c0_i32_0 = arith.constant 0 : i32
    return %arg0, %c0_i32 : i32, i32
  }
  func.func @transform_3(%arg0: i32) -> (i32, i32) {
    %c0_i32 = arith.constant 0 : i32
    %c0_i32_0 = arith.constant 0 : i32
    return %arg0, %c0_i32 : i32, i32
  }
  func.func @transform_4(%arg0: i32) -> (i32, i32) {
    %c0_i32 = arith.constant 0 : i32
    %c0_i32_0 = arith.constant 0 : i32
    %c0_i32_1 = arith.constant 0 : i32
    return %c0_i32, %c0_i32_0 : i32, i32
  }
  func.func @transform_5(%arg0: i32) -> (i32, i32) {
    %c0_i32 = arith.constant 0 : i32
    %c0_i32_0 = arith.constant 0 : i32
    %c0_i32_1 = arith.constant 0 : i32
    return %c0_i32, %c0_i32_0 : i32, i32
  }
  func.func @transform_6(%arg0: i32) -> (i32, i32) {
    %c0_i32 = arith.constant 0 : i32
    %c0_i32_0 = arith.constant 0 : i32
    %c0_i32_1 = arith.constant 0 : i32
    return %c0_i32, %c0_i32_0 : i32, i32
  }
  func.func @transform_7(%arg0: i32) -> (i32, i32) {
    %c0_i32 = arith.constant 0 : i32
    %c0_i32_0 = arith.constant 0 : i32
    %c0_i32_1 = arith.constant 0 : i32
    return %c0_i32, %c0_i32_0 : i32, i32
  }
  func.func @transform_8(%arg0: i32) -> (i32, i32) {
    %c0_i32 = arith.constant 0 : i32
    %c0_i32_0 = arith.constant 0 : i32
    %c0_i32_1 = arith.constant 0 : i32
    return %c0_i32, %c0_i32_0 : i32, i32
  }
  func.func @transform_9(%arg0: i32) -> (i32, i32) {
    %c0_i32 = arith.constant 0 : i32
    %c0_i32_0 = arith.constant 0 : i32
    %c0_i32_1 = arith.constant 0 : i32
    return %c0_i32, %c0_i32_0 : i32, i32
  }
  func.func @transform_10(%arg0: i32) -> (i32, i32) {
    %c0_i32 = arith.constant 0 : i32
    %c0_i32_0 = arith.constant 0 : i32
    %c0_i32_1 = arith.constant 0 : i32
    return %c0_i32, %c0_i32_0 : i32, i32
  }
  func.func @transform_11(%arg0: i32) -> (i32, i32) {
    %c0_i32 = arith.constant 0 : i32
    %c0_i32_0 = arith.constant 0 : i32
    %c0_i32_1 = arith.constant 0 : i32
    return %c0_i32, %c0_i32_0 : i32, i32
  }
  func.func @transform_12(%arg0: i32) -> (i32, i32) {
    %c0_i32 = arith.constant 0 : i32
    %c0_i32_0 = arith.constant 0 : i32
    return %arg0, %c0_i32 : i32, i32
  }
  func.func @transform_13(%arg0: i32) -> (i32, i32) {
    %c0_i32 = arith.constant 0 : i32
    %c0_i32_0 = arith.constant 0 : i32
    return %arg0, %c0_i32 : i32, i32
  }
}

</mosaic_0001>

<bundles_post_ra>
// kernel: tpu_custom_call.1
= control target key start
LH: loop header
LB: loop body
LE: loop exit
PB: predicated region body
PF: predicated region fallthrough
CT: control target
= control target key end

     0   :  { %s14607_s0 = inlined_call_operand.hbm [shape: f32[16,128,128], index: 0, kind: input, shape index: {}]   ;;  %s14608_s1 = inlined_call_operand.hbm [shape: f32[16,64,64], index: 1, kind: input, shape index: {}]   ;;  %s14609_s2 = inlined_call_operand.vmem [shape: f32[16,64], index: 2, kind: input, shape index: {}]   ;;  %s14610_s3 = inlined_call_operand.vmem [shape: f32[16,128], index: 3, kind: input, shape index: {}]   ;;  %s14611_s4 = inlined_call_operand.vmem [shape: f32[64,32], index: 4, kind: input, shape index: {}]   ;;  %s14612_s5 = inlined_call_operand.vmem [shape: f32[1,32], index: 5, kind: input, shape index: {}]   ;;  %s14613_s6 = inlined_call_operand.vmem [shape: f32[128,32], index: 6, kind: input, shape index: {}]   ;;  %s14614_s7 = inlined_call_operand.vmem [shape: f32[64,32], index: 7, kind: input, shape index: {}]   ;;  %s14615_s8 = inlined_call_operand.vmem [shape: f32[1,32], index: 8, kind: input, shape index: {}]   ;;  %s14616_s9 = inlined_call_operand.vmem [shape: f32[128,64], index: 9, kind: input, shape index: {}]   ;;  %s14617_s10 = inlined_call_operand.vmem [shape: f32[64,64], index: 10, kind: input, shape index: {}]   ;;  %s14618_s11 = inlined_call_operand.vmem [shape: f32[1,64], index: 11, kind: input, shape index: {}]   ;;  %s14619_s12 = inlined_call_operand.hbm [shape: f32[16,128], index: 12, kind: output, shape index: {0}]   ;;  %s14620_s13 = inlined_call_operand.hbm [shape: f32[16,128], index: 13, kind: output, shape index: {1}]  }
   0x1   :  { %14803 = sst [smem:[#allocation158_spill]] %s14607_s0 }
   0x2   :  { %14804 = sst [smem:[#allocation159_spill]] %s14619_s12 }
   0x3   :  { %14805 = sst [smem:[#allocation160_spill]] %s14620_s13 }
   0x4   :  { %19 = vsyncpa [#allocation3], 0 }
   0x5   :  { %21 = vsyncpa [#allocation3 + $0x1], 0 }
   0x6   :  { %22 = vsyncpa [#allocation6], 0 }
   0x7   :  { %24 = vsyncpa [#allocation6 + $0x1], 0 }
   0x8   :  { %25 = vsyncpa [#allocation4], 0 }
   0x9   :  { %27 = vsyncpa [#allocation4 + $0x1], 0 }
   0xa   :  { %28 = vsyncpa [#allocation9], 0 }
   0xb   :  { %30 = vsyncpa [#allocation9 + $0x1], 0  ;;  %s10463_s25 = smov 0   ;;  %s10465_s26 = smov 0  }
   0xc   :  { %s10467_s27 = smov 0   ;;  %s10469_s28 = smov 0  }
   0xd LB: > { %14806 = sst [smem:[#allocation14_spill]] %s10370_s25  ;;  %s10484_s29 = sadd.s32 4294967295, %s10382_s28   ;;  %s10382_s28 = sphi %s10469_s28, %s15317_s28   ;;  %s10378_s27 = sphi %s10467_s27, %s15322_s27   ;;  %s10374_s26 = sphi %s10465_s26, %s15321_s26   ;;  %s10370_s25 = sphi %s10463_s25, %s15320_s25  }
   0xe   : > { %14807 = sst [smem:[#allocation15_spill]] %s10378_s27  ;;  %s7903_s30 = sadd.s32 4294967294, %s10382_s28  }
   0xf   : > { %s10488_s14 = sadd.s32 1, %s10382_s28   ;;  %s43_s15 = sadd.s32 1, %s10378_s27 }
  0x10   : > { %14808 = sst [smem:[#allocation16_spill]] %s10488_s14  ;;  %s40_s16 = ssub.s32 %s10382_s28, %s10488_s14 }
  0x11   : > { %p50_p0 = scmp.ne.s32.totalorder %s10378_s27, %s10374_s26  ;;  %p41_p1 = scmp.eq.s32.totalorder %s40_s16, 0 }
  0x12   : > { %p51_p2 = scmp.eq.s32.totalorder %s10382_s28, 0  ;;  %p56_p3 = scmp.ne.s32.totalorder %s10374_s26, %s10370_s25 }
  0x13   : > { %p57_p4 = scmp.eq.s32.totalorder %s10484_s29, 0  ;;  %p326_p7 = scmp.eq.s32.totalorder %s10484_s29, 1 }
  0x14   : > { %s10500_s17 = scalar_select %p41_p1, %s10378_s27, %s43_s15  }
  0x15   : > { %p10502_p5 = por %p51_p2, %p50_p0  ;;  %p10506_p6 = por %p57_p4, %p56_p3 }
  0x16   : > { %14809 = sst [smem:[#allocation17_spill]] %s10500_s17  ;;  %p332_p8 = scmp.eq.s32.totalorder %s7903_s30, 1 }
  0x17   : > { %s14811_s19 = scalar_select %p10506_p6, 1, 0 }
  0x18   : > { %p9359_p10 = scmp.lt.s32.totalorder %s10382_s28, 2  ;;  %p10513_p11 = por %p326_p7, %p50_p0 }
  0x19   : > { %p10517_p12 = por %p332_p8, %p56_p3  ;;  %s10522_s22 = sand.u32 1, %s10378_s27  }
  0x1a   : > { %s14812_s20 = scalar_select %p10513_p11, 1, 0 }
  0x1b   : > { %s14813_s21 = scalar_select %p10517_p12, 1, 0 }
  0x1c   : > { %s8006_s23 = sshll.u32 %s10382_s28, 14  ;;  %s7906_s24 = sshll.u32 %s10522_s22, 10 }
  0x1d   : > { %14814 = sst [smem:[#allocation18_spill]] %s14813_s21  ;;  %s406_s17 = scalar_lea.vmem [#allocation2], %s7906_s24 }
  0x1e   : > { %s14815_s0 = sld [smem:[#allocation158_spill]]  ;;  %s414_s14 = sshll.u32 %s406_s17, 4  ;;  %s10537_s14 = int_to_ptr.vmem [resolvable:$true] %s414_s14 }
  0x1f   : > { %p10533_p13 = pnand %p9359_p10, %p10502_p5 }
  0x21   : > { %p10230_p1 = pneg %p10533_p13 }
  0x24   : > { %s10529_s30 = scalar_lea.hbm %s14815_s0, %s8006_s23  ;;  %s10233_s18 = scalar_lea.hbm %s14815_s0, 32768 }
  0x25   : > { %s10228_s21 = scalar_lea.hbm %s10529_s30, 16384  ;;  %p10234_p4 = scmp.lt.s32.totalorder %s10529_s30, %s14815_s0 }
  0x26   : > { %p10229_p0 = scmp.ne.s32.totalorder %s10529_s30, %s10228_s21  ;;  %p10235_p5 = scmp.lt.s32.totalorder %s10233_s18, %s10228_s21 }
  0x28   : > { %p10231_p2 = pnand %p10230_p1, %p10229_p0  ;;  %p10236_p7 = por %p10235_p5, %p10234_p4 }
  0x2a   : > { %p10232_p3 = pneg %p10231_p2 }
  0x2c   : > { %p10237_p8 = pnand %p10236_p7, %p10232_p3 }
  0x2e   : > { %10240 = shalt.err (!%p10237_p8)
}
  0x2f   : > { %s10241_s16 = scalar_lea.vmem %s10537_s14, 16384  ;;  %s10384_s23 = smov [#allocation2]  }
  0x30   : > { %p10242_p10 = scmp.ne.s32.totalorder %s10537_s14, %s10241_s16  ;;  %s10246_s17 = sshll.u32 %s10384_s23, 4  ;;  %s10247_s17 = int_to_ptr.vmem [resolvable:$false] %s10246_s17 }
  0x31   : > { %s10248_s27 = scalar_lea.vmem %s10247_s17, 32768  ;;  %p10249_p9 = scmp.lt.s32.totalorder %s10537_s14, %s10247_s17 }
  0x32   : > { %p10244_p0 = pnand %p10242_p10, %p10230_p1  ;;  %p10250_p12 = scmp.lt.s32.totalorder %s10248_s27, %s10241_s16 }
  0x34   : > { %p10245_p2 = pneg %p10244_p0  ;;  %p10251_p11 = por %p10250_p12, %p10249_p9 }
  0x36   : > { %p10252_p4 = pnand %p10251_p11, %p10245_p2 }
  0x38   : > { %10255 = shalt.err (!%p10252_p4)
}
  0x39   : > { %s14629_s21 = smov 128   ;;  %s10386_s18 = smov 8  }
  0x3a   : > { %s14817_s27 = scalar_lea.sflag [#allocation3], %s10522_s22  ;;  %p7914_p9 = scmp.ge.s32.totalorder %s10382_s28, 1 }
  0x3b   : > { %9348 = dma.hbm_to_vmem [thread:$0]  (!%p10533_p13), %s10529_s30, 16384, %s10537_s14, %s14817_s27, %s14629_s21, %s14629_s21, %s10386_s18  }
  0x3c   : > { %p458_p11 = scmp.lt.s32.totalorder %s10382_s28, 3  ;;  %s7910_s24 = sshll.u32 %s10522_s22, 9 }
  0x3d   : > { %s8008_s16 = sshll.u32 %s10382_s28, 13  ;;  %s428_s23 = scalar_lea.vmem [#allocation5], %s7910_s24 }
  0x3e   : > { %p10572_p12 = pnand %p7914_p9, %p458_p11  ;;  %s436_s17 = sshll.u32 %s428_s23, 4  ;;  %s10582_s17 = int_to_ptr.vmem [resolvable:$true] %s436_s17 }
  0x3f   : > { %s10580_s12 = scalar_lea.hbm %s14608_s1, %s8008_s16  ;;  %s425_s14 = scalar_lea.sflag [#allocation6], %s10522_s22 }
  0x40   : > { %s10256_s30 = scalar_lea.hbm %s10580_s12, 8192  ;;  %s10261_s23 = scalar_lea.hbm %s14608_s1, 16384 }
  0x41   : > { %p10257_p3 = scmp.ne.s32.totalorder %s10580_s12, %s10256_s30  ;;  %p10262_p8 = scmp.lt.s32.totalorder %s10580_s12, %s14608_s1 }
  0x42   : > { %p10263_p10 = scmp.lt.s32.totalorder %s10261_s23, %s10256_s30 }
  0x43   : > { %p10259_p5 = pnand %p10257_p3, %p10230_p1 }
  0x44   : > { %p10264_p0 = por %p10263_p10, %p10262_p8 }
  0x45   : > { %p10260_p7 = pneg %p10259_p5 }
  0x47   : > { %p10265_p2 = pnand %p10264_p0, %p10260_p7 }
  0x49   : > { %10268 = shalt.err (!%p10265_p2)
}
  0x4a   : > { %s10269_s13 = scalar_lea.vmem %s10582_s17, 8192  ;;  %s10387_s22 = smov [#allocation5]  }
  0x4b   : > { %p10270_p4 = scmp.ne.s32.totalorder %s10582_s17, %s10269_s13  ;;  %s10274_s16 = sshll.u32 %s10387_s22, 4  ;;  %s10275_s16 = int_to_ptr.vmem [resolvable:$false] %s10274_s16 }
  0x4c   : > { %s10276_s27 = scalar_lea.vmem %s10275_s16, 16384  ;;  %p10277_p3 = scmp.lt.s32.totalorder %s10582_s17, %s10275_s16 }
  0x4d   : > { %p10272_p9 = pnand %p10270_p4, %p10230_p1  ;;  %p10278_p5 = scmp.lt.s32.totalorder %s10276_s27, %s10269_s13 }
  0x4f   : > { %p10273_p11 = pneg %p10272_p9  ;;  %p10279_p6 = por %p10278_p5, %p10277_p3 }
  0x51   : > { %p10280_p8 = pnand %p10279_p6, %p10273_p11 }
  0x53   : > { %10283 = shalt.err (!%p10280_p8)
}
  0x54   : > { %s14819_s21 = smov 128   ;;  %462 = sbr.rel (%p10572_p12) target bundleno = 3694 (0xe6e), region = 68 }
  0x55   : > { %9351 = dma.hbm_to_vmem [thread:$0]  (!%p10533_p13), %s10580_s12, 8192, %s10582_s17, %s425_s14, %s14819_s21, %s14819_s21, %s10386_s18  }
  0x59   : > { %s10613_s30 = sand.u32 1, %s10374_s26   ;;  %p14820_p6 = scmp.ne.s32.totalorder %s14811_s19, 0 }
  0x5a   : > { %s7915_s24 = sshll.u32 %s10613_s30, 10  ;;  %s465_s23 = scalar_lea.sflag [#allocation3], %s10613_s30 }
  0x5b   : > { %s10617_s0 = scalar_lea.vmem [#allocation2], %s7915_s24 }
  0x5c   : > { %10353 = dma.done.wait (%p14820_p6), %s465_s23, 16384  }
  0x5d   : > { %10355 = vsyncadd (%p14820_p6), %s465_s23, 4294950912  ;;  %s7916_s12 = sshll.u32 %s10613_s30, 9  ;;  %s474_s25 = scalar_lea.sflag [#allocation6], %s10613_s30 }
  0x5e   : > { %s10625_s18 = scalar_lea.vmem [#allocation5], %s7916_s12 }
  0x5f   : > { %10357 = dma.done.wait (%p14820_p6), %s474_s25, 8192  }
  0x60   : > { %10359 = vsyncadd (%p14820_p6), %s474_s25, 4294959104  ;;  %v750_v0 = vld [vmem:[%s14611_s4 + $0x38] sm:$0xff]  ;;  %v749_v1 = vld [vmem:[%s14611_s4 + $0x30] sm:$0xff]  ;;  %vm14731_vm0 = vcmask 523264   ;;  %vm14797_vm1 = vcmask 261120   ;;  %vm1739_vm2 = vcmask 130112  }
  0x61   : > { %8477 = vmatprep.subr.mxu0 %v750_v0  ;;  %v748_v2 = vld [vmem:[%s14611_s4 + $0x28] sm:$0xff]  ;;  %v676_v3 = vld [vmem:[%s10625_s18] sm:$0xff]  ;;  %v746_v5 = vld [vmem:[%s14611_s4 + $0x18] sm:$0xff]  ;;  %vm1746_vm3 = vcmask 195712   ;;  %vm14631_vm4 = vcmask 261312   ;;  %vm1760_vm5 = vcmask 326912  }
  0x62   : > { %8478 = vmatpush3.msra.mxu0 %v750_v0  ;;  %8493 = vmatprep.mubr.msk.f32.mxu0 %vm14731_vm0, %v676_v3  ;;  %v747_v4 = vld [vmem:[%s14611_s4 + $0x20] sm:$0xff]  ;;  %v745_v6 = vld [vmem:[%s14611_s4 + $0x10] sm:$0xff]  ;;  %v744_v7 = vld [vmem:[%s14611_s4 + $0x8] sm:$0xff]  ;;  %vm1767_vm6 = vcmask 392512   ;;  %vm1774_vm7 = vcmask 458112   ;;  %vm1781_vm8 = vcmask 523712  }
  0x63   : > { %8479 = vmatprep.subr.mxu0 %v749_v1  ;;  %v743_v8 = vld [vmem:[%s14611_s4] sm:$0xff]  ;;  %v677_v9 = vld [vmem:[%s10625_s18 + $0x8] sm:$0xff]  ;;  %v678_v10 = vld [vmem:[%s10625_s18 + $0x10] sm:$0xff]  ;;  %vm14772_vm9 = vcmask 1041409   ;;  %p540_p13 = scmp.lt.s32.totalorder %s10484_s29, 1  ;;  %vm14761_vm10 = vcmask 1042434  }
  0x64   : > { %8480 = vmatpush3.msra.mxu0 %v749_v1  ;;  %v679_v11 = vld [vmem:[%s10625_s18 + $0x18] sm:$0xff]  ;;  %v680_v12 = vld [vmem:[%s10625_s18 + $0x20] sm:$0xff]  ;;  %v681_v13 = vld [vmem:[%s10625_s18 + $0x28] sm:$0xff]  ;;  %vm14759_vm11 = vcmask 1043459   ;;  %vm14757_vm12 = vcmask 1044484   ;;  %vm14752_vm13 = vcmask 1045509  }
  0x65   : > { %8481 = vmatprep.subr.mxu0 %v748_v2  ;;  %v682_v14 = vld [vmem:[%s10625_s18 + $0x30] sm:$0xff]  ;;  %v683_v15 = vld [vmem:[%s10625_s18 + $0x38] sm:$0xff]  ;;  %v684_v16 = vld [vmem:[%s10625_s18 + $0x40] sm:$0xff]  ;;  %s11260_s27 = scalar_select %p540_p13, %s10484_s29, 1  ;;  %vm14749_vm14 = vcmask 1046534   ;;  %vm14747_vm15 = vcmask 1047559  }
  0x66   : > { %8482 = vmatpush3.msra.mxu0 %v748_v2  ;;  %v685_v17 = vld [vmem:[%s10625_s18 + $0x48] sm:$0xff]  ;;  %v686_v18 = vld [vmem:[%s10625_s18 + $0x50] sm:$0xff]  ;;  %v687_v19 = vld [vmem:[%s10625_s18 + $0x58] sm:$0xff]  ;;  %s14802_s17 = sshll.u32 %s10484_s29, 7  ;;  %s15308_s13 = sld [smem:[#allocation159_spill]] }
  0x67   : > { %8483 = vmatprep.subr.mxu0 %v747_v4  ;;  %v688_v20 = vld [vmem:[%s10625_s18 + $0x60] sm:$0xff]  ;;  %v689_v21 = vld [vmem:[%s10625_s18 + $0x68] sm:$0xff]  ;;  %v690_v22 = vld [vmem:[%s10625_s18 + $0x70] sm:$0xff]  ;;  %s7919_s21 = sshll.u32 %s11260_s27, 3  ;;  %s7917_s27 = sshll.u32 %s10613_s30, 3 }
  0x68   : > { %8484 = vmatpush3.msra.mxu0 %v747_v4  ;;  %v691_v23 = vld [vmem:[%s10625_s18 + $0x78] sm:$0xff]  ;;  %v692_v24 = vld [vmem:[%s10625_s18 + $0x80] sm:$0xff]  ;;  %v693_v25 = vld [vmem:[%s10625_s18 + $0x88] sm:$0xff]  ;;  %s543_s12 = scalar_lea.vmem %s14609_s2, %s7919_s21  ;;  %s547_s24 = scalar_lea.vmem %s14610_s3, %s7919_s21 }
  0x69   : > { %8485 = vmatprep.subr.mxu0 %v746_v5  ;;  %v694_v26 = vld [vmem:[%s10625_s18 + $0x90] sm:$0xff]  ;;  %v695_v27 = vld [vmem:[%s10625_s18 + $0x98] sm:$0xff]  ;;  %v696_v28 = vld [vmem:[%s10625_s18 + $0xa0] sm:$0xff]  ;;  %s13218_s21 = scalar_lea.vmem [#allocation7], %s7917_s27  ;;  %s7723_s19 = scalar_lea.sflag [#allocation4], %s10613_s30 }
  0x6a   : > { %8486 = vmatpush3.msra.mxu0 %v746_v5  ;;  %v697_v29 = vld [vmem:[%s10625_s18 + $0xa8] sm:$0xff]  ;;  %v698_v30 = vld [vmem:[%s10625_s18 + $0xb0] sm:$0xff]  ;;  %v699_v31 = vld [vmem:[%s10625_s18 + $0xb8] sm:$0xff]  ;;  %s7741_s16 = sshll.u32 %s13218_s21, 4  ;;  %p15309_p12 = scmp.ne.s32.totalorder %s14812_s20, 0  ;;  %s7742_s16 = int_to_ptr.vmem [resolvable:$true] %s7741_s16 }
  0x6b   : > { %8487 = vmatprep.subr.mxu0 %v745_v6  ;;  %v700_v32 = vld [vmem:[%s10625_s18 + $0xc0] sm:$0xff]  ;;  %v701_v33 = vld [vmem:[%s10625_s18 + $0xc8] sm:$0xff]  ;;  %v702_v34 = vld [vmem:[%s10625_s18 + $0xd0] sm:$0xff]  ;;  %s10391_s23 = smov [#allocation7]  }
  0x6c   : > { %8488 = vmatpush3.msra.mxu0 %v745_v6  ;;  %v703_v35 = vld [vmem:[%s10625_s18 + $0xd8] sm:$0xff]  ;;  %v704_v36 = vld [vmem:[%s10625_s18 + $0xe0] sm:$0xff]  ;;  %v705_v37 = vld [vmem:[%s10625_s18 + $0xe8] sm:$0xff]  ;;  %s7739_s22 = scalar_lea.hbm %s15308_s13, %s14802_s17 }
  0x6d   : > { %8489 = vmatprep.subr.mxu0 %v744_v7  ;;  %v706_v38 = vld [vmem:[%s10625_s18 + $0xf0] sm:$0xff]  ;;  %v707_v39 = vld [vmem:[%s10625_s18 + $0xf8] sm:$0xff]  ;;  %v708_v40 = vld [vmem:[%s10625_s18 + $0x100] sm:$0xff] }
  0x6e   : > { %8490 = vmatpush3.msra.mxu0 %v744_v7  ;;  %v709_v41 = vld [vmem:[%s10625_s18 + $0x108] sm:$0xff]  ;;  %v710_v42 = vld [vmem:[%s10625_s18 + $0x110] sm:$0xff]  ;;  %v711_v43 = vld [vmem:[%s10625_s18 + $0x118] sm:$0xff] }
  0x6f   : > { %8491 = vmatprep.subr.mxu0 %v743_v8  ;;  %v712_v44 = vld [vmem:[%s10625_s18 + $0x120] sm:$0xff]  ;;  %v713_v45 = vld [vmem:[%s10625_s18 + $0x128] sm:$0xff]  ;;  %v714_v46 = vld [vmem:[%s10625_s18 + $0x130] sm:$0xff] }
  0x70   : > { %8492 = vmatpush3.msra.mxu0 %v743_v8  ;;  %v715_v47 = vld [vmem:[%s10625_s18 + $0x138] sm:$0xff]  ;;  %v716_v48 = vld [vmem:[%s10625_s18 + $0x140] sm:$0xff]  ;;  %v717_v49 = vld [vmem:[%s10625_s18 + $0x148] sm:$0xff] }
  0x71   : > { %8494 = vmatmul.mubr.msk.f32.vlgmr.msra.gmra.mxu0 %vm14731_vm0, %v677_v9  ;;  %v718_v50 = vld [vmem:[%s10625_s18 + $0x150] sm:$0xff]  ;;  %v719_v51 = vld [vmem:[%s10625_s18 + $0x158] sm:$0xff]  ;;  %v720_v52 = vld [vmem:[%s10625_s18 + $0x160] sm:$0xff] }
  0x72   : > { %8496 = vmatprep.mubr.msk.f32.mxu0 %vm14731_vm0, %v678_v10  ;;  %v721_v53 = vld [vmem:[%s10625_s18 + $0x168] sm:$0xff]  ;;  %v722_v54 = vld [vmem:[%s10625_s18 + $0x170] sm:$0xff]  ;;  %v723_v55 = vld [vmem:[%s10625_s18 + $0x178] sm:$0xff] }
  0x73   : > { %v724_v56 = vld [vmem:[%s10625_s18 + $0x180] sm:$0xff]  ;;  %v725_v57 = vld [vmem:[%s10625_s18 + $0x188] sm:$0xff]  ;;  %v726_v58 = vld [vmem:[%s10625_s18 + $0x190] sm:$0xff] }
  0x74   : > { %v727_v59 = vld [vmem:[%s10625_s18 + $0x198] sm:$0xff]  ;;  %v728_v60 = vld [vmem:[%s10625_s18 + $0x1a0] sm:$0xff]  ;;  %v729_v61 = vld [vmem:[%s10625_s18 + $0x1a8] sm:$0xff] }
  0x75   : > { %8497 = vmatmul.mubr.msk.f32.gmra.mxu0 %vm14731_vm0, %v679_v11  ;;  %v730_v62 = vld [vmem:[%s10625_s18 + $0x1b0] sm:$0xff]  ;;  %v731_v63 = vld [vmem:[%s10625_s18 + $0x1b8] sm:$0xff]  ;;  %v732_v0 = vld [vmem:[%s10625_s18 + $0x1c0] sm:$0xff] }
  0x76   : > { %8499 = vmatprep.mubr.msk.f32.mxu0 %vm14731_vm0, %v680_v12  ;;  %v733_v1 = vld [vmem:[%s10625_s18 + $0x1c8] sm:$0xff]  ;;  %v734_v2 = vld [vmem:[%s10625_s18 + $0x1d0] sm:$0xff]  ;;  %v735_v3 = vld [vmem:[%s10625_s18 + $0x1d8] sm:$0xff] }
  0x77   : > { %v736_v4 = vld [vmem:[%s10625_s18 + $0x1e0] sm:$0xff]  ;;  %v737_v5 = vld [vmem:[%s10625_s18 + $0x1e8] sm:$0xff]  ;;  %v738_v6 = vld [vmem:[%s10625_s18 + $0x1f0] sm:$0xff] }
  0x78   : > { %v739_v7 = vld [vmem:[%s10625_s18 + $0x1f8] sm:$0xff]  ;;  %v10786_v8 = vld [vmem:[%s14612_s5] ss:$0 sm:$0xff] }
  0x79   : > { %8500 = vmatmul.mubr.msk.f32.gmra.mxu0 %vm14731_vm0, %v681_v13 }
  0x7a   : > { %8502 = vmatprep.mubr.msk.f32.mxu0 %vm14731_vm0, %v682_v14 }
  0x7d   : > { %8503 = vmatmul.mubr.msk.f32.gmra.mxu0 %vm14731_vm0, %v683_v15 }
  0x7e   : > { %8505 = vmatprep.mubr.msk.f32.mxu0 %vm14731_vm0, %v684_v16 }
  0x81   : > { %8506 = vmatmul.mubr.msk.f32.gmra.mxu0 %vm14731_vm0, %v685_v17 }
  0x82   : > { %8508 = vmatprep.mubr.msk.f32.mxu0 %vm14731_vm0, %v686_v18 }
  0x85   : > { %8509 = vmatmul.mubr.msk.f32.gmra.mxu0 %vm14731_vm0, %v687_v19 }
  0x86   : > { %8511 = vmatprep.mubr.msk.f32.mxu0 %vm14731_vm0, %v688_v20 }
  0x89   : > { %8512 = vmatmul.mubr.msk.f32.gmra.mxu0 %vm14731_vm0, %v689_v21 }
  0x8a   : > { %8514 = vmatprep.mubr.msk.f32.mxu0 %vm14731_vm0, %v690_v22 }
  0x8d   : > { %8515 = vmatmul.mubr.msk.f32.gmra.mxu0 %vm14731_vm0, %v691_v23 }
  0x8e   : > { %8517 = vmatprep.mubr.msk.f32.mxu0 %vm14731_vm0, %v692_v24  ;;  %v10798_v24 = vld [vmem:[%s14615_s8] ss:$0 sm:$0xff] }
  0x91   : > { %8518 = vmatmul.mubr.msk.f32.gmra.mxu0 %vm14731_vm0, %v693_v25 }
  0x92   : > { %8520 = vmatprep.mubr.msk.f32.mxu0 %vm14731_vm0, %v694_v26 }
  0x95   : > { %8521 = vmatmul.mubr.msk.f32.gmra.mxu0 %vm14731_vm0, %v695_v27 }
  0x96   : > { %8523 = vmatprep.mubr.msk.f32.mxu0 %vm14731_vm0, %v696_v28 }
  0x99   : > { %8524 = vmatmul.mubr.msk.f32.gmra.mxu0 %vm14731_vm0, %v697_v29 }
  0x9a   : > { %8526 = vmatprep.mubr.msk.f32.mxu0 %vm14731_vm0, %v698_v30 }
  0x9d   : > { %8527 = vmatmul.mubr.msk.f32.gmra.mxu0 %vm14731_vm0, %v699_v31 }
  0x9e   : > { %8529 = vmatprep.mubr.msk.f32.mxu0 %vm14731_vm0, %v700_v32 }
  0xa1   : > { %8530 = vmatmul.mubr.msk.f32.gmra.mxu0 %vm14731_vm0, %v701_v33 }
  0xa2   : > { %8532 = vmatprep.mubr.msk.f32.mxu0 %vm14731_vm0, %v702_v34 }
  0xa5   : > { %8533 = vmatmul.mubr.msk.f32.gmra.mxu0 %vm14731_vm0, %v703_v35 }
  0xa6   : > { %8535 = vmatprep.mubr.msk.f32.mxu0 %vm14731_vm0, %v704_v36 }
  0xa9   : > { %8536 = vmatmul.mubr.msk.f32.gmra.mxu0 %vm14731_vm0, %v705_v37 }
  0xaa   : > { %8538 = vmatprep.mubr.msk.f32.mxu0 %vm14731_vm0, %v706_v38 }
  0xad   : > { %8539 = vmatmul.mubr.msk.f32.gmra.mxu0 %vm14731_vm0, %v707_v39 }
  0xae   : > { %8541 = vmatprep.mubr.msk.f32.mxu0 %vm14731_vm0, %v708_v40 }
  0xb1   : > { %8542 = vmatmul.mubr.msk.f32.gmra.mxu0 %vm14731_vm0, %v709_v41 }
  0xb2   : > { %8544 = vmatprep.mubr.msk.f32.mxu0 %vm14731_vm0, %v710_v42 }
  0xb5   : > { %8545 = vmatmul.mubr.msk.f32.gmra.mxu0 %vm14731_vm0, %v711_v43 }
  0xb6   : > { %8547 = vmatprep.mubr.msk.f32.mxu0 %vm14731_vm0, %v712_v44 }
  0xb9   : > { %8548 = vmatmul.mubr.msk.f32.gmra.mxu0 %vm14731_vm0, %v713_v45 }
  0xba   : > { %8550 = vmatprep.mubr.msk.f32.mxu0 %vm14731_vm0, %v714_v46 }
  0xbd   : > { %8551 = vmatmul.mubr.msk.f32.gmra.mxu0 %vm14731_vm0, %v715_v47 }
  0xbe   : > { %8553 = vmatprep.mubr.msk.f32.mxu0 %vm14731_vm0, %v716_v48 }
  0xc1   : > { %8554 = vmatmul.mubr.msk.f32.gmra.mxu0 %vm14731_vm0, %v717_v49 }
  0xc2   : > { %8556 = vmatprep.mubr.msk.f32.mxu0 %vm14731_vm0, %v718_v50 }
  0xc5   : > { %8557 = vmatmul.mubr.msk.f32.gmra.mxu0 %vm14731_vm0, %v719_v51 }
  0xc6   : > { %8559 = vmatprep.mubr.msk.f32.mxu0 %vm14731_vm0, %v720_v52 }
  0xc9   : > { %8560 = vmatmul.mubr.msk.f32.gmra.mxu0 %vm14731_vm0, %v721_v53 }
  0xca   : > { %8562 = vmatprep.mubr.msk.f32.mxu0 %vm14731_vm0, %v722_v54 }
  0xcd   : > { %8563 = vmatmul.mubr.msk.f32.gmra.mxu0 %vm14731_vm0, %v723_v55 }
  0xce   : > { %8565 = vmatprep.mubr.msk.f32.mxu0 %vm14731_vm0, %v724_v56 }
  0xd1   : > { %8566 = vmatmul.mubr.msk.f32.gmra.mxu0 %vm14731_vm0, %v725_v57 }
  0xd2   : > { %8568 = vmatprep.mubr.msk.f32.mxu0 %vm14731_vm0, %v726_v58 }
  0xd5   : > { %8569 = vmatmul.mubr.msk.f32.gmra.mxu0 %vm14731_vm0, %v727_v59 }
  0xd6   : > { %8571 = vmatprep.mubr.msk.f32.mxu0 %vm14731_vm0, %v728_v60 }
  0xd9   : > { %8572 = vmatmul.mubr.msk.f32.gmra.mxu0 %vm14731_vm0, %v729_v61 }
  0xda   : > { %8574 = vmatprep.mubr.msk.f32.mxu0 %vm14731_vm0, %v730_v62 }
  0xdd   : > { %8575 = vmatmul.mubr.msk.f32.gmra.mxu0 %vm14731_vm0, %v731_v63 }
  0xde   : > { %8577 = vmatprep.mubr.msk.f32.mxu0 %vm14731_vm0, %v732_v0 }
  0xe1   : > { %8578 = vmatmul.mubr.msk.f32.gmra.mxu0 %vm14731_vm0, %v733_v1 }
  0xe2   : > { %8580 = vmatprep.mubr.msk.f32.mxu0 %vm14731_vm0, %v734_v2 }
  0xe5   : > { %8581 = vmatmul.mubr.msk.f32.gmra.mxu0 %vm14731_vm0, %v735_v3 }
  0xe6   : > { %8583 = vmatprep.mubr.msk.f32.mxu0 %vm14731_vm0, %v736_v4 }
  0xe9   : > { %8584 = vmatmul.mubr.msk.f32.gmra.mxu0 %vm14731_vm0, %v737_v5 }
  0xea   : > { %8586 = vmatprep.mubr.msk.f32.mxu0 %vm14731_vm0, %v738_v6 }
  0xed   : > { %8587 = vmatmul.mubr.msk.f32.gmra.mxu0 %vm14731_vm0, %v739_v7 }
 0x131   : > { %v8495_v9 = vpop.f32.mrf.mxu0 }
 0x132   : > { %v1023_v10 = vadd.f32 %v8495_v9, %v10786_v8 }
 0x133   : > { %v1017_v11 = vpop.f32.mrf.mxu0 }
 0x134   : > { %9398 = vtanh.f32 %v1023_v10  ;;  %v1018_v12 = vadd.f32 %v10786_v8, %v1017_v11 }
 0x135   : > { %v8498_v13 = vpop.f32.mrf.mxu0 }
 0x136   : > { %9400 = vtanh.f32 %v1018_v12  ;;  %v1033_v14 = vadd.f32 %v8498_v13, %v10786_v8 }
 0x137   : > { %v1027_v15 = vpop.f32.mrf.mxu0 }
 0x138   : > { %9402 = vtanh.f32 %v1033_v14  ;;  %v1028_v16 = vadd.f32 %v10786_v8, %v1027_v15 }
 0x139   : > { %v8501_v17 = vpop.f32.mrf.mxu0 }
 0x13a   : > { %v1043_v18 = vadd.f32 %v8501_v17, %v10786_v8  ;;  %9404 = vtanh.f32 %v1028_v16 }
 0x13b   : > { %v1037_v19 = vpop.f32.mrf.mxu0 }
 0x13c   : > { %9406 = vtanh.f32 %v1043_v18  ;;  %v1038_v20 = vadd.f32 %v10786_v8, %v1037_v19 }
 0x13d   : > { %v8504_v21 = vpop.f32.mrf.mxu0 }
 0x13e   : > { %9408 = vtanh.f32 %v1038_v20  ;;  %v1053_v22 = vadd.f32 %v8504_v21, %v10786_v8 }
 0x13f   : > { %v1047_v23 = vpop.f32.mrf.mxu0 }
 0x140   : > { %9410 = vtanh.f32 %v1053_v22  ;;  %v1048_v25 = vadd.f32 %v10786_v8, %v1047_v23 }
 0x141   : > { %v9399_v26 = vpop.eup %9398  ;;  %v8507_v27 = vpop.f32.mrf.mxu0 }
 0x142   : > { %v1063_v28 = vadd.f32 %v8507_v27, %v10786_v8  ;;  %v1407_v29 = vmul.f32 %v9399_v26, %v10798_v24  ;;  %9412 = vtanh.f32 %v1048_v25 }
 0x143   : > { %v9401_v30 = vpop.eup %9400  ;;  %v1057_v31 = vpop.f32.mrf.mxu0 }
 0x144   : > { %9414 = vtanh.f32 %v1063_v28  ;;  %v1058_v32 = vadd.f32 %v10786_v8, %v1057_v31  ;;  %v1474_v33 = vsel %vm14797_vm1, %v1407_v29, 0.0  ;;  %v1406_v34 = vmul.f32 %v9401_v30, %v10798_v24 }
 0x145   : > { %v9403_v35 = vpop.eup %9402  ;;  %1475 = vadd.xlane.f32.xlu0 %v1474_v33  ;;  %v8510_v36 = vpop.f32.mrf.mxu0 }
 0x146   : > { %9416 = vtanh.f32 %v1058_v32  ;;  %v1073_v37 = vadd.f32 %v8510_v36, %v10786_v8  ;;  %v1409_v39 = vmul.f32 %v9403_v35, %v10798_v24  ;;  %v1471_v42 = vsel %vm14797_vm1, %v1406_v34, 0.0 }
 0x147   : > { %v1067_v38 = vpop.f32.mrf.mxu0  ;;  %v9405_v40 = vpop.eup %9404 }
 0x148   : > { %9418 = vtanh.f32 %v1073_v37  ;;  %v1068_v41 = vadd.f32 %v10786_v8, %v1067_v38  ;;  %v1480_v49 = vsel %vm14797_vm1, %v1409_v39, 0.0  ;;  %v1408_v50 = vmul.f32 %v9405_v40, %v10798_v24 }
 0x149   : > { %v9407_v43 = vpop.eup %9406  ;;  %v8513_v44 = vpop.f32.mrf.mxu0  ;;  %1472 = vadd.xlane.f32.xlu0 %v1471_v42 }
 0x14a   : > { %v1083_v45 = vadd.f32 %v8513_v44, %v10786_v8  ;;  %v1411_v46 = vmul.f32 %v9407_v43, %v10798_v24  ;;  %9420 = vtanh.f32 %v1068_v41  ;;  %v1477_v62 = vsel %vm14797_vm1, %v1408_v50, 0.0 }
 0x14b   : > { %v9409_v47 = vpop.eup %9408  ;;  %v1077_v48 = vpop.f32.mrf.mxu0 }
 0x14c   : > { %9422 = vtanh.f32 %v1083_v45  ;;  %v1078_v51 = vadd.f32 %v10786_v8, %v1077_v48  ;;  %v1486_v52 = vsel %vm14797_vm1, %v1411_v46, 0.0  ;;  %v1410_v53 = vmul.f32 %v9409_v47, %v10798_v24 }
 0x14d   : > { %v9411_v54 = vpop.eup %9410  ;;  %1487 = vadd.xlane.f32.xlu1 %v1486_v52  ;;  %v8516_v55 = vpop.f32.mrf.mxu0  ;;  %1481 = vadd.xlane.f32.xlu0 %v1480_v49 }
 0x14e   : > { %9424 = vtanh.f32 %v1078_v51  ;;  %v1093_v56 = vadd.f32 %v8516_v55, %v10786_v8  ;;  %v1413_v58 = vmul.f32 %v9411_v54, %v10798_v24  ;;  %v1483_v61 = vsel %vm14797_vm1, %v1410_v53, 0.0 }
 0x14f   : > { %v1087_v57 = vpop.f32.mrf.mxu0  ;;  %v9413_v59 = vpop.eup %9412 }
 0x150   : > { %9426 = vtanh.f32 %v1093_v56  ;;  %v1088_v60 = vadd.f32 %v10786_v8, %v1087_v57  ;;  %v1492_v4 = vsel %vm14797_vm1, %v1413_v58, 0.0  ;;  %v1412_v5 = vmul.f32 %v9413_v59, %v10798_v24 }
 0x151   : > { %v9415_v63 = vpop.eup %9414  ;;  %v8519_v0 = vpop.f32.mrf.mxu0  ;;  %1484 = vadd.xlane.f32.xlu1 %v1483_v61  ;;  %1478 = vadd.xlane.f32.xlu0 %v1477_v62 }
 0x152   : > { %v1415_v1 = vmul.f32 %v9415_v63, %v10798_v24  ;;  %9428 = vtanh.f32 %v1088_v60  ;;  %v1103_v6 = vadd.f32 %v8519_v0, %v10786_v8  ;;  %v1489_v19 = vsel %vm14797_vm1, %v1412_v5, 0.0 }
 0x153   : > { %v9417_v2 = vpop.eup %9416  ;;  %v1097_v3 = vpop.f32.mrf.mxu0 }
 0x154   : > { %v1098_v7 = vadd.f32 %v10786_v8, %v1097_v3  ;;  %v1498_v9 = vsel %vm14797_vm1, %v1415_v1, 0.0  ;;  %v1414_v10 = vmul.f32 %v9417_v2, %v10798_v24 }
 0x155   : > { %v9419_v11 = vpop.eup %9418  ;;  %v8522_v12 = vpop.f32.mrf.mxu0  ;;  %1499 = vadd.xlane.f32.xlu1 %v1498_v9  ;;  %1493 = vadd.xlane.f32.xlu0 %v1492_v4 }
 0x156   : > { %9430 = vtanh.f32 %v1098_v7  ;;  %v1417_v13 = vmul.f32 %v9419_v11, %v10798_v24  ;;  %v1113_v14 = vadd.f32 %v8522_v12, %v10786_v8  ;;  %v1495_v18 = vsel %vm14797_vm1, %v1414_v10, 0.0 }
 0x157   : > { %v1107_v15 = vpop.f32.mrf.mxu0  ;;  %v9421_v16 = vpop.eup %9420  ;;  %9432 = vtanh.f32 %v1103_v6 }
 0x158   : > { %v1108_v17 = vadd.f32 %v10786_v8, %v1107_v15  ;;  %v1504_v23 = vsel %vm14797_vm1, %v1417_v13, 0.0  ;;  %v1416_v28 = vmul.f32 %v9421_v16, %v10798_v24 }
 0x159   : > { %v9423_v20 = vpop.eup %9422  ;;  %v8525_v21 = vpop.f32.mrf.mxu0  ;;  %1496 = vadd.xlane.f32.xlu1 %v1495_v18  ;;  %1490 = vadd.xlane.f32.xlu0 %v1489_v19 }
 0x15a   : > { %9434 = vtanh.f32 %v1108_v17  ;;  %v1123_v22 = vadd.f32 %v8525_v21, %v10786_v8  ;;  %v1419_v25 = vmul.f32 %v9423_v20, %v10798_v24  ;;  %v1501_v40 = vsel %vm14797_vm1, %v1416_v28, 0.0 }
 0x15b   : > { %v9425_v26 = vpop.eup %9424  ;;  %9436 = vtanh.f32 %v1113_v14  ;;  %v1117_v27 = vpop.f32.mrf.mxu0 }
 0x15c   : > { %9438 = vtanh.f32 %v1123_v22  ;;  %v1118_v29 = vadd.f32 %v10786_v8, %v1117_v27  ;;  %v1510_v30 = vsel %vm14797_vm1, %v1419_v25, 0.0  ;;  %v1418_v31 = vmul.f32 %v9425_v26, %v10798_v24 }
 0x15d   : > { %v9427_v32 = vpop.eup %9426  ;;  %v8528_v33 = vpop.f32.mrf.mxu0  ;;  %1505 = vadd.xlane.f32.xlu1 %v1504_v23  ;;  %1511 = vadd.xlane.f32.xlu0 %v1510_v30 }
 0x15e   : > { %v1507_v34 = vsel %vm14797_vm1, %v1418_v31, 0.0  ;;  %v1421_v35 = vmul.f32 %v9427_v32, %v10798_v24  ;;  %v1133_v36 = vadd.f32 %v8528_v33, %v10786_v8  ;;  %9440 = vtanh.f32 %v1118_v29 }
 0x15f   : > { %v1127_v37 = vpop.f32.mrf.mxu0  ;;  %v9429_v38 = vpop.eup %9428 }
 0x160   : > { %v1128_v39 = vadd.f32 %v10786_v8, %v1127_v37  ;;  %v1516_v43 = vsel %vm14797_vm1, %v1421_v35, 0.0  ;;  %v1420_v46 = vmul.f32 %v9429_v38, %v10798_v24 }
 0x161   : > { %v8531_v41 = vpop.f32.mrf.mxu0  ;;  %1502 = vadd.xlane.f32.xlu1 %v1501_v40  ;;  %1508 = vadd.xlane.f32.xlu0 %v1507_v34 }
 0x162   : > { %9442 = vtanh.f32 %v1128_v39  ;;  %v1143_v42 = vadd.f32 %v8531_v41, %v10786_v8  ;;  %v1513_v55 = vsel %vm14797_vm1, %v1420_v46, 0.0 }
 0x163   : > { %v9431_v44 = vpop.eup %9430  ;;  %9444 = vtanh.f32 %v1133_v36  ;;  %v1137_v45 = vpop.f32.mrf.mxu0 }
 0x164   : > { %9446 = vtanh.f32 %v1143_v42  ;;  %v1138_v47 = vadd.f32 %v10786_v8, %v1137_v45  ;;  %v1422_v48 = vmul.f32 %v9431_v44, %v10798_v24  ;;  %v9433_v49 = vpop.eup %9432 }
 0x165   : > { %v8534_v50 = vpop.f32.mrf.mxu0  ;;  %1517 = vadd.xlane.f32.xlu1 %v1516_v43  ;;  %v1423_v59 = vmul.f32 %v9433_v49, %v10798_v24 }
 0x166   : > { %v1153_v51 = vadd.f32 %v8534_v50, %v10786_v8  ;;  %v1519_v52 = vsel %vm14797_vm1, %v1422_v48, 0.0  ;;  %9448 = vtanh.f32 %v1138_v47 }
 0x167   : > { %v9435_v53 = vpop.eup %9434  ;;  %v1147_v54 = vpop.f32.mrf.mxu0  ;;  %1520 = vadd.xlane.f32.xlu0 %v1519_v52  ;;  %v1522_v4 = vsel %vm14797_vm1, %v1423_v59, 0.0 }
 0x168   : > { %v9437_v56 = vpop.eup %9436  ;;  %9450 = vtanh.f32 %v1153_v51  ;;  %v1148_v57 = vadd.f32 %v10786_v8, %v1147_v54  ;;  %v1424_v58 = vmul.f32 %v9435_v53, %v10798_v24 }
 0x169   : > { %v9439_v60 = vpop.eup %9438  ;;  %v8537_v61 = vpop.f32.mrf.mxu0  ;;  %1514 = vadd.xlane.f32.xlu1 %v1513_v55  ;;  %v1425_v2 = vmul.f32 %v9437_v56, %v10798_v24 }
 0x16a   : > { %9452 = vtanh.f32 %v1148_v57  ;;  %v1163_v62 = vadd.f32 %v8537_v61, %v10786_v8  ;;  %v1525_v63 = vsel %vm14797_vm1, %v1424_v58, 0.0  ;;  %v1427_v0 = vmul.f32 %v9439_v60, %v10798_v24 }
 0x16b   : > { %v1157_v1 = vpop.f32.mrf.mxu0  ;;  %1526 = vadd.xlane.f32.xlu0 %v1525_v63  ;;  %v9441_v6 = vpop.eup %9440  ;;  %v1528_v12 = vsel %vm14797_vm1, %v1425_v2, 0.0 }
 0x16c   : > { %9454 = vtanh.f32 %v1163_v62  ;;  %v1158_v3 = vadd.f32 %v10786_v8, %v1157_v1  ;;  %v1534_v5 = vsel %vm14797_vm1, %v1427_v0, 0.0  ;;  %v1426_v16 = vmul.f32 %v9441_v6, %v10798_v24 }
 0x16d   : > { %v8540_v7 = vpop.f32.mrf.mxu0  ;;  %1523 = vadd.xlane.f32.xlu1 %v1522_v4 }
 0x16e   : > { %v1173_v10 = vadd.f32 %v8540_v7, %v10786_v8  ;;  %9456 = vtanh.f32 %v1158_v3  ;;  %v1531_v27 = vsel %vm14797_vm1, %v1426_v16, 0.0 }
 0x16f   : > { %v9443_v9 = vpop.eup %9442  ;;  %v1167_v11 = vpop.f32.mrf.mxu0  ;;  %1535 = vadd.xlane.f32.xlu0 %v1534_v5 }
 0x170   : > { %v9445_v13 = vpop.eup %9444  ;;  %v1168_v14 = vadd.f32 %v10786_v8, %v1167_v11  ;;  %v1428_v15 = vmul.f32 %v9443_v9, %v10798_v24 }
 0x171   : > { %v9447_v17 = vpop.eup %9446  ;;  %v8543_v18 = vpop.f32.mrf.mxu0  ;;  %1529 = vadd.xlane.f32.xlu1 %v1528_v12  ;;  %v1429_v23 = vmul.f32 %v9445_v13, %v10798_v24 }
 0x172   : > { %9458 = vtanh.f32 %v1168_v14  ;;  %v1183_v19 = vadd.f32 %v8543_v18, %v10786_v8  ;;  %v1537_v20 = vsel %vm14797_vm1, %v1428_v15, 0.0  ;;  %v1431_v21 = vmul.f32 %v9447_v17, %v10798_v24 }
 0x173   : > { %9460 = vtanh.f32 %v1173_v10  ;;  %v1177_v22 = vpop.f32.mrf.mxu0  ;;  %1538 = vadd.xlane.f32.xlu0 %v1537_v20  ;;  %v9449_v25 = vpop.eup %9448  ;;  %v1540_v35 = vsel %vm14797_vm1, %v1429_v23, 0.0 }
 0x174   : > { %9462 = vtanh.f32 %v1183_v19  ;;  %v1178_v26 = vadd.f32 %v10786_v8, %v1177_v22  ;;  %v1546_v28 = vsel %vm14797_vm1, %v1431_v21, 0.0  ;;  %v1430_v38 = vmul.f32 %v9449_v25, %v10798_v24 }
 0x175   : > { %v9451_v29 = vpop.eup %9450  ;;  %v8546_v30 = vpop.f32.mrf.mxu0  ;;  %1532 = vadd.xlane.f32.xlu1 %v1531_v27 }
 0x176   : > { %v1193_v31 = vadd.f32 %v8546_v30, %v10786_v8  ;;  %v1433_v32 = vmul.f32 %v9451_v29, %v10798_v24  ;;  %9464 = vtanh.f32 %v1178_v26  ;;  %v1543_v46 = vsel %vm14797_vm1, %v1430_v38, 0.0 }
 0x177   : > { %v9453_v33 = vpop.eup %9452  ;;  %v1187_v34 = vpop.f32.mrf.mxu0  ;;  %1547 = vadd.xlane.f32.xlu0 %v1546_v28 }
 0x178   : > { %9466 = vtanh.f32 %v1193_v31  ;;  %v1188_v36 = vadd.f32 %v10786_v8, %v1187_v34  ;;  %v1552_v37 = vsel %vm14797_vm1, %v1433_v32, 0.0  ;;  %v1432_v41 = vmul.f32 %v9453_v33, %v10798_v24 }
 0x179   : > { %v9455_v39 = vpop.eup %9454  ;;  %v8549_v40 = vpop.f32.mrf.mxu0  ;;  %1541 = vadd.xlane.f32.xlu1 %v1540_v35 }
 0x17a   : > { %v1435_v42 = vmul.f32 %v9455_v39, %v10798_v24  ;;  %9468 = vtanh.f32 %v1188_v36  ;;  %v1203_v43 = vadd.f32 %v8549_v40, %v10786_v8  ;;  %v1549_v50 = vsel %vm14797_vm1, %v1432_v41, 0.0 }
 0x17b   : > { %v1197_v44 = vpop.f32.mrf.mxu0  ;;  %1553 = vadd.xlane.f32.xlu0 %v1552_v37  ;;  %v9457_v47 = vpop.eup %9456 }
 0x17c   : > { %v1198_v45 = vadd.f32 %v10786_v8, %v1197_v44  ;;  %v1558_v51 = vsel %vm14797_vm1, %v1435_v42, 0.0  ;;  %v1434_v57 = vmul.f32 %v9457_v47, %v10798_v24 }
 0x17d   : > { %v8552_v48 = vpop.f32.mrf.mxu0  ;;  %1544 = vadd.xlane.f32.xlu1 %v1543_v46 }
 0x17e   : > { %9470 = vtanh.f32 %v1198_v45  ;;  %v1213_v49 = vadd.f32 %v8552_v48, %v10786_v8  ;;  %v1555_v3 = vsel %vm14797_vm1, %v1434_v57, 0.0 }
 0x17f   : > { %v9459_v52 = vpop.eup %9458  ;;  %9472 = vtanh.f32 %v1203_v43  ;;  %v1207_v53 = vpop.f32.mrf.mxu0  ;;  %1550 = vadd.xlane.f32.xlu0 %v1549_v50 }
 0x180   : > { %v9461_v54 = vpop.eup %9460  ;;  %9474 = vtanh.f32 %v1213_v49  ;;  %v1208_v55 = vadd.f32 %v10786_v8, %v1207_v53  ;;  %v1436_v56 = vmul.f32 %v9459_v52, %v10798_v24 }
 0x181   : > { %v9463_v58 = vpop.eup %9462  ;;  %v8555_v59 = vpop.f32.mrf.mxu0  ;;  %1559 = vadd.xlane.f32.xlu1 %v1558_v51  ;;  %v1437_v0 = vmul.f32 %v9461_v54, %v10798_v24 }
 0x182   : > { %9476 = vtanh.f32 %v1208_v55  ;;  %v1223_v60 = vadd.f32 %v8555_v59, %v10786_v8  ;;  %v1561_v61 = vsel %vm14797_vm1, %v1436_v56, 0.0  ;;  %v1439_v62 = vmul.f32 %v9463_v58, %v10798_v24 }
 0x183   : > { %v1217_v63 = vpop.f32.mrf.mxu0  ;;  %1562 = vadd.xlane.f32.xlu0 %v1561_v61  ;;  %v9465_v1 = vpop.eup %9464  ;;  %v1564_v11 = vsel %vm14797_vm1, %v1437_v0, 0.0 }
 0x184   : > { %9478 = vtanh.f32 %v1223_v60  ;;  %v1218_v2 = vadd.f32 %v10786_v8, %v1217_v63  ;;  %v1570_v4 = vsel %vm14797_vm1, %v1439_v62, 0.0  ;;  %v1438_v15 = vmul.f32 %v9465_v1, %v10798_v24 }
 0x185   : > { %v9467_v5 = vpop.eup %9466  ;;  %v8558_v6 = vpop.f32.mrf.mxu0  ;;  %1556 = vadd.xlane.f32.xlu1 %v1555_v3 }
 0x186   : > { %9480 = vtanh.f32 %v1218_v2  ;;  %v1233_v7 = vadd.f32 %v8558_v6, %v10786_v8  ;;  %v1441_v9 = vmul.f32 %v9467_v5, %v10798_v24  ;;  %v1567_v23 = vsel %vm14797_vm1, %v1438_v15, 0.0 }
 0x187   : > { %v1227_v10 = vpop.f32.mrf.mxu0  ;;  %1571 = vadd.xlane.f32.xlu0 %v1570_v4  ;;  %v9469_v12 = vpop.eup %9468 }
 0x188   : > { %9482 = vtanh.f32 %v1233_v7  ;;  %v1228_v13 = vadd.f32 %v10786_v8, %v1227_v10  ;;  %v1576_v14 = vsel %vm14797_vm1, %v1441_v9, 0.0  ;;  %v1440_v20 = vmul.f32 %v9469_v12, %v10798_v24 }
 0x189   : > { %v8561_v16 = vpop.f32.mrf.mxu0  ;;  %1565 = vadd.xlane.f32.xlu1 %v1564_v11 }
 0x18a   : > { %v1243_v18 = vadd.f32 %v8561_v16, %v10786_v8  ;;  %9484 = vtanh.f32 %v1228_v13  ;;  %v1573_v33 = vsel %vm14797_vm1, %v1440_v20, 0.0 }
 0x18b   : > { %v9471_v17 = vpop.eup %9470  ;;  %v1237_v19 = vpop.f32.mrf.mxu0  ;;  %1577 = vadd.xlane.f32.xlu0 %v1576_v14 }
 0x18c   : > { %v9473_v21 = vpop.eup %9472  ;;  %v1238_v22 = vadd.f32 %v10786_v8, %v1237_v19  ;;  %v1442_v25 = vmul.f32 %v9471_v17, %v10798_v24 }
 0x18d   : > { %v9475_v26 = vpop.eup %9474  ;;  %v8564_v27 = vpop.f32.mrf.mxu0  ;;  %1568 = vadd.xlane.f32.xlu1 %v1567_v23  ;;  %v1443_v36 = vmul.f32 %v9473_v21, %v10798_v24 }
 0x18e   : > { %9486 = vtanh.f32 %v1238_v22  ;;  %v1253_v28 = vadd.f32 %v8564_v27, %v10786_v8  ;;  %v1579_v29 = vsel %vm14797_vm1, %v1442_v25, 0.0  ;;  %v1445_v30 = vmul.f32 %v9475_v26, %v10798_v24 }
 0x18f   : > { %v9477_v31 = vpop.eup %9476  ;;  %9488 = vtanh.f32 %v1243_v18  ;;  %v1247_v32 = vpop.f32.mrf.mxu0  ;;  %1580 = vadd.xlane.f32.xlu0 %v1579_v29  ;;  %v1582_v45 = vsel %vm14797_vm1, %v1443_v36, 0.0 }
 0x190   : > { %9490 = vtanh.f32 %v1253_v28  ;;  %v1248_v34 = vadd.f32 %v10786_v8, %v1247_v32  ;;  %v1588_v35 = vsel %vm14797_vm1, %v1445_v30, 0.0  ;;  %v1444_v39 = vmul.f32 %v9477_v31, %v10798_v24 }
 0x191   : > { %v9479_v37 = vpop.eup %9478  ;;  %v8567_v38 = vpop.f32.mrf.mxu0  ;;  %1574 = vadd.xlane.f32.xlu1 %v1573_v33 }
 0x192   : > { %v1447_v40 = vmul.f32 %v9479_v37, %v10798_v24  ;;  %v1263_v42 = vadd.f32 %v8567_v38, %v10786_v8  ;;  %9492 = vtanh.f32 %v1248_v34  ;;  %v1585_v48 = vsel %vm14797_vm1, %v1444_v39, 0.0 }
 0x193   : > { %v9481_v41 = vpop.eup %9480  ;;  %v1257_v43 = vpop.f32.mrf.mxu0  ;;  %1589 = vadd.xlane.f32.xlu0 %v1588_v35 }
 0x194   : > { %v1258_v44 = vadd.f32 %v10786_v8, %v1257_v43  ;;  %v1594_v49 = vsel %vm14797_vm1, %v1447_v40, 0.0  ;;  %v1446_v50 = vmul.f32 %v9481_v41, %v10798_v24 }
 0x195   : > { %v9483_v46 = vpop.eup %9482  ;;  %v8570_v47 = vpop.f32.mrf.mxu0  ;;  %1583 = vadd.xlane.f32.xlu1 %v1582_v45 }
 0x196   : > { %9494 = vtanh.f32 %v1258_v44  ;;  %v1449_v51 = vmul.f32 %v9483_v46, %v10798_v24  ;;  %v1273_v52 = vadd.f32 %v8570_v47, %v10786_v8  ;;  %v1591_v58 = vsel %vm14797_vm1, %v1446_v50, 0.0 }
 0x197   : > { %9496 = vtanh.f32 %v1263_v42  ;;  %v1267_v53 = vpop.f32.mrf.mxu0  ;;  %1586 = vadd.xlane.f32.xlu0 %v1585_v48  ;;  %v9485_v55 = vpop.eup %9484 }
 0x198   : > { %v1268_v54 = vadd.f32 %v10786_v8, %v1267_v53  ;;  %v1600_v59 = vsel %vm14797_vm1, %v1449_v51, 0.0  ;;  %v1448_v1 = vmul.f32 %v9485_v55, %v10798_v24 }
 0x199   : > { %1595 = vadd.xlane.f32.xlu1 %v1594_v49  ;;  %v8573_v56 = vpop.f32.mrf.mxu0 }
 0x19a   : > { %9498 = vtanh.f32 %v1268_v54  ;;  %v1283_v57 = vadd.f32 %v8573_v56, %v10786_v8  ;;  %v1597_v11 = vsel %vm14797_vm1, %v1448_v1, 0.0 }
 0x19b   : > { %v9487_v60 = vpop.eup %9486  ;;  %9500 = vtanh.f32 %v1273_v52  ;;  %1592 = vadd.xlane.f32.xlu0 %v1591_v58  ;;  %v1277_v61 = vpop.f32.mrf.mxu0 }
 0x19c   : > { %v9489_v62 = vpop.eup %9488  ;;  %9502 = vtanh.f32 %v1283_v57  ;;  %v1278_v63 = vadd.f32 %v10786_v8, %v1277_v61  ;;  %v1450_v0 = vmul.f32 %v9487_v60, %v10798_v24 }
 0x19d   : > { %v9491_v2 = vpop.eup %9490  ;;  %1601 = vadd.xlane.f32.xlu1 %v1600_v59  ;;  %v8576_v3 = vpop.f32.mrf.mxu0  ;;  %v1451_v9 = vmul.f32 %v9489_v62, %v10798_v24 }
 0x19e   : > { %9504 = vtanh.f32 %v1278_v63  ;;  %v1293_v4 = vadd.f32 %v8576_v3, %v10786_v8  ;;  %v1603_v5 = vsel %vm14797_vm1, %v1450_v0, 0.0  ;;  %v1453_v6 = vmul.f32 %v9491_v2, %v10798_v24 }
 0x19f   : > { %1604 = vadd.xlane.f32.xlu0 %v1603_v5  ;;  %v1287_v7 = vpop.f32.mrf.mxu0  ;;  %v9493_v13 = vpop.eup %9492  ;;  %v1606_v17 = vsel %vm14797_vm1, %v1451_v9, 0.0 }
 0x1a0   : > { %9506 = vtanh.f32 %v1293_v4  ;;  %v1288_v10 = vadd.f32 %v10786_v8, %v1287_v7  ;;  %v1612_v12 = vsel %vm14797_vm1, %v1453_v6, 0.0  ;;  %v1452_v22 = vmul.f32 %v9493_v13, %v10798_v24 }
 0x1a1   : > { %1598 = vadd.xlane.f32.xlu1 %v1597_v11  ;;  %v8579_v14 = vpop.f32.mrf.mxu0 }
 0x1a2   : > { %v1303_v15 = vadd.f32 %v8579_v14, %v10786_v8  ;;  %9508 = vtanh.f32 %v1288_v10  ;;  %v1609_v31 = vsel %vm14797_vm1, %v1452_v22, 0.0 }
 0x1a3   : > { %v9495_v16 = vpop.eup %9494  ;;  %1613 = vadd.xlane.f32.xlu0 %v1612_v12  ;;  %v1297_v18 = vpop.f32.mrf.mxu0 }
 0x1a4   : > { %v9497_v19 = vpop.eup %9496  ;;  %9510 = vtanh.f32 %v1303_v15  ;;  %v1298_v20 = vadd.f32 %v10786_v8, %v1297_v18  ;;  %v1454_v21 = vmul.f32 %v9495_v16, %v10798_v24 }
 0x1a5   : > { %1607 = vadd.xlane.f32.xlu1 %v1606_v17  ;;  %v8582_v23 = vpop.f32.mrf.mxu0  ;;  %v1455_v29 = vmul.f32 %v9497_v19, %v10798_v24 }
 0x1a6   : > { %v1615_v25 = vsel %vm14797_vm1, %v1454_v21, 0.0  ;;  %v1313_v27 = vadd.f32 %v8582_v23, %v10786_v8  ;;  %9512 = vtanh.f32 %v1298_v20 }
 0x1a7   : > { %v9499_v26 = vpop.eup %9498  ;;  %1616 = vadd.xlane.f32.xlu0 %v1615_v25  ;;  %v1307_v28 = vpop.f32.mrf.mxu0  ;;  %v1618_v40 = vsel %vm14797_vm1, %v1455_v29, 0.0 }
 0x1a8   : > { %v9501_v30 = vpop.eup %9500  ;;  %v1308_v32 = vadd.f32 %v10786_v8, %v1307_v28  ;;  %v1456_v33 = vmul.f32 %v9499_v26, %v10798_v24 }
 0x1a9   : > { %v9503_v34 = vpop.eup %9502  ;;  %1610 = vadd.xlane.f32.xlu1 %v1609_v31  ;;  %v8585_v35 = vpop.f32.mrf.mxu0  ;;  %v1457_v44 = vmul.f32 %v9501_v30, %v10798_v24 }
 0x1aa   : > { %9514 = vtanh.f32 %v1308_v32  ;;  %v1621_v36 = vsel %vm14797_vm1, %v1456_v33, 0.0  ;;  %v1323_v37 = vadd.f32 %v8585_v35, %v10786_v8  ;;  %v1459_v38 = vmul.f32 %v9503_v34, %v10798_v24 }
 0x1ab   : > { %v9505_v39 = vpop.eup %9504  ;;  %9516 = vtanh.f32 %v1313_v27  ;;  %1622 = vadd.xlane.f32.xlu0 %v1621_v36  ;;  %v1317_v41 = vpop.f32.mrf.mxu0  ;;  %v1624_v52 = vsel %vm14797_vm1, %v1457_v44, 0.0 }
 0x1ac   : > { %9518 = vtanh.f32 %v1323_v37  ;;  %v1318_v42 = vadd.f32 %v10786_v8, %v1317_v41  ;;  %v1630_v43 = vsel %vm14797_vm1, %v1459_v38, 0.0  ;;  %v1458_v47 = vmul.f32 %v9505_v39, %v10798_v24 }
 0x1ad   : > { %v9507_v45 = vpop.eup %9506  ;;  %1619 = vadd.xlane.f32.xlu1 %v1618_v40  ;;  %v8588_v46 = vpop.f32.mrf.mxu0 }
 0x1ae   : > { %v1461_v48 = vmul.f32 %v9507_v45, %v10798_v24  ;;  %9520 = vtanh.f32 %v1318_v42  ;;  %v1333_v51 = vadd.f32 %v8588_v46, %v10786_v8  ;;  %v1627_v55 = vsel %vm14797_vm1, %v1458_v47, 0.0 }
 0x1af   : > { %1631 = vadd.xlane.f32.xlu0 %v1630_v43  ;;  %v1327_v49 = vpop.f32.mrf.mxu0  ;;  %v9509_v50 = vpop.eup %9508 }
 0x1b0   : > { %v1328_v53 = vadd.f32 %v10786_v8, %v1327_v49  ;;  %v1636_v56 = vsel %vm14797_vm1, %v1461_v48, 0.0  ;;  %v1460_v58 = vmul.f32 %v9509_v50, %v10798_v24 }
 0x1b1   : > { %v9511_v54 = vpop.eup %9510  ;;  %1625 = vadd.xlane.f32.xlu1 %v1624_v52 }
 0x1b2   : > { %9522 = vtanh.f32 %v1328_v53  ;;  %v1463_v57 = vmul.f32 %v9511_v54, %v10798_v24  ;;  %v1633_v62 = vsel %vm14797_vm1, %v1460_v58, 0.0 }
 0x1b3   : > { %1628 = vadd.xlane.f32.xlu0 %v1627_v55  ;;  %9524 = vtanh.f32 %v1333_v51  ;;  %v9513_v60 = vpop.eup %9512 }
 0x1b4   : > { %v1642_v59 = vsel %vm14797_vm1, %v1463_v57, 0.0  ;;  %v1462_v63 = vmul.f32 %v9513_v60, %v10798_v24  ;;  %v1728_v57 = vlaneseq }
 0x1b5   : > { %1637 = vadd.xlane.f32.xlu1 %v1636_v56 }
 0x1b6   : > { %v1639_v4 = vsel %vm14797_vm1, %v1462_v63, 0.0  ;;  %v11067_v60 = vand.u32 127, %v1728_v57  ;;  %v11074_v63 = vshrl.u32 %v1728_v57, 7 }
 0x1b7   : > { %v9515_v61 = vpop.eup %9514  ;;  %1643 = vadd.xlane.f32.xlu0 %v1642_v59 }
 0x1b8   : > { %v9517_v8 = vpop.eup %9516  ;;  %v1464_v0 = vmul.f32 %v9515_v61, %v10798_v24  ;;  %14821 = vst [vmem:[#allocation19_spill] sm:$0xff] %v11067_v60  ;;  %14822 = vst [vmem:[#allocation20_spill] sm:$0xff] %v11074_v63 }
 0x1b9   : > { %v9519_v1 = vpop.eup %9518  ;;  %1634 = vadd.xlane.f32.xlu1 %v1633_v62  ;;  %v1465_v5 = vmul.f32 %v9517_v8, %v10798_v24  ;;  %v1741_v8 = vadd.s32 4294967280, %v11067_v60 }
 0x1ba   : > { %v1645_v2 = vsel %vm14797_vm1, %v1464_v0, 0.0  ;;  %v1467_v3 = vmul.f32 %v9519_v1, %v10798_v24  ;;  %v1734_v0 = vadd.s32 4294967288, %v11067_v60 }
 0x1bb   : > { %1646 = vadd.xlane.f32.xlu0 %v1645_v2  ;;  %v9521_v7 = vpop.eup %9520  ;;  %v1648_v10 = vsel %vm14797_vm1, %v1465_v5, 0.0  ;;  %v11081_v2 = vsub.s32 %v11067_v60, %v11074_v63 }
 0x1bc   : > { %v1654_v6 = vsel %vm14797_vm1, %v1467_v3, 0.0  ;;  %v1466_v11 = vmul.f32 %v9521_v7, %v10798_v24  ;;  %v11084_v3 = vsub.s32 %v1741_v8, %v11074_v63  ;;  %v11089_v5 = vsub.s32 %v1734_v0, %v11074_v63 }
 0x1bd   : > { %1640 = vadd.xlane.f32.xlu1 %v1639_v4  ;;  %14823 = vst [vmem:[#allocation21_spill] sm:$0xff] %v11081_v2 }
 0x1be   : > { %v1651_v15 = vsel %vm14797_vm1, %v1466_v11, 0.0  ;;  %14824 = vst [vmem:[#allocation22_spill] sm:$0xff] %v11084_v3  ;;  %14825 = vst [vmem:[#allocation23_spill] sm:$0xff] %v11089_v5 }
 0x1bf   : > { %v9523_v9 = vpop.eup %9522  ;;  %1655 = vadd.xlane.f32.xlu0 %v1654_v6  ;;  %v1748_v6 = vadd.s32 4294967272, %v11067_v60 }
 0x1c0   : > { %v1468_v12 = vmul.f32 %v9523_v9, %v10798_v24  ;;  %v9525_v13 = vpop.eup %9524 }
 0x1c1   : > { %1649 = vadd.xlane.f32.xlu1 %v1648_v10  ;;  %v1469_v16 = vmul.f32 %v9525_v13, %v10798_v24  ;;  %v1755_v10 = vadd.s32 4294967264, %v11067_v60 }
 0x1c2   : > { %v1657_v14 = vsel %vm14797_vm1, %v1468_v12, 0.0 }
 0x1c3   : > { %1658 = vadd.xlane.f32.xlu0 %v1657_v14  ;;  %v1660_v17 = vsel %vm14797_vm1, %v1469_v16, 0.0  ;;  %v11104_v14 = vsub.s32 %v1748_v6, %v11074_v63 }
 0x1c5   : > { %1652 = vadd.xlane.f32.xlu1 %v1651_v15  ;;  %14827 = vst [vmem:[#allocation25_spill] sm:$0xff] %v11104_v14 }
 0x1c9   : > { %1661 = vadd.xlane.f32.xlu1 %v1660_v17 }
 0x1ce   : > { %v10985_v18 = vpop.xlane.xlu0 %1475 }
 0x1cf   : > { %v1738_v13 = vrot.slane %v10985_v18, %v11089_v5 }
 0x1d2   : > { %v10987_v19 = vpop.xlane.xlu0 %1472 }
 0x1d3   : > { %v1733_v9 = vrot.slane %v10987_v19, %v11081_v2  ;;  %v1762_v19 = vadd.s32 4294967256, %v11067_v60 }
 0x1d5   : > { %v1740_v17 = vsel %vm1739_vm2, %v1738_v13, %v1733_v9  ;;  %v1769_v9 = vadd.s32 4294967248, %v11067_v60 }
 0x1d6   : > { %v10989_v20 = vpop.xlane.xlu1 %1487  ;;  %v10991_v21 = vpop.xlane.xlu0 %1481 }
 0x1d7   : > { %v1752_v6 = vrot.slane %v10991_v21, %v11104_v14 }
 0x1da   : > { %v10993_v22 = vpop.xlane.xlu1 %1484  ;;  %v10995_v23 = vpop.xlane.xlu0 %1478 }
 0x1db   : > { %v1745_v11 = vrot.slane %v10995_v23, %v11084_v3  ;;  %v11113_v23 = vsub.s32 %v1755_v10, %v11074_v63 }
 0x1dd   : > { %14828 = vst [vmem:[#allocation26_spill] sm:$0xff] %v11113_v23  ;;  %v1747_v18 = vsel %vm1746_vm3, %v1745_v11, %v1740_v17  ;;  %v1759_v17 = vrot.slane %v10993_v22, %v11113_v23 }
 0x1de   : > { %v10997_v25 = vpop.xlane.xlu1 %1499  ;;  %v10999_v26 = vpop.xlane.xlu0 %1493  ;;  %v1754_v11 = vsel %vm14631_vm4, %v1752_v6, %v1747_v18 }
 0x1df   : > { %v1790_v8 = vrot.slane %v10997_v25, %v11089_v5 }
 0x1e2   : > { %v11001_v24 = vpop.xlane.xlu1 %1496  ;;  %v11003_v27 = vpop.xlane.xlu0 %1490 }
 0x1e3   : > { %v1786_v15 = vrot.slane %v11001_v24, %v11081_v2  ;;  %v1776_v24 = vadd.s32 4294967240, %v11067_v60 }
 0x1e5   : > { %v1791_v10 = vsel %vm1739_vm2, %v1790_v8, %v1786_v15 }
 0x1e6   : > { %v11005_v28 = vpop.xlane.xlu1 %1505  ;;  %v11007_v29 = vpop.xlane.xlu0 %1511 }
 0x1e7   : > { %v1800_v21 = vrot.slane %v11005_v28, %v11104_v14 }
 0x1ea   : > { %v11009_v30 = vpop.xlane.xlu1 %1502  ;;  %v11011_v31 = vpop.xlane.xlu0 %1508 }
 0x1eb   : > { %v1795_v57 = vrot.slane %v11009_v30, %v11084_v3  ;;  %v11130_v30 = vsub.s32 %v1762_v19, %v11074_v63  ;;  %v11146_v19 = vsub.s32 %v1769_v9, %v11074_v63  ;;  %v1805_v6 = vrot.slane %v11011_v31, %v11113_v23 }
 0x1ed   : > { %14829 = vst [vmem:[#allocation27_spill] sm:$0xff] %v11130_v30  ;;  %v1796_v25 = vsel %vm1746_vm3, %v1795_v57, %v1791_v10  ;;  %14831 = vst [vmem:[#allocation29_spill] sm:$0xff] %v11146_v19  ;;  %v1761_v57 = vsel %vm1760_vm5, %v1759_v17, %v1754_v11 }
 0x1ee   : > { %v11013_v32 = vpop.xlane.xlu1 %1517  ;;  %v1801_v18 = vsel %vm14631_vm4, %v1800_v21, %v1796_v25  ;;  %v1773_v21 = vrot.slane %v11003_v27, %v11146_v19 }
 0x1ef   : > { %v1806_v31 = vsel %vm1760_vm5, %v1805_v6, %v1801_v18 }
 0x1f0   : > { %v11015_v33 = vpop.xlane.xlu0 %1520 }
 0x1f1   : > { %v1825_v22 = vrot.slane %v11015_v33, %v11081_v2 }
 0x1f2   : > { %v11017_v34 = vpop.xlane.xlu1 %1514 }
 0x1f4   : > { %v11019_v35 = vpop.xlane.xlu0 %1526 }
 0x1f5   : > { %v1834_v9 = vrot.slane %v11019_v35, %v11084_v3 }
 0x1f6   : > { %v11021_v36 = vpop.xlane.xlu1 %1523 }
 0x1f7   : > { %v1829_v15 = vrot.slane %v11021_v36, %v11089_v5  ;;  %v1766_v36 = vrot.slane %v10989_v20, %v11130_v30 }
 0x1f8   : > { %v11023_v37 = vpop.xlane.xlu0 %1535 }
 0x1f9   : > { %v1830_v33 = vsel %vm1739_vm2, %v1829_v15, %v1825_v22  ;;  %v1768_v20 = vsel %vm1767_vm6, %v1766_v36, %v1761_v57  ;;  %v1849_v22 = vrot.slane %v11023_v37, %v11130_v30 }
 0x1fa   : > { %v11025_v38 = vpop.xlane.xlu1 %1529  ;;  %v1835_v18 = vsel %vm1746_vm3, %v1834_v9, %v1830_v33 }
 0x1fc   : > { %v11027_v39 = vpop.xlane.xlu0 %1538 }
 0x1fe   : > { %v11029_v40 = vpop.xlane.xlu1 %1532 }
 0x1ff   : > { %v1844_v35 = vrot.slane %v11029_v40, %v11113_v23 }
 0x200   : > { %v11031_v41 = vpop.xlane.xlu0 %1547 }
 0x201   : > { %v1868_v11 = vrot.slane %v11031_v41, %v11089_v5 }
 0x202   : > { %v11033_v42 = vpop.xlane.xlu1 %1541 }
 0x204   : > { %v11035_v43 = vpop.xlane.xlu0 %1553 }
 0x205   : > { %v1878_v37 = vrot.slane %v11035_v43, %v11104_v14 }
 0x206   : > { %v11037_v44 = vpop.xlane.xlu1 %1544 }
 0x208   : > { %v11039_v45 = vpop.xlane.xlu0 %1550 }
 0x209   : > { %v1873_v17 = vrot.slane %v11039_v45, %v11084_v3  ;;  %v1815_v45 = vrot.slane %v11017_v34, %v11146_v19 }
 0x20a   : > { %v11041_v46 = vpop.xlane.xlu1 %1559 }
 0x20c   : > { %v11043_v47 = vpop.xlane.xlu0 %1562 }
 0x20e   : > { %v11045_v48 = vpop.xlane.xlu1 %1556 }
 0x20f   : > { %v1883_v6 = vrot.slane %v11045_v48, %v11113_v23  ;;  %v1854_v48 = vrot.slane %v11027_v39, %v11146_v19  ;;  %v1888_v39 = vrot.slane %v11041_v46, %v11130_v30  ;;  %v1775_v46 = vsel %vm1774_vm7, %v1773_v21, %v1768_v20 }
 0x210   : > { %v11047_v49 = vpop.xlane.xlu0 %1571 }
 0x212   : > { %v11049_v50 = vpop.xlane.xlu1 %1565 }
 0x214   : > { %v11051_v51 = vpop.xlane.xlu0 %1577 }
 0x216   : > { %v11053_v52 = vpop.xlane.xlu1 %1568 }
 0x217   : > { %v1903_v15 = vrot.slane %v11053_v52, %v11081_v2 }
 0x218   : > { %v11055_v53 = vpop.xlane.xlu0 %1580 }
 0x21a   : > { %v11057_v54 = vpop.xlane.xlu1 %1574 }
 0x21b   : > { %v1912_v27 = vrot.slane %v11057_v54, %v11084_v3 }
 0x21c   : > { %v11059_v55 = vpop.xlane.xlu0 %1589 }
 0x21e   : > { %v11061_v56 = vpop.xlane.xlu1 %1583 }
 0x220   : > { %v11063_v58 = vpop.xlane.xlu0 %1586 }
 0x222   : > { %v11065_v59 = vpop.xlane.xlu1 %1595 }
 0x223   : > { %v1946_v43 = vrot.slane %v11065_v59, %v11089_v5 }
 0x224   : > { %v11069_v61 = vpop.xlane.xlu0 %1592 }
 0x225   : > { %v1942_v54 = vrot.slane %v11069_v61, %v11081_v2 }
 0x226   : > { %v11072_v62 = vpop.xlane.xlu1 %1601 }
 0x228   : > { %v11077_v1 = vpop.xlane.xlu0 %1604 }
 0x22a   : > { %v11086_v4 = vpop.xlane.xlu1 %1598 }
 0x22c   : > { %v11092_v7 = vpop.xlane.xlu0 %1613 }
 0x22d   : > { %14826 = vst [vmem:[#allocation24_spill] sm:$0xff] %v11092_v7  ;;  %v11137_v7 = vsub.s32 %v1776_v24, %v11074_v63  ;;  %v1864_v24 = vrot.slane %v11037_v44, %v11081_v2  ;;  %v1839_v44 = vrot.slane %v11025_v38, %v11104_v14  ;;  %v1810_v38 = vrot.slane %v11007_v29, %v11130_v30 }
 0x22e   : > { %v11099_v12 = vpop.xlane.xlu1 %1607 }
 0x22f   : > { %14830 = vst [vmem:[#allocation28_spill] sm:$0xff] %v11137_v7  ;;  %v1780_v10 = vrot.slane %v10999_v26, %v11137_v7  ;;  %v1869_v41 = vsel %vm1739_vm2, %v1868_v11, %v1864_v24  ;;  %v1820_v40 = vrot.slane %v11013_v32, %v11137_v7  ;;  %v1811_v29 = vsel %vm1767_vm6, %v1810_v38, %v1806_v31 }
 0x230   : > { %v11108_v16 = vpop.xlane.xlu0 %1616  ;;  %v1840_v52 = vsel %vm14631_vm4, %v1839_v44, %v1835_v18  ;;  %v1907_v24 = vrot.slane %v11047_v49, %v11089_v5  ;;  %v1874_v34 = vsel %vm1746_vm3, %v1873_v17, %v1869_v41  ;;  %v1951_v49 = vrot.slane %v11086_v4, %v11084_v3 }
 0x231   : > { %v1845_v32 = vsel %vm1760_vm5, %v1844_v35, %v1840_v52  ;;  %v1816_v11 = vsel %vm1774_vm7, %v1815_v45, %v1811_v29  ;;  %v1879_v4 = vsel %vm14631_vm4, %v1878_v37, %v1874_v34  ;;  %v1981_v35 = vrot.slane %v11108_v16, %v11081_v2 }
 0x232   : > { %v11121_v0 = vpop.xlane.xlu1 %1610  ;;  %v1908_v9 = vsel %vm1739_vm2, %v1907_v24, %v1903_v15  ;;  %v1850_v31 = vsel %vm1767_vm6, %v1849_v22, %v1845_v32  ;;  %v1884_v38 = vsel %vm1760_vm5, %v1883_v6, %v1879_v4  ;;  %v1947_v41 = vsel %vm1739_vm2, %v1946_v43, %v1942_v54 }
 0x233   : > { %v1913_v61 = vsel %vm1746_vm3, %v1912_v27, %v1908_v9  ;;  %v1821_v27 = vsel %vm1781_vm8, %v1820_v40, %v1816_v11  ;;  %v1956_v29 = vrot.slane %v11072_v62, %v11104_v14  ;;  %v1855_v22 = vsel %vm1774_vm7, %v1854_v48, %v1850_v31 }
 0x234   : > { %v11127_v13 = vpop.xlane.xlu0 %1622  ;;  %v1893_v52 = vrot.slane %v11043_v47, %v11146_v19  ;;  %v1927_v24 = vrot.slane %v11061_v56, %v11130_v30  ;;  %v1859_v47 = vrot.slane %v11033_v42, %v11137_v7  ;;  %v1961_v56 = vrot.slane %v11077_v1, %v11113_v23 }
 0x235   : > { %v1990_v59 = vrot.slane %v11127_v13, %v11084_v3  ;;  %v1922_v13 = vrot.slane %v11055_v53, %v11113_v23  ;;  %v1932_v37 = vrot.slane %v11063_v58, %v11146_v19  ;;  %v1966_v42 = vrot.slane %v11099_v12, %v11130_v30 }
 0x236   : > { %v11143_v8 = vpop.xlane.xlu1 %1619 }
 0x237   : > { %v1985_v33 = vrot.slane %v11143_v8, %v11089_v5  ;;  %v1917_v8 = vrot.slane %v11051_v51, %v11104_v14  ;;  %v1952_v51 = vsel %vm1746_vm3, %v1951_v49, %v1947_v41  ;;  %v1971_v49 = vrot.slane %v11121_v0, %v11146_v19 }
 0x238   : > { %v11154_v28 = vpop.xlane.xlu0 %1631  ;;  %v1957_v53 = vsel %vm14631_vm4, %v1956_v29, %v1952_v51 }
 0x239   : > { %v1918_v15 = vsel %vm14631_vm4, %v1917_v8, %v1913_v61  ;;  %v1986_v45 = vsel %vm1739_vm2, %v1985_v33, %v1981_v35  ;;  %v1962_v9 = vsel %vm1760_vm5, %v1961_v56, %v1957_v53  ;;  %v2005_v0 = vrot.slane %v11154_v28, %v11130_v30 }
 0x23a   : > { %v11169_v25 = vpop.xlane.xlu1 %1625  ;;  %v1923_v21 = vsel %vm1760_vm5, %v1922_v13, %v1918_v15  ;;  %v1991_v40 = vsel %vm1746_vm3, %v1990_v59, %v1986_v45  ;;  %v1967_v8 = vsel %vm1767_vm6, %v1966_v42, %v1962_v9  ;;  %v1937_v35 = vrot.slane %v11059_v55, %v11137_v7  ;;  %v10054_v9 = vld [vmem:[%s10625_s18 + $0x38] sm:$0xff] }
 0x23b   : > { %v1995_v16 = vrot.slane %v11169_v25, %v11104_v14  ;;  %v1889_v25 = vsel %vm1767_vm6, %v1888_v39, %v1884_v38  ;;  %v1928_v1 = vsel %vm1767_vm6, %v1927_v24, %v1923_v21  ;;  %v1972_v28 = vsel %vm1774_vm7, %v1971_v49, %v1967_v8  ;;  %v10055_v49 = vld [vmem:[%s10625_s18 + $0x30] sm:$0xff]  ;;  %v2716_v8 = vld [vmem:[%s14613_s6 + $0x38] sm:$0xff] }
 0x23c   : > { %v11184_v57 = vpop.xlane.xlu0 %1628  ;;  %v1894_v54 = vsel %vm1774_vm7, %v1893_v52, %v1889_v25  ;;  %v1933_v4 = vsel %vm1774_vm7, %v1932_v37, %v1928_v1  ;;  %v14632_v1 = vmov 0.0  }
 0x23d   : > { %v2000_v62 = vrot.slane %v11184_v57, %v11113_v23  ;;  %v1996_v32 = vsel %vm14631_vm4, %v1995_v16, %v1991_v40  ;;  %v1898_v57 = vrot.slane %v11049_v50, %v11137_v7  ;;  %v1782_v50 = vsel %vm1781_vm8, %v1780_v10, %v1775_v46  ;;  %8589 = vmatprep.subr.mxu1 %v14632_v1 }
 0x23e   : > { %v11199_v36 = vpop.xlane.xlu1 %1637  ;;  %v2057_v61 = vsel %vm14772_vm9, %v1821_v27, %v1782_v50  ;;  %v1860_v10 = vsel %vm1781_vm8, %v1859_v47, %v1855_v22  ;;  %v1938_v45 = vsel %vm1781_vm8, %v1937_v35, %v1933_v4  ;;  %v740_v22 = vld [vmem:[%s543_s12] sm:$0xff]  ;;  %8590 = vmatpush3.msra.mxu1 %v10054_v9  ;;  %v10058_v50 = vld [vmem:[%s10625_s18 + $0x18] sm:$0xff]  ;;  %v2715_v35 = vld [vmem:[%s14613_s6 + $0x30] sm:$0xff] }
 0x23f   : > { %v2001_v58 = vsel %vm1760_vm5, %v2000_v62, %v1996_v32  ;;  %v1899_v31 = vsel %vm1781_vm8, %v1898_v57, %v1894_v54  ;;  %v2015_v16 = vrot.slane %v11199_v36, %v11137_v7  ;;  %v2059_v27 = vsel %vm14761_vm10, %v1860_v10, %v2057_v61  ;;  %8591 = vmatprep.subr.mxu1 %v14632_v1  ;;  %v2724_v61 = vld [vmem:[%s14613_s6 + $0x78] sm:$0xff]  ;;  %v2719_v10 = vld [vmem:[%s14613_s6 + $0x50] sm:$0xff]  ;;  %v2717_v4 = vld [vmem:[%s14613_s6 + $0x40] sm:$0xff] }
 0x240   : > { %v1644_v44 = vpop.xlane.xlu0 %1643  ;;  %v2006_v38 = vsel %vm1767_vm6, %v2005_v0, %v2001_v58  ;;  %v2061_v52 = vsel %vm14759_vm11, %v1899_v31, %v2059_v27  ;;  %8592 = vmatpush3.msra.mxu1 %v10055_v49  ;;  %v10059_v58 = vld [vmem:[%s10625_s18 + $0x10] sm:$0xff]  ;;  %8741 = vmatprep.subr.mxu0 %v2724_v61  ;;  %v2718_v31 = vld [vmem:[%s14613_s6 + $0x48] sm:$0xff]  ;;  %v555_v27 = vld [vmem:[%s10617_s0 + $0x38] sm:$0xff] }
 0x241   : > { %v2024_v33 = vrot.slane %v1644_v44, %v11089_v5  ;;  %v2063_v53 = vsel %vm14757_vm12, %v1938_v45, %v2061_v52  ;;  %8593 = vmatprep.subr.mxu1 %v14632_v1  ;;  %8742 = vmatpush3.msra.mxu0 %v2724_v61  ;;  %v2723_v0 = vld [vmem:[%s14613_s6 + $0x70] sm:$0xff]  ;;  %v551_v45 = vld [vmem:[%s10617_s0 + $0x18] sm:$0xff]  ;;  %v573_v9 = vld [vmem:[%s10617_s0 + $0xc8] sm:$0xff] }
 0x242   : > { %v11226_v17 = vpop.xlane.xlu1 %1634  ;;  %8743 = vmatprep.subr.mxu0 %v2723_v0  ;;  %v11419_v52 = vld [vmem:[%s10617_s0 + $0x58] sm:$0xff]  ;;  %v574_v49 = vld [vmem:[%s10617_s0 + $0xd0] sm:$0xff] }
 0x243   : > { %v2010_v12 = vrot.slane %v11226_v17, %v11146_v19  ;;  %v14832_v17 = vld [vmem:[#allocation24_spill] sm:$0xff]  ;;  %8744 = vmatpush3.msra.mxu0 %v2723_v0 }
 0x244   : > { %v1647_v18 = vpop.xlane.xlu0 %1646  ;;  %v1976_v39 = vrot.slane %v14832_v17, %v11137_v7  ;;  %v2714_v17 = vld [vmem:[%s14613_s6 + $0x28] sm:$0xff] }
 0x245   : > { %v2029_v48 = vrot.slane %v1647_v18, %v11084_v3  ;;  %v2011_v59 = vsel %vm1774_vm7, %v2010_v12, %v2006_v38  ;;  %v10060_v12 = vld [vmem:[%s10625_s18 + $0x8] sm:$0xff]  ;;  %v2711_v38 = vld [vmem:[%s14613_s6 + $0x10] sm:$0xff] }
 0x246   : > { %v1641_v20 = vpop.xlane.xlu1 %1640  ;;  %v1977_v13 = vsel %vm1781_vm8, %v1976_v39, %v1972_v28  ;;  %v2713_v39 = vld [vmem:[%s14613_s6 + $0x20] sm:$0xff]  ;;  %v2712_v28 = vld [vmem:[%s14613_s6 + $0x18] sm:$0xff] }
 0x247   : > { %v2020_v34 = vrot.slane %v1641_v20, %v11081_v2  ;;  %v2016_v20 = vsel %vm1781_vm8, %v2015_v16, %v2011_v59  ;;  %v2065_v40 = vsel %vm14752_vm13, %v1977_v13, %v2063_v53  ;;  %v2709_v59 = vld [vmem:[%s14613_s6] sm:$0xff]  ;;  %v565_v53 = vld [vmem:[%s10617_s0 + $0x88] sm:$0xff] }
 0x248   : > { %v1656_v6 = vpop.xlane.xlu0 %1655  ;;  %v2067_v47 = vsel %vm14749_vm14, %v2016_v20, %v2065_v40  ;;  %v552_v16 = vld [vmem:[%s10617_s0 + $0x20] sm:$0xff]  ;;  %v11431_v20 = vld [vmem:[%s10617_s0 + $0x70] sm:$0xff] }
 0x249   : > { %v2025_v44 = vsel %vm1739_vm2, %v2024_v33, %v2020_v34  ;;  %v2044_v46 = vrot.slane %v1656_v6, %v11130_v30  ;;  %v10056_v33 = vld [vmem:[%s10625_s18 + $0x28] sm:$0xff]  ;;  %v556_v13 = vld [vmem:[%s10617_s0 + $0x40] sm:$0xff]  ;;  %v566_v40 = vld [vmem:[%s10617_s0 + $0x90] sm:$0xff] }
 0x24a   : > { %v1650_v11 = vpop.xlane.xlu1 %1649  ;;  %v2030_v15 = vsel %vm1746_vm3, %v2029_v48, %v2025_v44  ;;  %8594 = vmatpush3.msra.mxu1 %v10056_v33  ;;  %v10061_v48 = vld [vmem:[%s10625_s18] sm:$0xff]  ;;  %v2722_v44 = vld [vmem:[%s14613_s6 + $0x68] sm:$0xff]  ;;  %v575_v33 = vld [vmem:[%s10617_s0 + $0xd8] sm:$0xff] }
 0x24b   : > { %v2034_v26 = vrot.slane %v1650_v11, %v11104_v14  ;;  %8595 = vmatprep.subr.mxu1 %v14632_v1  ;;  %v10057_v11 = vld [vmem:[%s10625_s18 + $0x20] sm:$0xff]  ;;  %8745 = vmatprep.subr.mxu0 %v2722_v44 }
 0x24c   : > { %v1659_v43 = vpop.xlane.xlu0 %1658  ;;  %8596 = vmatpush3.msra.mxu1 %v10057_v11  ;;  %8746 = vmatpush3.msra.mxu0 %v2722_v44  ;;  %v579_v44 = vld [vmem:[%s10617_s0 + $0xf8] sm:$0xff] }
 0x24d   : > { %v2049_v55 = vrot.slane %v1659_v43, %v11146_v19  ;;  %v2035_v18 = vsel %vm14631_vm4, %v2034_v26, %v2030_v15  ;;  %vm1663_vm4 = vcmp.gt.f32.partialorder %v740_v22, 0.5  ;;  %8597 = vmatprep.subr.mxu1 %v14632_v1  ;;  %v2721_v26 = vld [vmem:[%s14613_s6 + $0x60] sm:$0xff]  ;;  %v2720_v43 = vld [vmem:[%s14613_s6 + $0x58] sm:$0xff]  ;;  %v11415_v22 = vld [vmem:[%s10617_s0 + $0x50] sm:$0xff] }
 0x24e   : > { %v1653_v41 = vpop.xlane.xlu1 %1652  ;;  %8598 = vmatpush3.msra.mxu1 %v10058_v50  ;;  %8747 = vmatprep.subr.mxu0 %v2721_v26  ;;  %v548_v15 = vld [vmem:[%s10617_s0] sm:$0xff] }
 0x24f   : > { %v2039_v51 = vrot.slane %v1653_v41, %v11113_v23  ;;  %8599 = vmatprep.subr.mxu1 %v14632_v1  ;;  %8748 = vmatpush3.msra.mxu0 %v2721_v26  ;;  %v2710_v41 = vld [vmem:[%s14613_s6 + $0x8] sm:$0xff]  ;;  %v576_v50 = vld [vmem:[%s10617_s0 + $0xe0] sm:$0xff] }
 0x250   : > { %8600 = vmatpush3.msra.mxu1 %v10059_v58  ;;  %8749 = vmatprep.subr.mxu0 %v2720_v43  ;;  %v577_v58 = vld [vmem:[%s10617_s0 + $0xe8] sm:$0xff] }
 0x251   : > { %v2040_v29 = vsel %vm1760_vm5, %v2039_v51, %v2035_v18  ;;  %8601 = vmatprep.subr.mxu1 %v14632_v1  ;;  %8750 = vmatpush3.msra.mxu0 %v2720_v43  ;;  %v549_v51 = vld [vmem:[%s10617_s0 + $0x8] sm:$0xff]  ;;  %v580_v43 = vld [vmem:[%s10617_s0 + $0x100] sm:$0xff] }
 0x252   : > { %v2045_v25 = vsel %vm1767_vm6, %v2044_v46, %v2040_v29  ;;  %v1662_v24 = vpop.xlane.xlu1 %1661  ;;  %8602 = vmatpush3.msra.mxu1 %v10060_v12  ;;  %8751 = vmatprep.subr.mxu0 %v2719_v10  ;;  %v553_v18 = vld [vmem:[%s10617_s0 + $0x28] sm:$0xff]  ;;  %v554_v46 = vld [vmem:[%s10617_s0 + $0x30] sm:$0xff] }
 0x253   : > { %v2050_v36 = vsel %vm1774_vm7, %v2049_v55, %v2045_v25  ;;  %v2054_v21 = vrot.slane %v1662_v24, %v11137_v7  ;;  %8603 = vmatprep.subr.mxu1 %v14632_v1  ;;  %8752 = vmatpush3.msra.mxu0 %v2719_v10  ;;  %v550_v55 = vld [vmem:[%s10617_s0 + $0x10] sm:$0xff]  ;;  %v557_v29 = vld [vmem:[%s10617_s0 + $0x48] sm:$0xff]  ;;  %v11423_v25 = vld [vmem:[%s10617_s0 + $0x60] sm:$0xff] }
 0x254   : > { %8604 = vmatpush3.msra.mxu1 %v10061_v48  ;;  %8753 = vmatprep.subr.mxu0 %v2718_v31  ;;  %v11427_v24 = vld [vmem:[%s10617_s0 + $0x68] sm:$0xff]  ;;  %v578_v48 = vld [vmem:[%s10617_s0 + $0xf0] sm:$0xff] }
 0x255   : > { %v2055_v62 = vsel %vm1781_vm8, %v2054_v21, %v2050_v36  ;;  %8608 = vmatprep.subr.mxu1 %v14632_v1  ;;  %8754 = vmatpush3.msra.mxu0 %v2718_v31  ;;  %v11435_v36 = vld [vmem:[%s10617_s0 + $0x78] sm:$0xff]  ;;  %v564_v21 = vld [vmem:[%s10617_s0 + $0x80] sm:$0xff]  ;;  %v581_v31 = vld [vmem:[%s10617_s0 + $0x108] sm:$0xff] }
 0x256   : > { %v2069_v56 = vsel %vm14747_vm15, %v2055_v62, %v2067_v47  ;;  %8755 = vmatprep.subr.mxu0 %v2717_v4  ;;  %8773 = vmatprep.mubr.f32.mxu0 %v548_v15  ;;  %v567_v62 = vld [vmem:[%s10617_s0 + $0x98] sm:$0xff]  ;;  %v568_v47 = vld [vmem:[%s10617_s0 + $0xa0] sm:$0xff] }
 0x257   : > { %v2071_v32 = vsel %vm1663_vm4, %v2069_v56, -1e+30  ;;  %vm14740_vm4 = vmmov 0   ;;  %8756 = vmatpush3.msra.mxu0 %v2717_v4  ;;  %v569_v56 = vld [vmem:[%s10617_s0 + $0xa8] sm:$0xff]  ;;  %v10062_v4 = vld [vmem:[%s10625_s18 + $0x78] sm:$0xff] }
 0x258   : > { %v2072_v34 = vsel %vm14731_vm0, %v2071_v32, -inf  ;;  %8605 = vmatprep.mubr.msk.f32.mxu1 %vm14740_vm4, %v14632_v1  ;;  %8757 = vmatprep.subr.mxu0 %v2716_v8 }
 0x259   : > { %2073 = vmax.xlane.f32.xlu0 %v2072_v34  ;;  %8758 = vmatpush3.msra.mxu0 %v2716_v8  ;;  %v570_v34 = vld [vmem:[%s10617_s0 + $0xb0] sm:$0xff] }
 0x25a   : > { %8759 = vmatprep.subr.mxu0 %v2715_v35  ;;  %v10063_v8 = vld [vmem:[%s10625_s18 + $0x70] sm:$0xff] }
 0x25b   : > { %8760 = vmatpush3.msra.mxu0 %v2715_v35  ;;  %v583_v35 = vld [vmem:[%s10617_s0 + $0x118] sm:$0xff] }
 0x25c   : > { %8761 = vmatprep.subr.mxu0 %v2714_v17 }
 0x25d   : > { %8762 = vmatpush3.msra.mxu0 %v2714_v17  ;;  %v584_v17 = vld [vmem:[%s10617_s0 + $0x120] sm:$0xff] }
 0x25e   : > { %8763 = vmatprep.subr.mxu0 %v2713_v39 }
 0x25f   : > { %8764 = vmatpush3.msra.mxu0 %v2713_v39  ;;  %v10064_v39 = vld [vmem:[%s10625_s18 + $0x68] sm:$0xff] }
 0x260   : > { %8765 = vmatprep.subr.mxu0 %v2712_v28 }
 0x261   : > { %8766 = vmatpush3.msra.mxu0 %v2712_v28  ;;  %v10065_v28 = vld [vmem:[%s10625_s18 + $0x60] sm:$0xff] }
 0x262   : > { %8767 = vmatprep.subr.mxu0 %v2711_v38 }
 0x263   : > { %8768 = vmatpush3.msra.mxu0 %v2711_v38  ;;  %v585_v38 = vld [vmem:[%s10617_s0 + $0x128] sm:$0xff] }
 0x264   : > { %8769 = vmatprep.subr.mxu0 %v2710_v41 }
 0x265   : > { %8770 = vmatpush3.msra.mxu0 %v2710_v41  ;;  %v586_v41 = vld [vmem:[%s10617_s0 + $0x130] sm:$0xff] }
 0x266   : > { %8771 = vmatprep.subr.mxu0 %v2709_v59 }
 0x267   : > { %8772 = vmatpush3.msra.mxu0 %v2709_v59  ;;  %v10066_v59 = vld [vmem:[%s10625_s18 + $0x58] sm:$0xff] }
 0x268   : > { %8774 = vmatmul.mubr.f32.vlgmr.msra.gmra.mxu0 %v549_v51  ;;  %9229 = vmatprep.subr.mxu0 %v14632_v1  ;;  %v10067_v51 = vld [vmem:[%s10625_s18 + $0x50] sm:$0xff] }
 0x269   : > { %8776 = vmatprep.mubr.f32.mxu0 %v550_v55  ;;  %v587_v55 = vld [vmem:[%s10617_s0 + $0x138] sm:$0xff] }
 0x26c   : > { %8777 = vmatmul.mubr.f32.gmra.mxu0 %v551_v45  ;;  %v588_v45 = vld [vmem:[%s10617_s0 + $0x140] sm:$0xff] }
 0x26d   : > { %8779 = vmatprep.mubr.f32.mxu0 %v552_v16  ;;  %v10068_v16 = vld [vmem:[%s10625_s18 + $0x48] sm:$0xff] }
 0x270   : > { %8780 = vmatmul.mubr.f32.gmra.mxu0 %v553_v18 }
 0x271   : > { %8782 = vmatprep.mubr.f32.mxu0 %v554_v46  ;;  %v10069_v46 = vld [vmem:[%s10625_s18 + $0x40] sm:$0xff] }
 0x274   : > { %8783 = vmatmul.mubr.f32.gmra.mxu0 %v555_v27  ;;  %v589_v27 = vld [vmem:[%s10617_s0 + $0x148] sm:$0xff] }
 0x275   : > { %8785 = vmatprep.mubr.f32.mxu0 %v556_v13  ;;  %v590_v13 = vld [vmem:[%s10617_s0 + $0x150] sm:$0xff] }
 0x278   : > { %8786 = vmatmul.mubr.f32.gmra.mxu0 %v557_v29  ;;  %v10070_v29 = vld [vmem:[%s10625_s18 + $0xb8] sm:$0xff] }
 0x279   : > { %8788 = vmatprep.mubr.f32.mxu0 %v11415_v22 }
 0x27c   : > { %8789 = vmatmul.mubr.f32.gmra.mxu0 %v11419_v52 }
 0x27d   : > { %8791 = vmatprep.mubr.f32.mxu0 %v11423_v25 }
 0x280   : > { %8792 = vmatmul.mubr.f32.gmra.mxu0 %v11427_v24 }
 0x281   : > { %8794 = vmatprep.mubr.f32.mxu0 %v11431_v20 }
 0x284   : > { %8795 = vmatmul.mubr.f32.gmra.mxu0 %v11435_v36 }
 0x285   : > { %8797 = vmatprep.mubr.f32.mxu0 %v564_v21  ;;  %v10071_v21 = vld [vmem:[%s10625_s18 + $0xb0] sm:$0xff] }
 0x288   : > { %8798 = vmatmul.mubr.f32.gmra.mxu0 %v565_v53  ;;  %v591_v53 = vld [vmem:[%s10617_s0 + $0x158] sm:$0xff] }
 0x289   : > { %8800 = vmatprep.mubr.f32.mxu0 %v566_v40  ;;  %v592_v40 = vld [vmem:[%s10617_s0 + $0x160] sm:$0xff] }
 0x28c   : > { %8801 = vmatmul.mubr.f32.gmra.mxu0 %v567_v62  ;;  %v10072_v62 = vld [vmem:[%s10625_s18 + $0xa8] sm:$0xff] }
 0x28d   : > { %8803 = vmatprep.mubr.f32.mxu0 %v568_v47  ;;  %v10073_v47 = vld [vmem:[%s10625_s18 + $0xa0] sm:$0xff] }
 0x290   : > { %8804 = vmatmul.mubr.f32.gmra.mxu0 %v569_v56  ;;  %v593_v56 = vld [vmem:[%s10617_s0 + $0x168] sm:$0xff] }
 0x291   : > { %8806 = vmatprep.mubr.f32.mxu0 %v570_v34  ;;  %v10074_v34 = vld [vmem:[%s10625_s18 + $0x98] sm:$0xff] }
 0x2e2   : > { %v2074_v6 = vpop.xlane.xlu0 %2073 }
 0x2e3   : > { %v2075_v54 = vsub.f32 %v2071_v32, %v2074_v6  ;;  %v571_v6 = vld [vmem:[%s10617_s0 + $0xb8] sm:$0xff] }
 0x2e4   : > { %8807 = vmatmul.mubr.f32.gmra.mxu0 %v571_v6  ;;  %v10075_v6 = vld [vmem:[%s10625_s18 + $0x90] sm:$0xff] }
 0x2e5   : > { %v2076_v57 = vmul.f32 1.442695, %v2075_v54  ;;  %v10390_v54 = vmov 1966171168  }
 0x2e7   : > { %9526 = vpow2.f32 %v2076_v57  ;;  %v2086_v57 = vunpack.c.l.s4 %v10390_v54  ;;  %v595_v54 = vld [vmem:[%s10617_s0 + $0x178] sm:$0xff] }
 0x2e9   : > { %v2087_v11 = vunpack.c.0.s8 %v2086_v57  ;;  %v596_v57 = vld [vmem:[%s10617_s0 + $0x180] sm:$0xff] }
 0x2eb   : > { %v11453_v12 = vsub.s32 %v2087_v11, %v11074_v63  ;;  %v598_v11 = vld [vmem:[%s10617_s0 + $0x190] sm:$0xff] }
 0x2ed   : > { %14833 = vst [vmem:[#allocation24_spill] sm:$0xff] %v11453_v12 }
 0x2f4   : > { %v11332_v37 = vpop.eup %9526 }
 0x2f5   : > { %v2078_v42 = vsel %vm14731_vm0, %v11332_v37, 0.0 }
 0x2f6   : > { %2079 = vadd.xlane.f32.xlu1 %v2078_v42  ;;  %v572_v42 = vld [vmem:[%s10617_s0 + $0xc0] sm:$0xff] }
 0x2f7   : > { %8809 = vmatprep.mubr.f32.mxu0 %v572_v42  ;;  %v10076_v42 = vld [vmem:[%s10625_s18 + $0x88] sm:$0xff] }
 0x2f8   : > { %8810 = vmatmul.mubr.f32.gmra.mxu0 %v573_v9 }
 0x2f9   : > { %8812 = vmatprep.mubr.f32.mxu0 %v574_v49  ;;  %v10077_v49 = vld [vmem:[%s10625_s18 + $0x80] sm:$0xff] }
 0x2fc   : > { %8813 = vmatmul.mubr.f32.gmra.mxu0 %v575_v33  ;;  %v597_v33 = vld [vmem:[%s10617_s0 + $0x188] sm:$0xff] }
 0x2fd   : > { %8815 = vmatprep.mubr.f32.mxu0 %v576_v50  ;;  %v10078_v50 = vld [vmem:[%s10625_s18 + $0xf8] sm:$0xff] }
 0x300   : > { %8816 = vmatmul.mubr.f32.gmra.mxu0 %v577_v58  ;;  %v10079_v58 = vld [vmem:[%s10625_s18 + $0xf0] sm:$0xff] }
 0x301   : > { %8818 = vmatprep.mubr.f32.mxu0 %v578_v48  ;;  %v599_v48 = vld [vmem:[%s10617_s0 + $0x198] sm:$0xff] }
 0x304   : > { %8819 = vmatmul.mubr.f32.gmra.mxu0 %v579_v44  ;;  %v10080_v44 = vld [vmem:[%s10625_s18 + $0xe8] sm:$0xff] }
 0x305   : > { %8821 = vmatprep.mubr.f32.mxu0 %v580_v43  ;;  %v601_v43 = vld [vmem:[%s10617_s0 + $0x1a8] sm:$0xff] }
 0x308   : > { %8822 = vmatmul.mubr.f32.gmra.mxu0 %v581_v31  ;;  %v10082_v31 = vld [vmem:[%s10625_s18 + $0xd8] sm:$0xff] }
 0x37f   : > { %v2080_v32 = vpop.xlane.xlu1 %2079 }
 0x380   : > { %9528 = vrcp.f32 %v2080_v32  ;;  %v594_v32 = vld [vmem:[%s10617_s0 + $0x170] sm:$0xff] }
 0x38d   : > { %v9529_v61 = vpop.eup %9528 }
 0x38e   : > { %v11457_v0 = vmul.f32 %v9529_v61, %v11332_v37  ;;  %v582_v37 = vld [vmem:[%s10617_s0 + $0x110] sm:$0xff]  ;;  %v600_v61 = vld [vmem:[%s10617_s0 + $0x1a0] sm:$0xff] }
 0x38f   : > { %8824 = vmatprep.mubr.f32.mxu0 %v582_v37  ;;  %v10083_v37 = vld [vmem:[%s10625_s18 + $0xd0] sm:$0xff] }
 0x390   : > { %v2091_v26 = vrot.slane %v11457_v0, %v11453_v12  ;;  %8825 = vmatmul.mubr.f32.gmra.mxu0 %v583_v35  ;;  %v10084_v35 = vld [vmem:[%s10625_s18 + $0xc8] sm:$0xff] }
 0x391   : > { %8827 = vmatprep.mubr.f32.mxu0 %v584_v17 }
 0x392   : > { %v11464_v10 = vrot.slane %v2091_v26, %v11453_v12  ;;  %v2099_v15 = vcombine.high %v2091_v26, %v2091_v26  ;;  %v10081_v26 = vld [vmem:[%s10625_s18 + $0xe0] sm:$0xff] }
 0x394   : > { %8606 = vmatmul.mubr.msk.f32.vlgmr.msra.gmra.mxu1 %vm14731_vm0, %v11464_v10  ;;  %8828 = vmatmul.mubr.f32.gmra.mxu0 %v585_v38  ;;  %v11493_v18 = vrot.slane %v2099_v15, %v11453_v12  ;;  %v2129_v9 = vcombine.high %v11464_v10, %v11464_v10  ;;  %v602_v10 = vld [vmem:[%s10617_s0 + $0x1b0] sm:$0xff]  ;;  %v607_v15 = vld [vmem:[%s10617_s0 + $0x1d8] sm:$0xff] }
 0x395   : > { %8609 = vmatpush3.msra.mxu1 %v10062_v4  ;;  %8624 = vmatprep.mubr.msk.f32.mxu1 %vm14740_vm4, %v14632_v1  ;;  %v603_v4 = vld [vmem:[%s10617_s0 + $0x1b8] sm:$0xff]  ;;  %v606_v38 = vld [vmem:[%s10617_s0 + $0x1d0] sm:$0xff] }
 0x396   : > { %8610 = vmatprep.subr.mxu1 %v14632_v1  ;;  %8830 = vmatprep.mubr.f32.mxu0 %v586_v41  ;;  %v2131_v17 = vcombine.high %v11493_v18, %v11493_v18  ;;  %v10086_v41 = vld [vmem:[%s10625_s18 + $0x138] sm:$0xff] }
 0x397   : > { %8611 = vmatpush3.msra.mxu1 %v10063_v8  ;;  %v604_v8 = vld [vmem:[%s10617_s0 + $0x1c0] sm:$0xff] }
 0x398   : > { %8612 = vmatprep.subr.mxu1 %v14632_v1  ;;  %8831 = vmatmul.mubr.f32.gmra.mxu0 %v587_v55  ;;  %v10088_v55 = vld [vmem:[%s10625_s18 + $0x128] sm:$0xff] }
 0x399   : > { %8613 = vmatpush3.msra.mxu1 %v10064_v39  ;;  %8833 = vmatprep.mubr.f32.mxu0 %v588_v45  ;;  %v10085_v39 = vld [vmem:[%s10625_s18 + $0xc0] sm:$0xff]  ;;  %v2084_v45 = vcombine.high %v11457_v0, %v11457_v0  ;;  %v10091_v0 = vld [vmem:[%s10625_s18 + $0x110] sm:$0xff] }
 0x39a   : > { %8614 = vmatprep.subr.mxu1 %v14632_v1 }
 0x39b   : > { %8615 = vmatpush3.msra.mxu1 %v10065_v28  ;;  %v605_v28 = vld [vmem:[%s10617_s0 + $0x1c8] sm:$0xff] }
 0x39c   : > { %8616 = vmatprep.subr.mxu1 %v14632_v1  ;;  %8834 = vmatmul.mubr.f32.gmra.mxu0 %v589_v27  ;;  %v10090_v27 = vld [vmem:[%s10625_s18 + $0x118] sm:$0xff] }
 0x39d   : > { %8617 = vmatpush3.msra.mxu1 %v10066_v59  ;;  %8836 = vmatprep.mubr.f32.mxu0 %v590_v13  ;;  %v10087_v59 = vld [vmem:[%s10625_s18 + $0x130] sm:$0xff]  ;;  %v2098_v13 = vrot.slane %v2084_v45, %v11453_v12  ;;  %v628_v45 = vld [vmem:[%s10617_s0 + $0x280] sm:$0xff] }
 0x39e   : > { %8618 = vmatprep.subr.mxu1 %v14632_v1 }
 0x39f   : > { %8619 = vmatpush3.msra.mxu1 %v10067_v51  ;;  %v608_v51 = vld [vmem:[%s10617_s0 + $0x1e0] sm:$0xff] }
 0x3a0   : > { %8620 = vmatprep.subr.mxu1 %v14632_v1  ;;  %8837 = vmatmul.mubr.f32.gmra.mxu0 %v591_v53  ;;  %v11584_v53 = vrot.slane %v2098_v13, %v11453_v12 }
 0x3a1   : > { %8621 = vmatpush3.msra.mxu1 %v10068_v16  ;;  %8839 = vmatprep.mubr.f32.mxu0 %v592_v40  ;;  %v10089_v16 = vld [vmem:[%s10625_s18 + $0x120] sm:$0xff] }
 0x3a2   : > { %8622 = vmatprep.subr.mxu1 %v14632_v1  ;;  %v10093_v40 = vld [vmem:[%s10625_s18 + $0x100] sm:$0xff] }
 0x3a3   : > { %8623 = vmatpush3.msra.mxu1 %v10069_v46  ;;  %v610_v46 = vld [vmem:[%s10617_s0 + $0x1f0] sm:$0xff] }
 0x3a4   : > { %8625 = vmatmul.mubr.msk.f32.vlgmr.msra.gmra.mxu1 %vm14731_vm0, %v11493_v18  ;;  %8627 = vmatprep.subr.mxu1 %v14632_v1  ;;  %v609_v18 = vld [vmem:[%s10617_s0 + $0x1e8] sm:$0xff] }
 0x3a5   : > { %8628 = vmatpush3.msra.mxu1 %v10070_v29  ;;  %8643 = vmatprep.mubr.msk.f32.mxu1 %vm14740_vm4, %v14632_v1  ;;  %v611_v29 = vld [vmem:[%s10617_s0 + $0x1f8] sm:$0xff] }
 0x3a6   : > { %8629 = vmatprep.subr.mxu1 %v14632_v1  ;;  %8840 = vmatmul.mubr.f32.gmra.mxu0 %v593_v56  ;;  %v10094_v56 = vld [vmem:[%s10625_s18 + $0x178] sm:$0xff] }
 0x3a7   : > { %8630 = vmatpush3.msra.mxu1 %v10071_v21  ;;  %8842 = vmatprep.mubr.f32.mxu0 %v594_v32  ;;  %v10092_v21 = vld [vmem:[%s10625_s18 + $0x108] sm:$0xff]  ;;  %v614_v32 = vld [vmem:[%s10617_s0 + $0x210] sm:$0xff] }
 0x3a8   : > { %8631 = vmatprep.subr.mxu1 %v14632_v1 }
 0x3a9   : > { %8632 = vmatpush3.msra.mxu1 %v10072_v62  ;;  %v612_v62 = vld [vmem:[%s10617_s0 + $0x200] sm:$0xff] }
 0x3aa   : > { %8633 = vmatprep.subr.mxu1 %v14632_v1  ;;  %8843 = vmatmul.mubr.f32.gmra.mxu0 %v595_v54  ;;  %v10096_v54 = vld [vmem:[%s10625_s18 + $0x168] sm:$0xff] }
 0x3ab   : > { %8634 = vmatpush3.msra.mxu1 %v10073_v47  ;;  %8845 = vmatprep.mubr.f32.mxu0 %v596_v57  ;;  %v613_v47 = vld [vmem:[%s10617_s0 + $0x208] sm:$0xff]  ;;  %v616_v57 = vld [vmem:[%s10617_s0 + $0x220] sm:$0xff] }
 0x3ac   : > { %8635 = vmatprep.subr.mxu1 %v14632_v1 }
 0x3ad   : > { %8636 = vmatpush3.msra.mxu1 %v10074_v34  ;;  %v10095_v34 = vld [vmem:[%s10625_s18 + $0x170] sm:$0xff] }
 0x3ae   : > { %8637 = vmatprep.subr.mxu1 %v14632_v1  ;;  %8846 = vmatmul.mubr.f32.gmra.mxu0 %v597_v33  ;;  %v618_v33 = vld [vmem:[%s10617_s0 + $0x230] sm:$0xff] }
 0x3af   : > { %8638 = vmatpush3.msra.mxu1 %v10075_v6  ;;  %8848 = vmatprep.mubr.f32.mxu0 %v598_v11  ;;  %v615_v6 = vld [vmem:[%s10617_s0 + $0x218] sm:$0xff]  ;;  %v2100_v11 = vcombine.high %v2098_v13, %v2098_v13 }
 0x3b0   : > { %8639 = vmatprep.subr.mxu1 %v14632_v1  ;;  %v631_v13 = vld [vmem:[%s10617_s0 + $0x298] sm:$0xff] }
 0x3b1   : > { %8640 = vmatpush3.msra.mxu1 %v10076_v42  ;;  %v10097_v42 = vld [vmem:[%s10625_s18 + $0x160] sm:$0xff] }
 0x3b2   : > { %8641 = vmatprep.subr.mxu1 %v14632_v1  ;;  %8849 = vmatmul.mubr.f32.gmra.mxu0 %v599_v48  ;;  %v10100_v48 = vld [vmem:[%s10625_s18 + $0x148] sm:$0xff] }
 0x3b3   : > { %8642 = vmatpush3.msra.mxu1 %v10077_v49  ;;  %8851 = vmatprep.mubr.f32.mxu0 %v600_v61  ;;  %v10098_v49 = vld [vmem:[%s10625_s18 + $0x158] sm:$0xff]  ;;  %v11615_v61 = vrot.slane %v2100_v11, %v11453_v12  ;;  %v642_v11 = vld [vmem:[%s10617_s0 + $0x2f0] sm:$0xff] }
 0x3b4   : > { %8644 = vmatmul.mubr.msk.f32.vlgmr.msra.gmra.mxu1 %vm14731_vm0, %v2129_v9  ;;  %8646 = vmatprep.subr.mxu1 %v14632_v1  ;;  %v617_v9 = vld [vmem:[%s10617_s0 + $0x228] sm:$0xff] }
 0x3b5   : > { %8647 = vmatpush3.msra.mxu1 %v10078_v50  ;;  %8662 = vmatprep.mubr.msk.f32.mxu1 %vm14740_vm4, %v14632_v1  ;;  %v10099_v50 = vld [vmem:[%s10625_s18 + $0x150] sm:$0xff] }
 0x3b6   : > { %8648 = vmatprep.subr.mxu1 %v14632_v1  ;;  %8852 = vmatmul.mubr.f32.gmra.mxu0 %v601_v43  ;;  %v10102_v43 = vld [vmem:[%s10625_s18 + $0x1b8] sm:$0xff] }
 0x3b7   : > { %8649 = vmatpush3.msra.mxu1 %v10079_v58  ;;  %8854 = vmatprep.mubr.f32.mxu0 %v602_v10  ;;  %v619_v58 = vld [vmem:[%s10617_s0 + $0x238] sm:$0xff]  ;;  %v621_v10 = vld [vmem:[%s10617_s0 + $0x248] sm:$0xff] }
 0x3b8   : > { %8650 = vmatprep.subr.mxu1 %v14632_v1 }
 0x3b9   : > { %8651 = vmatpush3.msra.mxu1 %v10080_v44  ;;  %v10101_v44 = vld [vmem:[%s10625_s18 + $0x140] sm:$0xff] }
 0x3ba   : > { %8652 = vmatprep.subr.mxu1 %v14632_v1  ;;  %8855 = vmatmul.mubr.f32.gmra.mxu0 %v603_v4  ;;  %v623_v4 = vld [vmem:[%s10617_s0 + $0x258] sm:$0xff] }
 0x3bb   : > { %8653 = vmatpush3.msra.mxu1 %v10081_v26  ;;  %8857 = vmatprep.mubr.f32.mxu0 %v604_v8  ;;  %v620_v26 = vld [vmem:[%s10617_s0 + $0x240] sm:$0xff]  ;;  %v10104_v8 = vld [vmem:[%s10625_s18 + $0x1a8] sm:$0xff] }
 0x3bc   : > { %8654 = vmatprep.subr.mxu1 %v14632_v1 }
 0x3bd   : > { %8655 = vmatpush3.msra.mxu1 %v10082_v31  ;;  %v10103_v31 = vld [vmem:[%s10625_s18 + $0x1b0] sm:$0xff] }
 0x3be   : > { %8656 = vmatprep.subr.mxu1 %v14632_v1  ;;  %8858 = vmatmul.mubr.f32.gmra.mxu0 %v605_v28  ;;  %v10106_v28 = vld [vmem:[%s10625_s18 + $0x198] sm:$0xff] }
 0x3bf   : > { %8657 = vmatpush3.msra.mxu1 %v10083_v37  ;;  %8860 = vmatprep.mubr.f32.mxu0 %v606_v38  ;;  %v622_v37 = vld [vmem:[%s10617_s0 + $0x250] sm:$0xff] }
 0x3c0   : > { %8658 = vmatprep.subr.mxu1 %v14632_v1  ;;  %v626_v38 = vld [vmem:[%s10617_s0 + $0x270] sm:$0xff] }
 0x3c1   : > { %8659 = vmatpush3.msra.mxu1 %v10084_v35  ;;  %v624_v35 = vld [vmem:[%s10617_s0 + $0x260] sm:$0xff] }
 0x3c2   : > { %8660 = vmatprep.subr.mxu1 %v14632_v1  ;;  %8861 = vmatmul.mubr.f32.gmra.mxu0 %v607_v15  ;;  %v10108_v15 = vld [vmem:[%s10625_s18 + $0x188] sm:$0xff] }
 0x3c3   : > { %8661 = vmatpush3.msra.mxu1 %v10085_v39  ;;  %8863 = vmatprep.mubr.f32.mxu0 %v608_v51  ;;  %v625_v39 = vld [vmem:[%s10617_s0 + $0x268] sm:$0xff]  ;;  %v2130_v51 = vcombine.high %v11584_v53, %v11584_v53 }
 0x3c4   : > { %8663 = vmatmul.mubr.msk.f32.vlgmr.msra.gmra.mxu1 %vm14731_vm0, %v2131_v17  ;;  %8665 = vmatprep.subr.mxu1 %v14632_v1  ;;  %v10105_v17 = vld [vmem:[%s10625_s18 + $0x1a0] sm:$0xff] }
 0x3c5   : > { %8666 = vmatpush3.msra.mxu1 %v10086_v41  ;;  %8681 = vmatprep.mubr.msk.f32.mxu1 %vm14740_vm4, %v14632_v1  ;;  %v10107_v41 = vld [vmem:[%s10625_s18 + $0x190] sm:$0xff] }
 0x3c6   : > { %8667 = vmatprep.subr.mxu1 %v14632_v1  ;;  %8864 = vmatmul.mubr.f32.gmra.mxu0 %v609_v18  ;;  %v629_v18 = vld [vmem:[%s10617_s0 + $0x288] sm:$0xff] }
 0x3c7   : > { %8668 = vmatpush3.msra.mxu1 %v10087_v59  ;;  %8866 = vmatprep.mubr.f32.mxu0 %v610_v46  ;;  %v627_v59 = vld [vmem:[%s10617_s0 + $0x278] sm:$0xff]  ;;  %v10111_v46 = vld [vmem:[%s10625_s18 + $0x1f0] sm:$0xff] }
 0x3c8   : > { %8669 = vmatprep.subr.mxu1 %v14632_v1 }
 0x3c9   : > { %8670 = vmatpush3.msra.mxu1 %v10088_v55  ;;  %v10109_v55 = vld [vmem:[%s10625_s18 + $0x180] sm:$0xff] }
 0x3ca   : > { %8671 = vmatprep.subr.mxu1 %v14632_v1  ;;  %8867 = vmatmul.mubr.f32.gmra.mxu0 %v611_v29  ;;  %v632_v29 = vld [vmem:[%s10617_s0 + $0x2a0] sm:$0xff] }
 0x3cb   : > { %8672 = vmatpush3.msra.mxu1 %v10089_v16  ;;  %8869 = vmatprep.mubr.f32.mxu0 %v612_v62  ;;  %v10110_v16 = vld [vmem:[%s10625_s18 + $0x1f8] sm:$0xff]  ;;  %v634_v62 = vld [vmem:[%s10617_s0 + $0x2b0] sm:$0xff] }
 0x3cc   : > { %8673 = vmatprep.subr.mxu1 %v14632_v1 }
 0x3cd   : > { %8674 = vmatpush3.msra.mxu1 %v10090_v27  ;;  %v630_v27 = vld [vmem:[%s10617_s0 + $0x290] sm:$0xff] }
 0x3ce   : > { %8675 = vmatprep.subr.mxu1 %v14632_v1  ;;  %8870 = vmatmul.mubr.f32.gmra.mxu0 %v613_v47  ;;  %v10115_v47 = vld [vmem:[%s10625_s18 + $0x1d0] sm:$0xff] }
 0x3cf   : > { %8676 = vmatpush3.msra.mxu1 %v10091_v0  ;;  %8872 = vmatprep.mubr.f32.mxu0 %v614_v32  ;;  %v10112_v0 = vld [vmem:[%s10625_s18 + $0x1e8] sm:$0xff] }
 0x3d0   : > { %8677 = vmatprep.subr.mxu1 %v14632_v1  ;;  %v10116_v32 = vld [vmem:[%s10625_s18 + $0x1c8] sm:$0xff] }
 0x3d1   : > { %8678 = vmatpush3.msra.mxu1 %v10092_v21  ;;  %v10113_v21 = vld [vmem:[%s10625_s18 + $0x1e0] sm:$0xff] }
 0x3d2   : > { %8679 = vmatprep.subr.mxu1 %v14632_v1  ;;  %8873 = vmatmul.mubr.f32.gmra.mxu0 %v615_v6  ;;  %v10117_v6 = vld [vmem:[%s10625_s18 + $0x1c0] sm:$0xff] }
 0x3d3   : > { %8680 = vmatpush3.msra.mxu1 %v10093_v40  ;;  %8875 = vmatprep.mubr.f32.mxu0 %v616_v57  ;;  %v10114_v40 = vld [vmem:[%s10625_s18 + $0x1d8] sm:$0xff]  ;;  %v637_v57 = vld [vmem:[%s10617_s0 + $0x2c8] sm:$0xff]  ;;  %s10288_s18 = sshll.u32 %s10391_s23, 4  ;;  %s10289_s18 = int_to_ptr.vmem [resolvable:$false] %s10288_s18 }
 0x3d4   : > { %8682 = vmatmul.mubr.msk.f32.vlgmr.msra.gmra.mxu1 %vm14731_vm0, %v11584_v53  ;;  %8684 = vmatprep.subr.mxu1 %v14632_v1  ;;  %v633_v53 = vld [vmem:[%s10617_s0 + $0x2a8] sm:$0xff]  ;;  %s10290_s12 = scalar_lea.vmem %s10289_s18, 256  ;;  %p10291_p0 = scmp.lt.s32.totalorder %s7742_s16, %s10289_s18 }
 0x3d5   : > { %8685 = vmatpush3.msra.mxu1 %v10094_v56  ;;  %8700 = vmatprep.mubr.msk.f32.mxu1 %vm14740_vm4, %v14632_v1  ;;  %v635_v56 = vld [vmem:[%s10617_s0 + $0x2b8] sm:$0xff] }
 0x3d6   : > { %8686 = vmatprep.subr.mxu1 %v14632_v1  ;;  %8876 = vmatmul.mubr.f32.gmra.mxu0 %v617_v9  ;;  %v639_v9 = vld [vmem:[%s10617_s0 + $0x2d8] sm:$0xff] }
 0x3d7   : > { %8687 = vmatpush3.msra.mxu1 %v10095_v34  ;;  %8878 = vmatprep.mubr.f32.mxu0 %v618_v33  ;;  %v2132_v34 = vcombine.high %v11615_v61, %v11615_v61  ;;  %v641_v33 = vld [vmem:[%s10617_s0 + $0x2e8] sm:$0xff] }
 0x3d8   : > { %8688 = vmatprep.subr.mxu1 %v14632_v1 }
 0x3d9   : > { %8689 = vmatpush3.msra.mxu1 %v10096_v54  ;;  %v636_v54 = vld [vmem:[%s10617_s0 + $0x2c0] sm:$0xff] }
 0x3da   : > { %8690 = vmatprep.subr.mxu1 %v14632_v1  ;;  %8879 = vmatmul.mubr.f32.gmra.mxu0 %v619_v58  ;;  %v644_v58 = vld [vmem:[%s10617_s0 + $0x300] sm:$0xff] }
 0x3db   : > { %8691 = vmatpush3.msra.mxu1 %v10097_v42  ;;  %8881 = vmatprep.mubr.f32.mxu0 %v620_v26  ;;  %v638_v42 = vld [vmem:[%s10617_s0 + $0x2d0] sm:$0xff]  ;;  %v647_v26 = vld [vmem:[%s10617_s0 + $0x318] sm:$0xff] }
 0x3dc   : > { %8692 = vmatprep.subr.mxu1 %v14632_v1 }
 0x3dd   : > { %8693 = vmatpush3.msra.mxu1 %v10098_v49  ;;  %v640_v49 = vld [vmem:[%s10617_s0 + $0x2e0] sm:$0xff] }
 0x3de   : > { %8694 = vmatprep.subr.mxu1 %v14632_v1  ;;  %8882 = vmatmul.mubr.f32.gmra.mxu0 %v621_v10 }
 0x3df   : > { %8695 = vmatpush3.msra.mxu1 %v10099_v50  ;;  %8884 = vmatprep.mubr.f32.mxu0 %v622_v37  ;;  %v643_v50 = vld [vmem:[%s10617_s0 + $0x2f8] sm:$0xff]  ;;  %v650_v37 = vld [vmem:[%s10617_s0 + $0x330] sm:$0xff] }
 0x3e0   : > { %8696 = vmatprep.subr.mxu1 %v14632_v1 }
 0x3e1   : > { %8697 = vmatpush3.msra.mxu1 %v10100_v48  ;;  %v645_v48 = vld [vmem:[%s10617_s0 + $0x308] sm:$0xff] }
 0x3e2   : > { %8698 = vmatprep.subr.mxu1 %v14632_v1  ;;  %8885 = vmatmul.mubr.f32.gmra.mxu0 %v623_v4 }
 0x3e3   : > { %8699 = vmatpush3.msra.mxu1 %v10101_v44  ;;  %8887 = vmatprep.mubr.f32.mxu0 %v624_v35  ;;  %v646_v44 = vld [vmem:[%s10617_s0 + $0x310] sm:$0xff] }
 0x3e4   : > { %8701 = vmatmul.mubr.msk.f32.vlgmr.msra.gmra.mxu1 %vm14731_vm0, %v11615_v61  ;;  %8703 = vmatprep.subr.mxu1 %v14632_v1  ;;  %v11691_v61 = vpop.f32.mrf.mxu0 }
 0x3e5   : > { %8704 = vmatpush3.msra.mxu1 %v10102_v43  ;;  %8719 = vmatprep.mubr.msk.f32.mxu1 %vm14740_vm4, %v14632_v1  ;;  %14834 = vst [vmem:[#allocation30_spill] sm:$0xff] %v11691_v61  ;;  %v648_v43 = vld [vmem:[%s10617_s0 + $0x320] sm:$0xff] }
 0x3e6   : > { %8705 = vmatprep.subr.mxu1 %v14632_v1  ;;  %8888 = vmatmul.mubr.f32.gmra.mxu0 %v625_v39  ;;  %v11696_v10 = vpop.f32.mrf.mxu0  ;;  %v653_v39 = vld [vmem:[%s10617_s0 + $0x348] sm:$0xff] }
 0x3e7   : > { %8706 = vmatpush3.msra.mxu1 %v10103_v31  ;;  %8890 = vmatprep.mubr.f32.mxu0 %v626_v38  ;;  %14835 = vst [vmem:[#allocation31_spill] sm:$0xff] %v11696_v10  ;;  %v649_v31 = vld [vmem:[%s10617_s0 + $0x328] sm:$0xff]  ;;  %v654_v38 = vld [vmem:[%s10617_s0 + $0x350] sm:$0xff] }
 0x3e8   : > { %8707 = vmatprep.subr.mxu1 %v14632_v1  ;;  %v11700_v4 = vpop.f32.mrf.mxu0 }
 0x3e9   : > { %8708 = vmatpush3.msra.mxu1 %v10104_v8  ;;  %14836 = vst [vmem:[#allocation32_spill] sm:$0xff] %v11700_v4  ;;  %v651_v8 = vld [vmem:[%s10617_s0 + $0x338] sm:$0xff] }
 0x3ea   : > { %8709 = vmatprep.subr.mxu1 %v14632_v1  ;;  %8891 = vmatmul.mubr.f32.gmra.mxu0 %v627_v59  ;;  %v11703_v35 = vpop.f32.mrf.mxu0  ;;  %v656_v59 = vld [vmem:[%s10617_s0 + $0x360] sm:$0xff] }
 0x3eb   : > { %8710 = vmatpush3.msra.mxu1 %v10105_v17  ;;  %8893 = vmatprep.mubr.f32.mxu0 %v628_v45  ;;  %14837 = vst [vmem:[#allocation33_spill] sm:$0xff] %v11703_v35  ;;  %v652_v17 = vld [vmem:[%s10617_s0 + $0x340] sm:$0xff] }
 0x3ec   : > { %8711 = vmatprep.subr.mxu1 %v14632_v1 }
 0x3ed   : > { %8712 = vmatpush3.msra.mxu1 %v10106_v28  ;;  %v11707_v28 = vpop.f32.mrf.mxu0 }
 0x3ee   : > { %8713 = vmatprep.subr.mxu1 %v14632_v1  ;;  %8894 = vmatmul.mubr.f32.gmra.mxu0 %v629_v18  ;;  %14838 = vst [vmem:[#allocation34_spill] sm:$0xff] %v11707_v28 }
 0x3ef   : > { %8714 = vmatpush3.msra.mxu1 %v10107_v41  ;;  %8896 = vmatprep.mubr.f32.mxu0 %v630_v27  ;;  %v655_v41 = vld [vmem:[%s10617_s0 + $0x358] sm:$0xff]  ;;  %v11726_v27 = vld [vmem:[%s10617_s0 + $0x388] sm:$0xff] }
 0x3f0   : > { %8715 = vmatprep.subr.mxu1 %v14632_v1 }
 0x3f1   : > { %8716 = vmatpush3.msra.mxu1 %v10108_v15  ;;  %v11712_v15 = vpop.f32.mrf.mxu0 }
 0x3f2   : > { %8717 = vmatprep.subr.mxu1 %v14632_v1  ;;  %8897 = vmatmul.mubr.f32.gmra.mxu0 %v631_v13  ;;  %14839 = vst [vmem:[#allocation35_spill] sm:$0xff] %v11712_v15 }
 0x3f3   : > { %8718 = vmatpush3.msra.mxu1 %v10109_v55  ;;  %8899 = vmatprep.mubr.f32.mxu0 %v632_v29  ;;  %v658_v55 = vld [vmem:[%s10617_s0 + $0x370] sm:$0xff]  ;;  %v11716_v45 = vpop.f32.mrf.mxu0  ;;  %v3437_v29 = vld [vmem:[%s14614_s7 + $0x38] sm:$0xff] }
 0x3f4   : > { %8720 = vmatmul.mubr.msk.f32.vlgmr.msra.gmra.mxu1 %vm14731_vm0, %v2130_v51  ;;  %8722 = vmatprep.subr.mxu1 %v14632_v1  ;;  %v657_v51 = vld [vmem:[%s10617_s0 + $0x368] sm:$0xff]  ;;  %14840 = vst [vmem:[#allocation36_spill] sm:$0xff] %v11716_v45 }
 0x3f5   : > { %8723 = vmatpush3.msra.mxu1 %v10110_v16  ;;  %8738 = vmatprep.mubr.msk.f32.mxu1 %vm14740_vm4, %v14632_v1  ;;  %v659_v16 = vld [vmem:[%s10617_s0 + $0x378] sm:$0xff]  ;;  %v11719_v18 = vpop.f32.mrf.mxu0 }
 0x3f6   : > { %8724 = vmatprep.subr.mxu1 %v14632_v1  ;;  %8900 = vmatmul.mubr.f32.gmra.mxu0 %v633_v53  ;;  %14841 = vst [vmem:[#allocation37_spill] sm:$0xff] %v11719_v18  ;;  %v3436_v53 = vld [vmem:[%s14614_s7 + $0x30] sm:$0xff] }
 0x3f7   : > { %8725 = vmatpush3.msra.mxu1 %v10111_v46  ;;  %8902 = vmatprep.mubr.f32.mxu0 %v634_v62  ;;  %v11722_v46 = vld [vmem:[%s10617_s0 + $0x380] sm:$0xff]  ;;  %v11728_v13 = vpop.f32.mrf.mxu0  ;;  %v3435_v62 = vld [vmem:[%s14614_s7 + $0x28] sm:$0xff] }
 0x3f8   : > { %8726 = vmatprep.subr.mxu1 %v14632_v1  ;;  %14842 = vst [vmem:[#allocation38_spill] sm:$0xff] %v11728_v13 }
 0x3f9   : > { %8727 = vmatpush3.msra.mxu1 %v10112_v0  ;;  %v11732_v0 = vld [vmem:[%s10617_s0 + $0x390] sm:$0xff] }
 0x3fa   : > { %8728 = vmatprep.subr.mxu1 %v14632_v1  ;;  %8903 = vmatmul.mubr.f32.gmra.mxu0 %v635_v56  ;;  %v3434_v56 = vld [vmem:[%s14614_s7 + $0x20] sm:$0xff] }
 0x3fb   : > { %8729 = vmatpush3.msra.mxu1 %v10113_v21  ;;  %8905 = vmatprep.mubr.f32.mxu0 %v636_v54  ;;  %v11739_v21 = vld [vmem:[%s10617_s0 + $0x398] sm:$0xff] }
 0x3fc   : > { %8730 = vmatprep.subr.mxu1 %v14632_v1 }
 0x3fd   : > { %8731 = vmatpush3.msra.mxu1 %v10114_v40  ;;  %v11746_v40 = vld [vmem:[%s10617_s0 + $0x3a0] sm:$0xff] }
 0x3fe   : > { %8732 = vmatprep.subr.mxu1 %v14632_v1  ;;  %8906 = vmatmul.mubr.f32.gmra.mxu0 %v637_v57  ;;  %v3432_v57 = vld [vmem:[%s14614_s7 + $0x10] sm:$0xff] }
 0x3ff   : > { %8733 = vmatpush3.msra.mxu1 %v10115_v47  ;;  %8908 = vmatprep.mubr.f32.mxu0 %v638_v42  ;;  %v11751_v47 = vpop.f32.mrf.mxu0  ;;  %v667_v42 = vld [vmem:[%s10617_s0 + $0x3b8] sm:$0xff] }
 0x400   : > { %8734 = vmatprep.subr.mxu1 %v14632_v1  ;;  %14843 = vst [vmem:[#allocation39_spill] sm:$0xff] %v11751_v47 }
 0x401   : > { %8735 = vmatpush3.msra.mxu1 %v10116_v32  ;;  %v11760_v32 = vld [vmem:[%s10617_s0 + $0x3a8] sm:$0xff]  ;;  %v11767_v54 = vpop.f32.mrf.mxu0 }
 0x402   : > { %8736 = vmatprep.subr.mxu1 %v14632_v1  ;;  %8909 = vmatmul.mubr.f32.gmra.mxu0 %v639_v9  ;;  %14844 = vst [vmem:[#allocation40_spill] sm:$0xff] %v11767_v54 }
 0x403   : > { %8737 = vmatpush3.msra.mxu1 %v10117_v6  ;;  %8911 = vmatprep.mubr.f32.mxu0 %v640_v49  ;;  %v3433_v6 = vld [vmem:[%s14614_s7 + $0x18] sm:$0xff]  ;;  %v11776_v9 = vpop.f32.mrf.mxu0  ;;  %v668_v49 = vld [vmem:[%s10617_s0 + $0x3c0] sm:$0xff] }
 0x404   : > { %8739 = vmatmul.mubr.msk.f32.vlgmr.msra.gmra.mxu1 %vm14731_vm0, %v2132_v34  ;;  %8965 = vmatprep.subr.mxu1 %v14632_v1  ;;  %v666_v34 = vld [vmem:[%s10617_s0 + $0x3b0] sm:$0xff]  ;;  %14845 = vst [vmem:[#allocation41_spill] sm:$0xff] %v11776_v9 }
 0x405   : > { %8981 = vmatprep.mubr.msk.f32.mxu1 %vm14740_vm4, %v14632_v1  ;;  %8966 = vmatpush3.msra.mxu1 %v3437_v29 }
 0x406   : > { %8912 = vmatmul.mubr.f32.gmra.mxu0 %v641_v33  ;;  %8967 = vmatprep.subr.mxu1 %v14632_v1  ;;  %v3431_v33 = vld [vmem:[%s14614_s7 + $0x8] sm:$0xff] }
 0x407   : > { %8914 = vmatprep.mubr.f32.mxu0 %v642_v11  ;;  %8968 = vmatpush3.msra.mxu1 %v3436_v53  ;;  %v669_v11 = vld [vmem:[%s10617_s0 + $0x3c8] sm:$0xff] }
 0x408   : > { %8969 = vmatprep.subr.mxu1 %v14632_v1 }
 0x409   : > { %8970 = vmatpush3.msra.mxu1 %v3435_v62 }
 0x40a   : > { %8915 = vmatmul.mubr.f32.gmra.mxu0 %v643_v50  ;;  %8971 = vmatprep.subr.mxu1 %v14632_v1  ;;  %v3430_v50 = vld [vmem:[%s14614_s7] sm:$0xff] }
 0x40b   : > { %8917 = vmatprep.mubr.f32.mxu0 %v644_v58  ;;  %8972 = vmatpush3.msra.mxu1 %v3434_v56  ;;  %v11788_v58 = vpop.f32.mrf.mxu0 }
 0x40c   : > { %8973 = vmatprep.subr.mxu1 %v14632_v1  ;;  %14846 = vst [vmem:[#allocation42_spill] sm:$0xff] %v11788_v58 }
 0x40d   : > { %8974 = vmatpush3.msra.mxu1 %v3433_v6 }
 0x40e   : > { %8918 = vmatmul.mubr.f32.gmra.mxu0 %v645_v48  ;;  %8975 = vmatprep.subr.mxu1 %v14632_v1  ;;  %v670_v48 = vld [vmem:[%s10617_s0 + $0x3d0] sm:$0xff] }
 0x40f   : > { %8920 = vmatprep.mubr.f32.mxu0 %v646_v44  ;;  %8976 = vmatpush3.msra.mxu1 %v3432_v57  ;;  %v671_v44 = vld [vmem:[%s10617_s0 + $0x3d8] sm:$0xff] }
 0x410   : > { %8977 = vmatprep.subr.mxu1 %v14632_v1 }
 0x411   : > { %8978 = vmatpush3.msra.mxu1 %v3431_v33 }
 0x412   : > { %8921 = vmatmul.mubr.f32.gmra.mxu0 %v647_v26  ;;  %8979 = vmatprep.subr.mxu1 %v14632_v1  ;;  %v672_v26 = vld [vmem:[%s10617_s0 + $0x3e0] sm:$0xff] }
 0x413   : > { %8923 = vmatprep.mubr.f32.mxu0 %v648_v43  ;;  %8980 = vmatpush3.msra.mxu1 %v3430_v50  ;;  %v675_v43 = vld [vmem:[%s10617_s0 + $0x3f8] sm:$0xff] }
 0x414   : > { %8984 = vmatprep.subr.mxu1 %v14632_v1  ;;  %9230 = vmatpush3.msra.mxu0 %v675_v43 }
 0x415   : > { %9231 = vmatprep.subr.mxu0 %v14632_v1 }
 0x416   : > { %8924 = vmatmul.mubr.f32.gmra.mxu0 %v649_v31  ;;  %v11795_v31 = vpop.f32.mrf.mxu0 }
 0x417   : > { %8926 = vmatprep.mubr.f32.mxu0 %v650_v37  ;;  %14847 = vst [vmem:[#allocation43_spill] sm:$0xff] %v11795_v31  ;;  %v674_v37 = vld [vmem:[%s10617_s0 + $0x3f0] sm:$0xff] }
 0x418   : > { %9232 = vmatpush3.msra.mxu0 %v674_v37 }
 0x419   : > { %9233 = vmatprep.subr.mxu0 %v14632_v1 }
 0x41a   : > { %8927 = vmatmul.mubr.f32.gmra.mxu0 %v651_v8  ;;  %v673_v8 = vld [vmem:[%s10617_s0 + $0x3e8] sm:$0xff] }
 0x41b   : > { %8929 = vmatprep.mubr.f32.mxu0 %v652_v17  ;;  %9234 = vmatpush3.msra.mxu0 %v673_v8  ;;  %v11801_v17 = vpop.f32.mrf.mxu0 }
 0x41c   : > { %14848 = vst [vmem:[#allocation44_spill] sm:$0xff] %v11801_v17  ;;  %9235 = vmatprep.subr.mxu0 %v14632_v1 }
 0x41d   : > { %9236 = vmatpush3.msra.mxu0 %v672_v26 }
 0x41e   : > { %8930 = vmatmul.mubr.f32.gmra.mxu0 %v653_v39  ;;  %9237 = vmatprep.subr.mxu0 %v14632_v1  ;;  %v11805_v39 = vpop.f32.mrf.mxu0 }
 0x41f   : > { %8932 = vmatprep.mubr.f32.mxu0 %v654_v38  ;;  %9238 = vmatpush3.msra.mxu0 %v671_v44  ;;  %14849 = vst [vmem:[#allocation45_spill] sm:$0xff] %v11805_v39 }
 0x420   : > { %9239 = vmatprep.subr.mxu0 %v14632_v1 }
 0x421   : > { %9240 = vmatpush3.msra.mxu0 %v670_v48 }
 0x422   : > { %8933 = vmatmul.mubr.f32.gmra.mxu0 %v655_v41  ;;  %9241 = vmatprep.subr.mxu0 %v14632_v1 }
 0x423   : > { %8935 = vmatprep.mubr.f32.mxu0 %v656_v59  ;;  %9242 = vmatpush3.msra.mxu0 %v669_v11 }
 0x424   : > { %9243 = vmatprep.subr.mxu0 %v14632_v1 }
 0x425   : > { %9244 = vmatpush3.msra.mxu0 %v668_v49 }
 0x426   : > { %8936 = vmatmul.mubr.f32.gmra.mxu0 %v657_v51  ;;  %9245 = vmatprep.subr.mxu0 %v14632_v1 }
 0x427   : > { %8938 = vmatprep.mubr.f32.mxu0 %v658_v55  ;;  %9246 = vmatpush3.msra.mxu0 %v667_v42 }
 0x428   : > { %9247 = vmatprep.subr.mxu0 %v14632_v1 }
 0x429   : > { %9248 = vmatpush3.msra.mxu0 %v666_v34 }
 0x42a   : > { %8939 = vmatmul.mubr.f32.gmra.mxu0 %v659_v16  ;;  %9249 = vmatprep.subr.mxu0 %v14632_v1 }
 0x42b   : > { %8941 = vmatprep.mubr.f32.mxu0 %v11722_v46  ;;  %9250 = vmatpush3.msra.mxu0 %v11760_v32 }
 0x42c   : > { %9251 = vmatprep.subr.mxu0 %v14632_v1 }
 0x42d   : > { %9252 = vmatpush3.msra.mxu0 %v11746_v40 }
 0x42e   : > { %8942 = vmatmul.mubr.f32.gmra.mxu0 %v11726_v27  ;;  %9253 = vmatprep.subr.mxu0 %v14632_v1 }
 0x42f   : > { %8944 = vmatprep.mubr.f32.mxu0 %v11732_v0  ;;  %9254 = vmatpush3.msra.mxu0 %v11739_v21 }
 0x430   : > { %9255 = vmatprep.subr.mxu0 %v14632_v1 }
 0x431   : > { %9256 = vmatpush3.msra.mxu0 %v11732_v0 }
 0x432   : > { %8945 = vmatmul.mubr.f32.gmra.mxu0 %v11739_v21  ;;  %9257 = vmatprep.subr.mxu0 %v14632_v1 }
 0x433   : > { %8947 = vmatprep.mubr.f32.mxu0 %v11746_v40  ;;  %9258 = vmatpush3.msra.mxu0 %v11726_v27 }
 0x434   : > { %9259 = vmatprep.subr.mxu0 %v14632_v1 }
 0x435   : > { %9260 = vmatpush3.msra.mxu0 %v11722_v46 }
 0x436   : > { %8948 = vmatmul.mubr.f32.gmra.mxu0 %v11760_v32  ;;  %9318 = vmatprep.subr.mxu0 %v14632_v1 }
 0x437   : > { %8950 = vmatprep.mubr.f32.mxu0 %v666_v34 }
 0x43a   : > { %8951 = vmatmul.mubr.f32.gmra.mxu0 %v667_v42  ;;  %v11829_v42 = vpop.f32.mrf.mxu0 }
 0x43b   : > { %8953 = vmatprep.mubr.f32.mxu0 %v668_v49  ;;  %14850 = vst [vmem:[#allocation46_spill] sm:$0xff] %v11829_v42 }
 0x43c   : > { %v11831_v49 = vpop.f32.mrf.mxu0 }
 0x43d   : > { %14851 = vst [vmem:[#allocation47_spill] sm:$0xff] %v11831_v49 }
 0x43e   : > { %8954 = vmatmul.mubr.f32.gmra.mxu0 %v669_v11  ;;  %v11833_v11 = vpop.f32.mrf.mxu0 }
 0x43f   : > { %8956 = vmatprep.mubr.f32.mxu0 %v670_v48  ;;  %14852 = vst [vmem:[#allocation48_spill] sm:$0xff] %v11833_v11 }
 0x442   : > { %8957 = vmatmul.mubr.f32.gmra.mxu0 %v671_v44 }
 0x443   : > { %8959 = vmatprep.mubr.f32.mxu0 %v672_v26 }
 0x446   : > { %8960 = vmatmul.mubr.f32.gmra.mxu0 %v673_v8 }
 0x447   : > { %8962 = vmatprep.mubr.f32.mxu0 %v674_v37 }
 0x44a   : > { %8963 = vmatmul.mubr.f32.gmra.mxu0 %v675_v43  ;;  %v11837_v43 = vpop.f32.mrf.mxu0 }
 0x44b   : > { %9261 = vmatprep.mubr.msk.f32.mxu0 %vm14740_vm4, %v14632_v1  ;;  %14853 = vst [vmem:[#allocation49_spill] sm:$0xff] %v11837_v43 }
 0x454   : > { %v2201_v38 = vpop.f32.mrf.mxu1 }
 0x456   : > { %v8607_v41 = vpop.f32.mrf.mxu1 }
 0x464   : > { %v2273_v59 = vpop.f32.mrf.mxu1 }
 0x465   : > { %v3446_v51 = vrot.slane %v2273_v59, 7 }
 0x466   : > { %v8626_v55 = vpop.f32.mrf.mxu1 }
 0x467   : > { %v3447_v16 = vsel %vm14772_vm9, %v3446_v51, %v2201_v38  ;;  %v11844_v55 = vpop.f32.mrf.mxu0  ;;  %vm14991_vm9 = vcmask 261312  }
 0x468   : > { %14855 = vst [vmem:[#allocation51_spill] sm:$0xff] %v11844_v55 }
 0x474   : > { %v2345_v29 = vpop.f32.mrf.mxu1 }
 0x475   : > { %v3448_v21 = vrot.slane %v2345_v29, 6 }
 0x476   : > { %v8645_v53 = vpop.f32.mrf.mxu1 }
 0x477   : > { %v3449_v40 = vsel %vm14761_vm10, %v3448_v21, %v3447_v16  ;;  %v11853_v16 = vpop.f32.mrf.mxu0  ;;  %v10122_v53 = vld [vmem:[%s10617_s0 + $0x28] sm:$0xff]  ;;  %vm14801_vm10 = vcmask 1048512  }
 0x478   : > { %14856 = vst [vmem:[#allocation52_spill] sm:$0xff] %v11853_v16 }
 0x484   : > { %v2417_v0 = vpop.f32.mrf.mxu1 }
 0x485   : > { %v3450_v46 = vrot.slane %v2417_v0, 5 }
 0x486   : > { %v8664_v62 = vpop.f32.mrf.mxu1 }
 0x487   : > { %v3451_v44 = vsel %vm14759_vm11, %v3450_v46, %v3449_v40  ;;  %v10123_v40 = vld [vmem:[%s10617_s0 + $0x20] sm:$0xff]  ;;  %v10124_v62 = vld [vmem:[%s10617_s0 + $0x18] sm:$0xff]  ;;  %vm4605_vm11 = vcmask 982912  }
 0x494   : > { %v2489_v56 = vpop.f32.mrf.mxu1 }
 0x495   : > { %v3452_v33 = vrot.slane %v2489_v56, 4  ;;  %v10125_v56 = vld [vmem:[%s10617_s0 + $0x10] sm:$0xff] }
 0x496   : > { %v8683_v32 = vpop.f32.mrf.mxu1 }
 0x497   : > { %v3453_v26 = vsel %vm14757_vm12, %v3452_v33, %v3451_v44  ;;  %vm4598_vm12 = vcmask 917312  }
 0x4a4   : > { %v2561_v34 = vpop.f32.mrf.mxu1 }
 0x4a5   : > { %v3454_v50 = vrot.slane %v2561_v34, 3  ;;  %v10126_v34 = vld [vmem:[%s10617_s0 + $0x8] sm:$0xff] }
 0x4a6   : > { %v8702_v6 = vpop.f32.mrf.mxu1 }
 0x4a7   : > { %v3455_v8 = vsel %vm14752_vm13, %v3454_v50, %v3453_v26  ;;  %v10127_v6 = vld [vmem:[%s10617_s0] sm:$0xff]  ;;  %vm14798_vm13 = vcmask 851712  }
 0x4b4   : > { %v2633_v27 = vpop.f32.mrf.mxu1 }
 0x4b5   : > { %v3456_v48 = vrot.slane %v2633_v27, 2 }
 0x4b6   : > { %v8721_v57 = vpop.f32.mrf.mxu1 }
 0x4b7   : > { %v3457_v41 = vsel %vm14749_vm14, %v3456_v48, %v3455_v8  ;;  %vm14799_vm14 = vcmask 786112  }
 0x4c4   : > { %v2705_v37 = vpop.f32.mrf.mxu1 }
 0x4c5   : > { %v3458_v38 = vrot.slane %v2705_v37, 1 }
 0x4c6   : > { %v8740_v59 = vpop.f32.mrf.mxu1 }
 0x4c7   : > { %v11842_v51 = vsel %vm14747_vm15, %v3458_v38, %v3457_v41  ;;  %vm4577_vm15 = vcmask 720512  }
 0x4c8   : > { %14854 = vst [vmem:[#allocation50_spill] sm:$0xff] %v11842_v51  ;;  %8982 = vmatmul.mubr.msk.f32.vlgmr.msra.gmra.mxu1 %vm14731_vm0, %v11842_v51  ;;  %vm14970_vm0 = vcmask 261312  }
 0x4c9   : > { %8985 = vmatpush3.msra.mxu1 %v11435_v36  ;;  %9016 = vmatprep.mubr.msk.f32.mxu1 %vm14740_vm4, %v14632_v1  ;;  %v11859_v36 = vpop.f32.mrf.mxu0  ;;  %vm4570_vm4 = vcmask 654912  }
 0x4ca   : > { %8986 = vmatprep.subr.mxu1 %v14632_v1  ;;  %14857 = vst [vmem:[#allocation53_spill] sm:$0xff] %v11859_v36 }
 0x4cb   : > { %8987 = vmatpush3.msra.mxu1 %v11431_v20  ;;  %v11865_v20 = vpop.f32.mrf.mxu0 }
 0x4cc   : > { %8988 = vmatprep.subr.mxu1 %v14632_v1  ;;  %14858 = vst [vmem:[#allocation54_spill] sm:$0xff] %v11865_v20 }
 0x4cd   : > { %8989 = vmatpush3.msra.mxu1 %v11427_v24  ;;  %v10118_v24 = vld [vmem:[%s10617_s0 + $0x48] sm:$0xff]  ;;  %v11871_v29 = vpop.f32.mrf.mxu0 }
 0x4ce   : > { %8990 = vmatprep.subr.mxu1 %v14632_v1  ;;  %14859 = vst [vmem:[#allocation55_spill] sm:$0xff] %v11871_v29 }
 0x4cf   : > { %8991 = vmatpush3.msra.mxu1 %v11423_v25  ;;  %v10119_v25 = vld [vmem:[%s10617_s0 + $0x40] sm:$0xff]  ;;  %v11877_v21 = vpop.f32.mrf.mxu0 }
 0x4d0   : > { %8992 = vmatprep.subr.mxu1 %v14632_v1  ;;  %14860 = vst [vmem:[#allocation56_spill] sm:$0xff] %v11877_v21 }
 0x4d1   : > { %8993 = vmatpush3.msra.mxu1 %v11419_v52  ;;  %v10120_v52 = vld [vmem:[%s10617_s0 + $0x38] sm:$0xff]  ;;  %v11883_v0 = vpop.f32.mrf.mxu0 }
 0x4d2   : > { %8994 = vmatprep.subr.mxu1 %v14632_v1  ;;  %14861 = vst [vmem:[#allocation57_spill] sm:$0xff] %v11883_v0 }
 0x4d3   : > { %8995 = vmatpush3.msra.mxu1 %v11415_v22  ;;  %v10121_v22 = vld [vmem:[%s10617_s0 + $0x30] sm:$0xff]  ;;  %v11889_v32 = vpop.f32.mrf.mxu0 }
 0x4d4   : > { %8996 = vmatprep.subr.mxu1 %v14632_v1  ;;  %14862 = vst [vmem:[#allocation58_spill] sm:$0xff] %v11889_v32 }
 0x4d5   : > { %8997 = vmatpush3.msra.mxu1 %v10118_v24  ;;  %v11895_v27 = vpop.f32.mrf.mxu0 }
 0x4d6   : > { %8998 = vmatprep.subr.mxu1 %v14632_v1  ;;  %14863 = vst [vmem:[#allocation59_spill] sm:$0xff] %v11895_v27 }
 0x4d7   : > { %8999 = vmatpush3.msra.mxu1 %v10119_v25  ;;  %v11898_v57 = vpop.f32.mrf.mxu0 }
 0x4d8   : > { %9000 = vmatprep.subr.mxu1 %v14632_v1  ;;  %14864 = vst [vmem:[#allocation60_spill] sm:$0xff] %v11898_v57 }
 0x4d9   : > { %9001 = vmatpush3.msra.mxu1 %v10120_v52  ;;  %v11900_v46 = vpop.f32.mrf.mxu0 }
 0x4da   : > { %9002 = vmatprep.subr.mxu1 %v14632_v1  ;;  %14865 = vst [vmem:[#allocation61_spill] sm:$0xff] %v11900_v46 }
 0x4db   : > { %9003 = vmatpush3.msra.mxu1 %v10121_v22  ;;  %v11902_v33 = vpop.f32.mrf.mxu0 }
 0x4dc   : > { %9004 = vmatprep.subr.mxu1 %v14632_v1  ;;  %14866 = vst [vmem:[#allocation62_spill] sm:$0xff] %v11902_v33 }
 0x4dd   : > { %9005 = vmatpush3.msra.mxu1 %v10122_v53  ;;  %v11904_v50 = vpop.f32.mrf.mxu0 }
 0x4de   : > { %9006 = vmatprep.subr.mxu1 %v14632_v1  ;;  %14867 = vst [vmem:[#allocation63_spill] sm:$0xff] %v11904_v50 }
 0x4df   : > { %9007 = vmatpush3.msra.mxu1 %v10123_v40  ;;  %v11906_v48 = vpop.f32.mrf.mxu0 }
 0x4e0   : > { %9008 = vmatprep.subr.mxu1 %v14632_v1  ;;  %14868 = vst [vmem:[#allocation64_spill] sm:$0xff] %v11906_v48 }
 0x4e1   : > { %9009 = vmatpush3.msra.mxu1 %v10124_v62  ;;  %v11908_v44 = vpop.f32.mrf.mxu0 }
 0x4e2   : > { %9010 = vmatprep.subr.mxu1 %v14632_v1  ;;  %14869 = vst [vmem:[#allocation65_spill] sm:$0xff] %v11908_v44 }
 0x4e3   : > { %9011 = vmatpush3.msra.mxu1 %v10125_v56  ;;  %v11910_v26 = vpop.f32.mrf.mxu0 }
 0x4e4   : > { %9012 = vmatprep.subr.mxu1 %v14632_v1  ;;  %14870 = vst [vmem:[#allocation66_spill] sm:$0xff] %v11910_v26 }
 0x4e5   : > { %9013 = vmatpush3.msra.mxu1 %v10126_v34  ;;  %v11912_v37 = vpop.f32.mrf.mxu0 }
 0x4e6   : > { %9014 = vmatprep.subr.mxu1 %v14632_v1  ;;  %14871 = vst [vmem:[#allocation67_spill] sm:$0xff] %v11912_v37 }
 0x4e7   : > { %9015 = vmatpush3.msra.mxu1 %v10127_v6  ;;  %v11914_v8 = vpop.f32.mrf.mxu0 }
 0x4e8   : > { %9019 = vmatprep.subr.mxu1 %v14632_v1  ;;  %14872 = vst [vmem:[#allocation68_spill] sm:$0xff] %v11914_v8 }
 0x4e9   : > { %v11916_v38 = vpop.f32.mrf.mxu0 }
 0x4ea   : > { %14873 = vst [vmem:[#allocation69_spill] sm:$0xff] %v11916_v38 }
 0x4eb   : > { %v11918_v41 = vpop.f32.mrf.mxu0 }
 0x4ec   : > { %14874 = vst [vmem:[#allocation70_spill] sm:$0xff] %v11918_v41 }
 0x4ed   : > { %v11920_v59 = vpop.f32.mrf.mxu0 }
 0x4ee   : > { %14875 = vst [vmem:[#allocation71_spill] sm:$0xff] %v11920_v59 }
 0x4ef   : > { %v11922_v24 = vpop.f32.mrf.mxu0 }
 0x4f0   : > { %14876 = vst [vmem:[#allocation72_spill] sm:$0xff] %v11922_v24 }
 0x4f1   : > { %v11924_v25 = vpop.f32.mrf.mxu0 }
 0x4f2   : > { %14877 = vst [vmem:[#allocation73_spill] sm:$0xff] %v11924_v25 }
 0x4f3   : > { %v11926_v52 = vpop.f32.mrf.mxu0 }
 0x4f4   : > { %14878 = vst [vmem:[#allocation74_spill] sm:$0xff] %v11926_v52 }
 0x4f5   : > { %v11928_v22 = vpop.f32.mrf.mxu0 }
 0x4f6   : > { %14879 = vst [vmem:[#allocation75_spill] sm:$0xff] %v11928_v22 }
 0x4f7   : > { %v11930_v53 = vpop.f32.mrf.mxu0 }
 0x4f8   : > { %14880 = vst [vmem:[#allocation76_spill] sm:$0xff] %v11930_v53 }
 0x4f9   : > { %v11932_v40 = vpop.f32.mrf.mxu0 }
 0x4fa   : > { %14881 = vst [vmem:[#allocation77_spill] sm:$0xff] %v11932_v40 }
 0x4fb   : > { %v11934_v62 = vpop.f32.mrf.mxu0 }
 0x4fc   : > { %14882 = vst [vmem:[#allocation78_spill] sm:$0xff] %v11934_v62 }
 0x4fd   : > { %v11936_v56 = vpop.f32.mrf.mxu0 }
 0x4fe   : > { %14883 = vst [vmem:[#allocation79_spill] sm:$0xff] %v11936_v56 }
 0x4ff   : > { %v11938_v34 = vpop.f32.mrf.mxu0 }
 0x500   : > { %14884 = vst [vmem:[#allocation80_spill] sm:$0xff] %v11938_v34 }
 0x501   : > { %v11940_v6 = vpop.f32.mrf.mxu0 }
 0x502   : > { %14885 = vst [vmem:[#allocation81_spill] sm:$0xff] %v11940_v6 }
 0x503   : > { %v11942_v1 = vpop.f32.mrf.mxu0 }
 0x504   : > { %14886 = vst [vmem:[#allocation82_spill] sm:$0xff] %v11942_v1 }
 0x505   : > { %v11944_v51 = vpop.f32.mrf.mxu0 }
 0x506   : > { %14887 = vst [vmem:[#allocation83_spill] sm:$0xff] %v11944_v51 }
 0x507   : > { %v11946_v7 = vpop.f32.mrf.mxu0 }
 0x508   : > { %14888 = vst [vmem:[#allocation84_spill] sm:$0xff] %v11946_v7 }
 0x509   : > { %v11948_v19 = vpop.f32.mrf.mxu0 }
 0x50a   : > { %14889 = vst [vmem:[#allocation85_spill] sm:$0xff] %v11948_v19 }
 0x50b   : > { %v11950_v30 = vpop.f32.mrf.mxu0 }
 0x50c   : > { %14890 = vst [vmem:[#allocation86_spill] sm:$0xff] %v11950_v30 }
 0x50d   : > { %v11952_v23 = vpop.f32.mrf.mxu0 }
 0x50e   : > { %14891 = vst [vmem:[#allocation87_spill] sm:$0xff] %v11952_v23 }
 0x50f   : > { %v11954_v14 = vpop.f32.mrf.mxu0 }
 0x510   : > { %14892 = vst [vmem:[#allocation88_spill] sm:$0xff] %v11954_v14 }
 0x511   : > { %v11956_v60 = vpop.f32.mrf.mxu0 }
 0x512   : > { %14893 = vst [vmem:[#allocation89_spill] sm:$0xff] %v11956_v60 }
 0x513   : > { %v11958_v3 = vpop.f32.mrf.mxu0 }
 0x514   : > { %14894 = vst [vmem:[#allocation90_spill] sm:$0xff] %v11958_v3 }
 0x515   : > { %v11960_v2 = vpop.f32.mrf.mxu0 }
 0x516   : > { %14895 = vst [vmem:[#allocation91_spill] sm:$0xff] %v11960_v2  ;;  %v11980_v2 = vsub.s32 0, %v11074_v63 }
 0x517   : > { %v11962_v5 = vpop.f32.mrf.mxu0 }
 0x518   : > { %14896 = vst [vmem:[#allocation92_spill] sm:$0xff] %v11962_v5  ;;  %14904 = vst [vmem:[#allocation100_spill] sm:$0xff] %v11980_v2 }
 0x519   : > { %v11964_v34 = vpop.f32.mrf.mxu0 }
 0x51a   : > { %14897 = vst [vmem:[#allocation93_spill] sm:$0xff] %v11964_v34 }
 0x51b   : > { %v11966_v51 = vpop.f32.mrf.mxu0 }
 0x51c   : > { %14898 = vst [vmem:[#allocation94_spill] sm:$0xff] %v11966_v51 }
 0x51d   : > { %v11968_v7 = vpop.f32.mrf.mxu0 }
 0x51e   : > { %14899 = vst [vmem:[#allocation95_spill] sm:$0xff] %v11968_v7 }
 0x51f   : > { %v11970_v40 = vpop.f32.mrf.mxu0 }
 0x520   : > { %14900 = vst [vmem:[#allocation96_spill] sm:$0xff] %v11970_v40 }
 0x521   : > { %v11972_v62 = vpop.f32.mrf.mxu0 }
 0x522   : > { %14901 = vst [vmem:[#allocation97_spill] sm:$0xff] %v11972_v62 }
 0x523   : > { %v11974_v23 = vpop.f32.mrf.mxu0 }
 0x524   : > { %14902 = vst [vmem:[#allocation98_spill] sm:$0xff] %v11974_v23 }
 0x525   : > { %v11976_v14 = vpop.f32.mrf.mxu0 }
 0x526   : > { %14903 = vst [vmem:[#allocation99_spill] sm:$0xff] %v11976_v14 }
 0x527   : > { %v11983_v51 = vpop.f32.mrf.mxu0 }
 0x528   : > { %14905 = vst [vmem:[#allocation101_spill] sm:$0xff] %v11983_v51 }
 0x529   : > { %v11988_v19 = vpop.f32.mrf.mxu0 }
 0x52a   : > { %14906 = vst [vmem:[#allocation102_spill] sm:$0xff] %v11988_v19 }
 0x52b   : > { %v11998_v25 = vpop.f32.mrf.mxu0 }
 0x52c   : > { %14907 = vst [vmem:[#allocation103_spill] sm:$0xff] %v11998_v25 }
 0x52d   : > { %v12000_v6 = vpop.f32.mrf.mxu0 }
 0x52e   : > { %14908 = vst [vmem:[#allocation104_spill] sm:$0xff] %v12000_v6 }
 0x588   : > { %v3528_v60 = vpop.f32.mrf.mxu1 }
 0x589   : > { %v3540_v3 = vrot.slane %v3528_v60, %v11453_v12  ;;  %v3533_v6 = vcombine.high %v3528_v60, %v3528_v60 }
 0x58a   : > { %v8983_v5 = vpop.f32.mrf.mxu1 }
 0x58b   : > { %v3556_v34 = vrot.slane %v3540_v3, %v11453_v12  ;;  %v3548_v52 = vcombine.high %v3540_v3, %v3540_v3 }
 0x58d   : > { %v11986_v22 = vrot.slane %v3556_v34, %v11980_v2  ;;  %v3578_v3 = vcombine.high %v3556_v34, %v3556_v34  ;;  %v12028_v34 = vld [vmem:[%s14615_s8] ss:$0 sm:$0xff] }
 0x58f   : > { %v3623_v53 = vadd.f32 %v11691_v61, %v11986_v22  ;;  %v3622_v30 = vadd.f32 %v11986_v22, %v11696_v10  ;;  %v3624_v63 = vadd.f32 %v11986_v22, %v11703_v35  ;;  %v3626_v5 = vadd.f32 %v11986_v22, %v11712_v15 }
 0x590   : > { %v12003_v61 = vrot.slane %v3548_v52, %v11453_v12  ;;  %v3627_v35 = vadd.f32 %v11707_v28, %v11986_v22  ;;  %v3628_v15 = vadd.f32 %v11986_v22, %v11719_v18  ;;  %v3629_v52 = vadd.f32 %v11716_v45, %v11986_v22 }
 0x591   : > { %9530 = vtanh.f32 %v3623_v53  ;;  %v3625_v53 = vadd.f32 %v11700_v4, %v11986_v22  ;;  %v3631_v4 = vadd.f32 %v11728_v13, %v11986_v22  ;;  %v3632_v13 = vadd.f32 %v11986_v22, %v11776_v9 }
 0x592   : > { %9532 = vtanh.f32 %v3622_v30  ;;  %v12011_v30 = vpop.f32.mrf.mxu0  ;;  %v3635_v9 = vadd.f32 %v11788_v58, %v11986_v22 }
 0x593   : > { %9534 = vtanh.f32 %v3624_v63  ;;  %14909 = vst [vmem:[#allocation105_spill] sm:$0xff] %v12011_v30  ;;  %v3630_v63 = vadd.f32 %v11986_v22, %v11751_v47 }
 0x594   : > { %9536 = vtanh.f32 %v3626_v5  ;;  %v12017_v5 = vrot.slane %v12003_v61, %v11980_v2  ;;  %v12023_v10 = vpop.f32.mrf.mxu0 }
 0x595   : > { %9538 = vtanh.f32 %v3625_v53  ;;  %14910 = vst [vmem:[#allocation106_spill] sm:$0xff] %v12023_v10 }
 0x596   : > { %9540 = vtanh.f32 %v3627_v35  ;;  %v12032_v35 = vrot.slane %v3578_v3, %v11980_v2  ;;  %v12042_v3 = vpop.f32.mrf.mxu0 }
 0x597   : > { %9542 = vtanh.f32 %v3628_v15  ;;  %v3638_v15 = vadd.f32 %v12017_v5, %v11831_v49  ;;  %14911 = vst [vmem:[#allocation107_spill] sm:$0xff] %v12042_v3 }
 0x598   : > { %9544 = vtanh.f32 %v3630_v63 }
 0x599   : > { %9546 = vtanh.f32 %v3629_v52 }
 0x59a   : > { %9548 = vtanh.f32 %v3631_v4  ;;  %v3654_v4 = vadd.f32 %v12032_v35, %v11906_v48 }
 0x59b   : > { %9550 = vtanh.f32 %v3638_v15 }
 0x59c   : > { %9552 = vtanh.f32 %v3632_v13  ;;  %v3634_v13 = vadd.f32 %v11986_v22, %v11795_v31  ;;  %v3642_v31 = vadd.f32 %v12017_v5, %v11853_v16 }
 0x59d   : > { %9554 = vtanh.f32 %v3654_v4 }
 0x59e   : > { %v9531_v28 = vpop.eup %9530 }
 0x59f   : > { %v9533_v18 = vpop.eup %9532  ;;  %v3879_v53 = vmul.f32 %v12028_v34, %v9531_v28 }
 0x5a0   : > { %v9535_v47 = vpop.eup %9534  ;;  %v3878_v45 = vmul.f32 %v12028_v34, %v9533_v18  ;;  %v12045_v18 = vrot.slane %v3533_v6, %v11453_v12 }
 0x5a1   : > { %v4009_v60 = vsel %vm14797_vm1, %v3879_v53, 0.0  ;;  %v9537_v10 = vpop.eup %9536  ;;  %v3880_v63 = vmul.f32 %v12028_v34, %v9535_v47 }
 0x5a2   : > { %4010 = vadd.xlane.f32.xlu1 %v4009_v60  ;;  %v4006_v28 = vsel %vm14797_vm1, %v3878_v45, 0.0  ;;  %v3882_v52 = vmul.f32 %v12028_v34, %v9537_v10  ;;  %v3633_v45 = vadd.f32 %v11767_v54, %v11986_v22  ;;  %v12054_v60 = vpop.f32.mrf.mxu0  ;;  %v12058_v6 = vrot.slane %v12045_v18, %v11453_v12  ;;  %v9539_v15 = vpop.eup %9538 }
 0x5a3   : > { %4007 = vadd.xlane.f32.xlu0 %v4006_v28  ;;  %v4012_v47 = vsel %vm14797_vm1, %v3880_v63, 0.0  ;;  %14912 = vst [vmem:[#allocation108_spill] sm:$0xff] %v12054_v60  ;;  %v3656_v10 = vadd.f32 %v12032_v35, %v11910_v26  ;;  %v9541_v28 = vpop.eup %9540  ;;  %v3881_v63 = vmul.f32 %v12028_v34, %v9539_v15 }
 0x5a4   : > { %v4018_v53 = vsel %vm14797_vm1, %v3882_v52, 0.0  ;;  %9556 = vtanh.f32 %v3633_v45  ;;  %v9543_v52 = vpop.eup %9542  ;;  %v12069_v48 = vrot.slane %v12058_v6, %v11980_v2  ;;  %v3883_v4 = vmul.f32 %v12028_v34, %v9541_v28 }
 0x5a5   : > { %v4015_v26 = vsel %vm14797_vm1, %v3881_v63, 0.0  ;;  %v3884_v45 = vmul.f32 %v12028_v34, %v9543_v52  ;;  %9558 = vtanh.f32 %v3656_v10 }
 0x5a6   : > { %4019 = vadd.xlane.f32.xlu1 %v4018_v53  ;;  %v12065_v53 = vpop.f32.mrf.mxu0  ;;  %v4021_v15 = vsel %vm14797_vm1, %v3883_v4, 0.0  ;;  %9560 = vtanh.f32 %v3634_v13 }
 0x5a7   : > { %4013 = vadd.xlane.f32.xlu0 %v4012_v47  ;;  %14913 = vst [vmem:[#allocation109_spill] sm:$0xff] %v12065_v53  ;;  %v9545_v47 = vpop.eup %9544  ;;  %v4024_v63 = vsel %vm14797_vm1, %v3884_v45, 0.0  ;;  %9562 = vtanh.f32 %v3642_v31  ;;  %v3643_v45 = vadd.f32 %v11844_v55, %v12017_v5 }
 0x5a8   : > { %v9547_v54 = vpop.eup %9546  ;;  %v3886_v49 = vmul.f32 %v12028_v34, %v9545_v47  ;;  %v12080_v60 = vpop.f32.mrf.mxu0  ;;  %9564 = vtanh.f32 %v3635_v9  ;;  %v3636_v47 = vadd.f32 %v11986_v22, %v11805_v39 }
 0x5a9   : > { %v9549_v28 = vpop.eup %9548  ;;  %14914 = vst [vmem:[#allocation110_spill] sm:$0xff] %v12080_v60  ;;  %v3885_v10 = vmul.f32 %v12028_v34, %v9547_v54 }
 0x5aa   : > { %4022 = vadd.xlane.f32.xlu1 %v4021_v15  ;;  %v9551_v52 = vpop.eup %9550  ;;  %v4030_v4 = vsel %vm14797_vm1, %v3886_v49, 0.0  ;;  %v3887_v13 = vmul.f32 %v12028_v34, %v9549_v28  ;;  %v12090_v16 = vpop.f32.mrf.mxu0  ;;  %v3637_v28 = vadd.f32 %v11801_v17, %v11986_v22  ;;  %v3639_v22 = vadd.f32 %v11829_v42, %v12017_v5 }
 0x5ab   : > { %4016 = vadd.xlane.f32.xlu0 %v4015_v26  ;;  %v3687_v26 = vadd.f32 %v11968_v7, %v12069_v48  ;;  %v9553_v15 = vpop.eup %9552  ;;  %14915 = vst [vmem:[#allocation111_spill] sm:$0xff] %v12090_v16  ;;  %v4027_v54 = vsel %vm14797_vm1, %v3885_v10, 0.0  ;;  %v3894_v31 = vmul.f32 %v12028_v34, %v9551_v52  ;;  %v3659_v52 = vadd.f32 %v11912_v37, %v12032_v35 }
 0x5ac   : > { %v4033_v49 = vsel %vm14797_vm1, %v3887_v13, 0.0  ;;  %v3888_v9 = vmul.f32 %v12028_v34, %v9553_v15  ;;  %v12100_v7 = vpop.f32.mrf.mxu0 }
 0x5ad   : > { %9566 = vtanh.f32 %v3687_v26  ;;  %14916 = vst [vmem:[#allocation112_spill] sm:$0xff] %v12100_v7  ;;  %v4054_v10 = vsel %vm14797_vm1, %v3894_v31, 0.0 }
 0x5ae   : > { %4031 = vadd.xlane.f32.xlu1 %v4030_v4  ;;  %9568 = vtanh.f32 %v3636_v47  ;;  %v4036_v13 = vsel %vm14797_vm1, %v3888_v9, 0.0 }
 0x5af   : > { %4025 = vadd.xlane.f32.xlu0 %v4024_v63  ;;  %v9555_v63 = vpop.eup %9554  ;;  %9570 = vtanh.f32 %v3643_v45 }
 0x5b0   : > { %v3910_v26 = vmul.f32 %v12028_v34, %v9555_v63  ;;  %9572 = vtanh.f32 %v3637_v28  ;;  %v3689_v63 = vadd.f32 %v11972_v62, %v12069_v48 }
 0x5b1   : > { %v9557_v4 = vpop.eup %9556  ;;  %9574 = vtanh.f32 %v3659_v52 }
 0x5b2   : > { %4034 = vadd.xlane.f32.xlu1 %v4033_v49  ;;  %v3889_v47 = vmul.f32 %v12028_v34, %v9557_v4  ;;  %v12110_v49 = vpop.f32.mrf.mxu0  ;;  %v4102_v31 = vsel %vm14797_vm1, %v3910_v26, 0.0  ;;  %9576 = vtanh.f32 %v3639_v22  ;;  %v3640_v4 = vadd.f32 %v12017_v5, %v11837_v43 }
 0x5b3   : > { %4028 = vadd.xlane.f32.xlu0 %v4027_v54  ;;  %v9559_v54 = vpop.eup %9558  ;;  %14917 = vst [vmem:[#allocation113_spill] sm:$0xff] %v12110_v49  ;;  %9578 = vtanh.f32 %v3689_v63 }
 0x5b4   : > { %v9561_v15 = vpop.eup %9560  ;;  %v3912_v45 = vmul.f32 %v12028_v34, %v9559_v54  ;;  %v12120_v37 = vpop.f32.mrf.mxu0  ;;  %v3660_v54 = vadd.f32 %v12032_v35, %v11918_v41  ;;  %9580 = vtanh.f32 %v3640_v4 }
 0x5b5   : > { %v9563_v9 = vpop.eup %9562  ;;  %v3890_v28 = vmul.f32 %v12028_v34, %v9561_v15  ;;  %14918 = vst [vmem:[#allocation114_spill] sm:$0xff] %v12120_v37  ;;  %v3655_v15 = vadd.f32 %v11904_v50, %v12032_v35 }
 0x5b6   : > { %4037 = vadd.xlane.f32.xlu1 %v4036_v13  ;;  %v9565_v13 = vpop.eup %9564  ;;  %v4108_v26 = vsel %vm14797_vm1, %v3912_v45, 0.0  ;;  %v3898_v52 = vmul.f32 %v12028_v34, %v9563_v9  ;;  %v12130_v62 = vpop.f32.mrf.mxu0  ;;  %9582 = vtanh.f32 %v3660_v54  ;;  %v3690_v9 = vadd.f32 %v12069_v48, %v11983_v51 }
 0x5b7   : > { %4055 = vadd.xlane.f32.xlu0 %v4054_v10  ;;  %v4039_v10 = vsel %vm14797_vm1, %v3889_v47, 0.0  ;;  %v3891_v22 = vmul.f32 %v12028_v34, %v9565_v13  ;;  %14919 = vst [vmem:[#allocation115_spill] sm:$0xff] %v12130_v62  ;;  %9584 = vtanh.f32 %v3655_v15  ;;  %v3641_v13 = vadd.f32 %v11833_v11, %v12017_v5 }
 0x5b8   : > { %v4066_v45 = vsel %vm14797_vm1, %v3898_v52, 0.0  ;;  %v12140_v41 = vpop.f32.mrf.mxu0  ;;  %9586 = vtanh.f32 %v3690_v9 }
 0x5b9   : > { %14920 = vst [vmem:[#allocation116_spill] sm:$0xff] %v12140_v41  ;;  %9588 = vtanh.f32 %v3641_v13 }
 0x5ba   : > { %4040 = vadd.xlane.f32.xlu1 %v4039_v10  ;;  %v9567_v47 = vpop.eup %9566  ;;  %v12150_v51 = vpop.f32.mrf.mxu0 }
 0x5bb   : > { %4103 = vadd.xlane.f32.xlu0 %v4102_v31  ;;  %v4042_v31 = vsel %vm14797_vm1, %v3890_v28, 0.0  ;;  %v9569_v10 = vpop.eup %9568  ;;  %v3943_v63 = vmul.f32 %v12028_v34, %v9567_v47  ;;  %v3646_v47 = vadd.f32 %v12017_v5, %v11877_v21  ;;  %14921 = vst [vmem:[#allocation117_spill] sm:$0xff] %v12150_v51 }
 0x5bc   : > { %v9571_v28 = vpop.eup %9570  ;;  %v3892_v4 = vmul.f32 %v12028_v34, %v9569_v10  ;;  %v3657_v10 = vadd.f32 %v11908_v44, %v12032_v35  ;;  %v12160_v21 = vpop.f32.mrf.mxu0 }
 0x5bd   : > { %v4201_v52 = vsel %vm14797_vm1, %v3943_v63, 0.0  ;;  %v3899_v54 = vmul.f32 %v12028_v34, %v9571_v28  ;;  %9590 = vtanh.f32 %v3646_v47  ;;  %v3647_v28 = vadd.f32 %v11871_v29, %v12017_v5  ;;  %14922 = vst [vmem:[#allocation118_spill] sm:$0xff] %v12160_v21 }
 0x5be   : > { %4043 = vadd.xlane.f32.xlu1 %v4042_v31  ;;  %v9573_v31 = vpop.eup %9572  ;;  %9592 = vtanh.f32 %v3657_v10  ;;  %v12170_v29 = vpop.f32.mrf.mxu0 }
 0x5bf   : > { %4109 = vadd.xlane.f32.xlu0 %v4108_v26  ;;  %v4045_v26 = vsel %vm14797_vm1, %v3891_v22, 0.0  ;;  %v9575_v22 = vpop.eup %9574  ;;  %v3893_v15 = vmul.f32 %v12028_v34, %v9573_v31  ;;  %v4069_v63 = vsel %vm14797_vm1, %v3899_v54, 0.0  ;;  %v3686_v31 = vadd.f32 %v12069_v48, %v11970_v40  ;;  %14923 = vst [vmem:[#allocation119_spill] sm:$0xff] %v12170_v29 }
 0x5c0   : > { %v3915_v9 = vmul.f32 %v12028_v34, %v9575_v22  ;;  %9594 = vtanh.f32 %v3647_v28  ;;  %v3648_v22 = vadd.f32 %v12017_v5, %v11889_v32  ;;  %v12180_v32 = vpop.f32.mrf.mxu0 }
 0x5c1   : > { %9596 = vtanh.f32 %v3686_v31  ;;  %14924 = vst [vmem:[#allocation120_spill] sm:$0xff] %v12180_v32 }
 0x5c2   : > { %4046 = vadd.xlane.f32.xlu1 %v4045_v26  ;;  %v9577_v26 = vpop.eup %9576  ;;  %v4117_v54 = vsel %vm14797_vm1, %v3915_v9, 0.0  ;;  %9598 = vtanh.f32 %v3648_v22 }
 0x5c3   : > { %4067 = vadd.xlane.f32.xlu0 %v4066_v45  ;;  %v4048_v45 = vsel %vm14797_vm1, %v3892_v4, 0.0  ;;  %v9579_v4 = vpop.eup %9578  ;;  %v3895_v13 = vmul.f32 %v12028_v34, %v9577_v26  ;;  %v3658_v26 = vadd.f32 %v12032_v35, %v11914_v8  ;;  %v14972_v8 = vld [vmem:[#allocation20_spill] sm:$0xff] }
 0x5c4   : > { %v3945_v47 = vmul.f32 %v12028_v34, %v9579_v4  ;;  %v3649_v4 = vadd.f32 %v11883_v0, %v12017_v5  ;;  %v12190_v0 = vpop.f32.mrf.mxu0 }
 0x5c5   : > { %9600 = vtanh.f32 %v3658_v26  ;;  %14925 = vst [vmem:[#allocation121_spill] sm:$0xff] %v12190_v0 }
 0x5c6   : > { %4049 = vadd.xlane.f32.xlu1 %v4048_v45  ;;  %v9581_v45 = vpop.eup %9580  ;;  %v4207_v9 = vsel %vm14797_vm1, %v3945_v47, 0.0  ;;  %9602 = vtanh.f32 %v3649_v4 }
 0x5c7   : > { %4202 = vadd.xlane.f32.xlu0 %v4201_v52  ;;  %v4051_v52 = vsel %vm14797_vm1, %v3893_v15, 0.0  ;;  %v9583_v15 = vpop.eup %9582  ;;  %v3896_v10 = vmul.f32 %v12028_v34, %v9581_v45  ;;  %v3688_v45 = vadd.f32 %v12069_v48, %v11974_v23 }
 0x5c8   : > { %v3916_v28 = vmul.f32 %v12028_v34, %v9583_v15  ;;  %v3650_v15 = vadd.f32 %v12017_v5, %v11898_v57  ;;  %v12200_v57 = vpop.f32.mrf.mxu0 }
 0x5c9   : > { %9604 = vtanh.f32 %v3688_v45  ;;  %14926 = vst [vmem:[#allocation122_spill] sm:$0xff] %v12200_v57 }
 0x5ca   : > { %4052 = vadd.xlane.f32.xlu1 %v4051_v52  ;;  %v9585_v52 = vpop.eup %9584  ;;  %v4120_v47 = vsel %vm14797_vm1, %v3916_v28, 0.0  ;;  %9606 = vtanh.f32 %v3650_v15 }
 0x5cb   : > { %4070 = vadd.xlane.f32.xlu0 %v4069_v63  ;;  %v4057_v63 = vsel %vm14797_vm1, %v3895_v13, 0.0  ;;  %v9587_v13 = vpop.eup %9586  ;;  %v3911_v31 = vmul.f32 %v12028_v34, %v9585_v52  ;;  %v3644_v52 = vadd.f32 %v12017_v5, %v11865_v20 }
 0x5cc   : > { %v3946_v22 = vmul.f32 %v12028_v34, %v9587_v13  ;;  %v3651_v13 = vadd.f32 %v11895_v27, %v12017_v5  ;;  %v12210_v27 = vpop.f32.mrf.mxu0 }
 0x5cd   : > { %9608 = vtanh.f32 %v3644_v52  ;;  %14927 = vst [vmem:[#allocation123_spill] sm:$0xff] %v12210_v27 }
 0x5ce   : > { %4058 = vadd.xlane.f32.xlu1 %v4057_v63  ;;  %v9589_v63 = vpop.eup %9588  ;;  %v4210_v28 = vsel %vm14797_vm1, %v3946_v22, 0.0  ;;  %9610 = vtanh.f32 %v3651_v13 }
 0x5cf   : > { %4118 = vadd.xlane.f32.xlu0 %v4117_v54  ;;  %v4060_v54 = vsel %vm14797_vm1, %v3896_v10, 0.0  ;;  %v9591_v10 = vpop.eup %9590  ;;  %v3897_v26 = vmul.f32 %v12028_v34, %v9589_v63  ;;  %v3645_v63 = vadd.f32 %v11859_v36, %v12017_v5 }
 0x5d0   : > { %v3902_v4 = vmul.f32 %v12028_v34, %v9591_v10  ;;  %v3652_v10 = vadd.f32 %v12017_v5, %v11902_v33  ;;  %v12220_v33 = vpop.f32.mrf.mxu0 }
 0x5d1   : > { %9612 = vtanh.f32 %v3645_v63  ;;  %14928 = vst [vmem:[#allocation124_spill] sm:$0xff] %v12220_v33 }
 0x5d2   : > { %4061 = vadd.xlane.f32.xlu1 %v4060_v54  ;;  %v9593_v54 = vpop.eup %9592  ;;  %v4078_v22 = vsel %vm14797_vm1, %v3902_v4, 0.0  ;;  %9614 = vtanh.f32 %v3652_v10 }
 0x5d3   : > { %4208 = vadd.xlane.f32.xlu0 %v4207_v9  ;;  %v4105_v9 = vsel %vm14797_vm1, %v3911_v31, 0.0  ;;  %v9595_v31 = vpop.eup %9594  ;;  %v3913_v45 = vmul.f32 %v12028_v34, %v9593_v54  ;;  %v3661_v54 = vadd.f32 %v11916_v38, %v12032_v35  ;;  %v14971_v38 = vld [vmem:[#allocation27_spill] sm:$0xff] }
 0x5d4   : > { %v3903_v15 = vmul.f32 %v12028_v34, %v9595_v31  ;;  %v3653_v31 = vadd.f32 %v11900_v46, %v12017_v5  ;;  %v14966_v46 = vld [vmem:[#allocation25_spill] sm:$0xff] }
 0x5d5   : > { %9616 = vtanh.f32 %v3661_v54 }
 0x5d6   : > { %4106 = vadd.xlane.f32.xlu1 %v4105_v9  ;;  %v9597_v9 = vpop.eup %9596  ;;  %v4081_v4 = vsel %vm14797_vm1, %v3903_v15, 0.0  ;;  %v3580_v15 = vcombine.high %v12003_v61, %v12003_v61  ;;  %9618 = vtanh.f32 %v3653_v31  ;;  %v12232_v61 = vpop.f32.mrf.mxu0 }
 0x5d7   : > { %4121 = vadd.xlane.f32.xlu0 %v4120_v47  ;;  %v4063_v47 = vsel %vm14797_vm1, %v3897_v26, 0.0  ;;  %v9599_v26 = vpop.eup %9598  ;;  %v3942_v52 = vmul.f32 %v12028_v34, %v9597_v9  ;;  %v3691_v9 = vadd.f32 %v11976_v14, %v12069_v48  ;;  %14929 = vst [vmem:[#allocation125_spill] sm:$0xff] %v12232_v61  ;;  %v14967_v14 = vld [vmem:[#allocation92_spill] sm:$0xff] }
 0x5d8   : > { %v3904_v13 = vmul.f32 %v12028_v34, %v9599_v26  ;;  %v3700_v26 = vadd.f32 %v12069_v48, %v12090_v16  ;;  %v12245_v16 = vpop.f32.mrf.mxu0 }
 0x5d9   : > { %9620 = vtanh.f32 %v3691_v9  ;;  %14930 = vst [vmem:[#allocation126_spill] sm:$0xff] %v12245_v16 }
 0x5da   : > { %4064 = vadd.xlane.f32.xlu1 %v4063_v47  ;;  %v9601_v47 = vpop.eup %9600  ;;  %v4084_v10 = vsel %vm14797_vm1, %v3904_v13, 0.0  ;;  %v12235_v13 = vrot.slane %v3580_v15, %v11980_v2  ;;  %9622 = vtanh.f32 %v3700_v26 }
 0x5db   : > { %4211 = vadd.xlane.f32.xlu0 %v4210_v28  ;;  %v4111_v28 = vsel %vm14797_vm1, %v3913_v45, 0.0  ;;  %v9603_v45 = vpop.eup %9602  ;;  %v3914_v63 = vmul.f32 %v12028_v34, %v9601_v47 }
 0x5dc   : > { %v3905_v5 = vmul.f32 %v12028_v34, %v9603_v45 }
 0x5dd   : > { %v4114_v54 = vsel %vm14797_vm1, %v3914_v63, 0.0  ;;  %v3701_v63 = vadd.f32 %v12080_v60, %v12069_v48 }
 0x5de   : > { %4112 = vadd.xlane.f32.xlu1 %v4111_v28  ;;  %v9605_v28 = vpop.eup %9604  ;;  %v4087_v31 = vsel %vm14797_vm1, %v3905_v5, 0.0  ;;  %v3549_v5 = vcombine.high %v12045_v18, %v12045_v18  ;;  %v12257_v18 = vpop.f32.mrf.mxu0 }
 0x5df   : > { %4079 = vadd.xlane.f32.xlu0 %v4078_v22  ;;  %v4198_v22 = vsel %vm14797_vm1, %v3942_v52, 0.0  ;;  %v9607_v52 = vpop.eup %9606  ;;  %v3944_v47 = vmul.f32 %v12028_v34, %v9605_v28  ;;  %14931 = vst [vmem:[#allocation127_spill] sm:$0xff] %v12257_v18 }
 0x5e0   : > { %v3906_v45 = vmul.f32 %v12028_v34, %v9607_v52 }
 0x5e1   : > { %v4204_v9 = vsel %vm14797_vm1, %v3944_v47, 0.0  ;;  %v3671_v47 = vadd.f32 %v11936_v56, %v12235_v13  ;;  %v12270_v56 = vpop.f32.mrf.mxu0 }
 0x5e2   : > { %4199 = vadd.xlane.f32.xlu1 %v4198_v22  ;;  %v9609_v22 = vpop.eup %9608  ;;  %v4090_v26 = vsel %vm14797_vm1, %v3906_v45, 0.0  ;;  %v12260_v45 = vrot.slane %v3549_v5, %v11453_v12  ;;  %14932 = vst [vmem:[#allocation128_spill] sm:$0xff] %v12270_v56 }
 0x5e3   : > { %4082 = vadd.xlane.f32.xlu0 %v4081_v4  ;;  %v3662_v4 = vadd.f32 %v12032_v35, %v11922_v24  ;;  %v9611_v28 = vpop.eup %9610 }
 0x5e4   : > { %v9613_v15 = vpop.eup %9612  ;;  %v3907_v52 = vmul.f32 %v12028_v34, %v9611_v28 }
 0x5e5   : > { %9624 = vtanh.f32 %v3662_v4 }
 0x5e6   : > { %4115 = vadd.xlane.f32.xlu1 %v4114_v54  ;;  %v3692_v54 = vadd.f32 %v12069_v48, %v11998_v25  ;;  %9626 = vtanh.f32 %v3701_v63  ;;  %v4093_v63 = vsel %vm14797_vm1, %v3907_v52, 0.0  ;;  %v3579_v52 = vcombine.high %v12058_v6, %v12058_v6  ;;  %v14934_v6 = vld [vmem:[#allocation74_spill] sm:$0xff]  ;;  %v12286_v25 = vpop.f32.mrf.mxu0 }
 0x5e7   : > { %4085 = vadd.xlane.f32.xlu0 %v4084_v10  ;;  %v3900_v10 = vmul.f32 %v12028_v34, %v9609_v22  ;;  %v9615_v22 = vpop.eup %9614  ;;  %14935 = vst [vmem:[#allocation129_spill] sm:$0xff] %v12286_v25 }
 0x5e8   : > { %9628 = vtanh.f32 %v3692_v54  ;;  %v9617_v60 = vpop.eup %9616  ;;  %v3908_v28 = vmul.f32 %v12028_v34, %v9615_v22 }
 0x5e9   : > { %v4072_v4 = vsel %vm14797_vm1, %v3900_v10, 0.0  ;;  %9630 = vtanh.f32 %v3671_v47  ;;  %v3672_v10 = vadd.f32 %v12235_v13, %v11942_v1  ;;  %v12276_v47 = vrot.slane %v12260_v45, %v11980_v2 }
 0x5ea   : > { %4205 = vadd.xlane.f32.xlu1 %v4204_v9  ;;  %v3663_v9 = vadd.f32 %v11920_v59, %v12032_v35  ;;  %v4096_v22 = vsel %vm14797_vm1, %v3908_v28, 0.0  ;;  %v12289_v28 = vrot.slane %v3579_v52, %v11980_v2 }
 0x5eb   : > { %4088 = vadd.xlane.f32.xlu0 %v4087_v31  ;;  %v3901_v31 = vmul.f32 %v12028_v34, %v9613_v15  ;;  %v9619_v15 = vpop.eup %9618 }
 0x5ec   : > { %9632 = vtanh.f32 %v3663_v9  ;;  %v9621_v5 = vpop.eup %9620 }
 0x5ed   : > { %v4075_v54 = vsel %vm14797_vm1, %v3901_v31, 0.0  ;;  %v3909_v31 = vmul.f32 %v12028_v34, %v9619_v15  ;;  %9634 = vtanh.f32 %v3672_v10  ;;  %v3947_v1 = vmul.f32 %v12028_v34, %v9621_v5 }
 0x5ee   : > { %4073 = vadd.xlane.f32.xlu1 %v4072_v4  ;;  %v3693_v4 = vadd.f32 %v11988_v19, %v12069_v48  ;;  %v3664_v19 = vadd.f32 %v12032_v35, %v14934_v6 }
 0x5ef   : > { %4091 = vadd.xlane.f32.xlu0 %v4090_v26  ;;  %v3917_v26 = vmul.f32 %v12028_v34, %v9617_v60  ;;  %v14933_v60 = vld [vmem:[#allocation81_spill] sm:$0xff]  ;;  %v4099_v10 = vsel %vm14797_vm1, %v3909_v31, 0.0 }
 0x5f0   : > { %v3673_v9 = vadd.f32 %v14933_v60, %v12235_v13  ;;  %9636 = vtanh.f32 %v3693_v4  ;;  %v4213_v4 = vsel %vm14797_vm1, %v3947_v1, 0.0  ;;  %v12299_v60 = vpop.f32.mrf.mxu0 }
 0x5f1   : > { %14936 = vst [vmem:[#allocation130_spill] sm:$0xff] %v12299_v60 }
 0x5f2   : > { %4076 = vadd.xlane.f32.xlu1 %v4075_v54  ;;  %v4123_v54 = vsel %vm14797_vm1, %v3917_v26, 0.0  ;;  %9638 = vtanh.f32 %v3673_v9  ;;  %v3702_v26 = vadd.f32 %v12276_v47, %v12110_v49 }
 0x5f3   : > { %4094 = vadd.xlane.f32.xlu0 %v4093_v63  ;;  %v9623_v63 = vpop.eup %9622  ;;  %9640 = vtanh.f32 %v3664_v19 }
 0x5f4   : > { %v9625_v59 = vpop.eup %9624  ;;  %v3956_v15 = vmul.f32 %v12028_v34, %v9623_v63  ;;  %9642 = vtanh.f32 %v3702_v26  ;;  %v3718_v63 = vadd.f32 %v12289_v28, %v12286_v25 }
 0x5f5   : > { %v9627_v5 = vpop.eup %9626 }
 0x5f6   : > { %4124 = vadd.xlane.f32.xlu1 %v4123_v54  ;;  %v3694_v54 = vadd.f32 %v12069_v48, %v12011_v30  ;;  %v9629_v52 = vpop.eup %9628  ;;  %v4240_v31 = vsel %vm14797_vm1, %v3956_v15, 0.0  ;;  %v3957_v9 = vmul.f32 %v12028_v34, %v9627_v5  ;;  %v12309_v30 = vpop.f32.mrf.mxu0 }
 0x5f7   : > { %4097 = vadd.xlane.f32.xlu0 %v4096_v22  ;;  %v3918_v22 = vmul.f32 %v12028_v34, %v9625_v59  ;;  %v9631_v1 = vpop.eup %9630  ;;  %v3948_v19 = vmul.f32 %v12028_v34, %v9629_v52  ;;  %v14937_v59 = vld [vmem:[#allocation73_spill] sm:$0xff]  ;;  %14938 = vst [vmem:[#allocation131_spill] sm:$0xff] %v12309_v30  ;;  %v3720_v5 = vadd.f32 %v12289_v28, %v12309_v30  ;;  %v14939_v52 = vld [vmem:[#allocation104_spill] sm:$0xff] }
 0x5f8   : > { %9644 = vtanh.f32 %v3694_v54  ;;  %v4243_v15 = vsel %vm14797_vm1, %v3957_v9, 0.0  ;;  %v3927_v26 = vmul.f32 %v12028_v34, %v9631_v1 }
 0x5f9   : > { %v9633_v49 = vpop.eup %9632  ;;  %9646 = vtanh.f32 %v3718_v63  ;;  %v14940_v63 = vld [vmem:[#allocation86_spill] sm:$0xff] }
 0x5fa   : > { %4214 = vadd.xlane.f32.xlu1 %v4213_v4  ;;  %v3665_v4 = vadd.f32 %v14937_v59, %v12032_v35  ;;  %v3919_v54 = vmul.f32 %v12028_v34, %v9633_v49  ;;  %v4153_v9 = vsel %vm14797_vm1, %v3927_v26, 0.0  ;;  %v3676_v30 = vadd.f32 %v12235_v13, %v14940_v63 }
 0x5fb   : > { %4100 = vadd.xlane.f32.xlu0 %v4099_v10  ;;  %v4126_v10 = vsel %vm14797_vm1, %v3918_v22, 0.0  ;;  %v9635_v22 = vpop.eup %9634 }
 0x5fc   : > { %9648 = vtanh.f32 %v3665_v4  ;;  %v3928_v1 = vmul.f32 %v12028_v34, %v9635_v22  ;;  %v14941_v4 = vld [vmem:[#allocation76_spill] sm:$0xff] }
 0x5fd   : > { %v9637_v25 = vpop.eup %9636  ;;  %9650 = vtanh.f32 %v3720_v5  ;;  %v3706_v5 = vadd.f32 %v12276_v47, %v12150_v51 }
 0x5fe   : > { %4127 = vadd.xlane.f32.xlu1 %v4126_v10  ;;  %v3695_v10 = vadd.f32 %v14939_v52, %v12069_v48  ;;  %v3949_v49 = vmul.f32 %v12028_v34, %v9637_v25  ;;  %v4156_v26 = vsel %vm14797_vm1, %v3928_v1, 0.0 }
 0x5ff   : > { %4241 = vadd.xlane.f32.xlu0 %v4240_v31  ;;  %v4216_v31 = vsel %vm14797_vm1, %v3948_v19, 0.0  ;;  %v9639_v59 = vpop.eup %9638  ;;  %v4129_v19 = vsel %vm14797_vm1, %v3919_v54, 0.0 }
 0x600   : > { %9652 = vtanh.f32 %v3695_v10  ;;  %v9641_v52 = vpop.eup %9640  ;;  %v3929_v22 = vmul.f32 %v12028_v34, %v9639_v59  ;;  %v4219_v54 = vsel %vm14797_vm1, %v3949_v49, 0.0  ;;  %v3696_v10 = vadd.f32 %v12069_v48, %v12042_v3 }
 0x601   : > { %9654 = vtanh.f32 %v3676_v30  ;;  %v3920_v25 = vmul.f32 %v12028_v34, %v9641_v52  ;;  %v14942_v30 = vld [vmem:[#allocation85_spill] sm:$0xff] }
 0x602   : > { %4217 = vadd.xlane.f32.xlu1 %v4216_v31  ;;  %v9643_v31 = vpop.eup %9642  ;;  %v4159_v1 = vsel %vm14797_vm1, %v3929_v22, 0.0 }
 0x603   : > { %4244 = vadd.xlane.f32.xlu0 %v4243_v15  ;;  %v3666_v15 = vadd.f32 %v12032_v35, %v14941_v4  ;;  %v3958_v59 = vmul.f32 %v12028_v34, %v9643_v31  ;;  %v4132_v49 = vsel %vm14797_vm1, %v3920_v25, 0.0 }
 0x605   : > { %9656 = vtanh.f32 %v3666_v15  ;;  %v14943_v15 = vld [vmem:[#allocation75_spill] sm:$0xff]  ;;  %v4246_v22 = vsel %vm14797_vm1, %v3958_v59, 0.0 }
 0x606   : > { %4130 = vadd.xlane.f32.xlu1 %v4129_v19  ;;  %9658 = vtanh.f32 %v3706_v5  ;;  %v3677_v19 = vadd.f32 %v14942_v30, %v12235_v13  ;;  %v3707_v5 = vadd.f32 %v12140_v41, %v12276_v47 }
 0x607   : > { %4154 = vadd.xlane.f32.xlu0 %v4153_v9  ;;  %v9645_v9 = vpop.eup %9644  ;;  %9660 = vtanh.f32 %v3696_v10  ;;  %v14944_v10 = vld [vmem:[#allocation106_spill] sm:$0xff] }
 0x608   : > { %v9647_v51 = vpop.eup %9646  ;;  %v3950_v52 = vmul.f32 %v12028_v34, %v9645_v9  ;;  %9662 = vtanh.f32 %v3677_v19  ;;  %v14946_v19 = vld [vmem:[#allocation88_spill] sm:$0xff] }
 0x609   : > { %v9649_v3 = vpop.eup %9648  ;;  %v3974_v31 = vmul.f32 %v12028_v34, %v9647_v51  ;;  %v3678_v41 = vadd.f32 %v12235_v13, %v14946_v19 }
 0x60a   : > { %4220 = vadd.xlane.f32.xlu1 %v4219_v54  ;;  %v9651_v54 = vpop.eup %9650  ;;  %v4222_v25 = vsel %vm14797_vm1, %v3950_v52, 0.0  ;;  %v3921_v9 = vmul.f32 %v12028_v34, %v9649_v3 }
 0x60b   : > { %4157 = vadd.xlane.f32.xlu0 %v4156_v26  ;;  %v3667_v26 = vadd.f32 %v14943_v15, %v12032_v35  ;;  %v4294_v51 = vsel %vm14797_vm1, %v3974_v31, 0.0  ;;  %v3976_v59 = vmul.f32 %v12028_v34, %v9651_v54  ;;  %v3708_v54 = vadd.f32 %v12276_v47, %v12170_v29 }
 0x60d   : > { %9664 = vtanh.f32 %v3667_v26  ;;  %v9653_v30 = vpop.eup %9652  ;;  %v14947_v26 = vld [vmem:[#allocation78_spill] sm:$0xff]  ;;  %v4300_v31 = vsel %vm14797_vm1, %v3976_v59, 0.0 }
 0x60e   : > { %4133 = vadd.xlane.f32.xlu1 %v4132_v49  ;;  %v12351_v49 = vpop.f32.mrf.mxu0  ;;  %9666 = vtanh.f32 %v3707_v5  ;;  %v9655_v52 = vpop.eup %9654  ;;  %v3951_v3 = vmul.f32 %v12028_v34, %v9653_v30 }
 0x60f   : > { %4160 = vadd.xlane.f32.xlu0 %v4159_v1  ;;  %v3697_v1 = vadd.f32 %v14944_v10, %v12069_v48  ;;  %14945 = vst [vmem:[#allocation132_spill] sm:$0xff] %v12351_v49  ;;  %v3932_v5 = vmul.f32 %v12028_v34, %v9655_v52  ;;  %v14950_v52 = vld [vmem:[#allocation87_spill] sm:$0xff] }
 0x610   : > { %v12361_v15 = vpop.f32.mrf.mxu0  ;;  %v3679_v29 = vadd.f32 %v14950_v52, %v12235_v13 }
 0x611   : > { %9668 = vtanh.f32 %v3697_v1  ;;  %14948 = vst [vmem:[#allocation133_spill] sm:$0xff] %v12361_v15  ;;  %v3698_v1 = vadd.f32 %v12069_v48, %v12065_v53  ;;  %v4168_v59 = vsel %vm14797_vm1, %v3932_v5, 0.0 }
 0x612   : > { %4223 = vadd.xlane.f32.xlu1 %v4222_v25  ;;  %v3668_v25 = vadd.f32 %v12032_v35, %v14947_v26  ;;  %v9657_v10 = vpop.eup %9656  ;;  %9670 = vtanh.f32 %v3678_v41  ;;  %v12371_v19 = vpop.f32.mrf.mxu0 }
 0x613   : > { %4247 = vadd.xlane.f32.xlu0 %v4246_v22  ;;  %v4135_v22 = vsel %vm14797_vm1, %v3921_v9, 0.0  ;;  %v9659_v9 = vpop.eup %9658  ;;  %v3922_v30 = vmul.f32 %v12028_v34, %v9657_v10  ;;  %14949 = vst [vmem:[#allocation134_spill] sm:$0xff] %v12371_v19 }
 0x614   : > { %9672 = vtanh.f32 %v3668_v25  ;;  %v3962_v41 = vmul.f32 %v12028_v34, %v9659_v9  ;;  %v14951_v25 = vld [vmem:[#allocation77_spill] sm:$0xff]  ;;  %v12381_v26 = vpop.f32.mrf.mxu0  ;;  %v3709_v9 = vadd.f32 %v12160_v21, %v12276_v47 }
 0x615   : > { %9674 = vtanh.f32 %v3708_v54  ;;  %14952 = vst [vmem:[#allocation135_spill] sm:$0xff] %v12381_v26 }
 0x616   : > { %4136 = vadd.xlane.f32.xlu1 %v4135_v22  ;;  %v9661_v22 = vpop.eup %9660  ;;  %9676 = vtanh.f32 %v3698_v1  ;;  %v4258_v5 = vsel %vm14797_vm1, %v3962_v41, 0.0  ;;  %v12391_v52 = vpop.f32.mrf.mxu0 }
 0x617   : > { %4295 = vadd.xlane.f32.xlu0 %v4294_v51  ;;  %v4225_v51 = vsel %vm14797_vm1, %v3951_v3, 0.0  ;;  %v9663_v3 = vpop.eup %9662  ;;  %v3952_v10 = vmul.f32 %v12028_v34, %v9661_v22  ;;  %9678 = vtanh.f32 %v3679_v29  ;;  %14954 = vst [vmem:[#allocation136_spill] sm:$0xff] %v12391_v52 }
 0x618   : > { %v3933_v54 = vmul.f32 %v12028_v34, %v9663_v3  ;;  %v14955_v3 = vld [vmem:[#allocation90_spill] sm:$0xff] }
 0x619   : > { %v3680_v21 = vadd.f32 %v12235_v13, %v14955_v3 }
 0x61a   : > { %4226 = vadd.xlane.f32.xlu1 %v4225_v51  ;;  %v3669_v51 = vadd.f32 %v14951_v25, %v12032_v35  ;;  %v9665_v53 = vpop.eup %9664  ;;  %v14953_v35 = vld [vmem:[#allocation108_spill] sm:$0xff]  ;;  %v4171_v41 = vsel %vm14797_vm1, %v3933_v54, 0.0  ;;  %v3703_v54 = vadd.f32 %v12100_v7, %v12276_v47  ;;  %v14959_v25 = vld [vmem:[#allocation21_spill] sm:$0xff] }
 0x61b   : > { %4301 = vadd.xlane.f32.xlu0 %v4300_v31  ;;  %v4138_v31 = vsel %vm14797_vm1, %v3922_v30, 0.0  ;;  %v9667_v30 = vpop.eup %9666  ;;  %v3923_v1 = vmul.f32 %v12028_v34, %v9665_v53  ;;  %v3699_v22 = vadd.f32 %v14953_v35, %v12069_v48  ;;  %v14956_v48 = vld [vmem:[#allocation80_spill] sm:$0xff] }
 0x61c   : > { %9680 = vtanh.f32 %v3669_v51  ;;  %v3963_v29 = vmul.f32 %v12028_v34, %v9667_v30  ;;  %v3670_v51 = vadd.f32 %v12235_v13, %v14956_v48  ;;  %v12405_v30 = vpop.f32.mrf.mxu0 }
 0x61d   : > { %9682 = vtanh.f32 %v3709_v9  ;;  %v3710_v9 = vadd.f32 %v12276_v47, %v12190_v0  ;;  %14957 = vst [vmem:[#allocation137_spill] sm:$0xff] %v12405_v30 }
 0x61e   : > { %4139 = vadd.xlane.f32.xlu1 %v4138_v31  ;;  %v9669_v31 = vpop.eup %9668  ;;  %9684 = vtanh.f32 %v3699_v22  ;;  %v12416_v6 = vpop.f32.mrf.mxu0 }
 0x61f   : > { %4169 = vadd.xlane.f32.xlu0 %v4168_v59  ;;  %v4228_v59 = vsel %vm14797_vm1, %v3952_v10, 0.0  ;;  %v9671_v10 = vpop.eup %9670  ;;  %v3953_v53 = vmul.f32 %v12028_v34, %v9669_v31  ;;  %9686 = vtanh.f32 %v3680_v21 }
 0x620   : > { %v3934_v22 = vmul.f32 %v12028_v34, %v9671_v10  ;;  %9688 = vtanh.f32 %v3670_v51 }
 0x621   : > { %9690 = vtanh.f32 %v3710_v9  ;;  %v12428_v9 = vpop.f32.mrf.mxu0 }
 0x622   : > { %4229 = vadd.xlane.f32.xlu1 %v4228_v59  ;;  %v9673_v59 = vpop.eup %9672  ;;  %v4174_v21 = vsel %vm14797_vm1, %v3934_v22, 0.0  ;;  %9692 = vtanh.f32 %v3703_v54  ;;  %14964 = vst [vmem:[#allocation21_spill] sm:$0xff] %v12428_v9 }
 0x623   : > { %4259 = vadd.xlane.f32.xlu0 %v4258_v5  ;;  %v4141_v5 = vsel %vm14797_vm1, %v3923_v1, 0.0  ;;  %v4261_v1 = vsel %vm14797_vm1, %v3963_v29, 0.0  ;;  %v9675_v48 = vpop.eup %9674  ;;  %v3924_v7 = vmul.f32 %v12028_v34, %v9673_v59  ;;  %v14960_v29 = vld [vmem:[#allocation84_spill] sm:$0xff] }
 0x624   : > { %v9677_v0 = vpop.eup %9676 }
 0x625   : > { %v9679_v59 = vpop.eup %9678  ;;  %v4144_v51 = vsel %vm14797_vm1, %v3924_v7, 0.0 }
 0x626   : > { %4142 = vadd.xlane.f32.xlu1 %v4141_v5  ;;  %v4231_v5 = vsel %vm14797_vm1, %v3953_v53, 0.0  ;;  %v3964_v53 = vmul.f32 %v12028_v34, %v9675_v48  ;;  %v3704_v48 = vadd.f32 %v12276_v47, %v12130_v62  ;;  %v3935_v7 = vmul.f32 %v12028_v34, %v9679_v59 }
 0x627   : > { %4172 = vadd.xlane.f32.xlu0 %v4171_v41  ;;  %v14958_v41 = vld [vmem:[#allocation23_spill] sm:$0xff] }
 0x628   : > { %14961 = vst [vmem:[#allocation23_spill] sm:$0xff] %v12416_v6 }
 0x629   : > { %v9681_v24 = vpop.eup %9680 }
 0x62a   : > { %4232 = vadd.xlane.f32.xlu1 %v4231_v5  ;;  %v14963_v5 = vld [vmem:[#allocation22_spill] sm:$0xff]  ;;  %v3925_v54 = vmul.f32 %v12028_v34, %v9681_v24 }
 0x62b   : > { %v4011_v35 = vpop.xlane.xlu1 %4010  ;;  %4262 = vadd.xlane.f32.xlu0 %v4261_v1  ;;  %v14962_v1 = vld [vmem:[#allocation89_spill] sm:$0xff]  ;;  %v14969_v24 = vld [vmem:[#allocation26_spill] sm:$0xff] }
 0x62c   : > { %v4526_v3 = vrot.slane %v4011_v35, %v14958_v41  ;;  %v4008_v31 = vpop.xlane.xlu0 %4007  ;;  %v3674_v35 = vadd.f32 %v12235_v13, %v14960_v29  ;;  %v3954_v29 = vmul.f32 %v12028_v34, %v9677_v0 }
 0x62d   : > { %v4522_v63 = vrot.slane %v4008_v31, %v14959_v25  ;;  %v3681_v31 = vadd.f32 %v14962_v1, %v12235_v13  ;;  %v4264_v1 = vsel %vm14797_vm1, %v3964_v53, 0.0 }
 0x62e   : > { %4145 = vadd.xlane.f32.xlu1 %v4144_v51  ;;  %v4234_v0 = vsel %vm14797_vm1, %v3954_v29, 0.0  ;;  %v3682_v29 = vadd.f32 %v12235_v13, %v14967_v14  ;;  %v4147_v14 = vsel %vm14797_vm1, %v3925_v54, 0.0 }
 0x62f   : > { %v4527_v4 = vsel %vm1739_vm2, %v4526_v3, %v4522_v63  ;;  %4175 = vadd.xlane.f32.xlu0 %v4174_v21  ;;  %v4020_v3 = vpop.xlane.xlu1 %4019  ;;  %9694 = vtanh.f32 %v3681_v31  ;;  %v3711_v21 = vadd.f32 %v12180_v32, %v12276_v47  ;;  %v3719_v32 = vadd.f32 %v12270_v56, %v12289_v28 }
 0x630   : > { %v4014_v10 = vpop.xlane.xlu0 %4013  ;;  %9696 = vtanh.f32 %v3674_v35  ;;  %v4541_v34 = vrot.slane %v4020_v3, %v14969_v24  ;;  %v4177_v35 = vsel %vm14797_vm1, %v3935_v7, 0.0 }
 0x631   : > { %v4531_v63 = vrot.slane %v4014_v10, %v14963_v5  ;;  %v9683_v10 = vpop.eup %9682  ;;  %9698 = vtanh.f32 %v3704_v48 }
 0x632   : > { %4235 = vadd.xlane.f32.xlu1 %v4234_v0  ;;  %v12450_v0 = vld [vmem:[%s14615_s8] ss:$0 sm:$0xff]  ;;  %9700 = vtanh.f32 %v3711_v21 }
 0x633   : > { %v4532_v22 = vsel %vm1746_vm3, %v4531_v63, %v4527_v4  ;;  %4265 = vadd.xlane.f32.xlu0 %v4264_v1  ;;  %v9685_v4 = vpop.eup %9684  ;;  %v14965_v63 = vld [vmem:[#allocation19_spill] sm:$0xff]  ;;  %v4023_v31 = vpop.xlane.xlu1 %4022  ;;  %9702 = vtanh.f32 %v3682_v29 }
 0x634   : > { %v4017_v51 = vpop.xlane.xlu0 %4016  ;;  %v4558_v62 = vadd.s32 4294967232, %v14965_v63  ;;  %v4565_v53 = vadd.s32 4294967224, %v14965_v63  ;;  %v12443_v1 = vpop.f32.mrf.mxu0  ;;  %v4546_v36 = vrot.slane %v4023_v31, %v14971_v38  ;;  %v3955_v3 = vmul.f32 %v12450_v0, %v9685_v4  ;;  %v14974_v4 = vld [vmem:[#allocation83_spill] sm:$0xff] }
 0x635   : > { %v4536_v59 = vrot.slane %v4017_v51, %v14966_v46  ;;  %14968 = vst [vmem:[#allocation22_spill] sm:$0xff] %v12443_v1  ;;  %v3965_v51 = vmul.f32 %v12450_v0, %v9683_v10  ;;  %v9687_v48 = vpop.eup %9686  ;;  %v4572_v21 = vadd.s32 4294967216, %v14965_v63  ;;  %9704 = vtanh.f32 %v3719_v32 }
 0x636   : > { %v9689_v20 = vpop.eup %9688  ;;  %4148 = vadd.xlane.f32.xlu1 %v4147_v14  ;;  %v12459_v40 = vsub.s32 %v4558_v62, %v14972_v8  ;;  %v12465_v54 = vsub.s32 %v4565_v53, %v14972_v8  ;;  %v12469_v44 = vpop.f32.mrf.mxu0  ;;  %v3936_v62 = vmul.f32 %v12450_v0, %v9687_v48  ;;  %v4579_v29 = vadd.s32 4294967208, %v14965_v63  ;;  %v14976_v48 = vld [vmem:[#allocation28_spill] sm:$0xff] }
 0x637   : > { %v4537_v56 = vsel %vm14970_vm0, %v4536_v59, %v4532_v22  ;;  %4178 = vadd.xlane.f32.xlu0 %v4177_v35  ;;  %v14973_v22 = vld [vmem:[#allocation29_spill] sm:$0xff]  ;;  %v4032_v31 = vpop.xlane.xlu1 %4031  ;;  %v3675_v35 = vadd.f32 %v14974_v4, %v12235_v13  ;;  %14975 = vst [vmem:[#allocation19_spill] sm:$0xff] %v12469_v44  ;;  %v4267_v14 = vsel %vm14797_vm1, %v3965_v51, 0.0  ;;  %v3926_v53 = vmul.f32 %v12450_v0, %v9689_v20  ;;  %v14977_v20 = vld [vmem:[#allocation91_spill] sm:$0xff] }
 0x638   : > { %v4542_v7 = vsel %vm1760_vm5, %v4541_v34, %v4537_v56  ;;  %v4026_v23 = vpop.xlane.xlu0 %4025  ;;  %v3712_v56 = vadd.f32 %v12276_v47, %v12210_v27  ;;  %v4237_v34 = vsel %vm14797_vm1, %v3955_v3, 0.0  ;;  %vm4563_vm0 = vcmask 589312  }
 0x639   : > { %v4547_v10 = vsel %vm1767_vm6, %v4546_v36, %v4542_v7  ;;  %v4551_v59 = vrot.slane %v4026_v23, %v14973_v22  ;;  %v9691_v36 = vpop.eup %9690  ;;  %v12479_v51 = vsub.s32 %v4572_v21, %v14972_v8  ;;  %9706 = vtanh.f32 %v3675_v35 }
 0x63a   : > { %v9693_v7 = vpop.eup %9692  ;;  %4238 = vadd.xlane.f32.xlu1 %v4237_v34  ;;  %v3705_v3 = vadd.f32 %v12120_v37, %v12276_v47  ;;  %v3683_v32 = vadd.f32 %v14977_v20, %v12235_v13  ;;  %v3966_v21 = vmul.f32 %v12450_v0, %v9691_v36  ;;  %9708 = vtanh.f32 %v3712_v56 }
 0x63b   : > { %v4552_v23 = vsel %vm1774_vm7, %v4551_v59, %v4547_v10  ;;  %4268 = vadd.xlane.f32.xlu0 %v4267_v14  ;;  %v4035_v11 = vpop.xlane.xlu1 %4034  ;;  %v12487_v10 = vpop.f32.mrf.mxu0  ;;  %v4562_v59 = vrot.slane %v4032_v31, %v12459_v40  ;;  %v4180_v14 = vsel %vm14797_vm1, %v3936_v62, 0.0  ;;  %v4150_v50 = vsel %vm14797_vm1, %v3926_v53, 0.0 }
 0x63c   : > { %v4029_v4 = vpop.xlane.xlu0 %4028  ;;  %14978 = vst [vmem:[#allocation25_spill] sm:$0xff] %v12487_v10  ;;  %v9695_v34 = vpop.eup %9694  ;;  %v4569_v35 = vrot.slane %v4035_v11, %v12465_v54  ;;  %v3959_v37 = vmul.f32 %v12450_v0, %v9693_v7  ;;  %v12501_v36 = vsub.s32 %v4579_v29, %v14972_v8  ;;  %v4586_v11 = vadd.s32 4294967200, %v14965_v63 }
 0x63d   : > { %v4556_v27 = vrot.slane %v4029_v4, %v14976_v48  ;;  %v9697_v20 = vpop.eup %9696  ;;  %v12506_v53 = vpop.f32.mrf.mxu0  ;;  %9710 = vtanh.f32 %v3683_v32  ;;  %v4593_v32 = vadd.s32 4294967192, %v14965_v63 }
 0x63e   : > { %4151 = vadd.xlane.f32.xlu1 %v4150_v50  ;;  %14979 = vst [vmem:[#allocation26_spill] sm:$0xff] %v12506_v53  ;;  %v4270_v50 = vsel %vm14797_vm1, %v3966_v21, 0.0  ;;  %v3930_v29 = vmul.f32 %v12450_v0, %v9697_v20  ;;  %9712 = vtanh.f32 %v3705_v3 }
 0x63f   : > { %v4557_v4 = vsel %vm1781_vm8, %v4556_v27, %v4552_v23  ;;  %4181 = vadd.xlane.f32.xlu0 %v4180_v14  ;;  %v4038_v56 = vpop.xlane.xlu1 %4037  ;;  %v3713_v27 = vadd.f32 %v12200_v57, %v12276_v47  ;;  %v9699_v23 = vpop.eup %9698  ;;  %v4249_v14 = vsel %vm14797_vm1, %v3959_v37, 0.0  ;;  %v14980_v37 = vld [vmem:[#allocation94_spill] sm:$0xff] }
 0x640   : > { %v4564_v43 = vsel %vm4563_vm0, %v4562_v59, %v4557_v4  ;;  %v12497_v31 = vpop.xlane.xlu0 %4055  ;;  %v4576_v7 = vrot.slane %v4038_v56, %v12479_v51  ;;  %v3937_v59 = vmul.f32 %v12450_v0, %v9695_v34  ;;  %v3721_v4 = vadd.f32 %v12299_v60, %v12289_v28  ;;  %v12524_v20 = vpop.f32.mrf.mxu0 }
 0x641   : > { %v4571_v62 = vsel %vm4570_vm4, %v4569_v35, %v4564_v43  ;;  %v9701_v43 = vpop.eup %9700  ;;  %v12519_v34 = vsub.s32 %v4586_v11, %v14972_v8  ;;  %v3684_v56 = vadd.f32 %v12235_v13, %v14980_v37  ;;  %14981 = vst [vmem:[#allocation27_spill] sm:$0xff] %v12524_v20  ;;  %9714 = vtanh.f32 %v3713_v27 }
 0x642   : > { %v4578_v35 = vsel %vm4577_vm15, %v4576_v7, %v4571_v62  ;;  %4250 = vadd.xlane.f32.xlu1 %v4249_v14  ;;  %v3967_v62 = vmul.f32 %v12450_v0, %v9701_v43  ;;  %v9703_v7 = vpop.eup %9702  ;;  %v4162_v14 = vsel %vm14797_vm1, %v3930_v29, 0.0  ;;  %v3960_v11 = vmul.f32 %v12450_v0, %v9699_v23 }
 0x643   : > { %4271 = vadd.xlane.f32.xlu0 %v4270_v50  ;;  %v4041_v21 = vpop.xlane.xlu1 %4040  ;;  %v4183_v50 = vsel %vm14797_vm1, %v3937_v59, 0.0  ;;  %9716 = vtanh.f32 %v3721_v4  ;;  %v3722_v60 = vadd.f32 %v12289_v28, %v12361_v15  ;;  %v9705_v37 = vpop.eup %9704  ;;  %v12537_v27 = vsub.s32 %v4593_v32, %v14972_v8 }
 0x644   : > { %v12516_v57 = vpop.xlane.xlu0 %4103  ;;  %v4583_v3 = vrot.slane %v4041_v21, %v12501_v36  ;;  %v4600_v43 = vadd.s32 4294967184, %v14965_v63  ;;  %v3714_v23 = vadd.f32 %v12276_v47, %v12232_v61  ;;  %v12542_v4 = vpop.f32.mrf.mxu0  ;;  %9718 = vtanh.f32 %v3684_v56 }
 0x645   : > { %14982 = vst [vmem:[#allocation20_spill] sm:$0xff] %v12542_v4  ;;  %v4252_v15 = vsel %vm14797_vm1, %v3960_v11, 0.0  ;;  %v3975_v32 = vmul.f32 %v12450_v0, %v9705_v37  ;;  %9720 = vtanh.f32 %v3722_v60  ;;  %v3723_v61 = vadd.f32 %v12351_v49, %v12289_v28 }
 0x646   : > { %v4585_v42 = vsel %vm14799_vm14, %v4583_v3, %v4578_v35  ;;  %4163 = vadd.xlane.f32.xlu1 %v4162_v14  ;;  %v9707_v29 = vpop.eup %9706  ;;  %v4273_v35 = vsel %vm14797_vm1, %v3967_v62, 0.0  ;;  %v3938_v3 = vmul.f32 %v12450_v0, %v9703_v7  ;;  %v12555_v7 = vsub.s32 %v4600_v43, %v14972_v8  ;;  %v12560_v37 = vpop.f32.mrf.mxu0 }
 0x647   : > { %4184 = vadd.xlane.f32.xlu0 %v4183_v50  ;;  %v4044_v59 = vpop.xlane.xlu1 %4043  ;;  %v9709_v14 = vpop.eup %9708  ;;  %v4607_v56 = vadd.s32 4294967176, %v14965_v63  ;;  %v3730_v11 = vadd.f32 %v12289_v28, %v12469_v44  ;;  %14983 = vst [vmem:[#allocation29_spill] sm:$0xff] %v12560_v37  ;;  %9722 = vtanh.f32 %v3714_v23  ;;  %v3931_v43 = vmul.f32 %v12450_v0, %v9707_v29 }
 0x648   : > { %v12534_v21 = vpop.xlane.xlu0 %4109  ;;  %v4590_v50 = vrot.slane %v4044_v59, %v12519_v34  ;;  %v4186_v59 = vsel %vm14797_vm1, %v3938_v3, 0.0  ;;  %9724 = vtanh.f32 %v3723_v61  ;;  %v3724_v63 = vadd.f32 %v12289_v28, %v12381_v26  ;;  %v12579_v29 = vpop.f32.mrf.mxu0 }
 0x649   : > { %v3581_v3 = vcombine.high %v12260_v45, %v12260_v45  ;;  %v3731_v61 = vadd.f32 %v12443_v1, %v12289_v28  ;;  %14984 = vst [vmem:[#allocation28_spill] sm:$0xff] %v12579_v29  ;;  %9726 = vtanh.f32 %v3730_v11  ;;  %v4165_v45 = vsel %vm14797_vm1, %v3931_v43, 0.0 }
 0x64a   : > { %v4592_v55 = vsel %vm14798_vm13, %v4590_v50, %v4585_v42  ;;  %4253 = vadd.xlane.f32.xlu1 %v4252_v15  ;;  %v3968_v42 = vmul.f32 %v12450_v0, %v9709_v14  ;;  %v9711_v15 = vpop.eup %9710  ;;  %v4297_v50 = vsel %vm14797_vm1, %v3975_v32, 0.0  ;;  %v12575_v14 = vsub.s32 %v4607_v56, %v14972_v8  ;;  %v12596_v43 = vpop.f32.mrf.mxu0 }
 0x64b   : > { %4274 = vadd.xlane.f32.xlu0 %v4273_v35  ;;  %v4047_v62 = vpop.xlane.xlu1 %4046  ;;  %v9713_v35 = vpop.eup %9712  ;;  %9728 = vtanh.f32 %v3724_v63  ;;  %v3725_v8 = vadd.f32 %v12371_v19, %v12289_v28  ;;  %14985 = vst [vmem:[#allocation138_spill] sm:$0xff] %v12596_v43 }
 0x64c   : > { %v12552_v17 = vpop.xlane.xlu0 %4067  ;;  %v4597_v60 = vrot.slane %v4047_v62, %v12537_v27  ;;  %9730 = vtanh.f32 %v3731_v61  ;;  %v3727_v61 = vadd.f32 %v12391_v52, %v12289_v28 }
 0x64d   : > { %9732 = vtanh.f32 %v3725_v8  ;;  %v4617_v8 = vrot.slane %v12497_v31, %v14959_v25 }
 0x64e   : > { %v4599_v44 = vsel %vm4598_vm12, %v4597_v60, %v4592_v55  ;;  %4298 = vadd.xlane.f32.xlu1 %v4297_v50  ;;  %v4276_v55 = vsel %vm14797_vm1, %v3968_v42, 0.0  ;;  %v3939_v60 = vmul.f32 %v12450_v0, %v9711_v15  ;;  %v3961_v50 = vmul.f32 %v12450_v0, %v9713_v35 }
 0x64f   : > { %4187 = vadd.xlane.f32.xlu0 %v4186_v59  ;;  %v4050_v23 = vpop.xlane.xlu1 %4049  ;;  %v9715_v59 = vpop.eup %9714  ;;  %v12592_v42 = vrot.slane %v3581_v3, %v11980_v2  ;;  %v3717_v15 = vadd.f32 %v12245_v16, %v12276_v47 }
 0x650   : > { %v12570_v62 = vpop.xlane.xlu0 %4202  ;;  %v4604_v32 = vrot.slane %v4050_v23, %v12555_v7  ;;  %v9717_v56 = vpop.eup %9716  ;;  %v4189_v35 = vsel %vm14797_vm1, %v3939_v60, 0.0 }
 0x651   : > { %v3977_v3 = vmul.f32 %v12450_v0, %v9717_v56  ;;  %9734 = vtanh.f32 %v3717_v15 }
 0x652   : > { %v4606_v1 = vsel %vm4605_vm11, %v4604_v32, %v4599_v44  ;;  %4166 = vadd.xlane.f32.xlu1 %v4165_v45  ;;  %v9719_v44 = vpop.eup %9718  ;;  %v4255_v32 = vsel %vm14797_vm1, %v3961_v50, 0.0  ;;  %v3726_v45 = vadd.f32 %v12289_v28, %v12405_v30  ;;  %v12614_v50 = vpop.f32.mrf.mxu0 }
 0x653   : > { %4277 = vadd.xlane.f32.xlu0 %v4276_v55  ;;  %v4053_v11 = vpop.xlane.xlu1 %4052  ;;  %v3969_v55 = vmul.f32 %v12450_v0, %v9715_v59  ;;  %v9721_v16 = vpop.eup %9720  ;;  %v3735_v59 = vadd.f32 %v12524_v20, %v12592_v42  ;;  %14986 = vst [vmem:[#allocation139_spill] sm:$0xff] %v12614_v50  ;;  %v4303_v15 = vsel %vm14797_vm1, %v3977_v3, 0.0 }
 0x654   : > { %v12589_v23 = vpop.xlane.xlu0 %4070  ;;  %v4611_v63 = vrot.slane %v4053_v11, %v12575_v14  ;;  %9736 = vtanh.f32 %v3726_v45 }
 0x655   : > { %9738 = vtanh.f32 %v3727_v61  ;;  %v3728_v61 = vadd.f32 %v12289_v28, %v12428_v9 }
 0x656   : > { %v12606_v19 = vsel %vm14801_vm10, %v4611_v63, %v4606_v1  ;;  %4256 = vadd.xlane.f32.xlu1 %v4255_v32  ;;  %v4279_v1 = vsel %vm14797_vm1, %v3969_v55, 0.0  ;;  %v3940_v63 = vmul.f32 %v12450_v0, %v9719_v44  ;;  %v3978_v32 = vmul.f32 %v12450_v0, %v9721_v16 }
 0x657   : > { %4190 = vadd.xlane.f32.xlu0 %v4189_v35  ;;  %v4059_v60 = vpop.xlane.xlu1 %4058  ;;  %v9723_v35 = vpop.eup %9722  ;;  %v3736_v55 = vadd.f32 %v12592_v42, %v12579_v29  ;;  %9740 = vtanh.f32 %v3735_v59  ;;  %v3729_v59 = vadd.f32 %v12416_v6, %v12289_v28 }
 0x658   : > { %v12608_v11 = vpop.xlane.xlu0 %4118  ;;  %v4621_v56 = vrot.slane %v4059_v60, %v14958_v41  ;;  %v9725_v52 = vpop.eup %9724  ;;  %v4192_v3 = vsel %vm14797_vm1, %v3940_v63, 0.0  ;;  %v3970_v16 = vmul.f32 %v12450_v0, %v9723_v35  ;;  %v3737_v63 = vadd.f32 %v12560_v37, %v12592_v42 }
 0x659   : > { %v12628_v60 = vpop.f32.mrf.mxu0  ;;  %v9727_v45 = vpop.eup %9726  ;;  %9742 = vtanh.f32 %v3736_v55  ;;  %v4705_v55 = vrot.slane %v12534_v21, %v14963_v5  ;;  %v3738_v21 = vadd.f32 %v12592_v42, %v12614_v50 }
 0x65a   : > { %v4622_v20 = vsel %vm1739_vm2, %v4621_v56, %v4617_v8  ;;  %4304 = vadd.xlane.f32.xlu1 %v4303_v15  ;;  %14987 = vst [vmem:[#allocation140_spill] sm:$0xff] %v12628_v60  ;;  %v4306_v8 = vsel %vm14797_vm1, %v3978_v32, 0.0  ;;  %v3979_v56 = vmul.f32 %v12450_v0, %v9725_v52  ;;  %v4696_v52 = vrot.slane %v12516_v57, %v14959_v25 }
 0x65b   : > { %4280 = vadd.xlane.f32.xlu0 %v4279_v1  ;;  %v4062_v31 = vpop.xlane.xlu1 %4061  ;;  %v9729_v1 = vpop.eup %9728  ;;  %9744 = vtanh.f32 %v3728_v61 }
 0x65c   : > { %v12624_v30 = vpop.xlane.xlu0 %4208  ;;  %v4626_v44 = vrot.slane %v4062_v31, %v14963_v5  ;;  %v12644_v35 = vpop.f32.mrf.mxu0  ;;  %v3980_v37 = vmul.f32 %v12450_v0, %v9729_v1  ;;  %9746 = vtanh.f32 %v3737_v63 }
 0x65d   : > { %14988 = vst [vmem:[#allocation141_spill] sm:$0xff] %v12644_v35  ;;  %9748 = vtanh.f32 %v3729_v59 }
 0x65e   : > { %v4627_v15 = vsel %vm1746_vm3, %v4626_v44, %v4622_v20  ;;  %4307 = vadd.xlane.f32.xlu1 %v4306_v8  ;;  %v4282_v20 = vsel %vm14797_vm1, %v3970_v16, 0.0  ;;  %v3986_v44 = vmul.f32 %v12450_v0, %v9727_v45  ;;  %v4309_v8 = vsel %vm14797_vm1, %v3979_v56, 0.0  ;;  %v14989_v45 = vld [vmem:[#allocation93_spill] sm:$0xff] }
 0x65f   : > { %4193 = vadd.xlane.f32.xlu0 %v4192_v3  ;;  %v4107_v31 = vpop.xlane.xlu1 %4106  ;;  %v9731_v3 = vpop.eup %9730  ;;  %v3685_v26 = vadd.f32 %v14989_v45, %v12235_v13  ;;  %9750 = vtanh.f32 %v3738_v21  ;;  %v3740_v21 = vadd.f32 %v12592_v42, %v12644_v35  ;;  %v3732_v35 = vadd.f32 %v12289_v28, %v12506_v53 }
 0x660   : > { %v12638_v29 = vpop.xlane.xlu0 %4121  ;;  %v4700_v32 = vrot.slane %v4107_v31, %v14958_v41  ;;  %v9733_v6 = vpop.eup %9732  ;;  %v4330_v1 = vsel %vm14797_vm1, %v3986_v44, 0.0 }
 0x661   : > { %v9735_v56 = vpop.eup %9734  ;;  %v3981_v13 = vmul.f32 %v12450_v0, %v9733_v6  ;;  %9752 = vtanh.f32 %v3685_v26 }
 0x662   : > { %v4701_v9 = vsel %vm1739_vm2, %v4700_v32, %v4696_v52  ;;  %4310 = vadd.xlane.f32.xlu1 %v4309_v8  ;;  %v3987_v52 = vmul.f32 %v12450_v0, %v9731_v3  ;;  %v4312_v32 = vsel %vm14797_vm1, %v3980_v37, 0.0  ;;  %v4641_v8 = vrot.slane %v12589_v23, %v14971_v38 }
 0x663   : > { %4283 = vadd.xlane.f32.xlu0 %v4282_v20  ;;  %v4065_v31 = vpop.xlane.xlu1 %4064  ;;  %v12659_v16 = vsel %vm1746_vm3, %v4705_v55, %v4701_v9  ;;  %v12665_v20 = vpop.f32.mrf.mxu0  ;;  %v4636_v9 = vrot.slane %v12552_v17, %v14969_v24  ;;  %v3739_v17 = vadd.f32 %v12596_v43, %v12592_v42  ;;  %v3973_v59 = vmul.f32 %v12450_v0, %v9735_v56 }
 0x664   : > { %v12656_v57 = vpop.xlane.xlu0 %4211  ;;  %14990 = vst [vmem:[#allocation142_spill] sm:$0xff] %v12665_v20  ;;  %v4631_v61 = vrot.slane %v4065_v31, %v14966_v46  ;;  %v9737_v55 = vpop.eup %9736  ;;  %v4333_v6 = vsel %vm14797_vm1, %v3987_v52, 0.0  ;;  %v3716_v56 = vadd.f32 %v12276_v47, %v12257_v18 }
 0x665   : > { %v9739_v37 = vpop.eup %9738  ;;  %9754 = vtanh.f32 %v3739_v17 }
 0x666   : > { %v4632_v31 = vsel %vm14991_vm9, %v4631_v61, %v4627_v15  ;;  %4313 = vadd.xlane.f32.xlu1 %v4312_v32  ;;  %v9741_v15 = vpop.eup %9740  ;;  %v4315_v61 = vsel %vm14797_vm1, %v3981_v13, 0.0  ;;  %v3715_v32 = vadd.f32 %v12220_v33, %v12276_v47  ;;  %v4291_v13 = vsel %vm14797_vm1, %v3973_v59, 0.0 }
 0x667   : > { %4331 = vadd.xlane.f32.xlu0 %v4330_v1  ;;  %v4637_v63 = vsel %vm1760_vm5, %v4636_v9, %v4632_v31  ;;  %v4113_v3 = vpop.xlane.xlu1 %4112  ;;  %v12682_v1 = vpop.f32.mrf.mxu0  ;;  %v3982_v9 = vmul.f32 %v12450_v0, %v9737_v55  ;;  %v3983_v26 = vmul.f32 %v12450_v0, %v9739_v37  ;;  %v3991_v55 = vmul.f32 %v12450_v0, %v9741_v15 }
 0x668   : > { %v12677_v44 = vpop.xlane.xlu0 %4079  ;;  %14992 = vst [vmem:[#allocation143_spill] sm:$0xff] %v12682_v1  ;;  %v12687_v23 = vsel %vm1767_vm6, %v4641_v8, %v4637_v63  ;;  %v9743_v8 = vpop.eup %9742  ;;  %9756 = vtanh.f32 %v3715_v32  ;;  %v3741_v37 = vadd.f32 %v12628_v60, %v12592_v42 }
 0x669   : > { %v12699_v63 = vpop.f32.mrf.mxu0  ;;  %v9745_v47 = vpop.eup %9744  ;;  %9758 = vtanh.f32 %v3716_v56  ;;  %v4321_v15 = vsel %vm14797_vm1, %v3983_v26, 0.0  ;;  %v3992_v32 = vmul.f32 %v12450_v0, %v9743_v8  ;;  %v4720_v56 = vrot.slane %v12608_v11, %v14971_v38 }
 0x66a   : > { %4316 = vadd.xlane.f32.xlu1 %v4315_v61  ;;  %14993 = vst [vmem:[#allocation144_spill] sm:$0xff] %v12699_v63  ;;  %v4318_v61 = vsel %vm14797_vm1, %v3982_v9, 0.0  ;;  %9760 = vtanh.f32 %v3740_v21  ;;  %v4345_v9 = vsel %vm14797_vm1, %v3991_v55, 0.0  ;;  %v3984_v60 = vmul.f32 %v12450_v0, %v9745_v47 }
 0x66b   : > { %4334 = vadd.xlane.f32.xlu0 %v4333_v6  ;;  %v4200_v52 = vpop.xlane.xlu1 %4199  ;;  %v4710_v6 = vrot.slane %v4113_v3, %v14966_v46  ;;  %v12712_v17 = vpop.f32.mrf.mxu0  ;;  %v4725_v26 = vrot.slane %v12638_v29, %v14973_v22  ;;  %9762 = vtanh.f32 %v3732_v35  ;;  %v3734_v11 = vadd.f32 %v12592_v42, %v12542_v4 }
 0x66c   : > { %v12693_v31 = vpop.xlane.xlu0 %4082  ;;  %14994 = vst [vmem:[#allocation145_spill] sm:$0xff] %v12712_v17  ;;  %9764 = vtanh.f32 %v3741_v37  ;;  %v3742_v47 = vadd.f32 %v12592_v42, %v12682_v1 }
 0x66d   : > { %v4711_v21 = vsel %vm14991_vm9, %v4710_v6, %v12659_v16  ;;  %v4858_v16 = vrot.slane %v12570_v62, %v14958_v41  ;;  %v12736_v29 = vpop.f32.mrf.mxu0  ;;  %v4868_v62 = vrot.slane %v12624_v30, %v14966_v46  ;;  %v3733_v30 = vadd.f32 %v12487_v10, %v12289_v28 }
 0x66e   : > { %4319 = vadd.xlane.f32.xlu1 %v4318_v61  ;;  %v4854_v61 = vrot.slane %v4200_v52, %v14959_v25  ;;  %14995 = vst [vmem:[#allocation146_spill] sm:$0xff] %v12736_v29  ;;  %9766 = vtanh.f32 %v3742_v47 }
 0x66f   : > { %4292 = vadd.xlane.f32.xlu0 %v4291_v13  ;;  %v4116_v59 = vpop.xlane.xlu1 %4115  ;;  %v9747_v13 = vpop.eup %9746  ;;  %9768 = vtanh.f32 %v3734_v11 }
 0x670   : > { %v12706_v18 = vpop.xlane.xlu0 %4085  ;;  %v4715_v3 = vrot.slane %v4116_v59, %v14969_v24  ;;  %v9749_v53 = vpop.eup %9748  ;;  %v3993_v35 = vmul.f32 %v12450_v0, %v9747_v13  ;;  %v4859_v37 = vsel %vm1739_vm2, %v4858_v16, %v4854_v61  ;;  %9770 = vtanh.f32 %v3733_v30 }
 0x671   : > { %v12759_v61 = vpop.f32.mrf.mxu0 }
 0x672   : > { %v4716_v55 = vsel %vm1760_vm5, %v4715_v3, %v4711_v21  ;;  %4322 = vadd.xlane.f32.xlu1 %v4321_v15  ;;  %v4348_v3 = vsel %vm14797_vm1, %v3992_v32, 0.0  ;;  %v3985_v21 = vmul.f32 %v12450_v0, %v9749_v53  ;;  %v4873_v32 = vrot.slane %v12656_v57, %v14969_v24  ;;  %14996 = vst [vmem:[#allocation147_spill] sm:$0xff] %v12759_v61 }
 0x673   : > { %4346 = vadd.xlane.f32.xlu0 %v4345_v9  ;;  %v4721_v52 = vsel %vm1767_vm6, %v4720_v56, %v4716_v55  ;;  %v4206_v6 = vpop.xlane.xlu1 %4205  ;;  %v9751_v9 = vpop.eup %9750  ;;  %v4324_v56 = vsel %vm14797_vm1, %v3984_v60, 0.0  ;;  %v3743_v60 = vadd.f32 %v12665_v20, %v12592_v42  ;;  %v4351_v53 = vsel %vm14797_vm1, %v3993_v35, 0.0 }
 0x674   : > { %v12727_v8 = vpop.xlane.xlu0 %4088  ;;  %v4863_v59 = vrot.slane %v4206_v6, %v14963_v5  ;;  %v12742_v15 = vsel %vm1774_vm7, %v4725_v26, %v4721_v52  ;;  %v9753_v55 = vpop.eup %9752  ;;  %v3994_v57 = vmul.f32 %v12450_v0, %v9751_v9 }
 0x675   : > { %v3941_v28 = vmul.f32 %v12450_v0, %v9753_v55  ;;  %9772 = vtanh.f32 %v3743_v60 }
 0x676   : > { %v4864_v13 = vsel %vm1746_vm3, %v4863_v59, %v4859_v37  ;;  %4325 = vadd.xlane.f32.xlu1 %v4324_v56  ;;  %v9755_v59 = vpop.eup %9754  ;;  %v3745_v56 = vadd.f32 %v12699_v63, %v12592_v42  ;;  %v4354_v55 = vsel %vm14797_vm1, %v3994_v57, 0.0  ;;  %v4661_v57 = vrot.slane %v12693_v31, %v12465_v54 }
 0x677   : > { %4349 = vadd.xlane.f32.xlu0 %v4348_v3  ;;  %v4869_v52 = vsel %vm14991_vm9, %v4868_v62, %v4864_v13  ;;  %v4074_v6 = vpop.xlane.xlu1 %4073  ;;  %v4327_v62 = vsel %vm14797_vm1, %v3985_v21, 0.0  ;;  %v9757_v37 = vpop.eup %9756  ;;  %v3995_v11 = vmul.f32 %v12450_v0, %v9755_v59  ;;  %v4671_v31 = vrot.slane %v12727_v8, %v12501_v36 }
 0x678   : > { %v12752_v26 = vpop.xlane.xlu0 %4091  ;;  %v12764_v16 = vsel %vm1760_vm5, %v4873_v32, %v4869_v52  ;;  %v4646_v3 = vrot.slane %v4074_v6, %v14973_v22  ;;  %v9759_v9 = vpop.eup %9758  ;;  %v3744_v32 = vadd.f32 %v12592_v42, %v12712_v17  ;;  %v4656_v6 = vrot.slane %v12677_v44, %v12459_v40 }
 0x679   : > { %v9761_v13 = vpop.eup %9760  ;;  %v12773_v52 = vpop.f32.mrf.mxu0  ;;  %v3971_v30 = vmul.f32 %v12450_v0, %v9757_v37  ;;  %9774 = vtanh.f32 %v3745_v56  ;;  %vm14999_vm9 = vcmask 1041409  }
 0x67a   : > { %4328 = vadd.xlane.f32.xlu1 %v4327_v62  ;;  %14997 = vst [vmem:[#allocation148_spill] sm:$0xff] %v12773_v52  ;;  %v4195_v62 = vsel %vm14797_vm1, %v3941_v28, 0.0  ;;  %v9763_v44 = vpop.eup %9762  ;;  %9776 = vtanh.f32 %v3744_v32  ;;  %v4357_v32 = vsel %vm14797_vm1, %v3995_v11, 0.0 }
 0x67b   : > { %4352 = vadd.xlane.f32.xlu0 %v4351_v53  ;;  %v4077_v47 = vpop.xlane.xlu1 %4076  ;;  %v4647_v53 = vsel %vm1774_vm7, %v4646_v3, %v12687_v23  ;;  %v3746_v23 = vadd.f32 %v12592_v42, %v12759_v61  ;;  %v4666_v3 = vrot.slane %v12706_v18, %v12479_v51  ;;  %v9765_v56 = vpop.eup %9764  ;;  %v3749_v61 = vadd.f32 %v12773_v52, %v12592_v42 }
 0x67c   : > { %v4095_v35 = vpop.xlane.xlu0 %4094  ;;  %v4651_v21 = vrot.slane %v4077_v47, %v14976_v48  ;;  %v3747_v47 = vadd.f32 %v12736_v29, %v12592_v42 }
 0x67e   : > { %v4652_v60 = vsel %vm1781_vm8, %v4651_v21, %v4647_v53  ;;  %4196 = vadd.xlane.f32.xlu1 %v4195_v62  ;;  %v3996_v53 = vmul.f32 %v12450_v0, %v9761_v13  ;;  %v4676_v62 = vrot.slane %v12752_v26, %v12519_v34  ;;  %9778 = vtanh.f32 %v3747_v47 }
 0x67f   : > { %4355 = vadd.xlane.f32.xlu0 %v4354_v55  ;;  %v4657_v28 = vsel %vm4563_vm0, %v4656_v6, %v4652_v60  ;;  %v12794_v37 = vpop.xlane.xlu1 %4124  ;;  %v12796_v55 = vpop.f32.mrf.mxu0  ;;  %v4285_v6 = vsel %vm14797_vm1, %v3971_v30, 0.0  ;;  %v3972_v60 = vmul.f32 %v12450_v0, %v9759_v9  ;;  %9780 = vtanh.f32 %v3746_v23 }
 0x680   : > { %v4098_v59 = vpop.xlane.xlu0 %4097  ;;  %14998 = vst [vmem:[#allocation149_spill] sm:$0xff] %v12796_v55  ;;  %v4662_v21 = vsel %vm4570_vm4, %v4661_v57, %v4657_v28  ;;  %v4681_v57 = vrot.slane %v4095_v35, %v12537_v27  ;;  %v3748_v13 = vadd.f32 %v12592_v42, %v12796_v55  ;;  %v3997_v35 = vmul.f32 %v12450_v0, %v9765_v56 }
 0x681   : > { %v4667_v18 = vsel %vm4577_vm15, %v4666_v3, %v4662_v21  ;;  %v4686_v3 = vrot.slane %v4098_v59, %v12555_v7  ;;  %v9767_v21 = vpop.eup %9766  ;;  %v4288_v42 = vsel %vm14797_vm1, %v3972_v60, 0.0  ;;  %v3988_v59 = vmul.f32 %v12450_v0, %v9763_v44 }
 0x682   : > { %v4672_v8 = vsel %vm14799_vm14, %v4671_v31, %v4667_v18  ;;  %4286 = vadd.xlane.f32.xlu1 %v4285_v6  ;;  %v4360_v31 = vsel %vm14797_vm1, %v3996_v53, 0.0  ;;  %9782 = vtanh.f32 %v3748_v13  ;;  %v4363_v6 = vsel %vm14797_vm1, %v3997_v35, 0.0 }
 0x683   : > { %4358 = vadd.xlane.f32.xlu0 %v4357_v32  ;;  %v4677_v26 = vsel %vm14798_vm13, %v4676_v62, %v4672_v8  ;;  %v12816_v30 = vpop.xlane.xlu1 %4214  ;;  %v9769_v62 = vpop.eup %9768  ;;  %v3998_v60 = vmul.f32 %v12450_v0, %v9767_v21  ;;  %9784 = vtanh.f32 %v3749_v61  ;;  %v4336_v44 = vsel %vm14797_vm1, %v3988_v59, 0.0 }
 0x684   : > { %v4101_v11 = vpop.xlane.xlu0 %4100  ;;  %v4682_v28 = vsel %vm4598_vm12, %v4681_v57, %v4677_v26  ;;  %v9771_v23 = vpop.eup %9770  ;;  %v3990_v57 = vmul.f32 %v12450_v0, %v9769_v62 }
 0x685   : > { %v4691_v9 = vrot.slane %v4101_v11, %v12575_v14  ;;  %v4687_v32 = vsel %vm4605_vm11, %v4686_v3, %v4682_v28  ;;  %v9773_v8 = vpop.eup %9772  ;;  %v4366_v13 = vsel %vm14797_vm1, %v3998_v60, 0.0  ;;  %v3989_v61 = vmul.f32 %v12450_v0, %v9771_v23 }
 0x686   : > { %4289 = vadd.xlane.f32.xlu1 %v4288_v42  ;;  %v4342_v28 = vsel %vm14797_vm1, %v3990_v57, 0.0 }
 0x687   : > { %4361 = vadd.xlane.f32.xlu0 %v4360_v31  ;;  %v4692_v18 = vsel %vm14801_vm10, %v4691_v9, %v4687_v32  ;;  %v12832_v56 = vpop.xlane.xlu1 %4127  ;;  %v3999_v9 = vmul.f32 %v12450_v0, %v9773_v8  ;;  %v4339_v59 = vsel %vm14797_vm1, %v3989_v61, 0.0 }
 0x688   : > { %v12826_v47 = vpop.xlane.xlu0 %4241  ;;  %v12830_v53 = vsel %vm14999_vm9, %v4692_v18, %v12606_v19  ;;  %v9775_v19 = vpop.eup %9774  ;;  %v4735_v55 = vrot.slane %v12832_v56, %v12459_v40  ;;  %vm15001_vm9 = vcmask 1042434  }
 0x689   : > { %v9777_v3 = vpop.eup %9776  ;;  %v4369_v21 = vsel %vm14797_vm1, %v3999_v9, 0.0  ;;  %v4001_v62 = vmul.f32 %v12450_v0, %v9775_v19 }
 0x68a   : > { %4337 = vadd.xlane.f32.xlu1 %v4336_v44  ;;  %v4000_v32 = vmul.f32 %v12450_v0, %v9777_v3 }
 0x68b   : > { %4364 = vadd.xlane.f32.xlu0 %v4363_v6  ;;  %v12840_v26 = vpop.xlane.xlu1 %4217  ;;  %v9779_v42 = vpop.eup %9778  ;;  %v4375_v57 = vsel %vm14797_vm1, %v4001_v62, 0.0 }
 0x68c   : > { %v12838_v11 = vpop.xlane.xlu0 %4244  ;;  %v9781_v18 = vpop.eup %9780  ;;  %v4372_v23 = vsel %vm14797_vm1, %v4000_v32, 0.0  ;;  %v4003_v8 = vmul.f32 %v12450_v0, %v9779_v42 }
 0x68d   : > { %v4002_v3 = vmul.f32 %v12450_v0, %v9781_v18 }
 0x68e   : > { %4343 = vadd.xlane.f32.xlu1 %v4342_v28  ;;  %v4381_v28 = vsel %vm14797_vm1, %v4003_v8, 0.0 }
 0x68f   : > { %4367 = vadd.xlane.f32.xlu0 %v4366_v13  ;;  %v4131_v35 = vpop.xlane.xlu1 %4130  ;;  %v9783_v44 = vpop.eup %9782 }
 0x690   : > { %v12846_v31 = vpop.xlane.xlu0 %4154  ;;  %v9785_v13 = vpop.eup %9784  ;;  %v4004_v61 = vmul.f32 %v12450_v0, %v9783_v44  ;;  %v4740_v63 = vrot.slane %v4131_v35, %v12465_v54 }
 0x691   : > { %v4005_v32 = vmul.f32 %v12450_v0, %v9785_v13  ;;  %v4779_v39 = vrot.slane %v12846_v31, %v14958_v41 }
 0x692   : > { %4340 = vadd.xlane.f32.xlu1 %v4339_v59  ;;  %v4384_v62 = vsel %vm14797_vm1, %v4004_v61, 0.0 }
 0x693   : > { %4370 = vadd.xlane.f32.xlu0 %v4369_v21  ;;  %v12854_v60 = vpop.xlane.xlu1 %4220  ;;  %v4378_v21 = vsel %vm14797_vm1, %v4002_v3, 0.0  ;;  %v4387_v18 = vsel %vm14797_vm1, %v4005_v32, 0.0  ;;  %vm15011_vm1 = vcmask 1044484  }
 0x694   : > { %v12852_v6 = vpop.xlane.xlu0 %4157 }
 0x696   : > { %4376 = vadd.xlane.f32.xlu1 %v4375_v57 }
 0x697   : > { %4373 = vadd.xlane.f32.xlu0 %v4372_v23  ;;  %v4134_v19 = vpop.xlane.xlu1 %4133 }
 0x698   : > { %v12860_v9 = vpop.xlane.xlu0 %4160  ;;  %v4745_v17 = vrot.slane %v4134_v19, %v12479_v51 }
 0x699   : > { %v4789_v31 = vrot.slane %v12860_v9, %v14966_v46 }
 0x69a   : > { %4379 = vadd.xlane.f32.xlu1 %v4378_v21 }
 0x69b   : > { %4382 = vadd.xlane.f32.xlu0 %v4381_v28  ;;  %v12868_v59 = vpop.xlane.xlu1 %4223 }
 0x69c   : > { %v12866_v42 = vpop.xlane.xlu0 %4247 }
 0x69e   : > { %4388 = vadd.xlane.f32.xlu1 %v4387_v18  ;;  %v4730_v18 = vrot.slane %v12794_v37, %v14976_v48 }
 0x69f   : > { %4385 = vadd.xlane.f32.xlu0 %v4384_v62  ;;  %v4137_v8 = vpop.xlane.xlu1 %4136 }
 0x6a0   : > { %v12872_v23 = vpop.xlane.xlu0 %4295  ;;  %v4731_v10 = vsel %vm1781_vm8, %v4730_v18, %v12742_v15  ;;  %v4750_v20 = vrot.slane %v4137_v8, %v12501_v36 }
 0x6a1   : > { %v4736_v1 = vsel %vm4563_vm0, %v4735_v55, %v4731_v10 }
 0x6a2   : > { %v4741_v56 = vsel %vm4570_vm4, %v4740_v63, %v4736_v1 }
 0x6a3   : > { %v12876_v57 = vpop.xlane.xlu1 %4226  ;;  %v4746_v35 = vsel %vm4577_vm15, %v4745_v17, %v4741_v56 }
 0x6a4   : > { %v12874_v44 = vpop.xlane.xlu0 %4301  ;;  %v4751_v15 = vsel %vm14799_vm14, %v4750_v20, %v4746_v35 }
 0x6a5   : > { %15000 = vst [vmem:[#allocation150_spill] sm:$0xff] %v12874_v44 }
 0x6a7   : > { %v4140_v0 = vpop.xlane.xlu1 %4139 }
 0x6a8   : > { %v12878_v3 = vpop.xlane.xlu0 %4169  ;;  %v4755_v37 = vrot.slane %v4140_v0, %v12519_v34 }
 0x6aa   : > { %v4756_v8 = vsel %vm14798_vm13, %v4755_v37, %v4751_v15 }
 0x6ab   : > { %v12882_v28 = vpop.xlane.xlu1 %4229 }
 0x6ac   : > { %v12880_v13 = vpop.xlane.xlu0 %4259 }
 0x6af   : > { %v4143_v61 = vpop.xlane.xlu1 %4142 }
 0x6b0   : > { %v12884_v21 = vpop.xlane.xlu0 %4172  ;;  %v4760_v33 = vrot.slane %v4143_v61, %v12537_v27 }
 0x6b2   : > { %v4761_v10 = vsel %vm4598_vm12, %v4760_v33, %v4756_v8 }
 0x6b3   : > { %v12888_v62 = vpop.xlane.xlu1 %4232 }
 0x6b4   : > { %v12886_v32 = vpop.xlane.xlu0 %4262 }
 0x6b7   : > { %v4146_v29 = vpop.xlane.xlu1 %4145 }
 0x6b8   : > { %v12892_v52 = vpop.xlane.xlu0 %4175  ;;  %v4765_v19 = vrot.slane %v4146_v29, %v12555_v7 }
 0x6ba   : > { %v4766_v0 = vsel %vm4605_vm11, %v4765_v19, %v4761_v10 }
 0x6bb   : > { %v12905_v43 = vpop.xlane.xlu1 %4235 }
 0x6bc   : > { %v12901_v4 = vpop.xlane.xlu0 %4265 }
 0x6bf   : > { %v4149_v50 = vpop.xlane.xlu1 %4148 }
 0x6c0   : > { %v4179_v18 = vpop.xlane.xlu0 %4178  ;;  %v4770_v55 = vrot.slane %v4149_v50, %v12575_v14 }
 0x6c2   : > { %v4771_v1 = vsel %vm14801_vm10, %v4770_v55, %v4766_v0 }
 0x6c3   : > { %v12921_v17 = vsel %vm15001_vm9, %v4771_v1, %v12830_v53  ;;  %v12923_v29 = vpop.xlane.xlu1 %4238  ;;  %vm15008_vm9 = vcmask 261312  }
 0x6c4   : > { %v12917_v63 = vpop.xlane.xlu0 %4268 }
 0x6c7   : > { %v4152_v61 = vpop.xlane.xlu1 %4151 }
 0x6c8   : > { %v4182_v20 = vpop.xlane.xlu0 %4181  ;;  %v4775_v49 = vrot.slane %v4152_v61, %v14959_v25 }
 0x6ca   : > { %v4780_v12 = vsel %vm1739_vm2, %v4779_v39, %v4775_v49 }
 0x6cb   : > { %v12927_v56 = vpop.xlane.xlu1 %4250 }
 0x6cc   : > { %v12925_v37 = vpop.xlane.xlu0 %4271 }
 0x6cd   : > { %15002 = vst [vmem:[#allocation151_spill] sm:$0xff] %v12925_v37 }
 0x6cf   : > { %v4164_v50 = vpop.xlane.xlu1 %4163 }
 0x6d0   : > { %v12929_v33 = vpop.xlane.xlu0 %4184  ;;  %v4794_v44 = vrot.slane %v4164_v50, %v14969_v24 }
 0x6d3   : > { %v12933_v19 = vpop.xlane.xlu1 %4253 }
 0x6d4   : > { %v12931_v35 = vpop.xlane.xlu0 %4274 }
 0x6d5   : > { %15003 = vst [vmem:[#allocation152_spill] sm:$0xff] %v12931_v35 }
 0x6d7   : > { %v12937_v8 = vpop.xlane.xlu1 %4298 }
 0x6d8   : > { %v12935_v15 = vpop.xlane.xlu0 %4187 }
 0x6db   : > { %v4167_v10 = vpop.xlane.xlu1 %4166 }
 0x6dc   : > { %v12939_v53 = vpop.xlane.xlu0 %4277  ;;  %v4799_v61 = vrot.slane %v4167_v10, %v14971_v38  ;;  %v4809_v10 = vrot.slane %v12884_v21, %v14976_v48 }
 0x6dd   : > { %15004 = vst [vmem:[#allocation153_spill] sm:$0xff] %v12939_v53  ;;  %v4784_v53 = vrot.slane %v12852_v6, %v14963_v5 }
 0x6df   : > { %v12943_v0 = vpop.xlane.xlu1 %4256 }
 0x6e0   : > { %v12941_v55 = vpop.xlane.xlu0 %4190 }
 0x6e3   : > { %v12947_v45 = vpop.xlane.xlu1 %4304 }
 0x6e4   : > { %v12945_v1 = vpop.xlane.xlu0 %4280  ;;  %15006 = vst [vmem:[#allocation155_spill] sm:$0xff] %v12947_v45 }
 0x6e5   : > { %15005 = vst [vmem:[#allocation154_spill] sm:$0xff] %v12945_v1  ;;  %v4785_v1 = vsel %vm1746_vm3, %v4784_v53, %v4780_v12  ;;  %v4804_v12 = vrot.slane %v12878_v3, %v14973_v22  ;;  %v4878_v3 = vrot.slane %v12816_v30, %v14971_v38 }
 0x6e7   : > { %v12954_v2 = vpop.xlane.xlu1 %4307  ;;  %v4879_v30 = vsel %vm1767_vm6, %v4878_v3, %v12764_v16  ;;  %v4937_v16 = vrot.slane %v12927_v56, %v14958_v41 }
 0x6e8   : > { %v12952_v58 = vpop.xlane.xlu0 %4193  ;;  %15007 = vst [vmem:[#allocation156_spill] sm:$0xff] %v12954_v2  ;;  %v4790_v2 = vsel %vm15008_vm9, %v4789_v31, %v4785_v1 }
 0x6e9   : > { %v4795_v39 = vsel %vm1760_vm5, %v4794_v44, %v4790_v2  ;;  %v4814_v2 = vrot.slane %v12892_v52, %v12459_v40  ;;  %v4893_v52 = vrot.slane %v12868_v59, %v12459_v40  ;;  %v4908_v59 = vrot.slane %v12888_v62, %v12501_v36 }
 0x6ea   : > { %v4800_v6 = vsel %vm1767_vm6, %v4799_v61, %v4795_v39  ;;  %v4883_v39 = vrot.slane %v12840_v26, %v14973_v22  ;;  %v4898_v26 = vrot.slane %v12876_v57, %v12465_v54  ;;  %v4933_v62 = vrot.slane %v12866_v42, %v14959_v25 }
 0x6eb   : > { %v12963_v45 = vpop.xlane.xlu1 %4310  ;;  %v4805_v53 = vsel %vm1774_vm7, %v4804_v12, %v4800_v6  ;;  %v4819_v6 = vrot.slane %v4179_v18, %v12465_v54  ;;  %v4888_v12 = vrot.slane %v12854_v60, %v14976_v48  ;;  %v4824_v18 = vrot.slane %v4182_v20, %v12479_v51 }
 0x6ec   : > { %v12959_v35 = vpop.xlane.xlu0 %4283  ;;  %v4810_v1 = vsel %vm1781_vm8, %v4809_v10, %v4805_v53  ;;  %v4903_v60 = vrot.slane %v12882_v28, %v12479_v51  ;;  %v4829_v28 = vrot.slane %v12929_v33, %v12501_v36  ;;  %v4834_v42 = vrot.slane %v12935_v15, %v12519_v34 }
 0x6ed   : > { %v4815_v61 = vsel %vm4563_vm0, %v4814_v2, %v4810_v1  ;;  %v4884_v1 = vsel %vm1774_vm7, %v4883_v39, %v4879_v30  ;;  %v4942_v39 = vrot.slane %v12933_v19, %v14963_v5  ;;  %v4938_v19 = vsel %vm1739_vm2, %v4937_v16, %v4933_v62 }
 0x6ee   : > { %v4820_v10 = vsel %vm4570_vm4, %v4819_v6, %v4815_v61  ;;  %v4913_v61 = vrot.slane %v12905_v43, %v12519_v34  ;;  %v4918_v6 = vrot.slane %v12923_v29, %v12537_v27  ;;  %v4952_v15 = vrot.slane %v12880_v13, %v14969_v24 }
 0x6ef   : > { %v12972_v49 = vpop.xlane.xlu1 %4313  ;;  %v4825_v3 = vsel %vm4577_vm15, %v4824_v18, %v4820_v10  ;;  %v4943_v30 = vsel %vm1746_vm3, %v4942_v39, %v4938_v19  ;;  %v4957_v13 = vrot.slane %v12886_v32, %v14971_v38 }
 0x6f0   : > { %v12969_v37 = vpop.xlane.xlu0 %4331  ;;  %v4830_v43 = vsel %vm14799_vm14, %v4829_v28, %v4825_v3 }
 0x6f1   : > { %v4835_v18 = vsel %vm14798_vm13, %v4834_v42, %v4830_v43  ;;  %v5016_v43 = vrot.slane %v12937_v8, %v14958_v41  ;;  %v4967_v42 = vrot.slane %v12917_v63, %v14976_v48  ;;  %v15013_v8 = vld [vmem:[#allocation155_spill] sm:$0xff]  ;;  %v15015_v63 = vld [vmem:[#allocation156_spill] sm:$0xff] }
 0x6f3   : > { %v12980_v9 = vpop.xlane.xlu1 %4316 }
 0x6f4   : > { %v12977_v50 = vpop.xlane.xlu0 %4334 }
 0x6f7   : > { %v12989_v44 = vpop.xlane.xlu1 %4319 }
 0x6f8   : > { %v12985_v31 = vpop.xlane.xlu0 %4292 }
 0x6f9   : > { %15009 = vst [vmem:[#allocation157_spill] sm:$0xff] %v12985_v31  ;;  %v4889_v31 = vsel %vm1781_vm8, %v4888_v12, %v4884_v1  ;;  %v4844_v1 = vrot.slane %v12952_v58, %v12555_v7 }
 0x6fa   : > { %v4894_v20 = vsel %vm4563_vm0, %v4893_v52, %v4889_v31  ;;  %v4947_v31 = vrot.slane %v12943_v0, %v14966_v46 }
 0x6fb   : > { %v13001_v53 = vpop.xlane.xlu1 %4322  ;;  %v4899_v56 = vsel %vm4570_vm4, %v4898_v26, %v4894_v20 }
 0x6fc   : > { %v12997_v21 = vpop.xlane.xlu0 %4346  ;;  %v4904_v12 = vsel %vm4577_vm15, %v4903_v60, %v4899_v56  ;;  %v4948_v26 = vsel %vm15008_vm9, %v4947_v31, %v4943_v30  ;;  %v4923_v60 = vrot.slane %v12826_v47, %v12555_v7  ;;  %v4928_v47 = vrot.slane %v12838_v11, %v12575_v14 }
 0x6fd   : > { %v4909_v33 = vsel %vm14799_vm14, %v4908_v59, %v4904_v12  ;;  %v4839_v59 = vrot.slane %v12941_v55, %v12537_v27  ;;  %vm15010_vm9 = vcmask 1043459   ;;  %v4962_v11 = vrot.slane %v12901_v4, %v14973_v22  ;;  %v15012_v4 = vld [vmem:[#allocation151_spill] sm:$0xff] }
 0x6fe   : > { %v4914_v29 = vsel %vm14798_vm13, %v4913_v61, %v4909_v33  ;;  %v4953_v61 = vsel %vm1760_vm5, %v4952_v15, %v4948_v26 }
 0x6ff   : > { %v13022_v57 = vpop.xlane.xlu1 %4325  ;;  %v4919_v0 = vsel %vm4598_vm12, %v4918_v6, %v4914_v29  ;;  %v4840_v28 = vsel %vm4598_vm12, %v4839_v59, %v4835_v18  ;;  %v4958_v6 = vsel %vm1767_vm6, %v4957_v13, %v4953_v61  ;;  %v5026_v18 = vrot.slane %v15013_v8, %v14966_v46  ;;  %v15016_v61 = vld [vmem:[#allocation152_spill] sm:$0xff] }
 0x700   : > { %v13014_v2 = vpop.xlane.xlu0 %4349  ;;  %v4924_v20 = vsel %vm4605_vm11, %v4923_v60, %v4919_v0  ;;  %v4845_v39 = vsel %vm4605_vm11, %v4844_v1, %v4840_v28  ;;  %v4963_v33 = vsel %vm1774_vm7, %v4962_v11, %v4958_v6  ;;  %v4972_v0 = vrot.slane %v15012_v4, %v12459_v40  ;;  %v15014_v60 = vld [vmem:[#allocation150_spill] sm:$0xff] }
 0x701   : > { %v4929_v56 = vsel %vm14801_vm10, %v4928_v47, %v4924_v20  ;;  %v4968_v30 = vsel %vm1781_vm8, %v4967_v42, %v4963_v33  ;;  %v5021_v15 = vrot.slane %v15014_v60, %v14963_v5  ;;  %v5031_v59 = vrot.slane %v15015_v63, %v14969_v24 }
 0x702   : > { %v5036_v20 = vrot.slane %v12963_v45, %v14971_v38  ;;  %v4977_v28 = vrot.slane %v15016_v61, %v12465_v54  ;;  %v5041_v47 = vrot.slane %v12972_v49, %v14973_v22  ;;  %v5051_v11 = vrot.slane %v12989_v44, %v12459_v40 }
 0x703   : > { %v13046_v10 = vpop.xlane.xlu1 %4328  ;;  %v5056_v49 = vrot.slane %v13001_v53, %v12465_v54  ;;  %v5100_v44 = vrot.slane %v13014_v2, %v14963_v5 }
 0x704   : > { %v13040_v52 = vpop.xlane.xlu0 %4352  ;;  %v5066_v53 = vrot.slane %v13046_v10, %v12501_v36 }
 0x707   : > { %v4197_v3 = vpop.xlane.xlu1 %4196 }
 0x708   : > { %v13061_v16 = vpop.xlane.xlu0 %4355  ;;  %v4849_v58 = vrot.slane %v4197_v3, %v12575_v14 }
 0x70a   : > { %v4850_v55 = vsel %vm14801_vm10, %v4849_v58, %v4845_v39  ;;  %v5046_v39 = vrot.slane %v12980_v9, %v14976_v48  ;;  %v5095_v9 = vrot.slane %v12997_v21, %v14958_v41  ;;  %v5105_v21 = vrot.slane %v13040_v52, %v14966_v46 }
 0x70b   : > { %v5169_v31 = vsel %vm15010_vm9, %v4850_v55, %v12921_v17  ;;  %v13079_v12 = vpop.xlane.xlu1 %4286  ;;  %v5012_v17 = vrot.slane %v12872_v23, %v14959_v25  ;;  %v4973_v23 = vsel %vm4563_vm0, %v4972_v0, %v4968_v30  ;;  %v5061_v0 = vrot.slane %v13022_v57, %v12479_v51 }
 0x70c   : > { %v13073_v62 = vpop.xlane.xlu0 %4358  ;;  %v13084_v32 = vsel %vm15011_vm1, %v4929_v56, %v5169_v31  ;;  %vm15017_vm1 = vcmask 261312   ;;  %v15018_v56 = vld [vmem:[#allocation153_spill] sm:$0xff]  ;;  %v4978_v31 = vsel %vm4570_vm4, %v4977_v28, %v4973_v23  ;;  %v5110_v57 = vrot.slane %v13061_v16, %v14969_v24 }
 0x70d   : > { %v5017_v26 = vsel %vm1739_vm2, %v5016_v43, %v5012_v17  ;;  %v4982_v6 = vrot.slane %v15018_v56, %v12479_v51  ;;  %v15019_v17 = vld [vmem:[#allocation154_spill] sm:$0xff]  ;;  %v5115_v52 = vrot.slane %v13073_v62, %v14971_v38  ;;  %vm15020_vm9 = vmmov %vm15017_vm1 }
 0x70e   : > { %v5022_v58 = vsel %vm1746_vm3, %v5021_v15, %v5017_v26  ;;  %v4987_v30 = vrot.slane %v15019_v17, %v12501_v36 }
 0x70f   : > { %v13091_v29 = vpop.xlane.xlu1 %4289  ;;  %v5027_v13 = vsel %vm15017_vm1, %v5026_v18, %v5022_v58  ;;  %v4983_v60 = vsel %vm4577_vm15, %v4982_v6, %v4978_v31 }
 0x710   : > { %v4362_v19 = vpop.xlane.xlu0 %4361  ;;  %v5032_v45 = vsel %vm1760_vm5, %v5031_v59, %v5027_v13  ;;  %v4992_v59 = vrot.slane %v12959_v35, %v12519_v34  ;;  %v4997_v35 = vrot.slane %v13079_v12, %v12537_v27  ;;  %v4988_v31 = vsel %vm14799_vm14, %v4987_v30, %v4983_v60 }
 0x711   : > { %v5037_v33 = vsel %vm1767_vm6, %v5036_v20, %v5032_v45  ;;  %v5071_v20 = vrot.slane %v12969_v37, %v12519_v34  ;;  %v5120_v16 = vrot.slane %v4362_v19, %v14973_v22 }
 0x712   : > { %v5042_v4 = vsel %vm1774_vm7, %v5041_v47, %v5037_v33  ;;  %v4993_v45 = vsel %vm14798_vm13, %v4992_v59, %v4988_v31 }
 0x713   : > { %v13105_v3 = vpop.xlane.xlu1 %4337  ;;  %v5047_v26 = vsel %vm1781_vm8, %v5046_v39, %v5042_v4  ;;  %v5002_v39 = vrot.slane %v13091_v29, %v12555_v7 }
 0x714   : > { %v4365_v1 = vpop.xlane.xlu0 %4364  ;;  %v5052_v15 = vsel %vm4563_vm0, %v5051_v11, %v5047_v26 }
 0x715   : > { %v5057_v10 = vsel %vm4570_vm4, %v5056_v49, %v5052_v15  ;;  %v5125_v47 = vrot.slane %v4365_v1, %v14976_v48 }
 0x716   : > { %v5062_v61 = vsel %vm4577_vm15, %v5061_v0, %v5057_v10 }
 0x717   : > { %v4344_v43 = vpop.xlane.xlu1 %4343  ;;  %v5067_v58 = vsel %vm14799_vm14, %v5066_v53, %v5062_v61 }
 0x718   : > { %v4368_v55 = vpop.xlane.xlu0 %4367  ;;  %v5091_v42 = vrot.slane %v4344_v43, %v14959_v25  ;;  %v5072_v11 = vsel %vm14798_vm13, %v5071_v20, %v5067_v58  ;;  %v4998_v43 = vsel %vm4598_vm12, %v4997_v35, %v4993_v45 }
 0x719   : > { %v5130_v56 = vrot.slane %v4368_v55, %v12459_v40  ;;  %v5081_v55 = vrot.slane %v13105_v3, %v12555_v7  ;;  %v5003_v17 = vsel %vm4605_vm11, %v5002_v39, %v4998_v43  ;;  %v15021_v3 = vld [vmem:[#allocation157_spill] sm:$0xff]  ;;  %v10130_v43 = vld [vmem:[%s10617_s0 + $0xf8] sm:$0xff] }
 0x71a   : > { %v5096_v8 = vsel %vm1739_vm2, %v5095_v9, %v5091_v42  ;;  %v5076_v42 = vrot.slane %v12977_v50, %v12537_v27 }
 0x71b   : > { %v5101_v2 = vsel %vm1746_vm3, %v5100_v44, %v5096_v8  ;;  %v4341_v63 = vpop.xlane.xlu1 %4340  ;;  %v5007_v44 = vrot.slane %v15021_v3, %v12575_v14  ;;  %v10137_v3 = vld [vmem:[%s10617_s0 + $0xc0] sm:$0xff] }
 0x71c   : > { %v4371_v18 = vpop.xlane.xlu0 %4370  ;;  %v5106_v23 = vsel %vm15020_vm9, %v5105_v21, %v5101_v2  ;;  %v5086_v30 = vrot.slane %v4341_v63, %v12575_v14  ;;  %v5077_v21 = vsel %vm4598_vm12, %v5076_v42, %v5072_v11  ;;  %vm15022_vm9 = vcmask 1045509   ;;  %v10132_v42 = vld [vmem:[%s10617_s0 + $0xe8] sm:$0xff] }
 0x71d   : > { %v5111_v28 = vsel %vm1760_vm5, %v5110_v57, %v5106_v23  ;;  %v5135_v1 = vrot.slane %v4371_v18, %v12465_v54  ;;  %v5008_v8 = vsel %vm14801_vm10, %v5007_v44, %v5003_v17  ;;  %v5082_v18 = vsel %vm4605_vm11, %v5081_v55, %v5077_v21  ;;  %v13199_v57 = vld [vmem:[%s547_s24] sm:$0xff]  ;;  %v10138_v44 = vld [vmem:[%s10617_s0 + $0xb8] sm:$0xff]  ;;  %s10284_s24 = scalar_lea.vmem %s7742_s16, 128 }
 0x71e   : > { %v5116_v62 = vsel %vm1767_vm6, %v5115_v52, %v5111_v28  ;;  %v5087_v2 = vsel %vm14801_vm10, %v5086_v30, %v5082_v18  ;;  %vm14800_vm1 = vcmp.gt.f32.partialorder %v13199_v57, 0.5  ;;  %v5171_v20 = vsel %vm15022_vm9, %v5008_v8, %v13084_v32  ;;  %v10133_v17 = vld [vmem:[%s10617_s0 + $0xe0] sm:$0xff]  ;;  %v10134_v30 = vld [vmem:[%s10617_s0 + $0xd8] sm:$0xff]  ;;  %v10143_v18 = vld [vmem:[%s10617_s0 + $0x90] sm:$0xff]  ;;  %p10285_p1 = scmp.ne.s32.totalorder %s7742_s16, %s10284_s24  ;;  %p10292_p2 = scmp.lt.s32.totalorder %s10290_s12, %s10284_s24 }
 0x71f   : > { %v5121_v37 = vsel %vm1774_vm7, %v5120_v16, %v5116_v62  ;;  %v4377_v19 = vpop.xlane.xlu1 %4376  ;;  %v15026_v55 = vmov 0.0   ;;  %v10142_v21 = vld [vmem:[%s10617_s0 + $0x98] sm:$0xff]  ;;  %vm15030_vm9 = vcmask 1041409  }
 0x720   : > { %v4374_v13 = vpop.xlane.xlu0 %4373  ;;  %v5126_v12 = vsel %vm1781_vm8, %v5125_v47, %v5121_v37  ;;  %v5145_v49 = vrot.slane %v4377_v19, %v12501_v36  ;;  %p10286_p7 = pnand %p10285_p1, %p15309_p12  ;;  %p10293_p4 = por %p10292_p2, %p10291_p0 }
 0x721   : > { %v5140_v6 = vrot.slane %v4374_v13, %v12479_v51  ;;  %v5131_v29 = vsel %vm4563_vm0, %v5130_v56, %v5126_v12  ;;  %v15025_v12 = vld [vmem:[#allocation24_spill] sm:$0xff] }
 0x722   : > { %v5136_v33 = vsel %vm4570_vm4, %v5135_v1, %v5131_v29  ;;  %p10287_p10 = pneg %p10286_p7 }
 0x723   : > { %v5141_v4 = vsel %vm4577_vm15, %v5140_v6, %v5136_v33  ;;  %v4380_v0 = vpop.xlane.xlu1 %4379 }
 0x724   : > { %v4383_v9 = vpop.xlane.xlu0 %4382  ;;  %v5146_v53 = vsel %vm14799_vm14, %v5145_v49, %v5141_v4  ;;  %v5150_v50 = vrot.slane %v4380_v0, %v12519_v34  ;;  %vm15024_vm14 = vcmask 1047559   ;;  %v10131_v49 = vld [vmem:[%s10617_s0 + $0xf0] sm:$0xff]  ;;  %v10136_v0 = vld [vmem:[%s10617_s0 + $0xc8] sm:$0xff]  ;;  %p10294_p9 = pnand %p10293_p4, %p10287_p10 }
 0x725   : > { %v5155_v26 = vrot.slane %v4383_v9, %v12537_v27  ;;  %v10135_v4 = vld [vmem:[%s10617_s0 + $0xd0] sm:$0xff] }
 0x726   : > { %v5151_v60 = vsel %vm14798_vm13, %v5150_v50, %v5146_v53  ;;  %vm15023_vm13 = vcmask 1046534   ;;  %v10140_v53 = vld [vmem:[%s10617_s0 + $0xa8] sm:$0xff]  ;;  %v10141_v50 = vld [vmem:[%s10617_s0 + $0xa0] sm:$0xff] }
 0x727   : > { %v4389_v63 = vpop.xlane.xlu1 %4388  ;;  %v5156_v52 = vsel %vm4598_vm12, %v5155_v26, %v5151_v60  ;;  %v5172_v16 = vsel %vm15023_vm13, %v5087_v2, %v5171_v20  ;;  %vm15027_vm13 = vmmov 0   ;;  %v10139_v26 = vld [vmem:[%s10617_s0 + $0xb0] sm:$0xff]  ;;  %v10144_v60 = vld [vmem:[%s10617_s0 + $0x88] sm:$0xff]  ;;  %v10145_v2 = vld [vmem:[%s10617_s0 + $0x80] sm:$0xff] }
 0x728   : > { %v4386_v15 = vpop.xlane.xlu0 %4385  ;;  %v5165_v10 = vrot.slane %v4389_v63, %v12575_v14  ;;  %v10146_v63 = vld [vmem:[%s10617_s0 + $0x178] sm:$0xff]  ;;  %v10151_v20 = vld [vmem:[%s10617_s0 + $0x150] sm:$0xff] }
 0x729   : > { %v5160_v59 = vrot.slane %v4386_v15, %v12555_v7 }
 0x72b   : > { %v5161_v23 = vsel %vm4605_vm11, %v5160_v59, %v5156_v52  ;;  %v10147_v59 = vld [vmem:[%s10617_s0 + $0x170] sm:$0xff]  ;;  %v10149_v52 = vld [vmem:[%s10617_s0 + $0x160] sm:$0xff] }
 0x72c   : > { %v5166_v61 = vsel %vm14801_vm10, %v5165_v10, %v5161_v23  ;;  %v10148_v10 = vld [vmem:[%s10617_s0 + $0x168] sm:$0xff]  ;;  %v10150_v23 = vld [vmem:[%s10617_s0 + $0x158] sm:$0xff]  ;;  %vm15036_vm10 = vcmask 1047559  }
 0x72d   : > { %v5173_v28 = vsel %vm15024_vm14, %v5166_v61, %v5172_v16  ;;  %v10152_v61 = vld [vmem:[%s10617_s0 + $0x148] sm:$0xff]  ;;  %v10153_v16 = vld [vmem:[%s10617_s0 + $0x140] sm:$0xff]  ;;  %vm15029_vm14 = vcmask 523264  }
 0x72e   : > { %v5175_v58 = vsel %vm14800_vm1, %v5173_v28, -1e+30  ;;  %v10154_v28 = vld [vmem:[%s10617_s0 + $0x138] sm:$0xff]  ;;  %vm15035_vm1 = vcmask 1046534  }
 0x72f   : > { %5176 = vmax.xlane.f32.xlu0 %v5175_v58 }
 0x7b8   : > { %v5177_v35 = vpop.xlane.xlu0 %5176 }
 0x7b9   : > { %v5178_v47 = vsub.f32 %v5175_v58, %v5177_v35  ;;  %v10155_v58 = vld [vmem:[%s10617_s0 + $0x130] sm:$0xff]  ;;  %v10156_v35 = vld [vmem:[%s10617_s0 + $0x128] sm:$0xff] }
 0x7bb   : > { %v5179_v62 = vmul.f32 1.442695, %v5178_v47 }
 0x7bd   : > { %9786 = vpow2.f32 %v5179_v62  ;;  %v10158_v62 = vld [vmem:[%s10617_s0 + $0x118] sm:$0xff] }
 0x7ca   : > { %v9787_v13 = vpop.eup %9786 }
 0x7cb   : > { %5181 = vadd.xlane.f32.xlu1 %v9787_v13 }
 0x854   : > { %v5182_v39 = vpop.xlane.xlu1 %5181 }
 0x855   : > { %9788 = vlog2.f32 %v5182_v39 }
 0x856   : > { %9790 = vrcp.f32 %v5182_v39  ;;  %v10160_v39 = vld [vmem:[%s10617_s0 + $0x108] sm:$0xff] }
 0x862   : > { %v9789_v32 = vpop.eup %9788 }
 0x863   : > { %v9791_v37 = vpop.eup %9790  ;;  %v5184_v56 = vmul.f32 0.6931472, %v9789_v32 }
 0x864   : > { %v5188_v19 = vmul.f32 %v9791_v37, %v9787_v13  ;;  %v10159_v13 = vld [vmem:[%s10617_s0 + $0x110] sm:$0xff]  ;;  %v10161_v37 = vld [vmem:[%s10617_s0 + $0x100] sm:$0xff] }
 0x865   : > { %v5185_v6 = vsub.f32 %v5178_v47, %v5184_v56  ;;  %v10157_v47 = vld [vmem:[%s10617_s0 + $0x120] sm:$0xff]  ;;  %v10162_v56 = vld [vmem:[%s10617_s0 + $0x1f8] sm:$0xff] }
 0x866   : > { %v5190_v31 = vcombine.high %v5188_v19, %v5188_v19  ;;  %v5197_v1 = vrot.slane %v5188_v19, %v15025_v12  ;;  %v10163_v19 = vld [vmem:[%s10617_s0 + $0x1f0] sm:$0xff] }
 0x867   : > { %5186 = vst [vmem:[%s13218_s21] sm:$0xff] %v5185_v6  ;;  %v10164_v6 = vld [vmem:[%s10617_s0 + $0x1e8] sm:$0xff] }
 0x868   : > { %v13222_v45 = vrot.slane %v5190_v31, %v15025_v12  ;;  %v13225_v11 = vrot.slane %v5197_v1, %v15025_v12  ;;  %v5205_v8 = vcombine.high %v5197_v1, %v5197_v1  ;;  %v10165_v31 = vld [vmem:[%s10617_s0 + $0x1e0] sm:$0xff]  ;;  %v10166_v1 = vld [vmem:[%s10617_s0 + $0x1d8] sm:$0xff] }
 0x86a   : > { %v5206_v29 = vcombine.high %v13222_v45, %v13222_v45  ;;  %9017 = vmatmul.mubr.f32.vlgmr.msra.gmra.mxu1 %v13225_v11  ;;  %v13270_v15 = vrot.slane %v5205_v8, %v15025_v12  ;;  %v5235_v32 = vcombine.high %v13225_v11, %v13225_v11  ;;  %v10167_v11 = vld [vmem:[%s10617_s0 + $0x1d0] sm:$0xff]  ;;  %v10182_v8 = vld [vmem:[%s10617_s0 + $0x258] sm:$0xff] }
 0x86b   : > { %9020 = vmatpush3.msra.mxu1 %v10130_v43  ;;  %9051 = vmatprep.mubr.msk.f32.mxu1 %vm15027_vm13, %v15026_v55  ;;  %v10169_v43 = vld [vmem:[%s10617_s0 + $0x1c0] sm:$0xff] }
 0x86c   : > { %9021 = vmatprep.subr.mxu1 %v15026_v55  ;;  %v13235_v33 = vrot.slane %v5206_v29, %v15025_v12  ;;  %v10168_v29 = vld [vmem:[%s10617_s0 + $0x1c8] sm:$0xff] }
 0x86d   : > { %9022 = vmatpush3.msra.mxu1 %v10131_v49  ;;  %v10170_v49 = vld [vmem:[%s10617_s0 + $0x1b8] sm:$0xff] }
 0x86e   : > { %9023 = vmatprep.subr.mxu1 %v15026_v55  ;;  %v5238_v9 = vcombine.high %v13235_v33, %v13235_v33 }
 0x86f   : > { %9024 = vmatpush3.msra.mxu1 %v10132_v42  ;;  %v10172_v42 = vld [vmem:[%s10617_s0 + $0x1a8] sm:$0xff] }
 0x870   : > { %9025 = vmatprep.subr.mxu1 %v15026_v55  ;;  %9262 = vmatmul.mubr.f32.vlgmr.msra.gmra.mxu0 %v5238_v9  ;;  %v10171_v9 = vld [vmem:[%s10617_s0 + $0x1b0] sm:$0xff] }
 0x871   : > { %9026 = vmatpush3.msra.mxu1 %v10133_v17  ;;  %9334 = vmatprep.mubr.msk.f32.mxu0 %vm15027_vm13, %v15026_v55  ;;  %v10173_v17 = vld [vmem:[%s10617_s0 + $0x1a0] sm:$0xff] }
 0x872   : > { %9027 = vmatprep.subr.mxu1 %v15026_v55 }
 0x873   : > { %9028 = vmatpush3.msra.mxu1 %v10134_v30  ;;  %v10174_v30 = vld [vmem:[%s10617_s0 + $0x198] sm:$0xff] }
 0x874   : > { %9029 = vmatprep.subr.mxu1 %v15026_v55 }
 0x875   : > { %9030 = vmatpush3.msra.mxu1 %v10135_v4  ;;  %v10175_v4 = vld [vmem:[%s10617_s0 + $0x190] sm:$0xff] }
 0x876   : > { %9031 = vmatprep.subr.mxu1 %v15026_v55 }
 0x877   : > { %9032 = vmatpush3.msra.mxu1 %v10136_v0  ;;  %v10176_v0 = vld [vmem:[%s10617_s0 + $0x188] sm:$0xff] }
 0x878   : > { %9033 = vmatprep.subr.mxu1 %v15026_v55 }
 0x879   : > { %9034 = vmatpush3.msra.mxu1 %v10137_v3  ;;  %v5237_v3 = vcombine.high %v13270_v15, %v13270_v15 }
 0x87a   : > { %9035 = vmatprep.subr.mxu1 %v15026_v55 }
 0x87b   : > { %9036 = vmatpush3.msra.mxu1 %v10138_v44  ;;  %v10177_v44 = vld [vmem:[%s10617_s0 + $0x180] sm:$0xff] }
 0x87c   : > { %9037 = vmatprep.subr.mxu1 %v15026_v55 }
 0x87d   : > { %9038 = vmatpush3.msra.mxu1 %v10139_v26  ;;  %v10178_v26 = vld [vmem:[%s10617_s0 + $0x278] sm:$0xff] }
 0x87e   : > { %9039 = vmatprep.subr.mxu1 %v15026_v55 }
 0x87f   : > { %9040 = vmatpush3.msra.mxu1 %v10140_v53  ;;  %v10179_v53 = vld [vmem:[%s10617_s0 + $0x270] sm:$0xff] }
 0x880   : > { %9041 = vmatprep.subr.mxu1 %v15026_v55 }
 0x881   : > { %9042 = vmatpush3.msra.mxu1 %v10141_v50  ;;  %v10180_v50 = vld [vmem:[%s10617_s0 + $0x268] sm:$0xff] }
 0x882   : > { %9043 = vmatprep.subr.mxu1 %v15026_v55 }
 0x883   : > { %9044 = vmatpush3.msra.mxu1 %v10142_v21  ;;  %v10181_v21 = vld [vmem:[%s10617_s0 + $0x260] sm:$0xff] }
 0x884   : > { %9045 = vmatprep.subr.mxu1 %v15026_v55 }
 0x885   : > { %9046 = vmatpush3.msra.mxu1 %v10143_v18  ;;  %v10183_v18 = vld [vmem:[%s10617_s0 + $0x250] sm:$0xff] }
 0x886   : > { %9047 = vmatprep.subr.mxu1 %v15026_v55 }
 0x887   : > { %9048 = vmatpush3.msra.mxu1 %v10144_v60  ;;  %v10184_v60 = vld [vmem:[%s10617_s0 + $0x248] sm:$0xff] }
 0x888   : > { %9049 = vmatprep.subr.mxu1 %v15026_v55 }
 0x889   : > { %9050 = vmatpush3.msra.mxu1 %v10145_v2  ;;  %v10186_v2 = vld [vmem:[%s10617_s0 + $0x238] sm:$0xff] }
 0x88a   : > { %9052 = vmatmul.mubr.f32.vlgmr.msra.gmra.mxu1 %v13270_v15  ;;  %9054 = vmatprep.subr.mxu1 %v15026_v55  ;;  %v10185_v15 = vld [vmem:[%s10617_s0 + $0x240] sm:$0xff] }
 0x88b   : > { %9055 = vmatpush3.msra.mxu1 %v10146_v63  ;;  %9086 = vmatprep.mubr.msk.f32.mxu1 %vm15027_vm13, %v15026_v55  ;;  %v10187_v63 = vld [vmem:[%s10617_s0 + $0x230] sm:$0xff] }
 0x88c   : > { %9056 = vmatprep.subr.mxu1 %v15026_v55 }
 0x88d   : > { %9057 = vmatpush3.msra.mxu1 %v10147_v59  ;;  %v10188_v59 = vld [vmem:[%s10617_s0 + $0x228] sm:$0xff] }
 0x88e   : > { %9058 = vmatprep.subr.mxu1 %v15026_v55 }
 0x88f   : > { %9059 = vmatpush3.msra.mxu1 %v10148_v10  ;;  %v10189_v10 = vld [vmem:[%s10617_s0 + $0x220] sm:$0xff] }
 0x890   : > { %9060 = vmatprep.subr.mxu1 %v15026_v55 }
 0x891   : > { %9061 = vmatpush3.msra.mxu1 %v10149_v52  ;;  %v10190_v52 = vld [vmem:[%s10617_s0 + $0x218] sm:$0xff] }
 0x892   : > { %9062 = vmatprep.subr.mxu1 %v15026_v55 }
 0x893   : > { %9063 = vmatpush3.msra.mxu1 %v10150_v23  ;;  %v10191_v23 = vld [vmem:[%s10617_s0 + $0x210] sm:$0xff] }
 0x894   : > { %9064 = vmatprep.subr.mxu1 %v15026_v55 }
 0x895   : > { %9065 = vmatpush3.msra.mxu1 %v10151_v20  ;;  %v10192_v20 = vld [vmem:[%s10617_s0 + $0x208] sm:$0xff] }
 0x896   : > { %9066 = vmatprep.subr.mxu1 %v15026_v55 }
 0x897   : > { %9067 = vmatpush3.msra.mxu1 %v10152_v61  ;;  %v13381_v61 = vrot.slane %v13222_v45, %v15025_v12  ;;  %v10196_v45 = vld [vmem:[%s10617_s0 + $0x2e8] sm:$0xff] }
 0x898   : > { %9068 = vmatprep.subr.mxu1 %v15026_v55 }
 0x899   : > { %9069 = vmatpush3.msra.mxu1 %v10153_v16  ;;  %v10193_v16 = vld [vmem:[%s10617_s0 + $0x200] sm:$0xff] }
 0x89a   : > { %9070 = vmatprep.subr.mxu1 %v15026_v55 }
 0x89b   : > { %9071 = vmatpush3.msra.mxu1 %v10154_v28  ;;  %v10194_v28 = vld [vmem:[%s10617_s0 + $0x2f8] sm:$0xff] }
 0x89c   : > { %9072 = vmatprep.subr.mxu1 %v15026_v55 }
 0x89d   : > { %9073 = vmatpush3.msra.mxu1 %v10155_v58  ;;  %v10195_v58 = vld [vmem:[%s10617_s0 + $0x2f0] sm:$0xff] }
 0x89e   : > { %9074 = vmatprep.subr.mxu1 %v15026_v55 }
 0x89f   : > { %9075 = vmatpush3.msra.mxu1 %v10156_v35  ;;  %v10197_v35 = vld [vmem:[%s10617_s0 + $0x2e0] sm:$0xff] }
 0x8a0   : > { %9076 = vmatprep.subr.mxu1 %v15026_v55 }
 0x8a1   : > { %9077 = vmatpush3.msra.mxu1 %v10157_v47  ;;  %v10198_v47 = vld [vmem:[%s10617_s0 + $0x2d8] sm:$0xff] }
 0x8a2   : > { %9078 = vmatprep.subr.mxu1 %v15026_v55 }
 0x8a3   : > { %9079 = vmatpush3.msra.mxu1 %v10158_v62  ;;  %v10199_v62 = vld [vmem:[%s10617_s0 + $0x2d0] sm:$0xff] }
 0x8a4   : > { %9080 = vmatprep.subr.mxu1 %v15026_v55 }
 0x8a5   : > { %9081 = vmatpush3.msra.mxu1 %v10159_v13  ;;  %v10200_v13 = vld [vmem:[%s10617_s0 + $0x2c8] sm:$0xff] }
 0x8a6   : > { %9082 = vmatprep.subr.mxu1 %v15026_v55 }
 0x8a7   : > { %9083 = vmatpush3.msra.mxu1 %v10160_v39  ;;  %v10201_v39 = vld [vmem:[%s10617_s0 + $0x2c0] sm:$0xff] }
 0x8a8   : > { %9084 = vmatprep.subr.mxu1 %v15026_v55 }
 0x8a9   : > { %9085 = vmatpush3.msra.mxu1 %v10161_v37  ;;  %v10203_v37 = vld [vmem:[%s10617_s0 + $0x2b0] sm:$0xff] }
 0x8aa   : > { %9087 = vmatmul.mubr.f32.vlgmr.msra.gmra.mxu1 %v5235_v32  ;;  %9089 = vmatprep.subr.mxu1 %v15026_v55  ;;  %v10202_v32 = vld [vmem:[%s10617_s0 + $0x2b8] sm:$0xff] }
 0x8ab   : > { %9090 = vmatpush3.msra.mxu1 %v10162_v56  ;;  %9121 = vmatprep.mubr.msk.f32.mxu1 %vm15027_vm13, %v15026_v55  ;;  %v10204_v56 = vld [vmem:[%s10617_s0 + $0x2a8] sm:$0xff] }
 0x8ac   : > { %9091 = vmatprep.subr.mxu1 %v15026_v55 }
 0x8ad   : > { %9092 = vmatpush3.msra.mxu1 %v10163_v19  ;;  %v10205_v19 = vld [vmem:[%s10617_s0 + $0x2a0] sm:$0xff] }
 0x8ae   : > { %9093 = vmatprep.subr.mxu1 %v15026_v55 }
 0x8af   : > { %9094 = vmatpush3.msra.mxu1 %v10164_v6  ;;  %v10206_v6 = vld [vmem:[%s10617_s0 + $0x298] sm:$0xff] }
 0x8b0   : > { %9095 = vmatprep.subr.mxu1 %v15026_v55 }
 0x8b1   : > { %9096 = vmatpush3.msra.mxu1 %v10165_v31  ;;  %v10207_v31 = vld [vmem:[%s10617_s0 + $0x290] sm:$0xff] }
 0x8b2   : > { %9097 = vmatprep.subr.mxu1 %v15026_v55 }
 0x8b3   : > { %9098 = vmatpush3.msra.mxu1 %v10166_v1  ;;  %v10208_v1 = vld [vmem:[%s10617_s0 + $0x288] sm:$0xff] }
 0x8b4   : > { %9099 = vmatprep.subr.mxu1 %v15026_v55 }
 0x8b5   : > { %9100 = vmatpush3.msra.mxu1 %v10167_v11  ;;  %v10209_v11 = vld [vmem:[%s10617_s0 + $0x280] sm:$0xff] }
 0x8b6   : > { %9101 = vmatprep.subr.mxu1 %v15026_v55 }
 0x8b7   : > { %9102 = vmatpush3.msra.mxu1 %v10168_v29  ;;  %v10210_v29 = vld [vmem:[%s10617_s0 + $0x378] sm:$0xff] }
 0x8b8   : > { %9103 = vmatprep.subr.mxu1 %v15026_v55 }
 0x8b9   : > { %9104 = vmatpush3.msra.mxu1 %v10169_v43  ;;  %v10211_v43 = vld [vmem:[%s10617_s0 + $0x370] sm:$0xff] }
 0x8ba   : > { %9105 = vmatprep.subr.mxu1 %v15026_v55 }
 0x8bb   : > { %9106 = vmatpush3.msra.mxu1 %v10170_v49  ;;  %v10212_v49 = vld [vmem:[%s10617_s0 + $0x368] sm:$0xff] }
 0x8bc   : > { %9107 = vmatprep.subr.mxu1 %v15026_v55 }
 0x8bd   : > { %9108 = vmatpush3.msra.mxu1 %v10171_v9  ;;  %v10214_v9 = vld [vmem:[%s10617_s0 + $0x358] sm:$0xff] }
 0x8be   : > { %9109 = vmatprep.subr.mxu1 %v15026_v55 }
 0x8bf   : > { %9110 = vmatpush3.msra.mxu1 %v10172_v42  ;;  %v10215_v42 = vld [vmem:[%s10617_s0 + $0x350] sm:$0xff] }
 0x8c0   : > { %9111 = vmatprep.subr.mxu1 %v15026_v55 }
 0x8c1   : > { %9112 = vmatpush3.msra.mxu1 %v10173_v17  ;;  %v10216_v17 = vld [vmem:[%s10617_s0 + $0x348] sm:$0xff] }
 0x8c2   : > { %9113 = vmatprep.subr.mxu1 %v15026_v55 }
 0x8c3   : > { %9114 = vmatpush3.msra.mxu1 %v10174_v30  ;;  %v10217_v30 = vld [vmem:[%s10617_s0 + $0x340] sm:$0xff] }
 0x8c4   : > { %9115 = vmatprep.subr.mxu1 %v15026_v55 }
 0x8c5   : > { %9116 = vmatpush3.msra.mxu1 %v10175_v4  ;;  %v10218_v4 = vld [vmem:[%s10617_s0 + $0x338] sm:$0xff] }
 0x8c6   : > { %9117 = vmatprep.subr.mxu1 %v15026_v55 }
 0x8c7   : > { %9118 = vmatpush3.msra.mxu1 %v10176_v0  ;;  %v10219_v0 = vld [vmem:[%s10617_s0 + $0x330] sm:$0xff] }
 0x8c8   : > { %9119 = vmatprep.subr.mxu1 %v15026_v55 }
 0x8c9   : > { %9120 = vmatpush3.msra.mxu1 %v10177_v44  ;;  %v10221_v44 = vld [vmem:[%s10617_s0 + $0x320] sm:$0xff] }
 0x8ca   : > { %9122 = vmatmul.mubr.f32.vlgmr.msra.gmra.mxu1 %v5237_v3  ;;  %9124 = vmatprep.subr.mxu1 %v15026_v55  ;;  %v10220_v3 = vld [vmem:[%s10617_s0 + $0x328] sm:$0xff] }
 0x8cb   : > { %9125 = vmatpush3.msra.mxu1 %v10178_v26  ;;  %9156 = vmatprep.mubr.msk.f32.mxu1 %vm15027_vm13, %v15026_v55  ;;  %v10222_v26 = vld [vmem:[%s10617_s0 + $0x318] sm:$0xff] }
 0x8cc   : > { %9126 = vmatprep.subr.mxu1 %v15026_v55 }
 0x8cd   : > { %9127 = vmatpush3.msra.mxu1 %v10179_v53  ;;  %v10223_v53 = vld [vmem:[%s10617_s0 + $0x310] sm:$0xff] }
 0x8ce   : > { %9128 = vmatprep.subr.mxu1 %v15026_v55 }
 0x8cf   : > { %9129 = vmatpush3.msra.mxu1 %v10180_v50  ;;  %v10224_v50 = vld [vmem:[%s10617_s0 + $0x308] sm:$0xff] }
 0x8d0   : > { %9130 = vmatprep.subr.mxu1 %v15026_v55 }
 0x8d1   : > { %9131 = vmatpush3.msra.mxu1 %v10181_v21  ;;  %v5236_v21 = vcombine.high %v13381_v61, %v13381_v61 }
 0x8d2   : > { %9132 = vmatprep.subr.mxu1 %v15026_v55 }
 0x8d3   : > { %9133 = vmatpush3.msra.mxu1 %v10182_v8  ;;  %v5830_v8 = vld [vmem:[%s14617_s10 + $0x38] sm:$0xff] }
 0x8d4   : > { %9134 = vmatprep.subr.mxu1 %v15026_v55 }
 0x8d5   : > { %9135 = vmatpush3.msra.mxu1 %v10183_v18  ;;  %v10225_v18 = vld [vmem:[%s10617_s0 + $0x300] sm:$0xff] }
 0x8d6   : > { %9136 = vmatprep.subr.mxu1 %v15026_v55 }
 0x8d7   : > { %9137 = vmatpush3.msra.mxu1 %v10184_v60 }
 0x8d8   : > { %9138 = vmatprep.subr.mxu1 %v15026_v55 }
 0x8d9   : > { %9139 = vmatpush3.msra.mxu1 %v10185_v15  ;;  %v5829_v15 = vld [vmem:[%s14617_s10 + $0x30] sm:$0xff] }
 0x8da   : > { %9140 = vmatprep.subr.mxu1 %v15026_v55 }
 0x8db   : > { %9141 = vmatpush3.msra.mxu1 %v10186_v2 }
 0x8dc   : > { %9142 = vmatprep.subr.mxu1 %v15026_v55 }
 0x8dd   : > { %9143 = vmatpush3.msra.mxu1 %v10187_v63  ;;  %v5828_v63 = vld [vmem:[%s14617_s10 + $0x28] sm:$0xff] }
 0x8de   : > { %9144 = vmatprep.subr.mxu1 %v15026_v55 }
 0x8df   : > { %9145 = vmatpush3.msra.mxu1 %v10188_v59  ;;  %v5827_v59 = vld [vmem:[%s14617_s10 + $0x20] sm:$0xff] }
 0x8e0   : > { %9146 = vmatprep.subr.mxu1 %v15026_v55 }
 0x8e1   : > { %9147 = vmatpush3.msra.mxu1 %v10189_v10 }
 0x8e2   : > { %9148 = vmatprep.subr.mxu1 %v15026_v55 }
 0x8e3   : > { %9149 = vmatpush3.msra.mxu1 %v10190_v52  ;;  %v5826_v52 = vld [vmem:[%s14617_s10 + $0x18] sm:$0xff] }
 0x8e4   : > { %9150 = vmatprep.subr.mxu1 %v15026_v55 }
 0x8e5   : > { %9151 = vmatpush3.msra.mxu1 %v10191_v23 }
 0x8e6   : > { %9152 = vmatprep.subr.mxu1 %v15026_v55 }
 0x8e7   : > { %9153 = vmatpush3.msra.mxu1 %v10192_v20  ;;  %v5825_v20 = vld [vmem:[%s14617_s10 + $0x10] sm:$0xff] }
 0x8e8   : > { %9154 = vmatprep.subr.mxu1 %v15026_v55 }
 0x8e9   : > { %9155 = vmatpush3.msra.mxu1 %v10193_v16  ;;  %v5823_v16 = vld [vmem:[%s14617_s10] sm:$0xff] }
 0x8ea   : > { %9157 = vmatmul.mubr.f32.vlgmr.msra.gmra.mxu1 %v13381_v61  ;;  %9159 = vmatprep.subr.mxu1 %v15026_v55  ;;  %v5824_v61 = vld [vmem:[%s14617_s10 + $0x8] sm:$0xff] }
 0x8eb   : > { %9160 = vmatpush3.msra.mxu1 %v10194_v28  ;;  %9191 = vmatprep.mubr.msk.f32.mxu1 %vm15027_vm13, %v15026_v55  ;;  %v15028_v28 = vld [vmem:[#allocation50_spill] sm:$0xff] }
 0x8ec   : > { %9161 = vmatprep.subr.mxu1 %v15026_v55 }
 0x8ed   : > { %9162 = vmatpush3.msra.mxu1 %v10195_v58 }
 0x8ee   : > { %9163 = vmatprep.subr.mxu1 %v15026_v55 }
 0x8ef   : > { %9164 = vmatpush3.msra.mxu1 %v10196_v45 }
 0x8f0   : > { %9165 = vmatprep.subr.mxu1 %v15026_v55 }
 0x8f1   : > { %9166 = vmatpush3.msra.mxu1 %v10197_v35 }
 0x8f2   : > { %9167 = vmatprep.subr.mxu1 %v15026_v55 }
 0x8f3   : > { %9168 = vmatpush3.msra.mxu1 %v10198_v47 }
 0x8f4   : > { %9169 = vmatprep.subr.mxu1 %v15026_v55 }
 0x8f5   : > { %9170 = vmatpush3.msra.mxu1 %v10199_v62  ;;  %v5822_v62 = vld [vmem:[%s14616_s9 + $0x78] sm:$0xff] }
 0x8f6   : > { %9171 = vmatprep.subr.mxu1 %v15026_v55 }
 0x8f7   : > { %9172 = vmatpush3.msra.mxu1 %v10200_v13  ;;  %v5821_v13 = vld [vmem:[%s14616_s9 + $0x70] sm:$0xff] }
 0x8f8   : > { %9173 = vmatprep.subr.mxu1 %v15026_v55 }
 0x8f9   : > { %9174 = vmatpush3.msra.mxu1 %v10201_v39  ;;  %v5820_v39 = vld [vmem:[%s14616_s9 + $0x68] sm:$0xff] }
 0x8fa   : > { %9175 = vmatprep.subr.mxu1 %v15026_v55 }
 0x8fb   : > { %9176 = vmatpush3.msra.mxu1 %v10202_v32  ;;  %v5819_v32 = vld [vmem:[%s14616_s9 + $0x60] sm:$0xff] }
 0x8fc   : > { %9177 = vmatprep.subr.mxu1 %v15026_v55 }
 0x8fd   : > { %9178 = vmatpush3.msra.mxu1 %v10203_v37  ;;  %v5818_v37 = vld [vmem:[%s14616_s9 + $0x58] sm:$0xff] }
 0x8fe   : > { %9179 = vmatprep.subr.mxu1 %v15026_v55 }
 0x8ff   : > { %9180 = vmatpush3.msra.mxu1 %v10204_v56  ;;  %v5817_v56 = vld [vmem:[%s14616_s9 + $0x50] sm:$0xff] }
 0x900   : > { %9181 = vmatprep.subr.mxu1 %v15026_v55 }
 0x901   : > { %9182 = vmatpush3.msra.mxu1 %v10205_v19  ;;  %v5816_v19 = vld [vmem:[%s14616_s9 + $0x48] sm:$0xff] }
 0x902   : > { %9183 = vmatprep.subr.mxu1 %v15026_v55 }
 0x903   : > { %9184 = vmatpush3.msra.mxu1 %v10206_v6  ;;  %v5815_v6 = vld [vmem:[%s14616_s9 + $0x40] sm:$0xff] }
 0x904   : > { %9185 = vmatprep.subr.mxu1 %v15026_v55 }
 0x905   : > { %9186 = vmatpush3.msra.mxu1 %v10207_v31  ;;  %v5814_v31 = vld [vmem:[%s14616_s9 + $0x38] sm:$0xff] }
 0x906   : > { %9187 = vmatprep.subr.mxu1 %v15026_v55 }
 0x907   : > { %9188 = vmatpush3.msra.mxu1 %v10208_v1  ;;  %v5813_v1 = vld [vmem:[%s14616_s9 + $0x30] sm:$0xff] }
 0x908   : > { %9189 = vmatprep.subr.mxu1 %v15026_v55 }
 0x909   : > { %9190 = vmatpush3.msra.mxu1 %v10209_v11  ;;  %v5812_v11 = vld [vmem:[%s14616_s9 + $0x28] sm:$0xff] }
 0x90a   : > { %9192 = vmatmul.mubr.f32.vlgmr.msra.gmra.mxu1 %v13235_v33  ;;  %9194 = vmatprep.subr.mxu1 %v15026_v55  ;;  %v10213_v33 = vld [vmem:[%s10617_s0 + $0x360] sm:$0xff] }
 0x90b   : > { %9195 = vmatpush3.msra.mxu1 %v10210_v29  ;;  %9226 = vmatprep.mubr.msk.f32.mxu1 %vm15027_vm13, %v15026_v55  ;;  %v5811_v29 = vld [vmem:[%s14616_s9 + $0x20] sm:$0xff] }
 0x90c   : > { %9196 = vmatprep.subr.mxu1 %v15026_v55 }
 0x90d   : > { %9197 = vmatpush3.msra.mxu1 %v10211_v43  ;;  %v5810_v43 = vld [vmem:[%s14616_s9 + $0x18] sm:$0xff] }
 0x90e   : > { %9198 = vmatprep.subr.mxu1 %v15026_v55 }
 0x90f   : > { %9199 = vmatpush3.msra.mxu1 %v10212_v49 }
 0x910   : > { %9200 = vmatprep.subr.mxu1 %v15026_v55 }
 0x911   : > { %9201 = vmatpush3.msra.mxu1 %v10213_v33 }
 0x912   : > { %9202 = vmatprep.subr.mxu1 %v15026_v55 }
 0x913   : > { %9203 = vmatpush3.msra.mxu1 %v10214_v9 }
 0x914   : > { %9204 = vmatprep.subr.mxu1 %v15026_v55 }
 0x915   : > { %9205 = vmatpush3.msra.mxu1 %v10215_v42 }
 0x916   : > { %9206 = vmatprep.subr.mxu1 %v15026_v55 }
 0x917   : > { %9207 = vmatpush3.msra.mxu1 %v10216_v17  ;;  %v5809_v17 = vld [vmem:[%s14616_s9 + $0x10] sm:$0xff] }
 0x918   : > { %9208 = vmatprep.subr.mxu1 %v15026_v55 }
 0x919   : > { %9209 = vmatpush3.msra.mxu1 %v10217_v30  ;;  %v5808_v30 = vld [vmem:[%s14616_s9 + $0x8] sm:$0xff] }
 0x91a   : > { %9210 = vmatprep.subr.mxu1 %v15026_v55 }
 0x91b   : > { %9211 = vmatpush3.msra.mxu1 %v10218_v4  ;;  %v5807_v4 = vld [vmem:[%s14616_s9] sm:$0xff] }
 0x91c   : > { %9212 = vmatprep.subr.mxu1 %v15026_v55 }
 0x91d   : > { %9213 = vmatpush3.msra.mxu1 %v10219_v0 }
 0x91e   : > { %9214 = vmatprep.subr.mxu1 %v15026_v55 }
 0x91f   : > { %9215 = vmatpush3.msra.mxu1 %v10220_v3 }
 0x920   : > { %9216 = vmatprep.subr.mxu1 %v15026_v55 }
 0x921   : > { %9217 = vmatpush3.msra.mxu1 %v10221_v44 }
 0x922   : > { %9218 = vmatprep.subr.mxu1 %v15026_v55 }
 0x923   : > { %9219 = vmatpush3.msra.mxu1 %v10222_v26 }
 0x924   : > { %9220 = vmatprep.subr.mxu1 %v15026_v55 }
 0x925   : > { %9221 = vmatpush3.msra.mxu1 %v10223_v53 }
 0x926   : > { %9222 = vmatprep.subr.mxu1 %v15026_v55 }
 0x927   : > { %9223 = vmatpush3.msra.mxu1 %v10224_v50 }
 0x928   : > { %9224 = vmatprep.subr.mxu1 %v15026_v55 }
 0x929   : > { %9225 = vmatpush3.msra.mxu1 %v10225_v18 }
 0x92a   : > { %9227 = vmatmul.mubr.f32.vlgmr.msra.gmra.mxu1 %v5236_v21  ;;  %9264 = vmatprep.subr.mxu1 %v15026_v55  ;;  %v5313_v60 = vpop.f32.mrf.mxu1 }
 0x92b   : > { %9265 = vmatpush3.msra.mxu1 %v5830_v8  ;;  %9280 = vmatprep.mubr.msk.f32.mxu1 %vm15027_vm13, %v15026_v55 }
 0x92c   : > { %9266 = vmatprep.subr.mxu1 %v15026_v55  ;;  %v9018_v2 = vpop.f32.mrf.mxu1 }
 0x92d   : > { %9267 = vmatpush3.msra.mxu1 %v5829_v15 }
 0x92e   : > { %9268 = vmatprep.subr.mxu1 %v15026_v55 }
 0x92f   : > { %9269 = vmatpush3.msra.mxu1 %v5828_v63 }
 0x930   : > { %9270 = vmatprep.subr.mxu1 %v15026_v55  ;;  %v13474_v10 = vpop.f32.mrf.mxu0 }
 0x931   : > { %9271 = vmatpush3.msra.mxu1 %v5827_v59  ;;  %v5921_v59 = vrot.slane %v13474_v10, 1  ;;  %v6008_v10 = vld [vmem:[%s14614_s7 + $0x28] sm:$0xff] }
 0x932   : > { %9272 = vmatprep.subr.mxu1 %v15026_v55  ;;  %v9263_v23 = vpop.f32.mrf.mxu0 }
 0x933   : > { %9273 = vmatpush3.msra.mxu1 %v5826_v52 }
 0x934   : > { %9274 = vmatprep.subr.mxu1 %v15026_v55 }
 0x935   : > { %9275 = vmatpush3.msra.mxu1 %v5825_v20 }
 0x936   : > { %9276 = vmatprep.subr.mxu1 %v15026_v55 }
 0x937   : > { %9277 = vmatpush3.msra.mxu1 %v5824_v61 }
 0x938   : > { %9278 = vmatprep.subr.mxu1 %v15026_v55 }
 0x939   : > { %9279 = vmatpush3.msra.mxu1 %v5823_v16 }
 0x93a   : > { %9281 = vmatmul.mubr.msk.f32.vlgmr.msra.gmra.mxu1 %vm15029_vm14, %v15028_v28  ;;  %9283 = vmatprep.subr.mxu1 %v15026_v55  ;;  %vm15032_vm14 = vcmask 1043459  }
 0x93b   : > { %9315 = vmatprep.mubr.msk.f32.mxu1 %vm15027_vm13, %v15026_v55  ;;  %9284 = vmatpush3.msra.mxu1 %v5822_v62  ;;  %vm15031_vm13 = vcmask 1042434   ;;  %v6005_v62 = vld [vmem:[%s14614_s7 + $0x10] sm:$0xff] }
 0x93c   : > { %9285 = vmatprep.subr.mxu1 %v15026_v55 }
 0x93d   : > { %9286 = vmatpush3.msra.mxu1 %v5821_v13  ;;  %v6004_v13 = vld [vmem:[%s14614_s7 + $0x8] sm:$0xff] }
 0x93e   : > { %9287 = vmatprep.subr.mxu1 %v15026_v55 }
 0x93f   : > { %9288 = vmatpush3.msra.mxu1 %v5820_v39  ;;  %v6003_v39 = vld [vmem:[%s14614_s7] sm:$0xff] }
 0x940   : > { %9289 = vmatprep.subr.mxu1 %v15026_v55 }
 0x941   : > { %9290 = vmatpush3.msra.mxu1 %v5819_v32 }
 0x942   : > { %9291 = vmatprep.subr.mxu1 %v15026_v55 }
 0x943   : > { %9292 = vmatpush3.msra.mxu1 %v5818_v37  ;;  %v7997_v37 = vld [vmem:[%s14618_s11] ss:$0 sm:$0xff] }
 0x944   : > { %9293 = vmatprep.subr.mxu1 %v15026_v55 }
 0x945   : > { %9294 = vmatpush3.msra.mxu1 %v5817_v56 }
 0x946   : > { %9295 = vmatprep.subr.mxu1 %v15026_v55 }
 0x947   : > { %9296 = vmatpush3.msra.mxu1 %v5816_v19 }
 0x948   : > { %9297 = vmatprep.subr.mxu1 %v15026_v55 }
 0x949   : > { %9298 = vmatpush3.msra.mxu1 %v5815_v6 }
 0x94a   : > { %v5383_v58 = vpop.f32.mrf.mxu1  ;;  %9299 = vmatprep.subr.mxu1 %v15026_v55 }
 0x94b   : > { %v5909_v45 = vrot.slane %v5383_v58, 7  ;;  %9300 = vmatpush3.msra.mxu1 %v5814_v31  ;;  %v6010_v58 = vld [vmem:[%s14614_s7 + $0x38] sm:$0xff] }
 0x94c   : > { %v9053_v35 = vpop.f32.mrf.mxu1  ;;  %9301 = vmatprep.subr.mxu1 %v15026_v55  ;;  %9319 = vmatpush3.msra.mxu0 %v6010_v58 }
 0x94d   : > { %v5910_v47 = vsel %vm15030_vm9, %v5909_v45, %v5313_v60  ;;  %9302 = vmatpush3.msra.mxu1 %v5813_v1  ;;  %vm15033_vm9 = vcmask 1044484   ;;  %v6009_v45 = vld [vmem:[%s14614_s7 + $0x30] sm:$0xff]  ;;  %9320 = vmatprep.subr.mxu0 %v15026_v55  ;;  %v6007_v35 = vld [vmem:[%s14614_s7 + $0x20] sm:$0xff] }
 0x94e   : > { %9303 = vmatprep.subr.mxu1 %v15026_v55  ;;  %9321 = vmatpush3.msra.mxu0 %v6009_v45 }
 0x94f   : > { %9304 = vmatpush3.msra.mxu1 %v5812_v11  ;;  %9322 = vmatprep.subr.mxu0 %v15026_v55 }
 0x950   : > { %9305 = vmatprep.subr.mxu1 %v15026_v55  ;;  %9323 = vmatpush3.msra.mxu0 %v6008_v10 }
 0x951   : > { %9306 = vmatpush3.msra.mxu1 %v5811_v29  ;;  %9324 = vmatprep.subr.mxu0 %v15026_v55 }
 0x952   : > { %9307 = vmatprep.subr.mxu1 %v15026_v55  ;;  %9325 = vmatpush3.msra.mxu0 %v6007_v35  ;;  %v15050_v35 = vld [vmem:[#allocation47_spill] sm:$0xff] }
 0x953   : > { %9308 = vmatpush3.msra.mxu1 %v5810_v43  ;;  %9326 = vmatprep.subr.mxu0 %v15026_v55 }
 0x954   : > { %9309 = vmatprep.subr.mxu1 %v15026_v55 }
 0x955   : > { %9310 = vmatpush3.msra.mxu1 %v5809_v17 }
 0x956   : > { %9311 = vmatprep.subr.mxu1 %v15026_v55 }
 0x957   : > { %9312 = vmatpush3.msra.mxu1 %v5808_v30  ;;  %v15041_v30 = vld [vmem:[#allocation35_spill] sm:$0xff] }
 0x958   : > { %9313 = vmatprep.subr.mxu1 %v15026_v55 }
 0x959   : > { %9314 = vmatpush3.msra.mxu1 %v5807_v4 }
 0x96a   : > { %v5453_v49 = vpop.f32.mrf.mxu1 }
 0x96b   : > { %v5911_v33 = vrot.slane %v5453_v49, 6 }
 0x96c   : > { %v9088_v9 = vpop.f32.mrf.mxu1 }
 0x96d   : > { %v5912_v42 = vsel %vm15031_vm13, %v5911_v33, %v5910_v47  ;;  %vm15034_vm13 = vcmask 1045509   ;;  %v6006_v47 = vld [vmem:[%s14614_s7 + $0x18] sm:$0xff] }
 0x96e   : > { %9327 = vmatpush3.msra.mxu0 %v6006_v47  ;;  %v15039_v33 = vld [vmem:[#allocation30_spill] sm:$0xff] }
 0x96f   : > { %9328 = vmatprep.subr.mxu0 %v15026_v55 }
 0x970   : > { %9329 = vmatpush3.msra.mxu0 %v6005_v62 }
 0x971   : > { %9330 = vmatprep.subr.mxu0 %v15026_v55 }
 0x972   : > { %9331 = vmatpush3.msra.mxu0 %v6004_v13  ;;  %v13645_v13 = vld [vmem:[%s14615_s8] ss:$0 sm:$0xff] }
 0x973   : > { %9332 = vmatprep.subr.mxu0 %v15026_v55  ;;  %v15038_v55 = vld [vmem:[#allocation100_spill] sm:$0xff] }
 0x974   : > { %9333 = vmatpush3.msra.mxu0 %v6003_v39 }
 0x98a   : > { %v5523_v0 = vpop.f32.mrf.mxu1 }
 0x98b   : > { %v5913_v3 = vrot.slane %v5523_v0, 5  ;;  %v15042_v0 = vld [vmem:[#allocation33_spill] sm:$0xff] }
 0x98c   : > { %v9123_v44 = vpop.f32.mrf.mxu1 }
 0x98d   : > { %v5914_v26 = vsel %vm15032_vm14, %v5913_v3, %v5912_v42  ;;  %v15040_v42 = vld [vmem:[#allocation31_spill] sm:$0xff]  ;;  %v15043_v44 = vld [vmem:[#allocation34_spill] sm:$0xff] }
 0x9aa   : > { %v5593_v53 = vpop.f32.mrf.mxu1 }
 0x9ab   : > { %v5915_v18 = vrot.slane %v5593_v53, 4 }
 0x9ac   : > { %v9158_v50 = vpop.f32.mrf.mxu1 }
 0x9ad   : > { %v5916_v2 = vsel %vm15033_vm9, %v5915_v18, %v5914_v26  ;;  %v15044_v50 = vld [vmem:[#allocation32_spill] sm:$0xff] }
 0x9ca   : > { %v5663_v21 = vpop.f32.mrf.mxu1 }
 0x9cb   : > { %v5917_v60 = vrot.slane %v5663_v21, 3 }
 0x9cc   : > { %v9193_v8 = vpop.f32.mrf.mxu1 }
 0x9cd   : > { %v5918_v52 = vsel %vm15034_vm13, %v5917_v60, %v5916_v2  ;;  %v15045_v8 = vld [vmem:[#allocation39_spill] sm:$0xff] }
 0x9ea   : > { %v5733_v15 = vpop.f32.mrf.mxu1 }
 0x9eb   : > { %v5919_v63 = vrot.slane %v5733_v15, 2  ;;  %v15046_v15 = vld [vmem:[#allocation37_spill] sm:$0xff] }
 0x9ec   : > { %v9228_v23 = vpop.f32.mrf.mxu1 }
 0x9ed   : > { %v5920_v20 = vsel %vm15035_vm1, %v5919_v63, %v5918_v52  ;;  %v15047_v63 = vld [vmem:[#allocation38_spill] sm:$0xff]  ;;  %vm15051_vm1 = vcmask 261120  }
 0x9ee   : > { %v5922_v61 = vsel %vm15036_vm10, %v5921_v59, %v5920_v20  ;;  %vm15037_vm10 = vcmask 523264   ;;  %v15048_v20 = vld [vmem:[#allocation36_spill] sm:$0xff]  ;;  %vm15053_vm14 = vmmov %vm15051_vm1 }
 0x9ef   : > { %9316 = vmatmul.mubr.f32.vlgmr.msra.gmra.mxu1 %v5922_v61  ;;  %vm15055_vm9 = vmmov %vm15051_vm1 }
 0x9f0   : > { %vm15057_vm13 = vmmov %vm15051_vm1 }
 0x9fa   : > { %v5897_v16 = vpop.f32.mrf.mxu1 }
 0x9fc   : > { %v9282_v28 = vpop.f32.mrf.mxu1 }
 0x9fd   : > { %v15049_v28 = vld [vmem:[#allocation41_spill] sm:$0xff] }
 0xaaf   : > { %v5990_v32 = vpop.f32.mrf.mxu1 }
 0xab0   : > { %v5991_v56 = vadd.f32 %v5990_v32, %v5897_v16 }
 0xab1   : > { %v9317_v19 = vpop.f32.mrf.mxu1 }
 0xab2   : > { %v6001_v6 = vadd.f32 %v7997_v37, %v5991_v56 }
 0xab4   : > { %9792 = vtanh.f32 %v6001_v6 }
 0xac1   : > { %v9793_v31 = vpop.eup %9792 }
 0xac2   : > { %9335 = vmatmul.mubr.msk.f32.vlgmr.msra.gmra.mxu0 %vm15037_vm10, %v9793_v31  ;;  %vm15059_vm10 = vmmov %vm15051_vm1 }
 0xb82   : > { %v6080_v1 = vpop.f32.mrf.mxu0 }
 0xb83   : > { %v6092_v11 = vrot.slane %v6080_v1, %v15025_v12  ;;  %v6085_v16 = vcombine.high %v6080_v1, %v6080_v1  ;;  %v15052_v1 = vld [vmem:[#allocation40_spill] sm:$0xff] }
 0xb84   : > { %v9336_v29 = vpop.f32.mrf.mxu0 }
 0xb85   : > { %v6108_v43 = vrot.slane %v6092_v11, %v15025_v12  ;;  %v6100_v53 = vcombine.high %v6092_v11, %v6092_v11  ;;  %v13649_v37 = vrot.slane %v6085_v16, %v15025_v12 }
 0xb87   : > { %v13606_v49 = vrot.slane %v6108_v43, %v15038_v55  ;;  %v13623_v60 = vrot.slane %v6100_v53, %v15025_v12  ;;  %v6130_v52 = vcombine.high %v6108_v43, %v6108_v43 }
 0xb89   : > { %v6175_v9 = vadd.f32 %v15039_v33, %v13606_v49  ;;  %v6174_v17 = vadd.f32 %v13606_v49, %v15040_v42  ;;  %v6178_v4 = vadd.f32 %v13606_v49, %v15041_v30  ;;  %v6176_v3 = vadd.f32 %v13606_v49, %v15042_v0 }
 0xb8a   : > { %v6179_v26 = vadd.f32 %v15043_v44, %v13606_v49  ;;  %v6177_v21 = vadd.f32 %v15044_v50, %v13606_v49  ;;  %v6182_v18 = vadd.f32 %v13606_v49, %v15045_v8  ;;  %v6180_v2 = vadd.f32 %v13606_v49, %v15046_v15 }
 0xb8b   : > { %9794 = vtanh.f32 %v6175_v9  ;;  %v6183_v59 = vadd.f32 %v15047_v63, %v13606_v49  ;;  %v13631_v23 = vrot.slane %v13623_v60, %v15038_v55  ;;  %v6181_v61 = vadd.f32 %v15048_v20, %v13606_v49  ;;  %v15054_v9 = vld [vmem:[#allocation64_spill] sm:$0xff] }
 0xb8c   : > { %9796 = vtanh.f32 %v6174_v17  ;;  %v6184_v58 = vadd.f32 %v13606_v49, %v15049_v28  ;;  %v13638_v10 = vrot.slane %v6130_v52, %v15038_v55  ;;  %v6185_v11 = vadd.f32 %v15052_v1, %v13606_v49  ;;  %v15061_v28 = vld [vmem:[#allocation52_spill] sm:$0xff] }
 0xb8d   : > { %9798 = vtanh.f32 %v6178_v4  ;;  %v6190_v47 = vadd.f32 %v13631_v23, %v15050_v35  ;;  %v13662_v30 = vrot.slane %v13649_v37, %v15025_v12 }
 0xb8e   : > { %9800 = vtanh.f32 %v6176_v3  ;;  %v6206_v42 = vadd.f32 %v13638_v10, %v15054_v9  ;;  %v15056_v3 = vld [vmem:[#allocation43_spill] sm:$0xff] }
 0xb8f   : > { %9802 = vtanh.f32 %v6179_v26  ;;  %v6186_v44 = vadd.f32 %v13606_v49, %v15056_v3  ;;  %v13674_v15 = vrot.slane %v13662_v30, %v15038_v55 }
 0xb90   : > { %9804 = vtanh.f32 %v6177_v21  ;;  %v15058_v21 = vld [vmem:[#allocation66_spill] sm:$0xff] }
 0xb91   : > { %9806 = vtanh.f32 %v6182_v18  ;;  %v6208_v8 = vadd.f32 %v13638_v10, %v15058_v21 }
 0xb92   : > { %9808 = vtanh.f32 %v6180_v2 }
 0xb93   : > { %9810 = vtanh.f32 %v6183_v59  ;;  %v15060_v59 = vld [vmem:[#allocation42_spill] sm:$0xff] }
 0xb94   : > { %9812 = vtanh.f32 %v6181_v61  ;;  %v6187_v52 = vadd.f32 %v15060_v59, %v13606_v49 }
 0xb95   : > { %9814 = vtanh.f32 %v6184_v58  ;;  %v6194_v58 = vadd.f32 %v13631_v23, %v15061_v28 }
 0xb96   : > { %9816 = vtanh.f32 %v6190_v47 }
 0xb97   : > { %9818 = vtanh.f32 %v6185_v11 }
 0xb98   : > { %v9795_v45 = vpop.eup %9794  ;;  %9820 = vtanh.f32 %v6206_v42 }
 0xb99   : > { %v9797_v62 = vpop.eup %9796  ;;  %v6431_v39 = vmul.f32 %v13645_v13, %v9795_v45  ;;  %9822 = vtanh.f32 %v6186_v44 }
 0xb9a   : > { %v9799_v32 = vpop.eup %9798  ;;  %v6430_v56 = vmul.f32 %v13645_v13, %v9797_v62  ;;  %9824 = vtanh.f32 %v6208_v8  ;;  %v15063_v62 = vld [vmem:[#allocation45_spill] sm:$0xff] }
 0xb9b   : > { %v9801_v19 = vpop.eup %9800  ;;  %v6561_v6 = vsel %vm15051_vm1, %v6431_v39, 0.0  ;;  %v6434_v31 = vmul.f32 %v13645_v13, %v9799_v32  ;;  %9826 = vtanh.f32 %v6187_v52  ;;  %v6188_v39 = vadd.f32 %v13606_v49, %v15063_v62 }
 0xb9c   : > { %v9803_v29 = vpop.eup %9802  ;;  %6562 = vadd.xlane.f32.xlu1 %v6561_v6  ;;  %v6558_v43 = vsel %vm15053_vm14, %v6430_v56, 0.0  ;;  %v6432_v33 = vmul.f32 %v13645_v13, %v9801_v19  ;;  %vm15062_vm14 = vmmov %vm15051_vm1  ;;  %9828 = vtanh.f32 %v6194_v58  ;;  %v15065_v6 = vld [vmem:[#allocation95_spill] sm:$0xff] }
 0xb9d   : > { %v9805_v17 = vpop.eup %9804  ;;  %6559 = vadd.xlane.f32.xlu0 %v6558_v43  ;;  %v6570_v4 = vsel %vm15055_vm9, %v6434_v31, 0.0  ;;  %v6435_v0 = vmul.f32 %v13645_v13, %v9803_v29  ;;  %vm15064_vm9 = vmmov %vm15051_vm1  ;;  %v6239_v31 = vadd.f32 %v15065_v6, %v13674_v15  ;;  %9830 = vtanh.f32 %v6188_v39  ;;  %v15067_v43 = vld [vmem:[#allocation44_spill] sm:$0xff] }
 0xb9e   : > { %v9807_v26 = vpop.eup %9806  ;;  %v6564_v53 = vsel %vm15057_vm13, %v6432_v33, 0.0  ;;  %v6433_v50 = vmul.f32 %v13645_v13, %v9805_v17  ;;  %vm15066_vm13 = vmmov %vm15051_vm1  ;;  %v6189_v33 = vadd.f32 %v15067_v43, %v13606_v49 }
 0xb9f   : > { %v9809_v18 = vpop.eup %9808  ;;  %v6573_v2 = vsel %vm15059_vm10, %v6435_v0, 0.0  ;;  %v6438_v63 = vmul.f32 %v13645_v13, %v9807_v26  ;;  %vm15068_vm10 = vmmov %vm15051_vm1  ;;  %9832 = vtanh.f32 %v6239_v31 }
 0xba0   : > { %6571 = vadd.xlane.f32.xlu1 %v6570_v4  ;;  %v9811_v20 = vpop.eup %9810  ;;  %v6567_v61 = vsel %vm15051_vm1, %v6433_v50, 0.0  ;;  %v6436_v16 = vmul.f32 %v13645_v13, %v9809_v18  ;;  %v15069_v4 = vld [vmem:[#allocation51_spill] sm:$0xff]  ;;  %9834 = vtanh.f32 %v6189_v33 }
 0xba1   : > { %6565 = vadd.xlane.f32.xlu0 %v6564_v53  ;;  %v9813_v45 = vpop.eup %9812  ;;  %v6582_v35 = vsel %vm15062_vm14, %v6438_v63, 0.0  ;;  %v6439_v47 = vmul.f32 %v13645_v13, %v9811_v20  ;;  %v6195_v0 = vadd.f32 %v15069_v4, %v13631_v23  ;;  %v15070_v53 = vld [vmem:[#allocation46_spill] sm:$0xff]  ;;  %vm15071_vm14 = vmmov %vm15051_vm1  ;;  %v15072_v18 = vld [vmem:[#allocation67_spill] sm:$0xff] }
 0xba2   : > { %v9815_v32 = vpop.eup %9814  ;;  %v6576_v56 = vsel %vm15064_vm9, %v6436_v16, 0.0  ;;  %v6437_v19 = vmul.f32 %v13645_v13, %v9813_v45  ;;  %v6191_v49 = vadd.f32 %v15070_v53, %v13631_v23  ;;  %vm15073_vm9 = vmmov %vm15051_vm1  ;;  %v15074_v20 = vld [vmem:[#allocation49_spill] sm:$0xff] }
 0xba3   : > { %v9817_v1 = vpop.eup %9816  ;;  %v6585_v11 = vsel %vm15066_vm13, %v6439_v47, 0.0  ;;  %v6440_v29 = vmul.f32 %v13645_v13, %v9815_v32  ;;  %9836 = vtanh.f32 %v6195_v0  ;;  %vm15075_vm13 = vmmov %vm15051_vm1  ;;  %v15076_v45 = vld [vmem:[#allocation97_spill] sm:$0xff]  ;;  %v15078_v32 = vld [vmem:[#allocation63_spill] sm:$0xff] }
 0xba4   : > { %6574 = vadd.xlane.f32.xlu1 %v6573_v2  ;;  %v9819_v9 = vpop.eup %9818  ;;  %v6579_v42 = vsel %vm15068_vm10, %v6437_v19, 0.0  ;;  %v6446_v17 = vmul.f32 %v13645_v13, %v9817_v1  ;;  %v6211_v2 = vadd.f32 %v15072_v18, %v13638_v10  ;;  %9838 = vtanh.f32 %v6191_v49  ;;  %vm15077_vm10 = vmmov %vm15051_vm1  ;;  %v15079_v1 = vld [vmem:[#allocation70_spill] sm:$0xff] }
 0xba5   : > { %6568 = vadd.xlane.f32.xlu0 %v6567_v61  ;;  %v9821_v3 = vpop.eup %9820  ;;  %v6588_v44 = vsel %vm15051_vm1, %v6440_v29, 0.0  ;;  %v6441_v26 = vmul.f32 %v13645_v13, %v9819_v9  ;;  %v6192_v61 = vadd.f32 %v13631_v23, %v15074_v20  ;;  %v15081_v9 = vld [vmem:[#allocation48_spill] sm:$0xff] }
 0xba6   : > { %v9823_v50 = vpop.eup %9822  ;;  %v6606_v21 = vsel %vm15071_vm14, %v6446_v17, 0.0  ;;  %v6462_v8 = vmul.f32 %v13645_v13, %v9821_v3  ;;  %9840 = vtanh.f32 %v6211_v2  ;;  %vm15080_vm14 = vmmov %vm15051_vm1  ;;  %v15083_v3 = vld [vmem:[#allocation101_spill] sm:$0xff] }
 0xba7   : > { %v9825_v63 = vpop.eup %9824  ;;  %v6591_v59 = vsel %vm15073_vm9, %v6441_v26, 0.0  ;;  %v6442_v52 = vmul.f32 %v13645_v13, %v9823_v50  ;;  %9842 = vtanh.f32 %v6192_v61  ;;  %vm15082_vm9 = vmmov %vm15051_vm1  ;;  %v15085_v50 = vld [vmem:[#allocation65_spill] sm:$0xff] }
 0xba8   : > { %6583 = vadd.xlane.f32.xlu1 %v6582_v35  ;;  %v9827_v16 = vpop.eup %9826  ;;  %v6654_v28 = vsel %vm15075_vm13, %v6462_v8, 0.0  ;;  %v6464_v58 = vmul.f32 %v13645_v13, %v9825_v63  ;;  %v6241_v35 = vadd.f32 %v15076_v45, %v13674_v15  ;;  %vm15084_vm13 = vmmov %vm15051_vm1  ;;  %v15087_v63 = vld [vmem:[#allocation56_spill] sm:$0xff] }
 0xba9   : > { %6577 = vadd.xlane.f32.xlu0 %v6576_v56  ;;  %v9829_v47 = vpop.eup %9828  ;;  %v6594_v62 = vsel %vm15077_vm10, %v6442_v52, 0.0  ;;  %v6443_v39 = vmul.f32 %v13645_v13, %v9827_v16  ;;  %v6207_v56 = vadd.f32 %v15078_v32, %v13638_v10  ;;  %vm15086_vm10 = vmmov %vm15051_vm1  ;;  %v15088_v16 = vld [vmem:[#allocation96_spill] sm:$0xff] }
 0xbaa   : > { %v9831_v19 = vpop.eup %9830  ;;  %v6660_v6 = vsel %vm15051_vm1, %v6464_v58, 0.0  ;;  %v6450_v31 = vmul.f32 %v13645_v13, %v9829_v47  ;;  %9844 = vtanh.f32 %v6241_v35  ;;  %v15090_v47 = vld [vmem:[#allocation55_spill] sm:$0xff] }
 0xbab   : > { %v6597_v43 = vsel %vm15080_vm14, %v6443_v39, 0.0  ;;  %v6444_v33 = vmul.f32 %v13645_v13, %v9831_v19  ;;  %9846 = vtanh.f32 %v6207_v56  ;;  %vm15089_vm14 = vmmov %vm15051_vm1  ;;  %v15092_v19 = vld [vmem:[#allocation68_spill] sm:$0xff] }
 0xbac   : > { %6586 = vadd.xlane.f32.xlu1 %v6585_v11  ;;  %v6212_v11 = vadd.f32 %v13638_v10, %v15079_v1  ;;  %v9833_v29 = vpop.eup %9832  ;;  %v6618_v4 = vsel %vm15082_vm9, %v6450_v31, 0.0  ;;  %vm15091_vm9 = vmmov %vm15051_vm1 }
 0xbad   : > { %6580 = vadd.xlane.f32.xlu0 %v6579_v42  ;;  %v6193_v42 = vadd.f32 %v15081_v9, %v13631_v23  ;;  %v9835_v17 = vpop.eup %9834  ;;  %v6495_v0 = vmul.f32 %v13645_v13, %v9833_v29  ;;  %v6600_v53 = vsel %vm15084_vm13, %v6444_v33, 0.0  ;;  %vm15093_vm13 = vmmov %vm15051_vm1  ;;  %v15094_v29 = vld [vmem:[#allocation58_spill] sm:$0xff] }
 0xbae   : > { %9848 = vtanh.f32 %v6212_v11  ;;  %v6445_v49 = vmul.f32 %v13645_v13, %v9835_v17  ;;  %v15096_v17 = vld [vmem:[#allocation98_spill] sm:$0xff] }
 0xbaf   : > { %9850 = vtanh.f32 %v6193_v42  ;;  %v6753_v18 = vsel %vm15086_vm10, %v6495_v0, 0.0  ;;  %vm15095_vm10 = vmmov %vm15051_vm1 }
 0xbb0   : > { %6589 = vadd.xlane.f32.xlu1 %v6588_v44  ;;  %v6242_v44 = vadd.f32 %v13674_v15, %v15083_v3  ;;  %v9837_v26 = vpop.eup %9836  ;;  %v6603_v20 = vsel %vm15051_vm1, %v6445_v49, 0.0 }
 0xbb1   : > { %6607 = vadd.xlane.f32.xlu0 %v6606_v21  ;;  %v6209_v21 = vadd.f32 %v15085_v50, %v13638_v10  ;;  %v9839_v8 = vpop.eup %9838  ;;  %v6451_v2 = vmul.f32 %v13645_v13, %v9837_v26  ;;  %v15097_v26 = vld [vmem:[#allocation57_spill] sm:$0xff] }
 0xbb2   : > { %9852 = vtanh.f32 %v6242_v44  ;;  %v6447_v61 = vmul.f32 %v13645_v13, %v9839_v8  ;;  %v15099_v8 = vld [vmem:[#allocation54_spill] sm:$0xff] }
 0xbb3   : > { %v9841_v52 = vpop.eup %9840  ;;  %9854 = vtanh.f32 %v6209_v21  ;;  %v6621_v45 = vsel %vm15089_vm14, %v6451_v2, 0.0  ;;  %vm15098_vm14 = vmmov %vm15051_vm1 }
 0xbb4   : > { %6592 = vadd.xlane.f32.xlu1 %v6591_v59  ;;  %v6198_v59 = vadd.f32 %v13631_v23, %v15087_v63  ;;  %v9843_v58 = vpop.eup %9842  ;;  %v6467_v35 = vmul.f32 %v13645_v13, %v9841_v52  ;;  %v6609_v32 = vsel %vm15091_vm9, %v6447_v61, 0.0  ;;  %vm15100_vm9 = vmmov %vm15051_vm1  ;;  %v15101_v52 = vld [vmem:[#allocation60_spill] sm:$0xff] }
 0xbb5   : > { %6655 = vadd.xlane.f32.xlu0 %v6654_v28  ;;  %v6238_v28 = vadd.f32 %v13674_v15, %v15088_v16  ;;  %v6448_v56 = vmul.f32 %v13645_v13, %v9843_v58  ;;  %v15103_v58 = vld [vmem:[#allocation53_spill] sm:$0xff] }
 0xbb6   : > { %9856 = vtanh.f32 %v6198_v59  ;;  %v6669_v1 = vsel %vm15093_vm13, %v6467_v35, 0.0  ;;  %vm15102_vm13 = vmmov %vm15051_vm1 }
 0xbb7   : > { %v9845_v39 = vpop.eup %9844  ;;  %9858 = vtanh.f32 %v6238_v28  ;;  %v6612_v9 = vsel %vm15095_vm10, %v6448_v56, 0.0  ;;  %vm15104_vm10 = vmmov %vm15051_vm1 }
 0xbb8   : > { %6595 = vadd.xlane.f32.xlu1 %v6594_v62  ;;  %v6199_v62 = vadd.f32 %v15090_v47, %v13631_v23  ;;  %v9847_v31 = vpop.eup %9846  ;;  %v6497_v11 = vmul.f32 %v13645_v13, %v9845_v39  ;;  %v15105_v39 = vld [vmem:[#allocation59_spill] sm:$0xff] }
 0xbb9   : > { %6661 = vadd.xlane.f32.xlu0 %v6660_v6  ;;  %v6210_v6 = vadd.f32 %v13638_v10, %v15092_v19  ;;  %v6463_v42 = vmul.f32 %v13645_v13, %v9847_v31  ;;  %v15106_v31 = vld [vmem:[#allocation69_spill] sm:$0xff] }
 0xbba   : > { %9860 = vtanh.f32 %v6199_v62  ;;  %v6759_v3 = vsel %vm15051_vm1, %v6497_v11, 0.0 }
 0xbbb   : > { %v9849_v33 = vpop.eup %9848  ;;  %9862 = vtanh.f32 %v6210_v6  ;;  %v6657_v50 = vsel %vm15098_vm14, %v6463_v42, 0.0  ;;  %vm15107_vm14 = vmmov %vm15051_vm1 }
 0xbbc   : > { %6598 = vadd.xlane.f32.xlu1 %v6597_v43  ;;  %v6200_v43 = vadd.f32 %v13631_v23, %v15094_v29  ;;  %v9851_v0 = vpop.eup %9850  ;;  %v6468_v44 = vmul.f32 %v13645_v13, %v9849_v33  ;;  %v15108_v33 = vld [vmem:[#allocation62_spill] sm:$0xff] }
 0xbbd   : > { %6619 = vadd.xlane.f32.xlu0 %v6618_v4  ;;  %v6240_v4 = vadd.f32 %v13674_v15, %v15096_v17  ;;  %v6449_v21 = vmul.f32 %v13645_v13, %v9851_v0  ;;  %v15110_v0 = vld [vmem:[#allocation99_spill] sm:$0xff] }
 0xbbe   : > { %9864 = vtanh.f32 %v6200_v43  ;;  %v6672_v63 = vsel %vm15100_vm9, %v6468_v44, 0.0  ;;  %vm15109_vm9 = vmmov %vm15051_vm1 }
 0xbbf   : > { %v9853_v49 = vpop.eup %9852  ;;  %9866 = vtanh.f32 %v6240_v4  ;;  %v6615_v16 = vsel %vm15102_vm13, %v6449_v21, 0.0  ;;  %vm15111_vm13 = vmmov %vm15051_vm1 }
 0xbc0   : > { %6601 = vadd.xlane.f32.xlu1 %v6600_v53  ;;  %v6201_v53 = vadd.f32 %v15097_v26, %v13631_v23  ;;  %v9855_v2 = vpop.eup %9854  ;;  %v6498_v59 = vmul.f32 %v13645_v13, %v9853_v49  ;;  %v15112_v49 = vld [vmem:[#allocation61_spill] sm:$0xff] }
 0xbc1   : > { %6754 = vadd.xlane.f32.xlu0 %v6753_v18  ;;  %v6196_v18 = vadd.f32 %v13631_v23, %v15099_v8  ;;  %v6465_v28 = vmul.f32 %v13645_v13, %v9855_v2  ;;  %v6132_v8 = vcombine.high %v13623_v60, %v13623_v60 }
 0xbc2   : > { %9868 = vtanh.f32 %v6201_v53  ;;  %v6762_v47 = vsel %vm15104_vm10, %v6498_v59, 0.0  ;;  %vm15113_vm10 = vmmov %vm15051_vm1 }
 0xbc3   : > { %v9857_v61 = vpop.eup %9856  ;;  %9870 = vtanh.f32 %v6196_v18  ;;  %v6663_v19 = vsel %vm15051_vm1, %v6465_v28, 0.0  ;;  %v13807_v60 = vrot.slane %v6132_v8, %v15038_v55  ;;  %v15126_v8 = vld [vmem:[#allocation82_spill] sm:$0xff] }
 0xbc4   : > { %6604 = vadd.xlane.f32.xlu1 %v6603_v20  ;;  %v6202_v20 = vadd.f32 %v13631_v23, %v15101_v52  ;;  %v9859_v35 = vpop.eup %9858  ;;  %v6454_v62 = vmul.f32 %v13645_v13, %v9857_v61 }
 0xbc5   : > { %6622 = vadd.xlane.f32.xlu0 %v6621_v45  ;;  %v6197_v45 = vadd.f32 %v15103_v58, %v13631_v23  ;;  %v6494_v6 = vmul.f32 %v13645_v13, %v9859_v35  ;;  %v15117_v35 = vld [vmem:[#allocation103_spill] sm:$0xff] }
 0xbc6   : > { %9872 = vtanh.f32 %v6202_v20  ;;  %v6630_v29 = vsel %vm15107_vm14, %v6454_v62, 0.0  ;;  %vm15116_vm14 = vmmov %vm15051_vm1 }
 0xbc7   : > { %v9861_v56 = vpop.eup %9860  ;;  %9874 = vtanh.f32 %v6197_v45  ;;  %v6750_v17 = vsel %vm15109_vm9, %v6494_v6, 0.0  ;;  %vm15118_vm9 = vmmov %vm15051_vm1 }
 0xbc8   : > { %6610 = vadd.xlane.f32.xlu1 %v6609_v32  ;;  %v6203_v32 = vadd.f32 %v15105_v39, %v13631_v23  ;;  %v9863_v11 = vpop.eup %9862  ;;  %v6455_v43 = vmul.f32 %v13645_v13, %v9861_v56  ;;  %v15119_v56 = vld [vmem:[#allocation110_spill] sm:$0xff] }
 0xbc9   : > { %6670 = vadd.xlane.f32.xlu0 %v6669_v1  ;;  %v6213_v1 = vadd.f32 %v15106_v31, %v13638_v10  ;;  %v6466_v4 = vmul.f32 %v13645_v13, %v9863_v11  ;;  %v6101_v31 = vcombine.high %v13649_v37, %v13649_v37 }
 0xbca   : > { %9876 = vtanh.f32 %v6203_v32  ;;  %v6633_v26 = vsel %vm15111_vm13, %v6455_v43, 0.0  ;;  %vm15120_vm13 = vmmov %vm15051_vm1 }
 0xbcb   : > { %v9865_v42 = vpop.eup %9864  ;;  %9878 = vtanh.f32 %v6213_v1  ;;  %v6666_v18 = vsel %vm15113_vm10, %v6466_v4, 0.0  ;;  %vm15122_vm10 = vmmov %vm15051_vm1  ;;  %v13828_v37 = vrot.slane %v6101_v31, %v15025_v12  ;;  %v15133_v31 = vld [vmem:[#allocation113_spill] sm:$0xff] }
 0xbcc   : > { %6613 = vadd.xlane.f32.xlu1 %v6612_v9  ;;  %v6204_v9 = vadd.f32 %v13631_v23, %v15108_v33  ;;  %v9867_v44 = vpop.eup %9866  ;;  %v6456_v53 = vmul.f32 %v13645_v13, %v9865_v42 }
 0xbcd   : > { %6760 = vadd.xlane.f32.xlu0 %v6759_v3  ;;  %v6243_v3 = vadd.f32 %v15110_v0, %v13674_v15  ;;  %v6496_v2 = vmul.f32 %v13645_v13, %v9867_v44 }
 0xbce   : > { %9880 = vtanh.f32 %v6204_v9  ;;  %v6636_v20 = vsel %vm15051_vm1, %v6456_v53, 0.0 }
 0xbcf   : > { %v9869_v21 = vpop.eup %9868  ;;  %9882 = vtanh.f32 %v6243_v3  ;;  %v6756_v58 = vsel %vm15116_vm14, %v6496_v2, 0.0  ;;  %vm15125_vm14 = vmmov %vm15051_vm1  ;;  %v6131_v2 = vcombine.high %v13662_v30, %v13662_v30  ;;  %v15130_v30 = vld [vmem:[#allocation81_spill] sm:$0xff] }
 0xbd0   : > { %6658 = vadd.xlane.f32.xlu1 %v6657_v50  ;;  %v6205_v50 = vadd.f32 %v15112_v49, %v13631_v23  ;;  %v9871_v52 = vpop.eup %9870  ;;  %v6457_v61 = vmul.f32 %v13645_v13, %v9869_v21  ;;  %v15115_v23 = vld [vmem:[#allocation111_spill] sm:$0xff] }
 0xbd1   : > { %6673 = vadd.xlane.f32.xlu0 %v6672_v63  ;;  %v15114_v63 = vld [vmem:[#allocation72_spill] sm:$0xff]  ;;  %v6452_v45 = vmul.f32 %v13645_v13, %v9871_v52 }
 0xbd2   : > { %v6214_v59 = vadd.f32 %v13638_v10, %v15114_v63  ;;  %9884 = vtanh.f32 %v6205_v50  ;;  %v6639_v39 = vsel %vm15118_vm9, %v6457_v61, 0.0  ;;  %v13842_v63 = vrot.slane %v13828_v37, %v15038_v55  ;;  %vm15127_vm9 = vmmov %vm15051_vm1 }
 0xbd3   : > { %v9873_v28 = vpop.eup %9872  ;;  %v6624_v1 = vsel %vm15120_vm13, %v6452_v45, 0.0  ;;  %vm15129_vm13 = vmmov %vm15051_vm1 }
 0xbd4   : > { %6616 = vadd.xlane.f32.xlu1 %v6615_v16  ;;  %v6252_v16 = vadd.f32 %v13674_v15, %v15115_v23  ;;  %9886 = vtanh.f32 %v6214_v59  ;;  %v9875_v62 = vpop.eup %9874  ;;  %v6458_v32 = vmul.f32 %v13645_v13, %v9873_v28 }
 0xbd5   : > { %6763 = vadd.xlane.f32.xlu0 %v6762_v47  ;;  %v6244_v47 = vadd.f32 %v13674_v15, %v15117_v35  ;;  %v6453_v11 = vmul.f32 %v13645_v13, %v9875_v62  ;;  %v13853_v35 = vrot.slane %v6131_v2, %v15038_v55 }
 0xbd6   : > { %9888 = vtanh.f32 %v6252_v16  ;;  %v6642_v9 = vsel %vm15122_vm10, %v6458_v32, 0.0  ;;  %vm15131_vm10 = vmmov %vm15051_vm1 }
 0xbd7   : > { %v9877_v6 = vpop.eup %9876  ;;  %9890 = vtanh.f32 %v6244_v47  ;;  %v6627_v3 = vsel %vm15051_vm1, %v6453_v11, 0.0 }
 0xbd8   : > { %6664 = vadd.xlane.f32.xlu1 %v6663_v19  ;;  %v6253_v19 = vadd.f32 %v15119_v56, %v13674_v15  ;;  %v9879_v33 = vpop.eup %9878  ;;  %v6459_v42 = vmul.f32 %v13645_v13, %v9877_v6 }
 0xbd9   : > { %6631 = vadd.xlane.f32.xlu0 %v6630_v29  ;;  %v15121_v29 = vld [vmem:[#allocation71_spill] sm:$0xff]  ;;  %v6469_v44 = vmul.f32 %v13645_v13, %v9879_v33  ;;  %v15135_v33 = vld [vmem:[#allocation73_spill] sm:$0xff] }
 0xbda   : > { %v6215_v43 = vadd.f32 %v15121_v29, %v13638_v10  ;;  %9892 = vtanh.f32 %v6253_v19  ;;  %v6645_v50 = vsel %vm15125_vm14, %v6459_v42, 0.0  ;;  %vm15134_vm14 = vmmov %vm15051_vm1 }
 0xbdb   : > { %v9881_v0 = vpop.eup %9880  ;;  %v6675_v59 = vsel %vm15127_vm9, %v6469_v44, 0.0  ;;  %vm15136_vm9 = vmmov %vm15051_vm1 }
 0xbdc   : > { %6751 = vadd.xlane.f32.xlu1 %v6750_v17  ;;  %v15123_v17 = vld [vmem:[#allocation79_spill] sm:$0xff]  ;;  %9894 = vtanh.f32 %v6215_v43  ;;  %v9883_v49 = vpop.eup %9882  ;;  %v6460_v21 = vmul.f32 %v13645_v13, %v9881_v0  ;;  %v15137_v0 = vld [vmem:[#allocation129_spill] sm:$0xff] }
 0xbdd   : > { %6634 = vadd.xlane.f32.xlu0 %v6633_v26  ;;  %v6223_v4 = vadd.f32 %v15123_v17, %v13807_v60  ;;  %v15124_v26 = vld [vmem:[#allocation102_spill] sm:$0xff]  ;;  %v6499_v52 = vmul.f32 %v13645_v13, %v9883_v49  ;;  %v15139_v49 = vld [vmem:[#allocation104_spill] sm:$0xff] }
 0xbde   : > { %v6245_v53 = vadd.f32 %v15124_v26, %v13674_v15  ;;  %v6648_v16 = vsel %vm15129_vm13, %v6460_v21, 0.0  ;;  %vm15138_vm13 = vmmov %vm15051_vm1 }
 0xbdf   : > { %9896 = vtanh.f32 %v6223_v4  ;;  %v9885_v12 = vpop.eup %9884  ;;  %v6765_v47 = vsel %vm15131_vm10, %v6499_v52, 0.0  ;;  %vm15140_vm10 = vmmov %vm15051_vm1 }
 0xbe0   : > { %6667 = vadd.xlane.f32.xlu1 %v6666_v18  ;;  %v6224_v18 = vadd.f32 %v13807_v60, %v15126_v8  ;;  %9898 = vtanh.f32 %v6245_v53  ;;  %v6461_v28 = vmul.f32 %v13645_v13, %v9885_v12  ;;  %v15141_v12 = vld [vmem:[#allocation131_spill] sm:$0xff] }
 0xbe1   : > { %6637 = vadd.xlane.f32.xlu0 %v6636_v20  ;;  %v15128_v20 = vld [vmem:[#allocation74_spill] sm:$0xff]  ;;  %v9887_v23 = vpop.eup %9886  ;;  %v6272_v2 = vadd.f32 %v13853_v35, %v15141_v12 }
 0xbe2   : > { %v6216_v61 = vadd.f32 %v13638_v10, %v15128_v20  ;;  %9900 = vtanh.f32 %v6224_v18  ;;  %v6470_v62 = vmul.f32 %v13645_v13, %v9887_v23  ;;  %v6651_v19 = vsel %vm15051_vm1, %v6461_v28, 0.0 }
 0xbe3   : > { %v9889_v45 = vpop.eup %9888 }
 0xbe4   : > { %6757 = vadd.xlane.f32.xlu1 %v6756_v58  ;;  %v6225_v58 = vadd.f32 %v15130_v30, %v13807_v60  ;;  %9902 = vtanh.f32 %v6216_v61  ;;  %v9891_v56 = vpop.eup %9890  ;;  %v6508_v6 = vmul.f32 %v13645_v13, %v9889_v45  ;;  %v6678_v29 = vsel %vm15134_vm14, %v6470_v62, 0.0  ;;  %v15142_v61 = vld [vmem:[#allocation76_spill] sm:$0xff]  ;;  %vm15143_vm14 = vmmov %vm15051_vm1 }
 0xbe5   : > { %6640 = vadd.xlane.f32.xlu0 %v6639_v39  ;;  %v15132_v39 = vld [vmem:[#allocation105_spill] sm:$0xff]  ;;  %v6500_v43 = vmul.f32 %v13645_v13, %v9891_v56  ;;  %v6218_v23 = vadd.f32 %v13638_v10, %v15142_v61 }
 0xbe6   : > { %v6246_v32 = vadd.f32 %v13674_v15, %v15132_v39  ;;  %9904 = vtanh.f32 %v6225_v58  ;;  %v6792_v17 = vsel %vm15136_vm9, %v6508_v6, 0.0  ;;  %v15144_v58 = vld [vmem:[#allocation86_spill] sm:$0xff]  ;;  %vm15145_vm9 = vmmov %vm15051_vm1 }
 0xbe7   : > { %v9893_v11 = vpop.eup %9892  ;;  %v6768_v26 = vsel %vm15138_vm13, %v6500_v43, 0.0  ;;  %v6228_v45 = vadd.f32 %v13807_v60, %v15144_v58  ;;  %vm15147_vm13 = vmmov %vm15051_vm1 }
 0xbe8   : > { %6625 = vadd.xlane.f32.xlu1 %v6624_v1  ;;  %v6254_v1 = vadd.f32 %v13842_v63, %v15133_v31  ;;  %9906 = vtanh.f32 %v6246_v32  ;;  %v6509_v4 = vmul.f32 %v13645_v13, %v9893_v11  ;;  %v15146_v32 = vld [vmem:[#allocation107_spill] sm:$0xff] }
 0xbe9   : > { %6643 = vadd.xlane.f32.xlu0 %v6642_v9  ;;  %v6217_v9 = vadd.f32 %v15135_v33, %v13638_v10  ;;  %v9895_v42 = vpop.eup %9894  ;;  %v6248_v56 = vadd.f32 %v13674_v15, %v15146_v32 }
 0xbea   : > { %9908 = vtanh.f32 %v6254_v1  ;;  %v6471_v53 = vmul.f32 %v13645_v13, %v9895_v42  ;;  %v6795_v8 = vsel %vm15140_vm10, %v6509_v4, 0.0  ;;  %v15148_v1 = vld [vmem:[#allocation117_spill] sm:$0xff]  ;;  %vm15149_vm10 = vmmov %vm15051_vm1 }
 0xbeb   : > { %9910 = vtanh.f32 %v6217_v9  ;;  %v6258_v11 = vadd.f32 %v13842_v63, %v15148_v1  ;;  %v15150_v9 = vld [vmem:[#allocation75_spill] sm:$0xff] }
 0xbec   : > { %6628 = vadd.xlane.f32.xlu1 %v6627_v3  ;;  %v6270_v3 = vadd.f32 %v13853_v35, %v15137_v0  ;;  %v9897_v44 = vpop.eup %9896  ;;  %v6681_v52 = vsel %vm15051_vm1, %v6471_v53, 0.0  ;;  %v6219_v42 = vadd.f32 %v15150_v9, %v13638_v10 }
 0xbed   : > { %6646 = vadd.xlane.f32.xlu0 %v6645_v50  ;;  %v6247_v50 = vadd.f32 %v15139_v49, %v13674_v15  ;;  %v9899_v21 = vpop.eup %9898  ;;  %v6479_v18 = vmul.f32 %v13645_v13, %v9897_v44 }
 0xbee   : > { %9912 = vtanh.f32 %v6270_v3  ;;  %v6501_v20 = vmul.f32 %v13645_v13, %v9899_v21  ;;  %v15151_v3 = vld [vmem:[#allocation85_spill] sm:$0xff] }
 0xbef   : > { %9914 = vtanh.f32 %v6247_v50  ;;  %v6705_v28 = vsel %vm15143_vm14, %v6479_v18, 0.0  ;;  %v6229_v44 = vadd.f32 %v15151_v3, %v13807_v60  ;;  %vm15152_vm14 = vmmov %vm15051_vm1  ;;  %v15153_v50 = vld [vmem:[#allocation106_spill] sm:$0xff] }
 0xbf0   : > { %6676 = vadd.xlane.f32.xlu1 %v6675_v59  ;;  %v9901_v59 = vpop.eup %9900  ;;  %9916 = vtanh.f32 %v6272_v2  ;;  %v6771_v62 = vsel %vm15145_vm9, %v6501_v20, 0.0  ;;  %v6249_v21 = vadd.f32 %v15153_v50, %v13674_v15  ;;  %vm15154_vm9 = vmmov %vm15051_vm1  ;;  %v15155_v2 = vld [vmem:[#allocation116_spill] sm:$0xff] }
 0xbf1   : > { %6649 = vadd.xlane.f32.xlu0 %v6648_v16  ;;  %v9903_v16 = vpop.eup %9902  ;;  %v6480_v30 = vmul.f32 %v13645_v13, %v9901_v59  ;;  %9918 = vtanh.f32 %v6218_v23  ;;  %v6259_v59 = vadd.f32 %v15155_v2, %v13842_v63  ;;  %v15157_v23 = vld [vmem:[#allocation78_spill] sm:$0xff] }
 0xbf2   : > { %v6472_v39 = vmul.f32 %v13645_v13, %v9903_v16  ;;  %9920 = vtanh.f32 %v6228_v45  ;;  %v6220_v16 = vadd.f32 %v13638_v10, %v15157_v23  ;;  %v15159_v45 = vld [vmem:[#allocation88_spill] sm:$0xff]  ;;  %v15169_v2 = vld [vmem:[#allocation118_spill] sm:$0xff] }
 0xbf3   : > { %v6708_v6 = vsel %vm15147_vm13, %v6480_v30, 0.0  ;;  %9922 = vtanh.f32 %v6248_v56  ;;  %vm15156_vm13 = vmmov %vm15051_vm1  ;;  %v15160_v56 = vld [vmem:[#allocation109_spill] sm:$0xff]  ;;  %v15171_v23 = vld [vmem:[#allocation80_spill] sm:$0xff] }
 0xbf4   : > { %6766 = vadd.xlane.f32.xlu1 %v6765_v47  ;;  %v9905_v47 = vpop.eup %9904  ;;  %v6684_v43 = vsel %vm15149_vm10, %v6472_v39, 0.0  ;;  %9924 = vtanh.f32 %v6258_v11  ;;  %vm15158_vm10 = vmmov %vm15051_vm1  ;;  %v15162_v11 = vld [vmem:[#allocation119_spill] sm:$0xff] }
 0xbf5   : > { %6652 = vadd.xlane.f32.xlu0 %v6651_v19  ;;  %v9907_v19 = vpop.eup %9906  ;;  %v6481_v31 = vmul.f32 %v13645_v13, %v9905_v47  ;;  %9926 = vtanh.f32 %v6219_v42  ;;  %v6230_v47 = vadd.f32 %v13807_v60, %v15159_v45  ;;  %v15164_v42 = vld [vmem:[#allocation77_spill] sm:$0xff] }
 0xbf6   : > { %v6502_v33 = vmul.f32 %v13645_v13, %v9907_v19  ;;  %9928 = vtanh.f32 %v6229_v44  ;;  %v6250_v19 = vadd.f32 %v13674_v15, %v15160_v56  ;;  %v15166_v44 = vld [vmem:[#allocation87_spill] sm:$0xff] }
 0xbf7   : > { %v6711_v4 = vsel %vm15051_vm1, %v6481_v31, 0.0  ;;  %9930 = vtanh.f32 %v6249_v21  ;;  %v15168_v21 = vld [vmem:[#allocation108_spill] sm:$0xff] }
 0xbf8   : > { %6679 = vadd.xlane.f32.xlu1 %v6678_v29  ;;  %v9909_v29 = vpop.eup %9908  ;;  %v6774_v53 = vsel %vm15152_vm14, %v6502_v33, 0.0  ;;  %9932 = vtanh.f32 %v6259_v59  ;;  %vm15161_vm14 = vmmov %vm15051_vm1  ;;  %v6261_v59 = vadd.f32 %v15169_v2, %v13842_v63 }
 0xbf9   : > { %6793 = vadd.xlane.f32.xlu0 %v6792_v17  ;;  %v9911_v17 = vpop.eup %9910  ;;  %v6510_v0 = vmul.f32 %v13645_v13, %v9909_v29  ;;  %9934 = vtanh.f32 %v6220_v16  ;;  %v6260_v29 = vadd.f32 %v13842_v63, %v15162_v11 }
 0xbfa   : > { %v6473_v49 = vmul.f32 %v13645_v13, %v9911_v17  ;;  %9936 = vtanh.f32 %v6230_v47  ;;  %v6221_v17 = vadd.f32 %v15164_v42, %v13638_v10  ;;  %v6251_v10 = vadd.f32 %v15168_v21, %v13674_v15  ;;  %v15178_v42 = vld [vmem:[#allocation84_spill] sm:$0xff] }
 0xbfb   : > { %v6798_v18 = vsel %vm15154_vm9, %v6510_v0, 0.0  ;;  %vm15163_vm9 = vmmov %vm15051_vm1  ;;  %9938 = vtanh.f32 %v6250_v19  ;;  %v6222_v15 = vadd.f32 %v13807_v60, %v15171_v23 }
 0xbfc   : > { %6769 = vadd.xlane.f32.xlu1 %v6768_v26  ;;  %v9913_v26 = vpop.eup %9912  ;;  %v6687_v20 = vsel %vm15156_vm13, %v6473_v49, 0.0  ;;  %vm15165_vm13 = vmmov %vm15051_vm1  ;;  %9940 = vtanh.f32 %v6260_v29 }
 0xbfd   : > { %6796 = vadd.xlane.f32.xlu0 %v6795_v8  ;;  %v9915_v8 = vpop.eup %9914  ;;  %v6526_v12 = vmul.f32 %v13645_v13, %v9913_v26  ;;  %v6231_v26 = vadd.f32 %v15166_v44, %v13807_v60  ;;  %9942 = vtanh.f32 %v6221_v17  ;;  %v6226_v17 = vadd.f32 %v13807_v60, %v15178_v42 }
 0xbfe   : > { %v6503_v61 = vmul.f32 %v13645_v13, %v9915_v8 }
 0xbff   : > { %v6846_v30 = vsel %vm15158_vm10, %v6526_v12, 0.0  ;;  %vm15167_vm10 = vmmov %vm15051_vm1  ;;  %9944 = vtanh.f32 %v6231_v26 }
 0xc00   : > { %6682 = vadd.xlane.f32.xlu1 %v6681_v52  ;;  %v9917_v52 = vpop.eup %9916  ;;  %v6777_v39 = vsel %vm15051_vm1, %v6503_v61, 0.0  ;;  %9946 = vtanh.f32 %v6251_v10 }
 0xc01   : > { %6706 = vadd.xlane.f32.xlu0 %v6705_v28  ;;  %v9919_v28 = vpop.eup %9918  ;;  %v6528_v58 = vmul.f32 %v13645_v13, %v9917_v52  ;;  %9948 = vtanh.f32 %v6261_v59 }
 0xc02   : > { %v6474_v32 = vmul.f32 %v13645_v13, %v9919_v28  ;;  %9950 = vtanh.f32 %v6222_v15 }
 0xc03   : > { %v6852_v31 = vsel %vm15161_vm14, %v6528_v58, 0.0  ;;  %vm15170_vm14 = vmmov %vm15051_vm1  ;;  %v15173_v58 = vld [vmem:[#allocation90_spill] sm:$0xff] }
 0xc04   : > { %6772 = vadd.xlane.f32.xlu1 %v6771_v62  ;;  %v9921_v62 = vpop.eup %9920  ;;  %v6690_v33 = vsel %vm15163_vm9, %v6474_v32, 0.0  ;;  %vm15172_vm9 = vmmov %vm15051_vm1  ;;  %v6232_v45 = vadd.f32 %v13807_v60, %v15173_v58  ;;  %v15175_v32 = vld [vmem:[#allocation112_spill] sm:$0xff] }
 0xc05   : > { %6709 = vadd.xlane.f32.xlu0 %v6708_v6  ;;  %v9923_v6 = vpop.eup %9922  ;;  %v6484_v1 = vmul.f32 %v13645_v13, %v9921_v62  ;;  %v6255_v56 = vadd.f32 %v15175_v32, %v13842_v63  ;;  %v15186_v32 = vld [vmem:[#allocation92_spill] sm:$0xff] }
 0xc06   : > { %v6504_v9 = vmul.f32 %v13645_v13, %v9923_v6  ;;  %9952 = vtanh.f32 %v6232_v45 }
 0xc07   : > { %v6720_v0 = vsel %vm15165_vm13, %v6484_v1, 0.0  ;;  %vm15174_vm13 = vmmov %vm15051_vm1  ;;  %v15177_v1 = vld [vmem:[#allocation121_spill] sm:$0xff]  ;;  %9954 = vtanh.f32 %v6255_v56  ;;  %v6234_v56 = vadd.f32 %v13807_v60, %v15186_v32 }
 0xc08   : > { %6685 = vadd.xlane.f32.xlu1 %v6684_v43  ;;  %v9925_v43 = vpop.eup %9924  ;;  %v6780_v49 = vsel %vm15167_vm10, %v6504_v9, 0.0  ;;  %vm15176_vm10 = vmmov %vm15051_vm1  ;;  %v6262_v11 = vadd.f32 %v13842_v63, %v15177_v1 }
 0xc09   : > { %6712 = vadd.xlane.f32.xlu0 %v6711_v4  ;;  %v9927_v4 = vpop.eup %9926  ;;  %v6514_v3 = vmul.f32 %v13645_v13, %v9925_v43 }
 0xc0a   : > { %v6475_v50 = vmul.f32 %v13645_v13, %v9927_v4  ;;  %9956 = vtanh.f32 %v6262_v11 }
 0xc0b   : > { %9958 = vtanh.f32 %v6226_v17 }
 0xc0c   : > { %6775 = vadd.xlane.f32.xlu1 %v6774_v53  ;;  %v9929_v53 = vpop.eup %9928 }
 0xc0d   : > { %6799 = vadd.xlane.f32.xlu0 %v6798_v18  ;;  %v9931_v8 = vpop.eup %9930  ;;  %v6810_v18 = vsel %vm15051_vm1, %v6514_v3, 0.0  ;;  %v6485_v12 = vmul.f32 %v13645_v13, %v9929_v53 }
 0xc0e   : > { %v9933_v52 = vpop.eup %9932  ;;  %v6505_v61 = vmul.f32 %v13645_v13, %v9931_v8 }
 0xc0f   : > { %v9935_v16 = vpop.eup %9934  ;;  %v6723_v28 = vsel %vm15172_vm9, %v6485_v12, 0.0  ;;  %v15181_v12 = vld [vmem:[#allocation115_spill] sm:$0xff]  ;;  %vm15182_vm9 = vmmov %vm15051_vm1 }
 0xc10   : > { %6688 = vadd.xlane.f32.xlu1 %v6687_v20  ;;  %v6693_v20 = vsel %vm15170_vm14, %v6475_v50, 0.0  ;;  %v9937_v47 = vpop.eup %9936  ;;  %v6783_v62 = vsel %vm15174_vm13, %v6505_v61, 0.0  ;;  %vm15179_vm14 = vmmov %vm15051_vm1  ;;  %v6256_v2 = vadd.f32 %v13842_v63, %v15181_v12 }
 0xc11   : > { %6847 = vadd.xlane.f32.xlu0 %v6846_v30  ;;  %v6515_v30 = vmul.f32 %v13645_v13, %v9933_v52  ;;  %v9939_v19 = vpop.eup %9938  ;;  %vm15183_vm13 = vmmov %vm15051_vm1 }
 0xc12   : > { %v9941_v29 = vpop.eup %9940  ;;  %v6506_v3 = vmul.f32 %v13645_v13, %v9939_v19 }
 0xc13   : > { %v6813_v6 = vsel %vm15176_vm10, %v6515_v30, 0.0  ;;  %v9943_v44 = vpop.eup %9942  ;;  %v6516_v53 = vmul.f32 %v13645_v13, %v9941_v29  ;;  %vm15187_vm10 = vmmov %vm15051_vm1 }
 0xc14   : > { %6778 = vadd.xlane.f32.xlu1 %v6777_v39  ;;  %v6476_v39 = vmul.f32 %v13645_v13, %v9935_v16  ;;  %v9945_v21 = vpop.eup %9944  ;;  %v6786_v52 = vsel %vm15182_vm9, %v6506_v3, 0.0  ;;  %v15184_v16 = vld [vmem:[#allocation120_spill] sm:$0xff]  ;;  %v15189_v3 = vld [vmem:[#allocation83_spill] sm:$0xff]  ;;  %vm15190_vm9 = vmmov %vm15051_vm1 }
 0xc15   : > { %6853 = vadd.xlane.f32.xlu0 %v6852_v31  ;;  %v6486_v31 = vmul.f32 %v13645_v13, %v9937_v47  ;;  %v9947_v61 = vpop.eup %9946  ;;  %v6816_v23 = vsel %vm15183_vm13, %v6516_v53, 0.0  ;;  %v6487_v15 = vmul.f32 %v13645_v13, %v9945_v21  ;;  %vm15191_vm13 = vmmov %vm15051_vm1 }
 0xc16   : > { %v9949_v30 = vpop.eup %9948 }
 0xc17   : > { %v6726_v26 = vsel %vm15179_vm14, %v6486_v31, 0.0  ;;  %v6507_v31 = vmul.f32 %v13645_v13, %v9947_v61  ;;  %v9951_v1 = vpop.eup %9950  ;;  %v6729_v29 = vsel %vm15051_vm1, %v6487_v15, 0.0  ;;  %vm15188_vm14 = vcmask 261312   ;;  %v15193_v61 = vld [vmem:[#allocation114_spill] sm:$0xff]  ;;  %v15194_v15 = vld [vmem:[#allocation91_spill] sm:$0xff] }
 0xc18   : > { %6691 = vadd.xlane.f32.xlu1 %v6690_v33 }
 0xc19   : > { %6721 = vadd.xlane.f32.xlu0 %v6720_v0  ;;  %v6696_v0 = vsel %vm15051_vm1, %v6476_v39, 0.0 }
 0xc1c   : > { %6781 = vadd.xlane.f32.xlu1 %v6780_v49  ;;  %v15180_v49 = vld [vmem:[#allocation89_spill] sm:$0xff] }
 0xc1d   : > { %6811 = vadd.xlane.f32.xlu0 %v6810_v18  ;;  %v6233_v50 = vadd.f32 %v15180_v49, %v13807_v60  ;;  %v6789_v49 = vsel %vm15190_vm9, %v6507_v31, 0.0  ;;  %vm15199_vm9 = vmmov %vm15051_vm1 }
 0xc1f   : > { %9960 = vtanh.f32 %v6233_v50  ;;  %v6478_v50 = vmul.f32 %v13645_v13, %v9951_v1 }
 0xc20   : > { %6694 = vadd.xlane.f32.xlu1 %v6693_v20  ;;  %v6477_v20 = vmul.f32 %v13645_v13, %v9943_v44  ;;  %9962 = vtanh.f32 %v6256_v2  ;;  %v6227_v44 = vadd.f32 %v15189_v3, %v13807_v60 }
 0xc21   : > { %6724 = vadd.xlane.f32.xlu0 %v6723_v28  ;;  %v6263_v28 = vadd.f32 %v15184_v16, %v13842_v63  ;;  %v6235_v16 = vadd.f32 %v15194_v15, %v13807_v60 }
 0xc23   : > { %9964 = vtanh.f32 %v6263_v28 }
 0xc24   : > { %6784 = vadd.xlane.f32.xlu1 %v6783_v62  ;;  %v15185_v62 = vld [vmem:[#allocation128_spill] sm:$0xff] }
 0xc25   : > { %6814 = vadd.xlane.f32.xlu0 %v6813_v6  ;;  %v6563_v43 = vpop.xlane.xlu1 %6562  ;;  %v6271_v39 = vadd.f32 %v15185_v62, %v13853_v35  ;;  %v6699_v6 = vsel %vm15187_vm10, %v6477_v20, 0.0  ;;  %vm15195_vm10 = vmmov %vm15051_vm1 }
 0xc26   : > { %v7077_v33 = vrot.slane %v6563_v43, %v14958_v41  ;;  %v6560_v9 = vpop.xlane.xlu0 %6559  ;;  %v6517_v43 = vmul.f32 %v13645_v13, %v9949_v30  ;;  %v6702_v30 = vsel %vm15195_vm10, %v6478_v50, 0.0  ;;  %vm15203_vm10 = vcmask 786112  }
 0xc27   : > { %v7073_v4 = vrot.slane %v6560_v9, %v14959_v25  ;;  %9966 = vtanh.f32 %v6271_v39  ;;  %v14016_v39 = vld [vmem:[%s14615_s8] ss:$0 sm:$0xff] }
 0xc28   : > { %6697 = vadd.xlane.f32.xlu1 %v6696_v0  ;;  %9968 = vtanh.f32 %v6234_v56 }
 0xc29   : > { %v7078_v10 = vsel %vm1739_vm2, %v7077_v33, %v7073_v4  ;;  %6727 = vadd.xlane.f32.xlu0 %v6726_v26  ;;  %v6572_v8 = vpop.xlane.xlu1 %6571  ;;  %v9953_v33 = vpop.eup %9952  ;;  %9970 = vtanh.f32 %v6227_v44 }
 0xc2a   : > { %v6566_v18 = vpop.xlane.xlu0 %6565  ;;  %v7092_v11 = vrot.slane %v6572_v8, %v14969_v24  ;;  %v9955_v21 = vpop.eup %9954  ;;  %v6488_v8 = vmul.f32 %v13645_v13, %v9953_v33  ;;  %v15197_v33 = vld [vmem:[#allocation122_spill] sm:$0xff] }
 0xc2b   : > { %v7082_v59 = vrot.slane %v6566_v18, %v14963_v5  ;;  %v15192_v18 = vld [vmem:[#allocation123_spill] sm:$0xff]  ;;  %v9957_v2 = vpop.eup %9956 }
 0xc2c   : > { %6787 = vadd.xlane.f32.xlu1 %v6786_v52  ;;  %v6264_v12 = vadd.f32 %v13842_v63, %v15192_v18  ;;  %v6732_v62 = vsel %vm15051_vm1, %v6488_v8, 0.0  ;;  %v6518_v32 = vmul.f32 %v14016_v39, %v9957_v2 }
 0xc2d   : > { %v7083_v58 = vsel %vm1746_vm3, %v7082_v59, %v7078_v10  ;;  %6817 = vadd.xlane.f32.xlu0 %v6816_v23  ;;  %v6575_v45 = vpop.xlane.xlu1 %6574  ;;  %v6819_v10 = vsel %vm15191_vm13, %v6517_v43, 0.0  ;;  %v6257_v23 = vadd.f32 %v15193_v61, %v13842_v63  ;;  %vm15201_vm13 = vmmov %vm15051_vm1 }
 0xc2e   : > { %v6569_v47 = vpop.xlane.xlu0 %6568  ;;  %v7097_v9 = vrot.slane %v6575_v45, %v14971_v38  ;;  %v9959_v45 = vpop.eup %9958  ;;  %9972 = vtanh.f32 %v6264_v12  ;;  %v6822_v44 = vsel %vm15199_vm9, %v6518_v32, 0.0  ;;  %v15206_v32 = vld [vmem:[#allocation125_spill] sm:$0xff]  ;;  %vm15207_vm9 = vcmask 851712  }
 0xc2f   : > { %v7087_v19 = vrot.slane %v6569_v47, %v14966_v46  ;;  %v9961_v56 = vpop.eup %9960  ;;  %9974 = vtanh.f32 %v6257_v23 }
 0xc30   : > { %6700 = vadd.xlane.f32.xlu1 %v6699_v6  ;;  %9976 = vtanh.f32 %v6235_v16 }
 0xc31   : > { %v7088_v42 = vsel %vm15188_vm14, %v7087_v19, %v7083_v58  ;;  %6730 = vadd.xlane.f32.xlu0 %v6729_v29  ;;  %v6584_v17 = vpop.xlane.xlu1 %6583  ;;  %v6511_v58 = vmul.f32 %v13645_v13, %v9955_v21  ;;  %v15196_v29 = vld [vmem:[#allocation130_spill] sm:$0xff]  ;;  %vm15198_vm14 = vmmov %vm15051_vm1 }
 0xc32   : > { %v7093_v4 = vsel %vm1760_vm5, %v7092_v11, %v7088_v42  ;;  %v6578_v0 = vpop.xlane.xlu0 %6577  ;;  %v7112_v47 = vrot.slane %v6584_v17, %v12459_v40  ;;  %v6273_v43 = vadd.f32 %v15196_v29, %v13853_v35 }
 0xc33   : > { %v7098_v26 = vsel %vm1767_vm6, %v7097_v9, %v7093_v4  ;;  %v7102_v53 = vrot.slane %v6578_v0, %v14973_v22  ;;  %v6265_v9 = vadd.f32 %v15197_v33, %v13842_v63  ;;  %v6801_v17 = vsel %vm15198_vm14, %v6511_v58, 0.0  ;;  %v9963_v0 = vpop.eup %9962  ;;  %v15204_v58 = vld [vmem:[#allocation132_spill] sm:$0xff]  ;;  %vm15205_vm14 = vmmov %vm15051_vm1 }
 0xc34   : > { %6790 = vadd.xlane.f32.xlu1 %v6789_v49  ;;  %v6482_v4 = vmul.f32 %v14016_v39, %v9959_v45  ;;  %v6512_v2 = vmul.f32 %v14016_v39, %v9963_v0  ;;  %9978 = vtanh.f32 %v6273_v43  ;;  %v6275_v45 = vadd.f32 %v15204_v58, %v13853_v35  ;;  %v15211_v0 = vld [vmem:[#allocation19_spill] sm:$0xff] }
 0xc35   : > { %v7103_v59 = vsel %vm1774_vm7, %v7102_v53, %v7098_v26  ;;  %6820 = vadd.xlane.f32.xlu0 %v6819_v10  ;;  %v6587_v52 = vpop.xlane.xlu1 %6586  ;;  %v6489_v26 = vmul.f32 %v14016_v39, %v9961_v56  ;;  %v9965_v53 = vpop.eup %9964  ;;  %v15200_v10 = vld [vmem:[#allocation133_spill] sm:$0xff]  ;;  %9980 = vtanh.f32 %v6265_v9  ;;  %v6266_v56 = vadd.f32 %v13842_v63, %v15206_v32  ;;  %v15209_v9 = vld [vmem:[#allocation135_spill] sm:$0xff] }
 0xc36   : > { %v6581_v20 = vpop.xlane.xlu0 %6580  ;;  %v7117_v19 = vrot.slane %v6587_v52, %v12465_v54  ;;  %v6274_v8 = vadd.f32 %v13853_v35, %v15200_v10  ;;  %v9967_v18 = vpop.eup %9966  ;;  %v6714_v12 = vsel %vm15201_vm13, %v6482_v4, 0.0  ;;  %v6519_v23 = vmul.f32 %v14016_v39, %v9965_v53  ;;  %vm15208_vm13 = vmmov %vm15051_vm1 }
 0xc37   : > { %v7107_v28 = vrot.slane %v6581_v20, %v14976_v48  ;;  %v6735_v61 = vsel %vm15051_vm1, %v6489_v26, 0.0  ;;  %v9969_v15 = vpop.eup %9968 }
 0xc38   : > { %6703 = vadd.xlane.f32.xlu1 %v6702_v30  ;;  %9982 = vtanh.f32 %v6274_v8  ;;  %v6133_v8 = vcombine.high %v13828_v37, %v13828_v37 }
 0xc39   : > { %v7108_v13 = vsel %vm1781_vm8, %v7107_v28, %v7103_v59  ;;  %6733 = vadd.xlane.f32.xlu0 %v6732_v62  ;;  %v6590_v6 = vpop.xlane.xlu1 %6589  ;;  %v15202_v59 = vld [vmem:[#allocation94_spill] sm:$0xff]  ;;  %v6527_v62 = vmul.f32 %v14016_v39, %v9967_v18 }
 0xc3a   : > { %v7113_v31 = vsel %vm4563_vm0, %v7112_v47, %v7108_v13  ;;  %v7122_v1 = vrot.slane %v6590_v6, %v12479_v51  ;;  %v14023_v11 = vpop.xlane.xlu0 %6607  ;;  %v6236_v52 = vadd.f32 %v13807_v60, %v15202_v59  ;;  %v6804_v47 = vsel %vm15205_vm14, %v6512_v2, 0.0  ;;  %v15212_v2 = vld [vmem:[#allocation134_spill] sm:$0xff]  ;;  %vm15213_vm14 = vmmov %vm15051_vm1 }
 0xc3b   : > { %v7118_v42 = vsel %vm4570_vm4, %v7117_v19, %v7113_v31  ;;  %v9971_v19 = vpop.eup %9970  ;;  %v6825_v6 = vsel %vm15208_vm13, %v6519_v23, 0.0  ;;  %v6490_v31 = vmul.f32 %v14016_v39, %v9969_v15  ;;  %v6277_v59 = vadd.f32 %v15212_v2, %v13853_v35  ;;  %vm15217_vm13 = vmmov %vm15051_vm1 }
 0xc3c   : > { %v7123_v3 = vsel %vm4577_vm15, %v7122_v1, %v7118_v42  ;;  %6802 = vadd.xlane.f32.xlu1 %v6801_v17  ;;  %9984 = vtanh.f32 %v6236_v52  ;;  %v9973_v1 = vpop.eup %9972  ;;  %v6276_v42 = vadd.f32 %v13853_v35, %v15209_v9  ;;  %v6483_v4 = vmul.f32 %v14016_v39, %v9971_v19 }
 0xc3d   : > { %6823 = vadd.xlane.f32.xlu0 %v6822_v44  ;;  %v6593_v49 = vpop.xlane.xlu1 %6592  ;;  %9986 = vtanh.f32 %v6275_v45  ;;  %v9975_v44 = vpop.eup %9974  ;;  %v6738_v53 = vsel %vm15051_vm1, %v6490_v31, 0.0  ;;  %v15218_v31 = vld [vmem:[#allocation126_spill] sm:$0xff] }
 0xc3e   : > { %v7127_v50 = vrot.slane %v6593_v49, %v12501_v36  ;;  %v14036_v21 = vpop.xlane.xlu0 %6655  ;;  %v6520_v49 = vmul.f32 %v14016_v39, %v9973_v1  ;;  %9988 = vtanh.f32 %v6266_v56  ;;  %v6717_v52 = vsel %vm15213_vm14, %v6483_v4, 0.0  ;;  %v15216_v56 = vld [vmem:[#allocation137_spill] sm:$0xff]  ;;  %vm15221_vm14 = vmmov %vm15051_vm1 }
 0xc3f   : > { %9990 = vtanh.f32 %v6276_v42  ;;  %v6278_v19 = vadd.f32 %v13853_v35, %v15216_v56  ;;  %v6269_v1 = vadd.f32 %v15218_v31, %v13842_v63  ;;  %v7152_v4 = vrot.slane %v14023_v11, %v14959_v25 }
 0xc40   : > { %v7128_v20 = vsel %vm15203_vm10, %v7127_v50, %v7123_v3  ;;  %6715 = vadd.xlane.f32.xlu1 %v6714_v12  ;;  %vm15210_vm10 = vmmov %vm15051_vm1  ;;  %v6282_v3 = vadd.f32 %v13853_v35, %v15211_v0  ;;  %v9977_v50 = vpop.eup %9976  ;;  %v7231_v31 = vrot.slane %v14036_v21, %v14959_v25 }
 0xc41   : > { %6736 = vadd.xlane.f32.xlu0 %v6735_v61  ;;  %v6596_v16 = vpop.xlane.xlu1 %6595  ;;  %v6849_v17 = vsel %vm15210_vm10, %v6527_v62, 0.0  ;;  %v15214_v61 = vld [vmem:[#allocation22_spill] sm:$0xff]  ;;  %v9979_v15 = vpop.eup %9978  ;;  %vm15219_vm10 = vcmask 1048512  }
 0xc42   : > { %v7132_v28 = vrot.slane %v6596_v16, %v12519_v34  ;;  %v14048_v30 = vpop.xlane.xlu0 %6661  ;;  %v6283_v23 = vadd.f32 %v15214_v61, %v13853_v35  ;;  %9992 = vtanh.f32 %v6282_v3  ;;  %v9981_v58 = vpop.eup %9980 }
 0xc43   : > { %9994 = vtanh.f32 %v6277_v59  ;;  %v6521_v9 = vmul.f32 %v14016_v39, %v9981_v58 }
 0xc44   : > { %v7133_v13 = vsel %vm15207_vm9, %v7132_v28, %v7128_v20  ;;  %6805 = vadd.xlane.f32.xlu1 %v6804_v47  ;;  %v6513_v20 = vmul.f32 %v14016_v39, %v9975_v44  ;;  %vm15215_vm9 = vmmov %vm15051_vm1  ;;  %v6491_v28 = vmul.f32 %v14016_v39, %v9977_v50  ;;  %v14086_v47 = vrot.slane %v6133_v8, %v15038_v55  ;;  %v15220_v44 = vld [vmem:[#allocation136_spill] sm:$0xff]  ;;  %v15222_v50 = vld [vmem:[#allocation27_spill] sm:$0xff] }
 0xc45   : > { %6826 = vadd.xlane.f32.xlu0 %v6825_v6  ;;  %v6599_v29 = vpop.xlane.xlu1 %6598  ;;  %v6828_v37 = vsel %vm15215_vm9, %v6520_v49, 0.0  ;;  %v6529_v6 = vmul.f32 %v14016_v39, %v9979_v15  ;;  %9996 = vtanh.f32 %v6283_v23  ;;  %vm15223_vm9 = vmmov %vm15051_vm1  ;;  %v15224_v23 = vld [vmem:[#allocation21_spill] sm:$0xff] }
 0xc46   : > { %v7137_v43 = vrot.slane %v6599_v29, %v12537_v27  ;;  %v14060_v33 = vpop.xlane.xlu0 %6619  ;;  %v9983_v29 = vpop.eup %9982  ;;  %v6741_v55 = vsel %vm15051_vm1, %v6491_v28, 0.0  ;;  %9998 = vtanh.f32 %v6278_v19  ;;  %v6831_v11 = vsel %vm15223_vm9, %v6521_v9, 0.0  ;;  %v15226_v28 = vld [vmem:[#allocation28_spill] sm:$0xff]  ;;  %vm15233_vm9 = vmmov %vm15051_vm1 }
 0xc47   : > { %v6530_v49 = vmul.f32 %v14016_v39, %v9983_v29  ;;  %10000 = vtanh.f32 %v6269_v1  ;;  %v6280_v15 = vadd.f32 %v13853_v35, %v15224_v23  ;;  %v6288_v58 = vadd.f32 %v14086_v47, %v15226_v28 }
 0xc48   : > { %v7138_v26 = vsel %vm4598_vm12, %v7137_v43, %v7133_v13  ;;  %6850 = vadd.xlane.f32.xlu1 %v6849_v17  ;;  %v6807_v13 = vsel %vm15217_vm13, %v6513_v20, 0.0  ;;  %vm15225_vm13 = vmmov %vm15051_vm1 }
 0xc49   : > { %6739 = vadd.xlane.f32.xlu0 %v6738_v53  ;;  %v6602_v10 = vpop.xlane.xlu1 %6601  ;;  %v9985_v42 = vpop.eup %9984  ;;  %v6855_v53 = vsel %vm15221_vm14, %v6529_v6, 0.0  ;;  %vm15230_vm14 = vmmov %vm15051_vm1 }
 0xc4a   : > { %v7142_v18 = vrot.slane %v6602_v10, %v12555_v7  ;;  %v14074_v12 = vpop.xlane.xlu0 %6754  ;;  %v6287_v10 = vadd.f32 %v15222_v50, %v14086_v47  ;;  %v9987_v8 = vpop.eup %9986  ;;  %v6492_v2 = vmul.f32 %v14016_v39, %v9985_v42  ;;  %v15229_v42 = vld [vmem:[#allocation29_spill] sm:$0xff] }
 0xc4b   : > { %v9989_v59 = vpop.eup %9988 }
 0xc4c   : > { %v7143_v16 = vsel %vm4605_vm11, %v7142_v18, %v7138_v26  ;;  %6718 = vadd.xlane.f32.xlu1 %v6717_v52  ;;  %v6279_v26 = vadd.f32 %v15220_v44, %v13853_v35  ;;  %v6522_v19 = vmul.f32 %v14016_v39, %v9989_v59  ;;  %v15232_v59 = vld [vmem:[#allocation139_spill] sm:$0xff] }
 0xc4d   : > { %6829 = vadd.xlane.f32.xlu0 %v6828_v37  ;;  %v6605_v45 = vpop.xlane.xlu1 %6604  ;;  %v6531_v37 = vmul.f32 %v14016_v39, %v9987_v8 }
 0xc4e   : > { %v7147_v62 = vrot.slane %v6605_v45, %v12575_v14  ;;  %v14089_v32 = vpop.xlane.xlu0 %6622  ;;  %10002 = vtanh.f32 %v6279_v26  ;;  %v9991_v45 = vpop.eup %9990 }
 0xc4f   : > { %10004 = vtanh.f32 %v6287_v10  ;;  %v6532_v44 = vmul.f32 %v14016_v39, %v9991_v45 }
 0xc50   : > { %v14098_v43 = vsel %vm15219_vm10, %v7147_v62, %v7143_v16  ;;  %6808 = vadd.xlane.f32.xlu1 %v6807_v13  ;;  %v6858_v16 = vsel %vm15225_vm13, %v6530_v49, 0.0  ;;  %vm15227_vm10 = vmmov %vm15051_vm1  ;;  %v9993_v13 = vpop.eup %9992  ;;  %10006 = vtanh.f32 %v6280_v15  ;;  %vm15234_vm13 = vcmask 261312  }
 0xc51   : > { %6742 = vadd.xlane.f32.xlu0 %v6741_v55  ;;  %v6611_v17 = vpop.xlane.xlu1 %6610  ;;  %v6744_v56 = vsel %vm15227_vm10, %v6492_v2, 0.0  ;;  %v15228_v55 = vld [vmem:[#allocation23_spill] sm:$0xff]  ;;  %v9995_v26 = vpop.eup %9994  ;;  %v6538_v49 = vmul.f32 %v14016_v39, %v9993_v13  ;;  %10008 = vtanh.f32 %v6288_v58  ;;  %v6864_v23 = vsel %vm15233_vm9, %v6532_v44, 0.0  ;;  %vm15235_vm10 = vmmov %vm15051_vm1 }
 0xc52   : > { %v7156_v0 = vrot.slane %v6611_v17, %v14958_v41  ;;  %v14105_v3 = vpop.xlane.xlu0 %6670  ;;  %v6281_v9 = vadd.f32 %v15228_v55, %v13853_v35  ;;  %v6289_v17 = vadd.f32 %v15229_v42, %v14086_v47  ;;  %v9997_v50 = vpop.eup %9996  ;;  %v6533_v15 = vmul.f32 %v14016_v39, %v9995_v26  ;;  %v15239_v44 = vld [vmem:[#allocation127_spill] sm:$0xff]  ;;  %vm15241_vm9 = vmmov %vm15051_vm1 }
 0xc53   : > { %v6539_v58 = vmul.f32 %v14016_v39, %v9997_v50  ;;  %v6268_v26 = vadd.f32 %v13842_v63, %v15239_v44  ;;  %v15240_v50 = vld [vmem:[#allocation141_spill] sm:$0xff]  ;;  %v15248_v44 = vld [vmem:[#allocation20_spill] sm:$0xff] }
 0xc54   : > { %v7157_v18 = vsel %vm1739_vm2, %v7156_v0, %v7152_v4  ;;  %6856 = vadd.xlane.f32.xlu1 %v6855_v53  ;;  %v7240_v4 = vrot.slane %v14048_v30, %v14963_v5  ;;  %v6861_v0 = vsel %vm15051_vm1, %v6531_v37, 0.0  ;;  %v6834_v53 = vsel %vm15230_vm14, %v6522_v19, 0.0  ;;  %vm15238_vm14 = vmmov %vm15051_vm1 }
 0xc55   : > { %6832 = vadd.xlane.f32.xlu0 %v6831_v11  ;;  %v6614_v52 = vpop.xlane.xlu1 %6613  ;;  %10010 = vtanh.f32 %v6281_v9  ;;  %v15231_v11 = vld [vmem:[#allocation93_spill] sm:$0xff]  ;;  %v7176_v37 = vrot.slane %v14089_v32, %v14971_v38  ;;  %v6885_v42 = vsel %vm15238_vm14, %v6539_v58, 0.0  ;;  %vm15246_vm14 = vmmov %vm15051_vm1 }
 0xc56   : > { %v7161_v20 = vrot.slane %v6614_v52, %v14963_v5  ;;  %v14117_v61 = vpop.xlane.xlu0 %6760  ;;  %v6237_v2 = vadd.f32 %v15231_v11, %v13807_v60  ;;  %v6290_v52 = vadd.f32 %v14086_v47, %v15232_v59  ;;  %10012 = vtanh.f32 %v6289_v17 }
 0xc57   : > { %v6882_v60 = vsel %vm15235_vm10, %v6538_v49, 0.0  ;;  %vm15245_vm10 = vcmask 261312  }
 0xc58   : > { %v7162_v62 = vsel %vm1746_vm3, %v7161_v20, %v7157_v18  ;;  %6859 = vadd.xlane.f32.xlu1 %v6858_v16  ;;  %v7171_v20 = vrot.slane %v14060_v33, %v14969_v24  ;;  %v9999_v16 = vpop.eup %9998  ;;  %10014 = vtanh.f32 %v6237_v2 }
 0xc59   : > { %6745 = vadd.xlane.f32.xlu0 %v6744_v56  ;;  %v6659_v6 = vpop.xlane.xlu1 %6658  ;;  %v10001_v45 = vpop.eup %10000  ;;  %10016 = vtanh.f32 %v6290_v52 }
 0xc5a   : > { %v7235_v1 = vrot.slane %v6659_v6, %v14958_v41  ;;  %v14131_v29 = vpop.xlane.xlu0 %6673  ;;  %v15236_v6 = vld [vmem:[#allocation124_spill] sm:$0xff]  ;;  %v6525_v17 = vmul.f32 %v14016_v39, %v10001_v45 }
 0xc5b   : > { %v6267_v32 = vadd.f32 %v15236_v6, %v13842_v63  ;;  %v10003_v9 = vpop.eup %10002 }
 0xc5c   : > { %v7236_v21 = vsel %vm1739_vm2, %v7235_v1, %v7231_v31  ;;  %6862 = vadd.xlane.f32.xlu1 %v6861_v0  ;;  %v6534_v31 = vmul.f32 %v14016_v39, %v9999_v16  ;;  %v15237_v1 = vld [vmem:[#allocation138_spill] sm:$0xff]  ;;  %v6535_v2 = vmul.f32 %v14016_v39, %v10003_v9 }
 0xc5d   : > { %6835 = vadd.xlane.f32.xlu0 %v6834_v53  ;;  %v6617_v10 = vpop.xlane.xlu1 %6616  ;;  %v7241_v8 = vsel %vm1746_vm3, %v7240_v4, %v7236_v21  ;;  %v6291_v55 = vadd.f32 %v15237_v1, %v14086_v47  ;;  %v10005_v4 = vpop.eup %10004  ;;  %v7393_v21 = vrot.slane %v14074_v12, %v14958_v41  ;;  %10018 = vtanh.f32 %v6267_v32 }
 0xc5e   : > { %v7166_v30 = vrot.slane %v6617_v10, %v14966_v46  ;;  %v14146_v18 = vpop.xlane.xlu0 %6763  ;;  %v6292_v10 = vadd.f32 %v14086_v47, %v15240_v50  ;;  %v6870_v11 = vsel %vm15241_vm9, %v6534_v31, 0.0  ;;  %v10007_v59 = vpop.eup %10006  ;;  %v6543_v52 = vmul.f32 %v14016_v39, %v10005_v4  ;;  %vm15249_vm9 = vmmov %vm15051_vm1 }
 0xc5f   : > { %10020 = vtanh.f32 %v6291_v55  ;;  %v6873_v6 = vsel %vm15051_vm1, %v6535_v2, 0.0  ;;  %v6536_v32 = vmul.f32 %v14016_v39, %v10007_v59  ;;  %v7260_v31 = vrot.slane %v14131_v29, %v14973_v22 }
 0xc60   : > { %v7167_v28 = vsel %vm15234_vm13, %v7166_v30, %v7162_v62  ;;  %6865 = vadd.xlane.f32.xlu1 %v6864_v23  ;;  %v6867_v62 = vsel %vm15051_vm1, %v6533_v15, 0.0  ;;  %vm15242_vm13 = vmmov %vm15051_vm1  ;;  %10022 = vtanh.f32 %v6268_v26  ;;  %v6897_v55 = vsel %vm15246_vm14, %v6543_v52, 0.0 }
 0xc61   : > { %v7172_v56 = vsel %vm1760_vm5, %v7171_v20, %v7167_v28  ;;  %6883 = vadd.xlane.f32.xlu0 %v6882_v60  ;;  %v6665_v33 = vpop.xlane.xlu1 %6664  ;;  %v6843_v12 = vsel %vm15242_vm13, %v6525_v17, 0.0  ;;  %v10009_v20 = vpop.eup %10008  ;;  %10024 = vtanh.f32 %v6292_v10  ;;  %v15244_v60 = vld [vmem:[#allocation140_spill] sm:$0xff]  ;;  %v6286_v26 = vadd.f32 %v14086_v47, %v15248_v44  ;;  %vm15250_vm13 = vmmov %vm15051_vm1 }
 0xc62   : > { %v14162_v19 = vpop.xlane.xlu0 %6631  ;;  %v14165_v13 = vsel %vm1767_vm6, %v7176_v37, %v7172_v56  ;;  %v7245_v30 = vrot.slane %v6665_v33, %v14966_v46  ;;  %v15243_v37 = vld [vmem:[#allocation26_spill] sm:$0xff]  ;;  %v6293_v58 = vadd.f32 %v15244_v60, %v14086_v47  ;;  %v10011_v45 = vpop.eup %10010  ;;  %v7255_v56 = vrot.slane %v14105_v3, %v14971_v38  ;;  %vm15254_vm14 = vmmov %vm15051_vm1 }
 0xc63   : > { %v6284_v28 = vadd.f32 %v13853_v35, %v15243_v37  ;;  %v6544_v9 = vmul.f32 %v14016_v39, %v10009_v20  ;;  %v6537_v50 = vmul.f32 %v14016_v39, %v10011_v45 }
 0xc64   : > { %6868 = vadd.xlane.f32.xlu1 %v6867_v62  ;;  %v7246_v33 = vsel %vm15245_vm10, %v7245_v30, %v7241_v8  ;;  %v10013_v62 = vpop.eup %10012  ;;  %v15247_v8 = vld [vmem:[#allocation143_spill] sm:$0xff]  ;;  %v7408_v30 = vrot.slane %v14146_v18, %v14969_v24  ;;  %v15251_v18 = vld [vmem:[#allocation142_spill] sm:$0xff] }
 0xc65   : > { %6886 = vadd.xlane.f32.xlu0 %v6885_v42  ;;  %v6752_v0 = vpop.xlane.xlu1 %6751  ;;  %v6294_v17 = vadd.f32 %v14086_v47, %v15247_v8  ;;  %10026 = vtanh.f32 %v6284_v28  ;;  %v10015_v10 = vpop.eup %10014  ;;  %v6900_v2 = vsel %vm15250_vm13, %v6544_v9, 0.0  ;;  %v6545_v59 = vmul.f32 %v14016_v39, %v10013_v62  ;;  %vm15258_vm13 = vmmov %vm15051_vm1 }
 0xc66   : > { %v14179_v53 = vpop.xlane.xlu0 %6634  ;;  %v7389_v49 = vrot.slane %v6752_v0, %v14959_v25  ;;  %10028 = vtanh.f32 %v6293_v58  ;;  %v6295_v37 = vadd.f32 %v15251_v18, %v14086_v47  ;;  %v6879_v58 = vsel %vm15051_vm1, %v6537_v50, 0.0 }
 0xc67   : > { %v6493_v45 = vmul.f32 %v14016_v39, %v10015_v10  ;;  %10030 = vtanh.f32 %v6286_v26  ;;  %v6903_v62 = vsel %vm15254_vm14, %v6545_v59, 0.0  ;;  %v7191_v26 = vrot.slane %v14162_v19, %v12459_v40 }
 0xc68   : > { %v7394_v63 = vsel %vm1739_vm2, %v7393_v21, %v7389_v49  ;;  %6871 = vadd.xlane.f32.xlu1 %v6870_v11  ;;  %v7403_v21 = vrot.slane %v14117_v61, %v14966_v46  ;;  %v6876_v49 = vsel %vm15249_vm9, %v6536_v32, 0.0  ;;  %10032 = vtanh.f32 %v6294_v17  ;;  %vm15257_vm9 = vmmov %vm15051_vm1 }
 0xc69   : > { %6844 = vadd.xlane.f32.xlu0 %v6843_v12  ;;  %v6668_v23 = vpop.xlane.xlu1 %6667  ;;  %v10017_v12 = vpop.eup %10016  ;;  %10034 = vtanh.f32 %v6295_v37  ;;  %v6747_v17 = vsel %vm15257_vm9, %v6493_v45, 0.0  ;;  %vm15261_vm14 = vcmask 786112   ;;  %vm15262_vm9 = vcmask 851712  }
 0xc6a   : > { %v14190_v15 = vpop.xlane.xlu0 %6637  ;;  %v7250_v16 = vrot.slane %v6668_v23, %v14969_v24  ;;  %v10019_v60 = vpop.eup %10018 }
 0xc6b   : > { %v6523_v8 = vmul.f32 %v14016_v39, %v10019_v60 }
 0xc6c   : > { %v7251_v1 = vsel %vm1760_vm5, %v7250_v16, %v7246_v33  ;;  %6874 = vadd.xlane.f32.xlu1 %v6873_v6  ;;  %v10021_v6 = vpop.eup %10020 }
 0xc6d   : > { %v7256_v42 = vsel %vm1767_vm6, %v7255_v56, %v7251_v1  ;;  %6898 = vadd.xlane.f32.xlu0 %v6897_v55  ;;  %v6758_v3 = vpop.xlane.xlu1 %6757  ;;  %v15253_v56 = vld [vmem:[#allocation145_spill] sm:$0xff]  ;;  %v15255_v1 = vld [vmem:[#allocation144_spill] sm:$0xff]  ;;  %v10023_v9 = vpop.eup %10022 }
 0xc6e   : > { %v14210_v4 = vpop.xlane.xlu0 %6640  ;;  %v7398_v0 = vrot.slane %v6758_v3, %v14963_v5  ;;  %v14214_v29 = vsel %vm1774_vm7, %v7260_v31, %v7256_v42  ;;  %v6296_v33 = vadd.f32 %v14086_v47, %v15253_v56  ;;  %v6546_v31 = vmul.f32 %v14016_v39, %v10017_v12  ;;  %v10025_v44 = vpop.eup %10024 }
 0xc6f   : > { %v6297_v55 = vadd.f32 %v15255_v1, %v14086_v47  ;;  %v6548_v56 = vmul.f32 %v14016_v39, %v10025_v44 }
 0xc70   : > { %v7399_v11 = vsel %vm1746_vm3, %v7398_v0, %v7394_v63  ;;  %6877 = vadd.xlane.f32.xlu1 %v6876_v49  ;;  %v15252_v63 = vld [vmem:[#allocation25_spill] sm:$0xff]  ;;  %v7196_v49 = vrot.slane %v14179_v53, %v12465_v54  ;;  %v6906_v10 = vsel %vm15258_vm13, %v6546_v31, 0.0  ;;  %v7206_v53 = vrot.slane %v14210_v4, %v12501_v36  ;;  %vm15265_vm13 = vmmov %vm15051_vm1 }
 0xc71   : > { %v7404_v52 = vsel %vm15245_vm10, %v7403_v21, %v7399_v11  ;;  %6901 = vadd.xlane.f32.xlu0 %v6900_v2  ;;  %v6626_v61 = vpop.xlane.xlu1 %6625  ;;  %v6285_v28 = vadd.f32 %v15252_v63, %v13853_v35  ;;  %v6547_v21 = vmul.f32 %v14016_v39, %v10021_v6  ;;  %v15259_v2 = vld [vmem:[#allocation147_spill] sm:$0xff]  ;;  %vm15260_vm10 = vmmov %vm15051_vm1 }
 0xc72   : > { %v6644_v20 = vpop.xlane.xlu0 %6643  ;;  %v7181_v23 = vrot.slane %v6626_v61, %v14973_v22  ;;  %v14230_v16 = vsel %vm1760_vm5, %v7408_v30, %v7404_v52  ;;  %v7201_v30 = vrot.slane %v14190_v15, %v12479_v51  ;;  %v6298_v59 = vadd.f32 %v14086_v47, %v15259_v2  ;;  %v10027_v18 = vpop.eup %10026 }
 0xc73   : > { %10036 = vtanh.f32 %v6285_v28  ;;  %v7211_v15 = vrot.slane %v6644_v20, %v12519_v34  ;;  %v6909_v63 = vsel %vm15051_vm1, %v6547_v21, 0.0  ;;  %v6524_v28 = vmul.f32 %v14016_v39, %v10023_v9  ;;  %v10029_v60 = vpop.eup %10028 }
 0xc74   : > { %v7182_v32 = vsel %vm1774_vm7, %v7181_v23, %v14165_v13  ;;  %6880 = vadd.xlane.f32.xlu1 %v6879_v58  ;;  %v15256_v13 = vld [vmem:[#allocation146_spill] sm:$0xff]  ;;  %10038 = vtanh.f32 %v6296_v33  ;;  %v6837_v23 = vsel %vm15260_vm10, %v6523_v8, 0.0  ;;  %v6540_v8 = vmul.f32 %v14016_v39, %v10027_v18  ;;  %vm15266_vm10 = vmmov %vm15051_vm1 }
 0xc75   : > { %6904 = vadd.xlane.f32.xlu0 %v6903_v62  ;;  %v6629_v35 = vpop.xlane.xlu1 %6628  ;;  %v6299_v0 = vadd.f32 %v15256_v13, %v14086_v47  ;;  %10040 = vtanh.f32 %v6297_v55  ;;  %v10031_v13 = vpop.eup %10030  ;;  %vm15267_vm1 = vcmask 1048512  }
 0xc76   : > { %v6647_v42 = vpop.xlane.xlu0 %6646  ;;  %v7186_v3 = vrot.slane %v6629_v35, %v14976_v48  ;;  %10042 = vtanh.f32 %v6298_v59  ;;  %v10033_v21 = vpop.eup %10032 }
 0xc77   : > { %v7216_v58 = vrot.slane %v6647_v42, %v12537_v27  ;;  %10044 = vtanh.f32 %v6299_v0 }
 0xc78   : > { %v7187_v50 = vsel %vm1781_vm8, %v7186_v3, %v7182_v32  ;;  %6748 = vadd.xlane.f32.xlu1 %v6747_v17  ;;  %v15263_v32 = vld [vmem:[#allocation149_spill] sm:$0xff]  ;;  %v6840_v3 = vsel %vm15265_vm13, %v6524_v28, 0.0  ;;  %v6549_v17 = vmul.f32 %v14016_v39, %v10029_v60 }
 0xc79   : > { %v7192_v11 = vsel %vm4563_vm0, %v7191_v26, %v7187_v50  ;;  %6907 = vadd.xlane.f32.xlu0 %v6906_v10  ;;  %v6677_v19 = vpop.xlane.xlu1 %6676  ;;  %v6300_v62 = vadd.f32 %v14086_v47, %v15263_v32  ;;  %v6912_v26 = vsel %vm15266_vm10, %v6548_v56, 0.0 }
 0xc7a   : > { %v7197_v12 = vsel %vm4570_vm4, %v7196_v49, %v7192_v11  ;;  %v6650_v52 = vpop.xlane.xlu0 %6649  ;;  %v7265_v61 = vrot.slane %v6677_v19, %v14976_v48  ;;  %v6542_v19 = vmul.f32 %v14016_v39, %v10031_v13 }
 0xc7b   : > { %v7202_v37 = vsel %vm4577_vm15, %v7201_v30, %v7197_v12  ;;  %v7221_v20 = vrot.slane %v6650_v52, %v12555_v7 }
 0xc7c   : > { %v7207_v4 = vsel %vm15261_vm14, %v7206_v53, %v7202_v37  ;;  %v7266_v45 = vsel %vm1781_vm8, %v7265_v61, %v14214_v29  ;;  %6838 = vadd.xlane.f32.xlu1 %v6837_v23  ;;  %v15264_v29 = vld [vmem:[#allocation148_spill] sm:$0xff]  ;;  %vm15268_vm14 = vcmask 1041409   ;;  %v6550_v53 = vmul.f32 %v14016_v39, %v10033_v21 }
 0xc7d   : > { %v7212_v33 = vsel %vm15262_vm9, %v7211_v15, %v7207_v4  ;;  %6910 = vadd.xlane.f32.xlu0 %v6909_v63  ;;  %v6767_v6 = vpop.xlane.xlu1 %6766  ;;  %v6301_v55 = vadd.f32 %v15264_v29, %v14086_v47  ;;  %vm15269_vm9 = vmmov %vm15266_vm10 }
 0xc7e   : > { %v7217_v31 = vsel %vm4598_vm12, %v7216_v58, %v7212_v33  ;;  %v6653_v35 = vpop.xlane.xlu0 %6652  ;;  %v7413_v1 = vrot.slane %v6767_v6, %v14971_v38  ;;  %v6888_v11 = vsel %vm15269_vm9, %v6540_v8, 0.0  ;;  %vm15270_vm13 = vmmov %vm15269_vm9 }
 0xc7f   : > { %v7222_v9 = vsel %vm4605_vm11, %v7221_v20, %v7217_v31  ;;  %v7226_v42 = vrot.slane %v6653_v35, %v12575_v14  ;;  %10046 = vtanh.f32 %v6301_v55  ;;  %v6915_v59 = vsel %vm15270_vm13, %v6549_v17, 0.0  ;;  %vm15271_vm10 = vmmov %vm15269_vm9 }
 0xc80   : > { %v7414_v44 = vsel %vm1767_vm6, %v7413_v1, %v14230_v16  ;;  %6841 = vadd.xlane.f32.xlu1 %v6840_v3  ;;  %v10035_v16 = vpop.eup %10034  ;;  %10048 = vtanh.f32 %v6300_v62  ;;  %v6894_v18 = vsel %vm15271_vm10, %v6542_v19, 0.0 }
 0xc81   : > { %v7227_v47 = vsel %vm15267_vm1, %v7226_v42, %v7222_v9  ;;  %6913 = vadd.xlane.f32.xlu0 %v6912_v26  ;;  %v6680_v49 = vpop.xlane.xlu1 %6679  ;;  %v10037_v0 = vpop.eup %10036  ;;  %vm15272_vm1 = vmmov %vm15269_vm9  ;;  %v6551_v28 = vmul.f32 %v14016_v39, %v10035_v16 }
 0xc82   : > { %v14296_v50 = vsel %vm15268_vm14, %v7227_v47, %v14098_v43  ;;  %v14298_v10 = vpop.xlane.xlu0 %6793  ;;  %v7270_v30 = vrot.slane %v6680_v49, %v12459_v40  ;;  %v10039_v43 = vpop.eup %10038  ;;  %v6541_v15 = vmul.f32 %v14016_v39, %v10037_v0  ;;  %v6918_v63 = vsel %vm15272_vm1, %v6550_v53, 0.0  ;;  %vm15273_vm14 = vmmov %vm15272_vm1 }
 0xc83   : > { %v10041_v52 = vpop.eup %10040  ;;  %vm15274_vm9 = vmmov %vm15272_vm1  ;;  %v6552_v32 = vmul.f32 %v14016_v39, %v10039_v43 }
 0xc84   : > { %v7271_v2 = vsel %vm4563_vm0, %v7270_v30, %v7266_v45  ;;  %6889 = vadd.xlane.f32.xlu1 %v6888_v11  ;;  %v10043_v45 = vpop.eup %10042  ;;  %v6891_v56 = vsel %vm15273_vm14, %v6541_v15, 0.0  ;;  %v6553_v33 = vmul.f32 %v14016_v39, %v10041_v52  ;;  %v6921_v6 = vsel %vm15274_vm9, %v6551_v28, 0.0  ;;  %vm15275_vm13 = vmmov %vm15272_vm1 }
 0xc85   : > { %6916 = vadd.xlane.f32.xlu0 %v6915_v59  ;;  %v6770_v12 = vpop.xlane.xlu1 %6769  ;;  %v10045_v62 = vpop.eup %10044  ;;  %v6554_v55 = vmul.f32 %v14016_v39, %v10043_v45  ;;  %vm15276_vm10 = vmmov %vm15272_vm1 }
 0xc86   : > { %v14306_v61 = vpop.xlane.xlu0 %6796  ;;  %v7418_v23 = vrot.slane %v6770_v12, %v14973_v22  ;;  %v6927_v29 = vsel %vm15275_vm13, %v6553_v33, 0.0  ;;  %v6924_v3 = vsel %vm15276_vm10, %v6552_v32, 0.0  ;;  %v6555_v8 = vmul.f32 %v14016_v39, %v10045_v62  ;;  %vm15277_vm14 = vmmov %vm15272_vm1 }
 0xc87   : > { %v6930_v21 = vsel %vm15272_vm1, %v6554_v55, 0.0  ;;  %vm15278_vm9 = vmmov %vm15272_vm1  ;;  %vm15280_vm10 = vcmask 786112  }
 0xc88   : > { %v7419_v37 = vsel %vm1774_vm7, %v7418_v23, %v7414_v44  ;;  %6895 = vadd.xlane.f32.xlu1 %v6894_v18  ;;  %v6933_v30 = vsel %vm15277_vm14, %v6555_v8, 0.0  ;;  %vm15279_vm13 = vmmov %vm15272_vm1  ;;  %vm15281_vm1 = vcmask 851712  }
 0xc89   : > { %6919 = vadd.xlane.f32.xlu0 %v6918_v63  ;;  %v6683_v60 = vpop.xlane.xlu1 %6682  ;;  %vm15282_vm14 = vmmov %vm15280_vm10 }
 0xc8a   : > { %v14314_v58 = vpop.xlane.xlu0 %6706  ;;  %v7275_v4 = vrot.slane %v6683_v60, %v12465_v54 }
 0xc8c   : > { %v7276_v20 = vsel %vm4570_vm4, %v7275_v4, %v7271_v2  ;;  %6892 = vadd.xlane.f32.xlu1 %v6891_v56  ;;  %v10047_v9 = vpop.eup %10046 }
 0xc8d   : > { %6922 = vadd.xlane.f32.xlu0 %v6921_v6  ;;  %v6773_v31 = vpop.xlane.xlu1 %6772  ;;  %v10049_v13 = vpop.eup %10048  ;;  %v6557_v47 = vmul.f32 %v14016_v39, %v10047_v9 }
 0xc8e   : > { %v14322_v35 = vpop.xlane.xlu0 %6709  ;;  %v7423_v1 = vrot.slane %v6773_v31, %v14976_v48  ;;  %v6556_v16 = vmul.f32 %v14016_v39, %v10049_v13 }
 0xc8f   : > { %v6939_v2 = vsel %vm15278_vm9, %v6557_v47, 0.0  ;;  %vm15283_vm9 = vmmov %vm15281_vm1 }
 0xc90   : > { %v7424_v42 = vsel %vm1781_vm8, %v7423_v1, %v7419_v37  ;;  %6928 = vadd.xlane.f32.xlu1 %v6927_v29  ;;  %v6936_v53 = vsel %vm15279_vm13, %v6556_v16, 0.0  ;;  %vm15284_vm13 = vcmask 1048512  }
 0xc91   : > { %6925 = vadd.xlane.f32.xlu0 %v6924_v3  ;;  %v6686_v44 = vpop.xlane.xlu1 %6685 }
 0xc92   : > { %v14330_v26 = vpop.xlane.xlu0 %6712  ;;  %v7280_v17 = vrot.slane %v6686_v44, %v12479_v51 }
 0xc94   : > { %v7281_v49 = vsel %vm4577_vm15, %v7280_v17, %v7276_v20  ;;  %6931 = vadd.xlane.f32.xlu1 %v6930_v21 }
 0xc95   : > { %6934 = vadd.xlane.f32.xlu0 %v6933_v30  ;;  %v6776_v11 = vpop.xlane.xlu1 %6775 }
 0xc96   : > { %v7428_v19 = vrot.slane %v6776_v11, %v12459_v40  ;;  %v14339_v0 = vpop.xlane.xlu0 %6799 }
 0xc98   : > { %v7429_v59 = vsel %vm4563_vm0, %v7428_v19, %v7424_v42  ;;  %6940 = vadd.xlane.f32.xlu1 %v6939_v2 }
 0xc99   : > { %6937 = vadd.xlane.f32.xlu0 %v6936_v53  ;;  %v6689_v43 = vpop.xlane.xlu1 %6688 }
 0xc9a   : > { %v7285_v12 = vrot.slane %v6689_v43, %v12501_v36  ;;  %v14345_v52 = vpop.xlane.xlu0 %6847  ;;  %v7458_v43 = vrot.slane %v14298_v10, %v12555_v7  ;;  %v7319_v10 = vrot.slane %v14322_v35, %v14963_v5 }
 0xc9c   : > { %v7286_v39 = vsel %vm15280_vm10, %v7285_v12, %v7281_v49  ;;  %vm15285_vm10 = vcmask 1042434   ;;  %v7463_v12 = vrot.slane %v14306_v61, %v12575_v14  ;;  %v7324_v61 = vrot.slane %v14330_v26, %v14966_v46 }
 0xc9d   : > { %v6779_v23 = vpop.xlane.xlu1 %6778 }
 0xc9e   : > { %v7433_v18 = vrot.slane %v6779_v23, %v12465_v54  ;;  %v14349_v15 = vpop.xlane.xlu0 %6853 }
 0xca0   : > { %v7434_v37 = vsel %vm4570_vm4, %v7433_v18, %v7429_v59 }
 0xca1   : > { %v6692_v63 = vpop.xlane.xlu1 %6691 }
 0xca2   : > { %v7290_v28 = vrot.slane %v6692_v63, %v12519_v34  ;;  %v14353_v60 = vpop.xlane.xlu0 %6721 }
 0xca4   : > { %v7291_v4 = vsel %vm15281_vm1, %v7290_v28, %v7286_v39  ;;  %vm15286_vm1 = vmmov %vm15284_vm13 }
 0xca5   : > { %v6782_v45 = vpop.xlane.xlu1 %6781 }
 0xca6   : > { %v7438_v56 = vrot.slane %v6782_v45, %v12479_v51  ;;  %v14357_v33 = vpop.xlane.xlu0 %6811 }
 0xca8   : > { %v7439_v20 = vsel %vm4577_vm15, %v7438_v56, %v7434_v37 }
 0xca9   : > { %v6695_v6 = vpop.xlane.xlu1 %6694 }
 0xcaa   : > { %v7295_v32 = vrot.slane %v6695_v6, %v12537_v27  ;;  %v14361_v62 = vpop.xlane.xlu0 %6724 }
 0xcac   : > { %v7296_v31 = vsel %vm4598_vm12, %v7295_v32, %v7291_v4 }
 0xcad   : > { %v6785_v1 = vpop.xlane.xlu1 %6784 }
 0xcae   : > { %v7443_v29 = vrot.slane %v6785_v1, %v12501_v36  ;;  %v14365_v55 = vpop.xlane.xlu0 %6814 }
 0xcb0   : > { %v7444_v9 = vsel %vm15282_vm14, %v7443_v29, %v7439_v20  ;;  %vm15287_vm14 = vcmask 261312  }
 0xcb1   : > { %v6698_v42 = vpop.xlane.xlu1 %6697 }
 0xcb2   : > { %v7300_v3 = vrot.slane %v6698_v42, %v12555_v7  ;;  %v14369_v8 = vpop.xlane.xlu0 %6727 }
 0xcb4   : > { %v7301_v13 = vsel %vm4605_vm11, %v7300_v3, %v7296_v31 }
 0xcb5   : > { %v6788_v44 = vpop.xlane.xlu1 %6787 }
 0xcb6   : > { %v7448_v17 = vrot.slane %v6788_v44, %v12519_v34  ;;  %v14373_v21 = vpop.xlane.xlu0 %6817  ;;  %v7547_v44 = vrot.slane %v14345_v52, %v14959_v25  ;;  %v7344_v52 = vrot.slane %v14361_v62, %v14976_v48 }
 0xcb8   : > { %v7449_v47 = vsel %vm15283_vm9, %v7448_v17, %v7444_v9  ;;  %vm15288_vm9 = vmmov %vm15287_vm14 }
 0xcb9   : > { %v6701_v49 = vpop.xlane.xlu1 %6700 }
 0xcba   : > { %v7305_v30 = vrot.slane %v6701_v49, %v12575_v14  ;;  %v6731_v16 = vpop.xlane.xlu0 %6730  ;;  %v7556_v49 = vrot.slane %v14349_v15, %v14963_v5  ;;  %v7349_v15 = vrot.slane %v14369_v8, %v12459_v40  ;;  %v7492_v8 = vrot.slane %v14365_v55, %v14971_v38 }
 0xcbc   : > { %v7306_v11 = vsel %vm15284_vm13, %v7305_v30, %v7301_v13  ;;  %vm15289_vm13 = vcmask 786112  }
 0xcbd   : > { %v14380_v19 = vsel %vm15285_vm10, %v7306_v11, %v14296_v50  ;;  %v6791_v2 = vpop.xlane.xlu1 %6790  ;;  %v7314_v50 = vrot.slane %v14314_v58, %v14958_v41  ;;  %v7468_v58 = vrot.slane %v14339_v0, %v14959_v25  ;;  %vm15290_vm10 = vcmask 851712  }
 0xcbe   : > { %v7453_v59 = vrot.slane %v6791_v2, %v12537_v27  ;;  %v14383_v53 = vpop.xlane.xlu0 %6820 }
 0xcc0   : > { %v7454_v39 = vsel %vm4598_vm12, %v7453_v59, %v7449_v47 }
 0xcc1   : > { %v7459_v23 = vsel %vm4605_vm11, %v7458_v43, %v7454_v39  ;;  %v6704_v18 = vpop.xlane.xlu1 %6703 }
 0xcc2   : > { %v14394_v37 = vsel %vm15286_vm1, %v7463_v12, %v7459_v23  ;;  %v7310_v63 = vrot.slane %v6704_v18, %v14959_v25  ;;  %v6734_v28 = vpop.xlane.xlu0 %6733  ;;  %v7339_v12 = vrot.slane %v14353_v60, %v14973_v22  ;;  %v7487_v60 = vrot.slane %v14357_v33, %v14969_v24 }
 0xcc3   : > { %v7359_v62 = vrot.slane %v6734_v28, %v12479_v51 }
 0xcc4   : > { %v7315_v4 = vsel %vm1739_vm2, %v7314_v50, %v7310_v63  ;;  %v7354_v50 = vrot.slane %v6731_v16, %v12465_v54 }
 0xcc5   : > { %v7320_v45 = vsel %vm1746_vm3, %v7319_v10, %v7315_v4  ;;  %v6803_v56 = vpop.xlane.xlu1 %6802 }
 0xcc6   : > { %v7472_v20 = vrot.slane %v6803_v56, %v14958_v41  ;;  %v6824_v6 = vpop.xlane.xlu0 %6823  ;;  %v7325_v32 = vsel %vm15287_vm14, %v7324_v61, %v7320_v45  ;;  %vm15291_vm14 = vcmask 1043459  }
 0xcc8   : > { %v7473_v31 = vsel %vm1739_vm2, %v7472_v20, %v7468_v58  ;;  %v7497_v58 = vrot.slane %v14373_v21, %v14973_v22 }
 0xcc9   : > { %v6716_v1 = vpop.xlane.xlu1 %6715 }
 0xcca   : > { %v7329_v35 = vrot.slane %v6716_v1, %v14969_v24  ;;  %v6737_v29 = vpop.xlane.xlu0 %6736 }
 0xccb   : > { %v7364_v45 = vrot.slane %v6737_v29, %v12501_v36 }
 0xccc   : > { %v7330_v26 = vsel %vm1760_vm5, %v7329_v35, %v7325_v32 }
 0xccd   : > { %v6806_v9 = vpop.xlane.xlu1 %6805 }
 0xcce   : > { %v7477_v42 = vrot.slane %v6806_v9, %v14963_v5  ;;  %v6827_v3 = vpop.xlane.xlu0 %6826 }
 0xcd0   : > { %v7478_v13 = vsel %vm1746_vm3, %v7477_v42, %v7473_v31  ;;  %v7502_v31 = vrot.slane %v14383_v53, %v14976_v48  ;;  %v7512_v42 = vrot.slane %v6827_v3, %v12465_v54 }
 0xcd1   : > { %v6851_v0 = vpop.xlane.xlu1 %6850 }
 0xcd2   : > { %v7551_v17 = vrot.slane %v6851_v0, %v14958_v41  ;;  %v6740_v47 = vpop.xlane.xlu0 %6739 }
 0xcd3   : > { %v7369_v20 = vrot.slane %v6740_v47, %v12519_v34 }
 0xcd4   : > { %v7552_v30 = vsel %vm1739_vm2, %v7551_v17, %v7547_v44 }
 0xcd5   : > { %v6719_v11 = vpop.xlane.xlu1 %6718  ;;  %v14419_v2 = vsel %vm1746_vm3, %v7556_v49, %v7552_v30 }
 0xcd6   : > { %v7334_v59 = vrot.slane %v6719_v11, %v14971_v38  ;;  %v6830_v43 = vpop.xlane.xlu0 %6829 }
 0xcd7   : > { %v7517_v53 = vrot.slane %v6830_v43, %v12479_v51 }
 0xcd8   : > { %v7335_v39 = vsel %vm1767_vm6, %v7334_v59, %v7330_v26  ;;  %v7507_v26 = vrot.slane %v6824_v6, %v12459_v40 }
 0xcd9   : > { %v7340_v23 = vsel %vm1774_vm7, %v7339_v12, %v7335_v39  ;;  %v6809_v18 = vpop.xlane.xlu1 %6808 }
 0xcda   : > { %v7345_v63 = vsel %vm1781_vm8, %v7344_v52, %v7340_v23  ;;  %v7482_v10 = vrot.slane %v6809_v18, %v14966_v46  ;;  %v6743_v61 = vpop.xlane.xlu0 %6742 }
 0xcdb   : > { %v7350_v4 = vsel %vm4563_vm0, %v7349_v15, %v7345_v63  ;;  %v7374_v35 = vrot.slane %v6743_v61, %v12537_v27 }
 0xcdc   : > { %v7483_v56 = vsel %vm15288_vm9, %v7482_v10, %v7478_v13  ;;  %v7355_v16 = vsel %vm4570_vm4, %v7354_v50, %v7350_v4  ;;  %vm15292_vm9 = vcmask 1044484  }
 0xcdd   : > { %v7488_v33 = vsel %vm1760_vm5, %v7487_v60, %v7483_v56  ;;  %v7360_v28 = vsel %vm4577_vm15, %v7359_v62, %v7355_v16  ;;  %v6857_v32 = vpop.xlane.xlu1 %6856 }
 0xcde   : > { %v7493_v55 = vsel %vm1767_vm6, %v7492_v8, %v7488_v33  ;;  %v7365_v1 = vsel %vm15289_vm13, %v7364_v45, %v7360_v28  ;;  %v6833_v29 = vpop.xlane.xlu0 %6832  ;;  %v7561_v45 = vrot.slane %v6857_v32, %v14966_v46  ;;  %vm15293_vm13 = vcmask 261312  }
 0xcdf   : > { %v7498_v21 = vsel %vm1774_vm7, %v7497_v58, %v7493_v55  ;;  %v7370_v9 = vsel %vm15290_vm10, %v7369_v20, %v7365_v1  ;;  %v7522_v1 = vrot.slane %v6833_v29, %v12501_v36  ;;  %vm15294_vm10 = vcmask 786112  }
 0xce0   : > { %v7375_v13 = vsel %vm4598_vm12, %v7374_v35, %v7370_v9  ;;  %v7503_v0 = vsel %vm1781_vm8, %v7502_v31, %v7498_v21 }
 0xce1   : > { %v7508_v44 = vsel %vm4563_vm0, %v7507_v26, %v7503_v0  ;;  %v6860_v17 = vpop.xlane.xlu1 %6859  ;;  %v7562_v26 = vsel %vm15293_vm13, %v7561_v45, %v14419_v2  ;;  %vm15298_vm13 = vmmov %vm15294_vm10 }
 0xce2   : > { %v7513_v47 = vsel %vm4570_vm4, %v7512_v42, %v7508_v44  ;;  %v6746_v49 = vpop.xlane.xlu0 %6745  ;;  %v7566_v16 = vrot.slane %v6860_v17, %v14969_v24 }
 0xce3   : > { %v7518_v6 = vsel %vm4577_vm15, %v7517_v53, %v7513_v47  ;;  %v7379_v61 = vrot.slane %v6746_v49, %v12555_v7 }
 0xce4   : > { %v7523_v21 = vsel %vm15294_vm10, %v7522_v1, %v7518_v6  ;;  %v7567_v9 = vsel %vm1760_vm5, %v7566_v16, %v7562_v26 }
 0xce5   : > { %v6863_v30 = vpop.xlane.xlu1 %6862  ;;  %v7380_v8 = vsel %vm4605_vm11, %v7379_v61, %v7375_v13 }
 0xce6   : > { %v6836_v11 = vpop.xlane.xlu0 %6835  ;;  %v7571_v33 = vrot.slane %v6863_v30, %v14971_v38 }
 0xce7   : > { %v7527_v28 = vrot.slane %v6836_v11, %v12519_v34 }
 0xce9   : > { %v6866_v59 = vpop.xlane.xlu1 %6865 }
 0xcea   : > { %v6884_v12 = vpop.xlane.xlu0 %6883  ;;  %v7576_v32 = vrot.slane %v6866_v59, %v14973_v22 }
 0xced   : > { %v6869_v52 = vpop.xlane.xlu1 %6868 }
 0xcee   : > { %v14462_v3 = vpop.xlane.xlu0 %6886 }
 0xcf1   : > { %v6872_v39 = vpop.xlane.xlu1 %6871 }
 0xcf2   : > { %v6845_v15 = vpop.xlane.xlu0 %6844  ;;  %v7586_v42 = vrot.slane %v6872_v39, %v12459_v40 }
 0xcf3   : > { %v7542_v17 = vrot.slane %v6845_v15, %v12575_v14 }
 0xcf5   : > { %v6875_v23 = vpop.xlane.xlu1 %6874 }
 0xcf6   : > { %v6899_v18 = vpop.xlane.xlu0 %6898  ;;  %v7591_v0 = vrot.slane %v6875_v23, %v12465_v54 }
 0xcf9   : > { %v6878_v43 = vpop.xlane.xlu1 %6877 }
 0xcfa   : > { %v6902_v50 = vpop.xlane.xlu0 %6901  ;;  %v7596_v47 = vrot.slane %v6878_v43, %v12479_v51 }
 0xcfb   : > { %v7635_v16 = vrot.slane %v6902_v50, %v14963_v5 }
 0xcfd   : > { %v6881_v63 = vpop.xlane.xlu1 %6880 }
 0xcfe   : > { %v6905_v10 = vpop.xlane.xlu0 %6904  ;;  %v7601_v30 = vrot.slane %v6881_v63, %v12501_v36  ;;  %v7630_v63 = vrot.slane %v6899_v18, %v14958_v41 }
 0xd01   : > { %v6749_v60 = vpop.xlane.xlu1 %6748 }
 0xd02   : > { %v7384_v62 = vrot.slane %v6749_v60, %v12575_v14  ;;  %v14466_v4 = vpop.xlane.xlu0 %6907 }
 0xd04   : > { %v7385_v56 = vsel %vm15286_vm1, %v7384_v62, %v7380_v8  ;;  %vm15295_vm1 = vcmask 851712   ;;  %v7606_v62 = vrot.slane %v6884_v12, %v12519_v34  ;;  %v7645_v12 = vrot.slane %v14466_v4, %v14969_v24 }
 0xd05   : > { %v7704_v58 = vsel %vm15291_vm14, %v7385_v56, %v14380_v19  ;;  %v6839_v20 = vpop.xlane.xlu1 %6838  ;;  %v7581_v19 = vrot.slane %v6869_v52, %v14976_v48  ;;  %v7528_v29 = vsel %vm15295_vm1, %v7527_v28, %v7523_v21  ;;  %vm15296_vm14 = vcmask 1048512   ;;  %vm15299_vm10 = vmmov %vm15295_vm1 }
 0xd06   : > { %v6911_v31 = vpop.xlane.xlu0 %6910  ;;  %v7705_v55 = vsel %vm15292_vm9, %v14394_v37, %v7704_v58  ;;  %v7532_v35 = vrot.slane %v6839_v20, %v12537_v27  ;;  %v7572_v37 = vsel %vm1767_vm6, %v7571_v33, %v7567_v9  ;;  %vm15297_vm9 = vcmask 1045509  }
 0xd07   : > { %v7577_v2 = vsel %vm1774_vm7, %v7576_v32, %v7572_v37  ;;  %v7611_v33 = vrot.slane %v14462_v3, %v12537_v27  ;;  %v7640_v28 = vrot.slane %v6905_v10, %v14966_v46  ;;  %vm15300_vm1 = vcmask 261312  }
 0xd08   : > { %v7533_v49 = vsel %vm4598_vm12, %v7532_v35, %v7528_v29  ;;  %v7582_v6 = vsel %vm1781_vm8, %v7581_v19, %v7577_v2 }
 0xd09   : > { %v6842_v13 = vpop.xlane.xlu1 %6841  ;;  %v7587_v59 = vsel %vm4563_vm0, %v7586_v42, %v7582_v6 }
 0xd0a   : > { %v7537_v53 = vrot.slane %v6842_v13, %v12555_v7  ;;  %v6914_v44 = vpop.xlane.xlu0 %6913  ;;  %v7592_v23 = vsel %vm4570_vm4, %v7591_v0, %v7587_v59 }
 0xd0b   : > { %v7597_v43 = vsel %vm4577_vm15, %v7596_v47, %v7592_v23  ;;  %v7655_v3 = vrot.slane %v6914_v44, %v14973_v22 }
 0xd0c   : > { %v7538_v11 = vsel %vm4605_vm11, %v7537_v53, %v7533_v49  ;;  %v7602_v60 = vsel %vm15298_vm13, %v7601_v30, %v7597_v43 }
 0xd0d   : > { %v7543_v52 = vsel %vm15296_vm14, %v7542_v17, %v7538_v11  ;;  %v6890_v39 = vpop.xlane.xlu1 %6889  ;;  %v7607_v58 = vsel %vm15299_vm10, %v7606_v62, %v7602_v60 }
 0xd0e   : > { %v6917_v61 = vpop.xlane.xlu0 %6916  ;;  %v7706_v15 = vsel %vm15297_vm9, %v7543_v52, %v7705_v55  ;;  %v7616_v20 = vrot.slane %v6890_v39, %v12555_v7  ;;  %v7612_v5 = vsel %vm4598_vm12, %v7611_v33, %v7607_v58 }
 0xd0f   : > { %v7660_v24 = vrot.slane %v6917_v61, %v14976_v48 }
 0xd10   : > { %v7617_v46 = vsel %vm4605_vm11, %v7616_v20, %v7612_v5 }
 0xd11   : > { %v6896_v8 = vpop.xlane.xlu1 %6895 }
 0xd12   : > { %v6920_v45 = vpop.xlane.xlu0 %6919  ;;  %v7626_v56 = vrot.slane %v6896_v8, %v14959_v25  ;;  %v7650_v25 = vrot.slane %v6911_v31, %v14971_v38 }
 0xd13   : > { %v7665_v38 = vrot.slane %v6920_v45, %v12459_v40 }
 0xd14   : > { %v7631_v55 = vsel %vm1739_vm2, %v7630_v63, %v7626_v56  ;;  %vm15301_vm2 = vmmov %vm15296_vm14 }
 0xd15   : > { %v7636_v41 = vsel %vm1746_vm3, %v7635_v16, %v7631_v55  ;;  %v6893_v18 = vpop.xlane.xlu1 %6892  ;;  %vm15302_vm3 = vcmask 1046534  }
 0xd16   : > { %v7641_v50 = vsel %vm15300_vm1, %v7640_v28, %v7636_v41  ;;  %v6923_v1 = vpop.xlane.xlu0 %6922  ;;  %v7621_v32 = vrot.slane %v6893_v18, %v12575_v14 }
 0xd17   : > { %v7646_v10 = vsel %vm1760_vm5, %v7645_v12, %v7641_v50  ;;  %v7670_v22 = vrot.slane %v6923_v1, %v12465_v54  ;;  %vm15303_vm5 = vmmov %vm15298_vm13 }
 0xd18   : > { %v7651_v4 = vsel %vm1767_vm6, %v7650_v25, %v7646_v10  ;;  %v7622_v35 = vsel %vm15301_vm2, %v7621_v32, %v7617_v46  ;;  %vm15304_vm6 = vmmov %vm15299_vm10 }
 0xd19   : > { %v7656_v31 = vsel %vm1774_vm7, %v7655_v3, %v7651_v4  ;;  %v6929_v26 = vpop.xlane.xlu1 %6928  ;;  %v7707_v19 = vsel %vm15302_vm3, %v7622_v35, %v7706_v15  ;;  %vm15305_vm7 = vmmov %vm15301_vm2 }
 0xd1a   : > { %v7661_v21 = vsel %vm1781_vm8, %v7660_v24, %v7656_v31  ;;  %v6926_v9 = vpop.xlane.xlu0 %6925  ;;  %v7680_v37 = vrot.slane %v6929_v26, %v12501_v36  ;;  %vm15306_vm8 = vcmask 1047559  }
 0xd1b   : > { %v7666_v42 = vsel %vm4563_vm0, %v7665_v38, %v7661_v21  ;;  %v7675_v48 = vrot.slane %v6926_v9, %v12479_v51 }
 0xd1c   : > { %v7671_v13 = vsel %vm4570_vm4, %v7670_v22, %v7666_v42 }
 0xd1d   : > { %v7676_v40 = vsel %vm4577_vm15, %v7675_v48, %v7671_v13  ;;  %v6932_v29 = vpop.xlane.xlu1 %6931  ;;  %vm15307_vm15 = vcmp.gt.f32.partialorder %v13199_v57, 0.5 }
 0xd1e   : > { %v7681_v0 = vsel %vm15303_vm5, %v7680_v37, %v7676_v40  ;;  %v6935_v53 = vpop.xlane.xlu0 %6934  ;;  %v7685_v44 = vrot.slane %v6932_v29, %v12519_v34 }
 0xd1f   : > { %v7690_v2 = vrot.slane %v6935_v53, %v12537_v27 }
 0xd20   : > { %v7686_v54 = vsel %vm15304_vm6, %v7685_v44, %v7681_v0 }
 0xd21   : > { %v6941_v17 = vpop.xlane.xlu1 %6940  ;;  %v7691_v49 = vsel %vm4598_vm12, %v7690_v2, %v7686_v54 }
 0xd22   : > { %v6938_v47 = vpop.xlane.xlu0 %6937  ;;  %v7700_v51 = vrot.slane %v6941_v17, %v12575_v14 }
 0xd23   : > { %v7695_v36 = vrot.slane %v6938_v47, %v12555_v7 }
 0xd25   : > { %v7696_v6 = vsel %vm4605_vm11, %v7695_v36, %v7691_v49 }
 0xd26   : > { %v7701_v34 = vsel %vm15305_vm7, %v7700_v51, %v7696_v6 }
 0xd27   : > { %v7708_v27 = vsel %vm15306_vm8, %v7701_v34, %v7707_v19 }
 0xd28   : > { %v7710_v30 = vsel %vm15307_vm15, %v7708_v27, -1e+30 }
 0xd29   : > { %7711 = vmax.xlane.f32.xlu0 %v7710_v30 }
 0xdb2   : > { %v7712_v11 = vpop.xlane.xlu0 %7711 }
 0xdb3   : > { %v7713_v59 = vsub.f32 %v7710_v30, %v7712_v11 }
 0xdb5   : > { %v7714_v14 = vmul.f32 1.442695, %v7713_v59 }
 0xdb7   : > { %10050 = vpow2.f32 %v7714_v14 }
 0xdc4   : > { %v10051_v52 = vpop.eup %10050 }
 0xdc5   : > { %7716 = vadd.xlane.f32.xlu1 %v10051_v52 }
 0xdc6   : > { %10297 = shalt.err (!%p10294_p9)
}
 0xdc7   : > { %s10298_s25 = scalar_lea.hbm %s7739_s22, 128  ;;  %s10302_s0 = scalar_lea.hbm %s15308_s13, 256 }
 0xdc8   : > { %p10299_p11 = scmp.ne.s32.totalorder %s7739_s22, %s10298_s25  ;;  %p10303_p8 = scmp.lt.s32.totalorder %s7739_s22, %s15308_s13 }
 0xdc9   : > { %p10304_p6 = scmp.lt.s32.totalorder %s10302_s0, %s10298_s25 }
 0xdca   : > { %p10300_p3 = pnand %p10299_p11, %p15309_p12 }
 0xdcb   : > { %p10305_p13 = por %p10304_p6, %p10303_p8 }
 0xdcc   : > { %p10301_p5 = pneg %p10300_p3 }
 0xdce   : > { %p10306_p1 = pnand %p10305_p13, %p10301_p5 }
 0xdd0   : > { %10309 = shalt.err (!%p10306_p1)
}
 0xdd1   : > { %9341 = dma.vmem_to_hbm [thread:$0]  (%p15309_p12), %s7742_s16, 128, %s7739_s22, %s7723_s19  }
 0xdd2   : > { %s537_s24 = scalar_lea.vmem [#allocation8], %s7917_s27  ;;  %s15310_s17 = sshll.u32 %s10484_s29, 7 }
 0xdd3   : > { %s7754_s23 = sshll.u32 %s537_s24, 4  ;;  %s15311_s25 = sld [smem:[#allocation160_spill]]  ;;  %s7755_s23 = int_to_ptr.vmem [resolvable:$true] %s7754_s23 }
 0xdd4   : > { %s7728_s0 = scalar_lea.sflag [#allocation9], %s10613_s30  ;;  %s10310_s14 = scalar_lea.vmem %s7755_s23, 128 }
 0xdd5   : > { %p10311_p7 = scmp.ne.s32.totalorder %s7755_s23, %s10310_s14  ;;  %s10392_s22 = smov [#allocation8]  }
 0xdd6   : > { %s10314_s16 = sshll.u32 %s10392_s22, 4  ;;  %s10315_s16 = int_to_ptr.vmem [resolvable:$false] %s10314_s16 }
 0xdd7   : > { %p10312_p10 = pnand %p10311_p7, %p15309_p12  ;;  %s10316_s27 = scalar_lea.vmem %s10315_s16, 256 }
 0xdd8   : > { %p10317_p2 = scmp.lt.s32.totalorder %s7755_s23, %s10315_s16  ;;  %p10318_p4 = scmp.lt.s32.totalorder %s10316_s27, %s10310_s14 }
 0xdd9   : > { %s15312_s21 = smov %s15311_s25  ;;  %s7752_s15 = scalar_lea.hbm %s15311_s25, %s15310_s17 }
 0xdda   : > { %p10313_p0 = pneg %p10312_p10  ;;  %p10319_p9 = por %p10318_p4, %p10317_p2 }
 0xddc   : > { %p10320_p11 = pnand %p10319_p9, %p10313_p0 }
 0xe4e   : > { %v7717_v7 = vpop.xlane.xlu1 %7716 }
 0xe4f   : > { %10052 = vlog2.f32 %v7717_v7 }
 0xe5c   : > { %v10053_v57 = vpop.eup %10052 }
 0xe5d   : > { %v7719_v39 = vmul.f32 0.6931472, %v10053_v57 }
 0xe5f   : > { %v7720_v23 = vsub.f32 %v7713_v59, %v7719_v39 }
 0xe61   : > { %7721 = vst [vmem:[%s537_s24] sm:$0xff] %v7720_v23 }
 0xe62   : > { %10323 = shalt.err (!%p10320_p11)
}
 0xe63   : > { %s10324_s29 = scalar_lea.hbm %s7752_s15, 128  ;;  %s10328_s24 = scalar_lea.hbm %s15312_s21, 256 }
 0xe64   : > { %p10325_p3 = scmp.ne.s32.totalorder %s7752_s15, %s10324_s29  ;;  %p10329_p6 = scmp.lt.s32.totalorder %s7752_s15, %s15312_s21 }
 0xe65   : > { %p10330_p13 = scmp.lt.s32.totalorder %s10328_s24, %s10324_s29 }
 0xe66   : > { %p10326_p5 = pnand %p10325_p3, %p15309_p12 }
 0xe67   : > { %p10331_p1 = por %p10330_p13, %p10329_p6 }
 0xe68   : > { %p10327_p8 = pneg %p10326_p5 }
 0xe6a   : > { %p10332_p7 = pnand %p10331_p1, %p10327_p8 }
 0xe6c   : > { %10335 = shalt.err (!%p10332_p7)
}
 0xe6d   : > { %9342 = dma.vmem_to_hbm [thread:$0]  (%p15309_p12), %s7755_s23, 128, %s7752_s15, %s7728_s0  }
 0xe6e PF: > { %s15313_s12 = sld [smem:[#allocation14_spill]]  ;;  %p15316_p0 = scmp.ge.s32.totalorder %s10382_s28, 2 }
 0xe6f   : > { %s15314_s25 = sld [smem:[#allocation18_spill]] }
 0xe74   : > { %s7766_s14 = sand.u32 1, %s15313_s12  }
 0xe75   : > { %p15315_p10 = scmp.ne.s32.totalorder %s15314_s25, 0  ;;  %s7767_s22 = scalar_lea.sflag [#allocation4], %s7766_s14 }
 0xe77   : > { %p9353_p2 = pnand %p15316_p0, %p15315_p10 }
 0xe79   : > { %p9354_p4 = pneg %p9353_p2 }
 0xe7b   : > { %10361 = dma.done.wait (%p9354_p4), %s7767_s22, 128  }
 0xe7c   : > { %10363 = vsyncadd (%p9354_p4), %s7767_s22, 4294967168  ;;  %s7776_s16 = scalar_lea.sflag [#allocation9], %s7766_s14 }
 0xe7d   : > { %10365 = dma.done.wait (%p9354_p4), %s7776_s16, 128  }
 0xe7e   : > { %10367 = vsyncadd (%p9354_p4), %s7776_s16, 4294967168  ;;  %s15317_s28 = sld [smem:[#allocation16_spill]]  ;;  %s15320_s25 = smov %s10374_s26 }
 0xe7f   : > { %s15318_s27 = sld [smem:[#allocation15_spill]] }
 0xe80   : > { %s15319_s20 = sld [smem:[#allocation17_spill]] }
 0xe84   : > { %p33_p12 = scmp.ge.s32.totalorder %s15317_s28, 4  }
 0xe85   : > { %s15321_s26 = smov %s15318_s27 }
 0xe86   : > { %s15322_s27 = smov %s15319_s20  ;;  %35 = sbr.rel (!%p33_p12) target bundleno = 13 (0xd), region = 149 }
 0xe8b   :  { %7781 = vsyncpa [#allocation3], 1 }
 0xe8c   :  { %7783 = vsyncpa [#allocation3 + $0x1], 1 }
 0xe8d   :  { %7784 = vsyncpa [#allocation6], 1 }
 0xe8e   :  { %7786 = vsyncpa [#allocation6 + $0x1], 1 }
 0xe8f   :  { %7787 = vsyncpa [#allocation4], 1 }
 0xe90   :  { %7789 = vsyncpa [#allocation4 + $0x1], 1 }
 0xe91   :  { %7790 = vsyncpa [#allocation9], 1 }
 0xe92   :  { %7792 = vsyncpa [#allocation9 + $0x1], 1 }

</bundles_post_ra>
